<compile_context>
chip_gen: v7x
topology: tpu7x:2x2x1
jax: 0.10.0
libtpu: 0.0.40
codegen_flags: <defaults>
</compile_context>

<pallas_src>
import jax
import jax.numpy as jnp
from jax.experimental import pallas as pl

EPS = 1e-5
LEAKY = 0.1


# ------------------------------ Pallas kernels ------------------------------ #

def _conv_lrelu_kernel(p_ref, w_ref, b_ref, o_ref):
    """o = LeakyReLU(P @ W + b).  P:(M,K) bf16, W:(K,C) bf16, b:(1,C) f32."""
    y = jnp.dot(p_ref[...], w_ref[...], preferred_element_type=jnp.float32)
    y = y + b_ref[...]
    o_ref[...] = jnp.maximum(y, LEAKY * y)


def _conv_bn_lrelu_kernel(p_ref, w_ref, b_ref, g_ref, be_ref, o_ref):
    """o = LeakyReLU(BatchNorm_train(P @ W + b)); batch stats over the M rows."""
    y = jnp.dot(p_ref[...], w_ref[...], preferred_element_type=jnp.float32)
    y = y + b_ref[...]                                   # conv bias (cancels under BN)
    inv_m = 1.0 / y.shape[0]
    mean = jnp.sum(y, axis=0, keepdims=True) * inv_m     # (1, C)
    yc = y - mean
    var = jnp.sum(yc * yc, axis=0, keepdims=True) * inv_m  # biased variance, centered
    scale = g_ref[...] * jax.lax.rsqrt(var + EPS)        # in-kernel rsqrt (EUP)
    y = yc * scale + be_ref[...]
    o_ref[...] = jnp.maximum(y, LEAKY * y)


def _linear_layernorm_kernel(f_ref, w_ref, b_ref, g_ref, be_ref, o_ref):
    """o = LayerNorm(F @ W + b) over the last (latent) axis."""
    z = jnp.dot(f_ref[...], w_ref[...], preferred_element_type=jnp.float32)
    z = z + b_ref[...]
    mu = jnp.mean(z, axis=-1, keepdims=True)
    zc = z - mu
    var = jnp.mean(zc * zc, axis=-1, keepdims=True)
    o_ref[...] = zc * jax.lax.rsqrt(var + EPS) * g_ref[...] + be_ref[...]


# ------------------------------ kernel wrappers ------------------------------ #

def _pad_k(p, wm):
    """Zero-pad the shared contraction dim up to a multiple of 128 lanes."""
    K = p.shape[1]
    Kp = ((K + 127) // 128) * 128
    if Kp != K:
        p = jnp.pad(p, ((0, 0), (0, Kp - K)))
        wm = jnp.pad(wm, ((0, Kp - K), (0, 0)))
    return p, wm


def _fused_conv(p, wm, b, gamma=None, beta=None):
    """Single-block pallas_call: conv-as-matmul + bias [+ BN(train)] + LeakyReLU."""
    M = p.shape[0]
    C = wm.shape[1]
    p, wm = _pad_k(p, wm)
    p = p.astype(jnp.bfloat16)
    wm = wm.astype(jnp.bfloat16)
    b2 = b.reshape(1, C).astype(jnp.float32)
    out_shape = jax.ShapeDtypeStruct((M, C), jnp.float32)
    if gamma is None:
        return pl.pallas_call(_conv_lrelu_kernel, out_shape=out_shape)(p, wm, b2)
    g2 = gamma.reshape(1, C).astype(jnp.float32)
    be2 = beta.reshape(1, C).astype(jnp.float32)
    return pl.pallas_call(_conv_bn_lrelu_kernel, out_shape=out_shape)(p, wm, b2, g2, be2)


def _fused_head(feat, wm, b, gamma, beta):
    """Single-block pallas_call: Linear + bias + LayerNorm."""
    B = feat.shape[0]
    L = wm.shape[1]
    feat, wm = _pad_k(feat, wm)   # 6400 is already a multiple of 128 (no-op)
    return pl.pallas_call(
        _linear_layernorm_kernel,
        out_shape=jax.ShapeDtypeStruct((B, L), jnp.float32),
    )(feat.astype(jnp.bfloat16), wm.astype(jnp.bfloat16),
      b.reshape(1, L).astype(jnp.float32),
      gamma.reshape(1, L).astype(jnp.float32),
      beta.reshape(1, L).astype(jnp.float32))


# ------------------------------ plain-JAX glue ------------------------------- #

def _l2normalize(v):
    return v * jax.lax.rsqrt(jnp.sum(v * v) + 1e-12)


def _spectral_normalize(w, u):
    """Miyato spectral norm, one power iteration (matches SpectralNorm.forward)."""
    w_mat = w.reshape(w.shape[0], -1)
    v = _l2normalize(u @ w_mat)
    u_new = _l2normalize(w_mat @ v)
    sigma = jnp.dot(u_new, w_mat @ v)
    return w / sigma


def _im2col(h_nhwc, stride):
    """(B, H, W, C) -> (B*Ho*Wo, 9*C) valid 3x3 patches, tap-major / channel-minor."""
    B, H, W, C = h_nhwc.shape
    Ho = (H - 3) // stride + 1
    Wo = (W - 3) // stride + 1
    cols = []
    for kh in range(3):
        for kw in range(3):
            cols.append(h_nhwc[:, kh:kh + stride * Ho:stride,
                               kw:kw + stride * Wo:stride, :])
    p = jnp.concatenate(cols, axis=-1)                    # (B, Ho, Wo, 9*C)
    return p.reshape(B * Ho * Wo, 9 * C), Ho, Wo


def _conv_w_matrix(w):
    """PyTorch (Co, Ci, kh, kw) -> (9*Ci, Co), matching _im2col column order."""
    Co, Ci, _, _ = w.shape
    return jnp.transpose(w, (2, 3, 1, 0)).reshape(9 * Ci, Co)


# ------------------------------ forward pass --------------------------------- #

def encoder_28_forward(x, params):
    """x: (B, 1, 28, 28) -> (B, latent, 1, 1)."""
    B = x.shape[0]
    L = params["wl"].shape[0]
    h = x.astype(jnp.float32).reshape(B, 1, 28, 28).transpose(0, 2, 3, 1)  # NHWC

    # conv0: SpectralNorm(Conv2d(1, 64, 3, s=1)) + LeakyReLU(0.1)
    w0 = _spectral_normalize(params["w0"], params["u0"])
    p, Ho, Wo = _im2col(h, stride=1)                                  # (B*676, 9)
    h = _fused_conv(p, _conv_w_matrix(w0), params["b0"]).reshape(B, Ho, Wo, 64)

    # conv1: SpectralNorm(Conv2d(64, 128, 3, s=2)) + BatchNorm2d + LeakyReLU
    w1 = _spectral_normalize(params["w1"], params["u1"])
    p, Ho, Wo = _im2col(h, stride=2)                                  # (B*144, 576)
    h = _fused_conv(p, _conv_w_matrix(w1), params["b1"],
                    params["g1"], params["be1"]).reshape(B, Ho, Wo, 128)

    # conv2: SpectralNorm(Conv2d(128, 256, 3, s=2)) + BatchNorm2d + LeakyReLU
    w2 = _spectral_normalize(params["w2"], params["u2"])
    p, Ho, Wo = _im2col(h, stride=2)                                  # (B*25, 1152)
    h = _fused_conv(p, _conv_w_matrix(w2), params["b2"],
                    params["g2"], params["be2"])                      # (B*25, 256)

    # head: SpectralNorm(Linear(6400, L)) + LayerNorm(L)
    wl = _spectral_normalize(params["wl"], params["ul"])              # (L, 6400) in (c,h,w) col order
    wl_hwc = wl.reshape(L, 256, 5, 5).transpose(0, 2, 3, 1).reshape(L, 6400)
    feat = h.reshape(B, Ho * Wo * 256)                                # (h, w, c)-ordered flatten
    z = _fused_head(feat, wl_hwc.T, params["bl"], params["ln_g"], params["ln_b"])

    return z.reshape(B, L, 1, 1)


# ------------------------------ parameter init ------------------------------- #

def init_params(key, latent_size):
    ks = jax.random.split(key, 18)

    def n(i, shape, s=0.05):
        return s * jax.random.normal(ks[i], shape, jnp.float32)

    return {
        "w0": n(0, (64, 1, 3, 3), 0.2), "b0": n(1, (64,)),
        "u0": jax.random.normal(ks[2], (64,), jnp.float32),
        "w1": n(3, (128, 64, 3, 3), 0.1), "b1": n(4, (128,)),
        "u1": jax.random.normal(ks[5], (128,), jnp.float32),
        "g1": 1.0 + n(6, (128,), 0.1), "be1": n(7, (128,), 0.1),
        "w2": n(8, (256, 128, 3, 3), 0.1), "b2": n(9, (256,)),
        "u2": jax.random.normal(ks[10], (256,), jnp.float32),
        "g2": 1.0 + n(11, (256,), 0.1), "be2": n(12, (256,), 0.1),
        "wl": n(13, (latent_size, 6400), 0.05), "bl": n(14, (latent_size,)),
        "ul": jax.random.normal(ks[15], (latent_size,), jnp.float32),
        "ln_g": jnp.ones((latent_size,), jnp.float32),
        "ln_b": jnp.zeros((latent_size,), jnp.float32),
    }


# ----------------------------------- main ------------------------------------ #

if __name__ == "__main__":
    latent_size = 32
    batch = 2

    key = jax.random.PRNGKey(0)
    k_x, k_p = jax.random.split(key)
    x = jax.random.normal(k_x, (batch, 1, 28, 28), jnp.float32)
    params = init_params(k_p, latent_size)

    fwd = jax.jit(encoder_28_forward)
    out = jax.block_until_ready(fwd(x, params))

    assert out.shape == (batch, latent_size, 1, 1), out.shape
    assert bool(jnp.all(jnp.isfinite(out)))
    print("KERNEL_OK")
</pallas_src>

<mosaic_0001>
module attributes {stable_mosaic.version = 11 : i64} {
  func.func @_conv_lrelu_kernel(%arg0: memref<1352x128xbf16, #tpu.memory_space<vmem>>, %arg1: memref<128x64xbf16, #tpu.memory_space<vmem>>, %arg2: memref<1x64xf32, #tpu.memory_space<vmem>>, %arg3: memref<1352x64xf32, #tpu.memory_space<vmem>>) attributes {dimension_semantics = [], scalar_prefetch = 0 : i64, scratch_operands = 0 : i64, tpu.core_type = #tpu.core_type<tc>} {
    %c0 = arith.constant 0 : index
    %c0_0 = arith.constant 0 : index
    %0 = vector.load %arg0[%c0, %c0_0] : memref<1352x128xbf16, #tpu.memory_space<vmem>>, vector<1352x128xbf16>
    %c0_1 = arith.constant 0 : index
    %c0_2 = arith.constant 0 : index
    %1 = vector.load %arg1[%c0_1, %c0_2] : memref<128x64xbf16, #tpu.memory_space<vmem>>, vector<128x64xbf16>
    %cst = arith.constant dense<0.000000e+00> : vector<1352x64xf32>
    %2 = tpu.matmul %0, %1, %cst {dimension_numbers = #tpu.dot_dimension_numbers<[1], [0], [0], [1], [0, 0, 1, 1], [], []>} : vector<1352x128xbf16>, vector<128x64xbf16>, vector<1352x64xf32> -> vector<1352x64xf32>
    %c0_3 = arith.constant 0 : index
    %c0_4 = arith.constant 0 : index
    %3 = vector.load %arg2[%c0_3, %c0_4] : memref<1x64xf32, #tpu.memory_space<vmem>>, vector<1x64xf32>
    %4 = vector.broadcast %3 : vector<1x64xf32> to vector<1352x64xf32>
    %5 = arith.addf %2, %4 : vector<1352x64xf32>
    %cst_5 = arith.constant 1.000000e-01 : f32
    %6 = vector.broadcast %cst_5 : f32 to vector<1352x64xf32>
    %7 = arith.mulf %6, %5 : vector<1352x64xf32>
    %8 = arith.maximumf %5, %7 : vector<1352x64xf32>
    %c0_6 = arith.constant 0 : index
    %c0_7 = arith.constant 0 : index
    %9 = vector.load %arg3[%c0_6, %c0_7] : memref<1352x64xf32, #tpu.memory_space<vmem>>, vector<1352x64xf32>
    tpu.vector_store %arg3[%c0_6, %c0_7], %8 {strides = array<i32>} : memref<1352x64xf32, #tpu.memory_space<vmem>>, vector<1352x64xf32>,
    return
  }
}

module attributes {stable_mosaic.version = 11 : i64} {
  func.func @_conv_bn_lrelu_kernel(%arg0: memref<288x640xbf16, #tpu.memory_space<vmem>>, %arg1: memref<640x128xbf16, #tpu.memory_space<vmem>>, %arg2: memref<1x128xf32, #tpu.memory_space<vmem>>, %arg3: memref<1x128xf32, #tpu.memory_space<vmem>>, %arg4: memref<1x128xf32, #tpu.memory_space<vmem>>, %arg5: memref<288x128xf32, #tpu.memory_space<vmem>>) attributes {dimension_semantics = [], scalar_prefetch = 0 : i64, scratch_operands = 0 : i64, tpu.core_type = #tpu.core_type<tc>} {
    %c0 = arith.constant 0 : index
    %c0_0 = arith.constant 0 : index
    %0 = vector.load %arg0[%c0, %c0_0] : memref<288x640xbf16, #tpu.memory_space<vmem>>, vector<288x640xbf16>
    %c0_1 = arith.constant 0 : index
    %c0_2 = arith.constant 0 : index
    %1 = vector.load %arg1[%c0_1, %c0_2] : memref<640x128xbf16, #tpu.memory_space<vmem>>, vector<640x128xbf16>
    %cst = arith.constant dense<0.000000e+00> : vector<288x128xf32>
    %2 = tpu.matmul %0, %1, %cst {dimension_numbers = #tpu.dot_dimension_numbers<[1], [0], [0], [1], [0, 0, 1, 1], [], []>} : vector<288x640xbf16>, vector<640x128xbf16>, vector<288x128xf32> -> vector<288x128xf32>
    %c0_3 = arith.constant 0 : index
    %c0_4 = arith.constant 0 : index
    %3 = vector.load %arg2[%c0_3, %c0_4] : memref<1x128xf32, #tpu.memory_space<vmem>>, vector<1x128xf32>
    %4 = vector.broadcast %3 : vector<1x128xf32> to vector<288x128xf32>
    %5 = arith.addf %2, %4 : vector<288x128xf32>
    %cst_5 = arith.constant dense<0.000000e+00> : vector<128xf32>
    %6 = vector.multi_reduction <add>, %5, %cst_5 [0] : vector<288x128xf32> to vector<128xf32>
    %7 = vector.shape_cast %6 : vector<128xf32> to vector<1x128xf32>
    %cst_6 = arith.constant 0.00347222225 : f32
    %8 = vector.broadcast %cst_6 : f32 to vector<1x128xf32>
    %9 = arith.mulf %7, %8 : vector<1x128xf32>
    %10 = vector.broadcast %9 : vector<1x128xf32> to vector<288x128xf32>
    %11 = arith.subf %5, %10 : vector<288x128xf32>
    %12 = arith.mulf %11, %11 : vector<288x128xf32>
    %cst_7 = arith.constant dense<0.000000e+00> : vector<128xf32>
    %13 = vector.multi_reduction <add>, %12, %cst_7 [0] : vector<288x128xf32> to vector<128xf32>
    %14 = vector.shape_cast %13 : vector<128xf32> to vector<1x128xf32>
    %cst_8 = arith.constant 0.00347222225 : f32
    %15 = vector.broadcast %cst_8 : f32 to vector<1x128xf32>
    %16 = arith.mulf %14, %15 : vector<1x128xf32>
    %c0_9 = arith.constant 0 : index
    %c0_10 = arith.constant 0 : index
    %17 = vector.load %arg3[%c0_9, %c0_10] : memref<1x128xf32, #tpu.memory_space<vmem>>, vector<1x128xf32>
    %cst_11 = arith.constant 9.99999974E-6 : f32
    %18 = vector.broadcast %cst_11 : f32 to vector<1x128xf32>
    %19 = arith.addf %16, %18 : vector<1x128xf32>
    %20 = math.rsqrt %19 : vector<1x128xf32>
    %21 = arith.mulf %17, %20 : vector<1x128xf32>
    %22 = vector.broadcast %21 : vector<1x128xf32> to vector<288x128xf32>
    %23 = arith.mulf %11, %22 : vector<288x128xf32>
    %c0_12 = arith.constant 0 : index
    %c0_13 = arith.constant 0 : index
    %24 = vector.load %arg4[%c0_12, %c0_13] : memref<1x128xf32, #tpu.memory_space<vmem>>, vector<1x128xf32>
    %25 = vector.broadcast %24 : vector<1x128xf32> to vector<288x128xf32>
    %26 = arith.addf %23, %25 : vector<288x128xf32>
    %cst_14 = arith.constant 1.000000e-01 : f32
    %27 = vector.broadcast %cst_14 : f32 to vector<288x128xf32>
    %28 = arith.mulf %27, %26 : vector<288x128xf32>
    %29 = arith.maximumf %26, %28 : vector<288x128xf32>
    %c0_15 = arith.constant 0 : index
    %c0_16 = arith.constant 0 : index
    %30 = vector.load %arg5[%c0_15, %c0_16] : memref<288x128xf32, #tpu.memory_space<vmem>>, vector<288x128xf32>
    tpu.vector_store %arg5[%c0_15, %c0_16], %29 {strides = array<i32>} : memref<288x128xf32, #tpu.memory_space<vmem>>, vector<288x128xf32>,
    return
  }
}

module attributes {stable_mosaic.version = 11 : i64} {
  func.func @_conv_bn_lrelu_kernel(%arg0: memref<50x1152xbf16, #tpu.memory_space<vmem>>, %arg1: memref<1152x256xbf16, #tpu.memory_space<vmem>>, %arg2: memref<1x256xf32, #tpu.memory_space<vmem>>, %arg3: memref<1x256xf32, #tpu.memory_space<vmem>>, %arg4: memref<1x256xf32, #tpu.memory_space<vmem>>, %arg5: memref<50x256xf32, #tpu.memory_space<vmem>>) attributes {dimension_semantics = [], scalar_prefetch = 0 : i64, scratch_operands = 0 : i64, tpu.core_type = #tpu.core_type<tc>} {
    %c0 = arith.constant 0 : index
    %c0_0 = arith.constant 0 : index
    %0 = vector.load %arg0[%c0, %c0_0] : memref<50x1152xbf16, #tpu.memory_space<vmem>>, vector<50x1152xbf16>
    %c0_1 = arith.constant 0 : index
    %c0_2 = arith.constant 0 : index
    %1 = vector.load %arg1[%c0_1, %c0_2] : memref<1152x256xbf16, #tpu.memory_space<vmem>>, vector<1152x256xbf16>
    %cst = arith.constant dense<0.000000e+00> : vector<50x256xf32>
    %2 = tpu.matmul %0, %1, %cst {dimension_numbers = #tpu.dot_dimension_numbers<[1], [0], [0], [1], [0, 0, 1, 1], [], []>} : vector<50x1152xbf16>, vector<1152x256xbf16>, vector<50x256xf32> -> vector<50x256xf32>
    %c0_3 = arith.constant 0 : index
    %c0_4 = arith.constant 0 : index
    %3 = vector.load %arg2[%c0_3, %c0_4] : memref<1x256xf32, #tpu.memory_space<vmem>>, vector<1x256xf32>
    %4 = vector.broadcast %3 : vector<1x256xf32> to vector<50x256xf32>
    %5 = arith.addf %2, %4 : vector<50x256xf32>
    %cst_5 = arith.constant dense<0.000000e+00> : vector<256xf32>
    %6 = vector.multi_reduction <add>, %5, %cst_5 [0] : vector<50x256xf32> to vector<256xf32>
    %7 = vector.shape_cast %6 : vector<256xf32> to vector<1x256xf32>
    %cst_6 = arith.constant 2.000000e-02 : f32
    %8 = vector.broadcast %cst_6 : f32 to vector<1x256xf32>
    %9 = arith.mulf %7, %8 : vector<1x256xf32>
    %10 = vector.broadcast %9 : vector<1x256xf32> to vector<50x256xf32>
    %11 = arith.subf %5, %10 : vector<50x256xf32>
    %12 = arith.mulf %11, %11 : vector<50x256xf32>
    %cst_7 = arith.constant dense<0.000000e+00> : vector<256xf32>
    %13 = vector.multi_reduction <add>, %12, %cst_7 [0] : vector<50x256xf32> to vector<256xf32>
    %14 = vector.shape_cast %13 : vector<256xf32> to vector<1x256xf32>
    %cst_8 = arith.constant 2.000000e-02 : f32
    %15 = vector.broadcast %cst_8 : f32 to vector<1x256xf32>
    %16 = arith.mulf %14, %15 : vector<1x256xf32>
    %c0_9 = arith.constant 0 : index
    %c0_10 = arith.constant 0 : index
    %17 = vector.load %arg3[%c0_9, %c0_10] : memref<1x256xf32, #tpu.memory_space<vmem>>, vector<1x256xf32>
    %cst_11 = arith.constant 9.99999974E-6 : f32
    %18 = vector.broadcast %cst_11 : f32 to vector<1x256xf32>
    %19 = arith.addf %16, %18 : vector<1x256xf32>
    %20 = math.rsqrt %19 : vector<1x256xf32>
    %21 = arith.mulf %17, %20 : vector<1x256xf32>
    %22 = vector.broadcast %21 : vector<1x256xf32> to vector<50x256xf32>
    %23 = arith.mulf %11, %22 : vector<50x256xf32>
    %c0_12 = arith.constant 0 : index
    %c0_13 = arith.constant 0 : index
    %24 = vector.load %arg4[%c0_12, %c0_13] : memref<1x256xf32, #tpu.memory_space<vmem>>, vector<1x256xf32>
    %25 = vector.broadcast %24 : vector<1x256xf32> to vector<50x256xf32>
    %26 = arith.addf %23, %25 : vector<50x256xf32>
    %cst_14 = arith.constant 1.000000e-01 : f32
    %27 = vector.broadcast %cst_14 : f32 to vector<50x256xf32>
    %28 = arith.mulf %27, %26 : vector<50x256xf32>
    %29 = arith.maximumf %26, %28 : vector<50x256xf32>
    %c0_15 = arith.constant 0 : index
    %c0_16 = arith.constant 0 : index
    %30 = vector.load %arg5[%c0_15, %c0_16] : memref<50x256xf32, #tpu.memory_space<vmem>>, vector<50x256xf32>
    tpu.vector_store %arg5[%c0_15, %c0_16], %29 {strides = array<i32>} : memref<50x256xf32, #tpu.memory_space<vmem>>, vector<50x256xf32>,
    return
  }
}

module attributes {stable_mosaic.version = 11 : i64} {
  func.func @_linear_layernorm_kernel(%arg0: memref<2x6400xbf16, #tpu.memory_space<vmem>>, %arg1: memref<6400x32xbf16, #tpu.memory_space<vmem>>, %arg2: memref<1x32xf32, #tpu.memory_space<vmem>>, %arg3: memref<1x32xf32, #tpu.memory_space<vmem>>, %arg4: memref<1x32xf32, #tpu.memory_space<vmem>>, %arg5: memref<2x32xf32, #tpu.memory_space<vmem>>) attributes {dimension_semantics = [], scalar_prefetch = 0 : i64, scratch_operands = 0 : i64, tpu.core_type = #tpu.core_type<tc>} {
    %c0 = arith.constant 0 : index
    %c0_0 = arith.constant 0 : index
    %0 = vector.load %arg0[%c0, %c0_0] : memref<2x6400xbf16, #tpu.memory_space<vmem>>, vector<2x6400xbf16>
    %c0_1 = arith.constant 0 : index
    %c0_2 = arith.constant 0 : index
    %1 = vector.load %arg1[%c0_1, %c0_2] : memref<6400x32xbf16, #tpu.memory_space<vmem>>, vector<6400x32xbf16>
    %cst = arith.constant dense<0.000000e+00> : vector<2x32xf32>
    %2 = tpu.matmul %0, %1, %cst {dimension_numbers = #tpu.dot_dimension_numbers<[1], [0], [0], [1], [0, 0, 1, 1], [], []>} : vector<2x6400xbf16>, vector<6400x32xbf16>, vector<2x32xf32> -> vector<2x32xf32>
    %c0_3 = arith.constant 0 : index
    %c0_4 = arith.constant 0 : index
    %3 = vector.load %arg2[%c0_3, %c0_4] : memref<1x32xf32, #tpu.memory_space<vmem>>, vector<1x32xf32>
    %4 = vector.broadcast %3 : vector<1x32xf32> to vector<2x32xf32>
    %5 = arith.addf %2, %4 : vector<2x32xf32>
    %cst_5 = arith.constant dense<0.000000e+00> : vector<2xf32>
    %6 = vector.multi_reduction <add>, %5, %cst_5 [1] : vector<2x32xf32> to vector<2xf32>
    %7 = vector.shape_cast %6 : vector<2xf32> to vector<2x1xf32>
    %cst_6 = arith.constant 3.200000e+01 : f32
    %8 = vector.broadcast %cst_6 : f32 to vector<2x1xf32>
    %9 = arith.divf %7, %8 : vector<2x1xf32>
    %10 = vector.broadcast %9 : vector<2x1xf32> to vector<2x32xf32>
    %11 = arith.subf %5, %10 : vector<2x32xf32>
    %12 = arith.mulf %11, %11 : vector<2x32xf32>
    %cst_7 = arith.constant dense<0.000000e+00> : vector<2xf32>
    %13 = vector.multi_reduction <add>, %12, %cst_7 [1] : vector<2x32xf32> to vector<2xf32>
    %14 = vector.shape_cast %13 : vector<2xf32> to vector<2x1xf32>
    %cst_8 = arith.constant 3.200000e+01 : f32
    %15 = vector.broadcast %cst_8 : f32 to vector<2x1xf32>
    %16 = arith.divf %14, %15 : vector<2x1xf32>
    %cst_9 = arith.constant 9.99999974E-6 : f32
    %17 = vector.broadcast %cst_9 : f32 to vector<2x1xf32>
    %18 = arith.addf %16, %17 : vector<2x1xf32>
    %19 = math.rsqrt %18 : vector<2x1xf32>
    %20 = vector.broadcast %19 : vector<2x1xf32> to vector<2x32xf32>
    %21 = arith.mulf %11, %20 : vector<2x32xf32>
    %c0_10 = arith.constant 0 : index
    %c0_11 = arith.constant 0 : index
    %22 = vector.load %arg3[%c0_10, %c0_11] : memref<1x32xf32, #tpu.memory_space<vmem>>, vector<1x32xf32>
    %23 = vector.broadcast %22 : vector<1x32xf32> to vector<2x32xf32>
    %24 = arith.mulf %21, %23 : vector<2x32xf32>
    %c0_12 = arith.constant 0 : index
    %c0_13 = arith.constant 0 : index
    %25 = vector.load %arg4[%c0_12, %c0_13] : memref<1x32xf32, #tpu.memory_space<vmem>>, vector<1x32xf32>
    %26 = vector.broadcast %25 : vector<1x32xf32> to vector<2x32xf32>
    %27 = arith.addf %24, %26 : vector<2x32xf32>
    %c0_14 = arith.constant 0 : index
    %c0_15 = arith.constant 0 : index
    %28 = vector.load %arg5[%c0_14, %c0_15] : memref<2x32xf32, #tpu.memory_space<vmem>>, vector<2x32xf32>
    tpu.vector_store %arg5[%c0_14, %c0_15], %27 {strides = array<i32>} : memref<2x32xf32, #tpu.memory_space<vmem>>, vector<2x32xf32>,
    return
  }
}

</mosaic_0001>

<bundles_post_ra>
// kernel: encoder_28_forward.4
= control target key start
LH: loop header
LB: loop body
LE: loop exit
PB: predicated region body
PF: predicated region fallthrough
CT: control target
= control target key end

     0   :  { %v2643_v0 = vmov 0.0   ;;  %vm2644_vm0 = vmmov 0   ;;  %vm1813_vm1 = vcmask 523264   ;;  %s3990_s1 = inlined_call_operand.vmem [shape: bf16[128,64], index: 1, kind: input, shape index: {}]   ;;  %s3991_s0 = inlined_call_operand.vmem [shape: bf16[1352,128], index: 0, kind: input, shape index: {}]   ;;  %s3992_s2 = inlined_call_operand.vmem [shape: f32[1,64], index: 2, kind: input, shape index: {}]   ;;  %s3993_s3 = inlined_call_operand.vmem [shape: f32[1352,64], index: 3, kind: output, shape index: {}]  }
   0x1   :  { %2174 = vmatprep.subr.bf16.mxu0 %v2643_v0  ;;  %v2548_v1 = vld [vmem:[%s3990_s1] sm:$0xff]   ;;  %2530 = vmatprep.subr.bf16.mxu1 %v2643_v0  ;;  %v2549_v2 = vld [vmem:[%s3990_s1 + $0x8] sm:$0xff]   ;;  %v2550_v3 = vld [vmem:[%s3990_s1 + $0x10] sm:$0xff]  }
   0x2   :  { %2190 = vmatprep.mubr.msk.bf16.mxu0 %vm2644_vm0, %v2643_v0  ;;  %2362 = vmatprep.mubr.msk.bf16.mxu1 %vm2644_vm0, %v2643_v0  ;;  %v2551_v4 = vld [vmem:[%s3990_s1 + $0x18] sm:$0xff]   ;;  %v2552_v5 = vld [vmem:[%s3990_s1 + $0x20] sm:$0xff]   ;;  %v2553_v6 = vld [vmem:[%s3990_s1 + $0x28] sm:$0xff]  }
   0x3   :  { %2175 = vmatpush3.bf16.msra.mxu0 %v2548_v1  ;;  %2538 = vmatpush3.bf16.msra.mxu1 %v2548_v1  ;;  %v2554_v7 = vld [vmem:[%s3990_s1 + $0x30] sm:$0xff]   ;;  %v2555_v8 = vld [vmem:[%s3990_s1 + $0x38] sm:$0xff]   ;;  %v2556_v9 = vld [vmem:[%s3991_s0] sm:$0xff]  }
   0x4   :  { %2176 = vmatprep.subr.bf16.mxu0 %v2643_v0  ;;  %2531 = vmatprep.subr.bf16.mxu1 %v2643_v0  ;;  %v2557_v10 = vld [vmem:[%s3991_s0 + $0x158] sm:$0xff]   ;;  %v2558_v11 = vld [vmem:[%s3991_s0 + $0x8] sm:$0xff]   ;;  %v2559_v12 = vld [vmem:[%s3991_s0 + $0x160] sm:$0xff]  }
   0x5   :  { %v2560_v13 = vld [vmem:[%s3991_s0 + $0x10] sm:$0xff]   ;;  %v2561_v14 = vld [vmem:[%s3991_s0 + $0x168] sm:$0xff]   ;;  %v2562_v15 = vld [vmem:[%s3991_s0 + $0x18] sm:$0xff]  }
   0x6   :  { %v2563_v16 = vld [vmem:[%s3991_s0 + $0x170] sm:$0xff]   ;;  %v2564_v17 = vld [vmem:[%s3991_s0 + $0x20] sm:$0xff]   ;;  %v2565_v18 = vld [vmem:[%s3991_s0 + $0x178] sm:$0xff]  }
   0x7   :  { %2177 = vmatpush3.bf16.msra.mxu0 %v2549_v2  ;;  %2539 = vmatpush3.bf16.msra.mxu1 %v2549_v2  ;;  %v2566_v19 = vld [vmem:[%s3991_s0 + $0x28] sm:$0xff]   ;;  %v2567_v20 = vld [vmem:[%s3991_s0 + $0x180] sm:$0xff]   ;;  %v2568_v21 = vld [vmem:[%s3991_s0 + $0x30] sm:$0xff]  }
   0x8   :  { %2178 = vmatprep.subr.bf16.mxu0 %v2643_v0  ;;  %2532 = vmatprep.subr.bf16.mxu1 %v2643_v0  ;;  %v2569_v22 = vld [vmem:[%s3991_s0 + $0x188] sm:$0xff]   ;;  %v2570_v23 = vld [vmem:[%s3991_s0 + $0x38] sm:$0xff]   ;;  %v2571_v24 = vld [vmem:[%s3991_s0 + $0x190] sm:$0xff]  }
   0x9   :  { %v2572_v25 = vld [vmem:[%s3991_s0 + $0x40] sm:$0xff]   ;;  %v2573_v26 = vld [vmem:[%s3991_s0 + $0x198] sm:$0xff]   ;;  %v2574_v27 = vld [vmem:[%s3991_s0 + $0x48] sm:$0xff]  }
   0xa   :  { %v2575_v28 = vld [vmem:[%s3991_s0 + $0x1a0] sm:$0xff]   ;;  %v2576_v29 = vld [vmem:[%s3991_s0 + $0x50] sm:$0xff]   ;;  %v2577_v30 = vld [vmem:[%s3991_s0 + $0x1a8] sm:$0xff]  }
   0xb   :  { %2179 = vmatpush3.bf16.msra.mxu0 %v2550_v3  ;;  %2540 = vmatpush3.bf16.msra.mxu1 %v2550_v3  ;;  %v2578_v31 = vld [vmem:[%s3991_s0 + $0x58] sm:$0xff]   ;;  %v2579_v32 = vld [vmem:[%s3991_s0 + $0x1b0] sm:$0xff]   ;;  %v2580_v33 = vld [vmem:[%s3991_s0 + $0x60] sm:$0xff]  }
   0xc   :  { %2180 = vmatprep.subr.bf16.mxu0 %v2643_v0  ;;  %2533 = vmatprep.subr.bf16.mxu1 %v2643_v0  ;;  %v2581_v34 = vld [vmem:[%s3991_s0 + $0x1b8] sm:$0xff]   ;;  %v2582_v35 = vld [vmem:[%s3991_s0 + $0x68] sm:$0xff]   ;;  %v2583_v36 = vld [vmem:[%s3991_s0 + $0x1c0] sm:$0xff]  }
   0xd   :  { %v2584_v37 = vld [vmem:[%s3991_s0 + $0x70] sm:$0xff]   ;;  %v2585_v38 = vld [vmem:[%s3991_s0 + $0x1c8] sm:$0xff]   ;;  %v2586_v39 = vld [vmem:[%s3991_s0 + $0x78] sm:$0xff]  }
   0xe   :  { %v2587_v40 = vld [vmem:[%s3991_s0 + $0x1d0] sm:$0xff]   ;;  %v2588_v41 = vld [vmem:[%s3991_s0 + $0x80] sm:$0xff]   ;;  %v2589_v42 = vld [vmem:[%s3991_s0 + $0x1d8] sm:$0xff]  }
   0xf   :  { %2181 = vmatpush3.bf16.msra.mxu0 %v2551_v4  ;;  %2541 = vmatpush3.bf16.msra.mxu1 %v2551_v4  ;;  %v2590_v43 = vld [vmem:[%s3991_s0 + $0x88] sm:$0xff]   ;;  %v2591_v44 = vld [vmem:[%s3991_s0 + $0x1e0] sm:$0xff]   ;;  %v2592_v45 = vld [vmem:[%s3991_s0 + $0x90] sm:$0xff]  }
  0x10   :  { %2182 = vmatprep.subr.bf16.mxu0 %v2643_v0  ;;  %2534 = vmatprep.subr.bf16.mxu1 %v2643_v0  ;;  %v2593_v46 = vld [vmem:[%s3991_s0 + $0x1e8] sm:$0xff]   ;;  %v2594_v47 = vld [vmem:[%s3991_s0 + $0x98] sm:$0xff]   ;;  %v2595_v48 = vld [vmem:[%s3991_s0 + $0x1f0] sm:$0xff]  }
  0x11   :  { %v2596_v49 = vld [vmem:[%s3991_s0 + $0xa0] sm:$0xff]   ;;  %v2597_v50 = vld [vmem:[%s3991_s0 + $0x1f8] sm:$0xff]   ;;  %v2598_v51 = vld [vmem:[%s3991_s0 + $0xa8] sm:$0xff]  }
  0x12   :  { %v2599_v52 = vld [vmem:[%s3991_s0 + $0x200] sm:$0xff]   ;;  %v2600_v53 = vld [vmem:[%s3991_s0 + $0xb0] sm:$0xff]   ;;  %v2601_v54 = vld [vmem:[%s3991_s0 + $0x208] sm:$0xff]  }
  0x13   :  { %2183 = vmatpush3.bf16.msra.mxu0 %v2552_v5  ;;  %2542 = vmatpush3.bf16.msra.mxu1 %v2552_v5  ;;  %v2602_v55 = vld [vmem:[%s3991_s0 + $0xb8] sm:$0xff]   ;;  %v2603_v56 = vld [vmem:[%s3991_s0 + $0x210] sm:$0xff]   ;;  %v2604_v57 = vld [vmem:[%s3991_s0 + $0xc0] sm:$0xff]  }
  0x14   :  { %2184 = vmatprep.subr.bf16.mxu0 %v2643_v0  ;;  %2535 = vmatprep.subr.bf16.mxu1 %v2643_v0  ;;  %v2605_v58 = vld [vmem:[%s3991_s0 + $0x218] sm:$0xff]   ;;  %v2606_v59 = vld [vmem:[%s3991_s0 + $0xc8] sm:$0xff]   ;;  %v2607_v60 = vld [vmem:[%s3991_s0 + $0x220] sm:$0xff]  }
  0x15   :  { %v2608_v61 = vld [vmem:[%s3991_s0 + $0xd0] sm:$0xff]   ;;  %v2609_v62 = vld [vmem:[%s3991_s0 + $0x228] sm:$0xff]   ;;  %v2978_v63 = vld [vmem:[%s3992_s2] ss:$0 sm:$0xff] }
  0x16   :  { %v2610_v5 = vld [vmem:[%s3991_s0 + $0xd8] sm:$0xff]  }
  0x17   :  { %2185 = vmatpush3.bf16.msra.mxu0 %v2553_v6  ;;  %2543 = vmatpush3.bf16.msra.mxu1 %v2553_v6 }
  0x18   :  { %2186 = vmatprep.subr.bf16.mxu0 %v2643_v0  ;;  %2536 = vmatprep.subr.bf16.mxu1 %v2643_v0 }
  0x1b   :  { %2187 = vmatpush3.bf16.msra.mxu0 %v2554_v7  ;;  %2544 = vmatpush3.bf16.msra.mxu1 %v2554_v7 }
  0x1c   :  { %2188 = vmatprep.subr.bf16.mxu0 %v2643_v0  ;;  %2537 = vmatprep.subr.bf16.mxu1 %v2643_v0 }
  0x1f   :  { %2189 = vmatpush3.bf16.msra.mxu0 %v2555_v8  ;;  %2545 = vmatpush3.bf16.msra.mxu1 %v2555_v8  ;;  %v2611_v8 = vld [vmem:[%s3991_s0 + $0x230] sm:$0xff]  }
  0x22   :  { %2191 = vmatmul.mubr.bf16.vlgmr.msra.gmra.mrb[0].mxu0 %v2556_v9  ;;  %2363 = vmatmul.mubr.bf16.vlgmr.msra.gmra.mrb[0].mxu1 %v2557_v10 }
  0x23   :  { %2194 = vmatprep.mubr.msk.bf16.mxu0 %vm2644_vm0, %v2643_v0  ;;  %2366 = vmatprep.mubr.msk.bf16.mxu1 %vm2644_vm0, %v2643_v0 }
  0x2a   :  { %2195 = vmatmul.mubr.bf16.gmra.mrb[4].mxu0 %v2558_v11  ;;  %2367 = vmatmul.mubr.bf16.gmra.mrb[4].mxu1 %v2559_v12 }
  0x2b   :  { %2198 = vmatprep.mubr.msk.bf16.mxu0 %vm2644_vm0, %v2643_v0  ;;  %2370 = vmatprep.mubr.msk.bf16.mxu1 %vm2644_vm0, %v2643_v0 }
  0x32   :  { %2199 = vmatmul.mubr.bf16.gmra.mrb[8].mxu0 %v2560_v13  ;;  %2371 = vmatmul.mubr.bf16.gmra.mrb[8].mxu1 %v2561_v14 }
  0x33   :  { %2202 = vmatprep.mubr.msk.bf16.mxu0 %vm2644_vm0, %v2643_v0  ;;  %2374 = vmatprep.mubr.msk.bf16.mxu1 %vm2644_vm0, %v2643_v0 }
  0x3a   :  { %2203 = vmatmul.mubr.bf16.gmra.mrb[12].mxu0 %v2562_v15  ;;  %2375 = vmatmul.mubr.bf16.gmra.mrb[12].mxu1 %v2563_v16 }
  0x3b   :  { %2206 = vmatprep.mubr.msk.bf16.mxu0 %vm2644_vm0, %v2643_v0  ;;  %2378 = vmatprep.mubr.msk.bf16.mxu1 %vm2644_vm0, %v2643_v0 }
  0x42   :  { %2207 = vmatmul.mubr.bf16.gmra.mrb[16].mxu0 %v2564_v17  ;;  %2379 = vmatmul.mubr.bf16.gmra.mrb[16].mxu1 %v2565_v18 }
  0x43   :  { %2210 = vmatprep.mubr.msk.bf16.mxu0 %vm2644_vm0, %v2643_v0  ;;  %2382 = vmatprep.mubr.msk.bf16.mxu1 %vm2644_vm0, %v2643_v0 }
  0x4a   :  { %2211 = vmatmul.mubr.bf16.gmra.mrb[20].mxu0 %v2566_v19  ;;  %2383 = vmatmul.mubr.bf16.gmra.mrb[20].mxu1 %v2567_v20 }
  0x4b   :  { %2214 = vmatprep.mubr.msk.bf16.mxu0 %vm2644_vm0, %v2643_v0  ;;  %2386 = vmatprep.mubr.msk.bf16.mxu1 %vm2644_vm0, %v2643_v0 }
  0x52   :  { %2215 = vmatmul.mubr.bf16.gmra.mrb[24].mxu0 %v2568_v21  ;;  %2387 = vmatmul.mubr.bf16.gmra.mrb[24].mxu1 %v2569_v22 }
  0x53   :  { %2218 = vmatprep.mubr.msk.bf16.mxu0 %vm2644_vm0, %v2643_v0  ;;  %2390 = vmatprep.mubr.msk.bf16.mxu1 %vm2644_vm0, %v2643_v0 }
  0x5a   :  { %2219 = vmatmul.mubr.bf16.gmra.mrb[28].mxu0 %v2570_v23  ;;  %2391 = vmatmul.mubr.bf16.gmra.mrb[28].mxu1 %v2571_v24 }
  0x5b   :  { %2222 = vmatprep.mubr.msk.bf16.mxu0 %vm2644_vm0, %v2643_v0  ;;  %2394 = vmatprep.mubr.msk.bf16.mxu1 %vm2644_vm0, %v2643_v0 }
  0x62   :  { %2223 = vmatmul.mubr.bf16.gmra.mrb[32].mxu0 %v2572_v25  ;;  %2395 = vmatmul.mubr.bf16.gmra.mrb[32].mxu1 %v2573_v26 }
  0x63   :  { %2226 = vmatprep.mubr.msk.bf16.mxu0 %vm2644_vm0, %v2643_v0  ;;  %2398 = vmatprep.mubr.msk.bf16.mxu1 %vm2644_vm0, %v2643_v0 }
  0x6a   :  { %2227 = vmatmul.mubr.bf16.gmra.mrb[36].mxu0 %v2574_v27  ;;  %2399 = vmatmul.mubr.bf16.gmra.mrb[36].mxu1 %v2575_v28  ;;  %v2612_v27 = vld [vmem:[%s3991_s0 + $0xe0] sm:$0xff]  }
  0x6b   :  { %2230 = vmatprep.mubr.msk.bf16.mxu0 %vm2644_vm0, %v2643_v0  ;;  %2402 = vmatprep.mubr.msk.bf16.mxu1 %vm2644_vm0, %v2643_v0 }
  0x72   :  { %2231 = vmatmul.mubr.bf16.gmra.mrb[40].mxu0 %v2576_v29  ;;  %2403 = vmatmul.mubr.bf16.gmra.mrb[40].mxu1 %v2577_v30  ;;  %v2613_v30 = vld [vmem:[%s3991_s0 + $0x238] sm:$0xff]  }
  0x73   :  { %2234 = vmatprep.mubr.msk.bf16.mxu0 %vm2644_vm0, %v2643_v0  ;;  %2406 = vmatprep.mubr.msk.bf16.mxu1 %vm2644_vm0, %v2643_v0 }
  0x7a   :  { %2235 = vmatmul.mubr.bf16.gmra.mrb[44].mxu0 %v2578_v31  ;;  %2407 = vmatmul.mubr.bf16.gmra.mrb[44].mxu1 %v2579_v32 }
  0x7b   :  { %2238 = vmatprep.mubr.msk.bf16.mxu0 %vm2644_vm0, %v2643_v0  ;;  %2410 = vmatprep.mubr.msk.bf16.mxu1 %vm2644_vm0, %v2643_v0 }
  0x82   :  { %2239 = vmatmul.mubr.bf16.gmra.mrb[48].mxu0 %v2580_v33  ;;  %2411 = vmatmul.mubr.bf16.gmra.mrb[48].mxu1 %v2581_v34 }
  0x83   :  { %2242 = vmatprep.mubr.msk.bf16.mxu0 %vm2644_vm0, %v2643_v0  ;;  %2414 = vmatprep.mubr.msk.bf16.mxu1 %vm2644_vm0, %v2643_v0 }
  0x8a   :  { %2243 = vmatmul.mubr.bf16.gmra.mrb[52].mxu0 %v2582_v35  ;;  %2415 = vmatmul.mubr.bf16.gmra.mrb[52].mxu1 %v2583_v36 }
  0x8b   :  { %2246 = vmatprep.mubr.msk.bf16.mxu0 %vm2644_vm0, %v2643_v0  ;;  %2418 = vmatprep.mubr.msk.bf16.mxu1 %vm2644_vm0, %v2643_v0 }
  0x92   :  { %2247 = vmatmul.mubr.bf16.gmra.mrb[56].mxu0 %v2584_v37  ;;  %2419 = vmatmul.mubr.bf16.gmra.mrb[56].mxu1 %v2585_v38 }
  0x93   :  { %2250 = vmatprep.mubr.msk.bf16.mxu0 %vm2644_vm0, %v2643_v0  ;;  %2422 = vmatprep.mubr.msk.bf16.mxu1 %vm2644_vm0, %v2643_v0 }
  0x9a   :  { %2251 = vmatmul.mubr.bf16.gmra.mrb[60].mxu0 %v2586_v39  ;;  %2423 = vmatmul.mubr.bf16.gmra.mrb[60].mxu1 %v2587_v40 }
  0x9b   :  { %2254 = vmatprep.mubr.msk.bf16.mxu0 %vm2644_vm0, %v2643_v0  ;;  %2426 = vmatprep.mubr.msk.bf16.mxu1 %vm2644_vm0, %v2643_v0 }
  0xa2   :  { %2255 = vmatmul.mubr.bf16.gmra.mrb[64].mxu0 %v2588_v41  ;;  %2427 = vmatmul.mubr.bf16.gmra.mrb[64].mxu1 %v2589_v42 }
  0xa3   :  { %2258 = vmatprep.mubr.msk.bf16.mxu0 %vm2644_vm0, %v2643_v0  ;;  %2430 = vmatprep.mubr.msk.bf16.mxu1 %vm2644_vm0, %v2643_v0 }
  0xaa   :  { %2259 = vmatmul.mubr.bf16.gmra.mrb[68].mxu0 %v2590_v43  ;;  %2431 = vmatmul.mubr.bf16.gmra.mrb[68].mxu1 %v2591_v44 }
  0xab   :  { %2262 = vmatprep.mubr.msk.bf16.mxu0 %vm2644_vm0, %v2643_v0  ;;  %2434 = vmatprep.mubr.msk.bf16.mxu1 %vm2644_vm0, %v2643_v0 }
  0xb2   :  { %2263 = vmatmul.mubr.bf16.gmra.mrb[72].mxu0 %v2592_v45  ;;  %2435 = vmatmul.mubr.bf16.gmra.mrb[72].mxu1 %v2593_v46 }
  0xb3   :  { %2266 = vmatprep.mubr.msk.bf16.mxu0 %vm2644_vm0, %v2643_v0  ;;  %2438 = vmatprep.mubr.msk.bf16.mxu1 %vm2644_vm0, %v2643_v0 }
  0xba   :  { %2267 = vmatmul.mubr.bf16.gmra.mrb[76].mxu0 %v2594_v47  ;;  %2439 = vmatmul.mubr.bf16.gmra.mrb[76].mxu1 %v2595_v48 }
  0xbb   :  { %2270 = vmatprep.mubr.msk.bf16.mxu0 %vm2644_vm0, %v2643_v0  ;;  %2442 = vmatprep.mubr.msk.bf16.mxu1 %vm2644_vm0, %v2643_v0 }
  0xc2   :  { %2271 = vmatmul.mubr.bf16.gmra.mrb[80].mxu0 %v2596_v49  ;;  %2443 = vmatmul.mubr.bf16.gmra.mrb[80].mxu1 %v2597_v50  ;;  %v2614_v49 = vld [vmem:[%s3991_s0 + $0xe8] sm:$0xff]  }
  0xc3   :  { %2274 = vmatprep.mubr.msk.bf16.mxu0 %vm2644_vm0, %v2643_v0  ;;  %2446 = vmatprep.mubr.msk.bf16.mxu1 %vm2644_vm0, %v2643_v0 }
  0xca   :  { %2275 = vmatmul.mubr.bf16.gmra.mrb[84].mxu0 %v2598_v51  ;;  %2447 = vmatmul.mubr.bf16.gmra.mrb[84].mxu1 %v2599_v52  ;;  %v2615_v52 = vld [vmem:[%s3991_s0 + $0x240] sm:$0xff]  }
  0xcb   :  { %2278 = vmatprep.mubr.msk.bf16.mxu0 %vm2644_vm0, %v2643_v0  ;;  %2450 = vmatprep.mubr.msk.bf16.mxu1 %vm2644_vm0, %v2643_v0 }
  0xd2   :  { %2279 = vmatmul.mubr.bf16.gmra.mrb[88].mxu0 %v2600_v53  ;;  %2451 = vmatmul.mubr.bf16.gmra.mrb[88].mxu1 %v2601_v54 }
  0xd3   :  { %2282 = vmatprep.mubr.msk.bf16.mxu0 %vm2644_vm0, %v2643_v0  ;;  %2454 = vmatprep.mubr.msk.bf16.mxu1 %vm2644_vm0, %v2643_v0 }
  0xda   :  { %2283 = vmatmul.mubr.bf16.gmra.mrb[92].mxu0 %v2602_v55  ;;  %2455 = vmatmul.mubr.bf16.gmra.mrb[92].mxu1 %v2603_v56 }
  0xdb   :  { %2286 = vmatprep.mubr.msk.bf16.mxu0 %vm2644_vm0, %v2643_v0  ;;  %2458 = vmatprep.mubr.msk.bf16.mxu1 %vm2644_vm0, %v2643_v0 }
  0xe2   :  { %2287 = vmatmul.mubr.bf16.gmra.mrb[96].mxu0 %v2604_v57  ;;  %2459 = vmatmul.mubr.bf16.gmra.mrb[96].mxu1 %v2605_v58 }
  0xe3   :  { %2290 = vmatprep.mubr.msk.bf16.mxu0 %vm2644_vm0, %v2643_v0  ;;  %2462 = vmatprep.mubr.msk.bf16.mxu1 %vm2644_vm0, %v2643_v0 }
  0xea   :  { %2291 = vmatmul.mubr.bf16.gmra.mrb[100].mxu0 %v2606_v59  ;;  %2463 = vmatmul.mubr.bf16.gmra.mrb[100].mxu1 %v2607_v60 }
  0xeb   :  { %2294 = vmatprep.mubr.msk.bf16.mxu0 %vm2644_vm0, %v2643_v0  ;;  %2466 = vmatprep.mubr.msk.bf16.mxu1 %vm2644_vm0, %v2643_v0 }
  0xf2   :  { %2295 = vmatmul.mubr.bf16.gmra.mrb[104].mxu0 %v2608_v61  ;;  %2467 = vmatmul.mubr.bf16.gmra.mrb[104].mxu1 %v2609_v62 }
  0xf3   :  { %2298 = vmatprep.mubr.msk.bf16.mxu0 %vm2644_vm0, %v2643_v0  ;;  %2470 = vmatprep.mubr.msk.bf16.mxu1 %vm2644_vm0, %v2643_v0 }
  0xf5   :  { %v797_v1 = vpop.f32.mrb[0].mxu0  ;;  %v1141_v2 = vpop.f32.mrb[0].mxu1 }
  0xf6   :  { %v798_v3 = vadd.f32 %v2978_v63, %v797_v1  ;;  %v2192_v4 = vpop.f32.mrb[1].mxu0  ;;  %v1142_v6 = vadd.f32 %v2978_v63, %v1141_v2  ;;  %v2364_v7 = vpop.f32.mrb[1].mxu1 }
  0xf7   :  { %v800_v9 = vpop.f32.mrb[2].mxu0  ;;  %v1144_v10 = vpop.f32.mrb[2].mxu1 }
  0xf8   :  { %v1475_v11 = vmul.f32 0.1, %v798_v3  ;;  %v801_v12 = vadd.f32 %v2978_v63, %v800_v9  ;;  %v2193_v13 = vpop.f32.mrb[3].mxu0  ;;  %v1561_v14 = vmul.f32 0.1, %v1142_v6  ;;  %v1145_v15 = vadd.f32 %v2978_v63, %v1144_v10  ;;  %v2365_v16 = vpop.f32.mrb[3].mxu1 }
  0xf9   :  { %v2616_v9 = vld [vmem:[%s3991_s0 + $0xf0] sm:$0xff]  }
  0xfa   :  { %v1644_v17 = vmax.f32 %v798_v3, %v1475_v11  ;;  %v1476_v18 = vmul.f32 0.1, %v801_v12  ;;  %2299 = vmatmul.mubr.bf16.gmra.mrb[108].mxu0 %v2610_v5  ;;  %v1730_v19 = vmax.f32 %v1142_v6, %v1561_v14  ;;  %v1562_v20 = vmul.f32 0.1, %v1145_v15  ;;  %2471 = vmatmul.mubr.bf16.gmra.mrb[108].mxu1 %v2611_v8 }
  0xfb   :  { %2302 = vmatprep.mubr.msk.bf16.mxu0 %vm2644_vm0, %v2643_v0  ;;  %2474 = vmatprep.mubr.msk.bf16.mxu1 %vm2644_vm0, %v2643_v0 }
  0xfc   :  { %1814 = vst.msk [vmem:[%s3993_s3] sm:$0xff] %vm1813_vm1, %v1644_v17  ;;  %v1645_v21 = vmax.f32 %v801_v12, %v1476_v18  ;;  %1900 = vst.msk [vmem:[%s3993_s3 + $0x2b0] sm:$0xff] %vm1813_vm1, %v1730_v19  ;;  %v1731_v22 = vmax.f32 %v1145_v15, %v1562_v20  ;;  %v2617_v12 = vld [vmem:[%s3991_s0 + $0x248] sm:$0xff]  }
  0xfd   :  { %v805_v23 = vpop.f32.mrb[4].mxu0  ;;  %v1149_v24 = vpop.f32.mrb[4].mxu1 }
  0xfe   :  { %1815 = vst.msk [vmem:[%s3993_s3 + $0x8] sm:$0xff] %vm1813_vm1, %v1645_v21  ;;  %v806_v25 = vadd.f32 %v2978_v63, %v805_v23  ;;  %1901 = vst.msk [vmem:[%s3993_s3 + $0x2b8] sm:$0xff] %vm1813_vm1, %v1731_v22  ;;  %v2196_v26 = vpop.f32.mrb[5].mxu0  ;;  %v1150_v28 = vadd.f32 %v2978_v63, %v1149_v24  ;;  %v2368_v29 = vpop.f32.mrb[5].mxu1 }
  0xff   :  { %v808_v31 = vpop.f32.mrb[6].mxu0  ;;  %v1152_v32 = vpop.f32.mrb[6].mxu1 }
 0x100   :  { %v1477_v33 = vmul.f32 0.1, %v806_v25  ;;  %v809_v34 = vadd.f32 %v2978_v63, %v808_v31  ;;  %v2197_v35 = vpop.f32.mrb[7].mxu0  ;;  %v1563_v36 = vmul.f32 0.1, %v1150_v28  ;;  %v1153_v37 = vadd.f32 %v2978_v63, %v1152_v32  ;;  %v2369_v38 = vpop.f32.mrb[7].mxu1 }
 0x101   :  { %v2618_v31 = vld [vmem:[%s3991_s0 + $0xf8] sm:$0xff]  }
 0x102   :  { %v1646_v39 = vmax.f32 %v806_v25, %v1477_v33  ;;  %v1478_v40 = vmul.f32 0.1, %v809_v34  ;;  %2303 = vmatmul.mubr.bf16.gmra.mrb[112].mxu0 %v2612_v27  ;;  %v1732_v41 = vmax.f32 %v1150_v28, %v1563_v36  ;;  %v1564_v42 = vmul.f32 0.1, %v1153_v37  ;;  %2475 = vmatmul.mubr.bf16.gmra.mrb[112].mxu1 %v2613_v30 }
 0x103   :  { %2306 = vmatprep.mubr.msk.bf16.mxu0 %vm2644_vm0, %v2643_v0  ;;  %2478 = vmatprep.mubr.msk.bf16.mxu1 %vm2644_vm0, %v2643_v0 }
 0x104   :  { %1816 = vst.msk [vmem:[%s3993_s3 + $0x10] sm:$0xff] %vm1813_vm1, %v1646_v39  ;;  %v1647_v43 = vmax.f32 %v809_v34, %v1478_v40  ;;  %1902 = vst.msk [vmem:[%s3993_s3 + $0x2c0] sm:$0xff] %vm1813_vm1, %v1732_v41  ;;  %v1733_v44 = vmax.f32 %v1153_v37, %v1564_v42  ;;  %v2619_v34 = vld [vmem:[%s3991_s0 + $0x250] sm:$0xff]  }
 0x105   :  { %v813_v45 = vpop.f32.mrb[8].mxu0  ;;  %v1157_v46 = vpop.f32.mrb[8].mxu1 }
 0x106   :  { %1817 = vst.msk [vmem:[%s3993_s3 + $0x18] sm:$0xff] %vm1813_vm1, %v1647_v43  ;;  %v814_v47 = vadd.f32 %v2978_v63, %v813_v45  ;;  %1903 = vst.msk [vmem:[%s3993_s3 + $0x2c8] sm:$0xff] %vm1813_vm1, %v1733_v44  ;;  %v2200_v48 = vpop.f32.mrb[9].mxu0  ;;  %v1158_v50 = vadd.f32 %v2978_v63, %v1157_v46  ;;  %v2372_v51 = vpop.f32.mrb[9].mxu1 }
 0x107   :  { %v816_v53 = vpop.f32.mrb[10].mxu0  ;;  %v1160_v54 = vpop.f32.mrb[10].mxu1 }
 0x108   :  { %v1479_v55 = vmul.f32 0.1, %v814_v47  ;;  %v817_v56 = vadd.f32 %v2978_v63, %v816_v53  ;;  %v2201_v57 = vpop.f32.mrb[11].mxu0  ;;  %v1565_v58 = vmul.f32 0.1, %v1158_v50  ;;  %v1161_v59 = vadd.f32 %v2978_v63, %v1160_v54  ;;  %v2373_v60 = vpop.f32.mrb[11].mxu1 }
 0x109   :  { %v2620_v53 = vld [vmem:[%s3991_s0 + $0x100] sm:$0xff]  }
 0x10a   :  { %v1648_v61 = vmax.f32 %v814_v47, %v1479_v55  ;;  %v1480_v62 = vmul.f32 0.1, %v817_v56  ;;  %2307 = vmatmul.mubr.bf16.gmra.mrb[116].mxu0 %v2614_v49  ;;  %v1734_v1 = vmax.f32 %v1158_v50, %v1565_v58  ;;  %v1566_v2 = vmul.f32 0.1, %v1161_v59  ;;  %2479 = vmatmul.mubr.bf16.gmra.mrb[116].mxu1 %v2615_v52 }
 0x10b   :  { %2310 = vmatprep.mubr.msk.bf16.mxu0 %vm2644_vm0, %v2643_v0  ;;  %2482 = vmatprep.mubr.msk.bf16.mxu1 %vm2644_vm0, %v2643_v0 }
 0x10c   :  { %1818 = vst.msk [vmem:[%s3993_s3 + $0x20] sm:$0xff] %vm1813_vm1, %v1648_v61  ;;  %v1649_v3 = vmax.f32 %v817_v56, %v1480_v62  ;;  %1904 = vst.msk [vmem:[%s3993_s3 + $0x2d0] sm:$0xff] %vm1813_vm1, %v1734_v1  ;;  %v1735_v4 = vmax.f32 %v1161_v59, %v1566_v2  ;;  %v2621_v56 = vld [vmem:[%s3991_s0 + $0x258] sm:$0xff]  }
 0x10d   :  { %v821_v5 = vpop.f32.mrb[12].mxu0  ;;  %v1165_v6 = vpop.f32.mrb[12].mxu1 }
 0x10e   :  { %1819 = vst.msk [vmem:[%s3993_s3 + $0x28] sm:$0xff] %vm1813_vm1, %v1649_v3  ;;  %v822_v7 = vadd.f32 %v2978_v63, %v821_v5  ;;  %1905 = vst.msk [vmem:[%s3993_s3 + $0x2d8] sm:$0xff] %vm1813_vm1, %v1735_v4  ;;  %v2204_v8 = vpop.f32.mrb[13].mxu0  ;;  %v1166_v10 = vadd.f32 %v2978_v63, %v1165_v6  ;;  %v2376_v11 = vpop.f32.mrb[13].mxu1 }
 0x10f   :  { %v824_v13 = vpop.f32.mrb[14].mxu0  ;;  %v1168_v14 = vpop.f32.mrb[14].mxu1 }
 0x110   :  { %v1481_v15 = vmul.f32 0.1, %v822_v7  ;;  %v825_v16 = vadd.f32 %v2978_v63, %v824_v13  ;;  %v2205_v17 = vpop.f32.mrb[15].mxu0  ;;  %v1567_v18 = vmul.f32 0.1, %v1166_v10  ;;  %v1169_v19 = vadd.f32 %v2978_v63, %v1168_v14  ;;  %v2377_v20 = vpop.f32.mrb[15].mxu1 }
 0x111   :  { %v2622_v13 = vld [vmem:[%s3991_s0 + $0x108] sm:$0xff]  }
 0x112   :  { %v1650_v21 = vmax.f32 %v822_v7, %v1481_v15  ;;  %v1482_v22 = vmul.f32 0.1, %v825_v16  ;;  %2311 = vmatmul.mubr.bf16.gmra.mrb[120].mxu0 %v2616_v9  ;;  %v1736_v23 = vmax.f32 %v1166_v10, %v1567_v18  ;;  %v1568_v24 = vmul.f32 0.1, %v1169_v19  ;;  %2483 = vmatmul.mubr.bf16.gmra.mrb[120].mxu1 %v2617_v12 }
 0x113   :  { %2314 = vmatprep.mubr.msk.bf16.mxu0 %vm2644_vm0, %v2643_v0  ;;  %2486 = vmatprep.mubr.msk.bf16.mxu1 %vm2644_vm0, %v2643_v0 }
 0x114   :  { %1820 = vst.msk [vmem:[%s3993_s3 + $0x30] sm:$0xff] %vm1813_vm1, %v1650_v21  ;;  %v1651_v25 = vmax.f32 %v825_v16, %v1482_v22  ;;  %1906 = vst.msk [vmem:[%s3993_s3 + $0x2e0] sm:$0xff] %vm1813_vm1, %v1736_v23  ;;  %v1737_v26 = vmax.f32 %v1169_v19, %v1568_v24  ;;  %v2623_v16 = vld [vmem:[%s3991_s0 + $0x260] sm:$0xff]  }
 0x115   :  { %v829_v27 = vpop.f32.mrb[16].mxu0  ;;  %v1173_v28 = vpop.f32.mrb[16].mxu1 }
 0x116   :  { %1821 = vst.msk [vmem:[%s3993_s3 + $0x38] sm:$0xff] %vm1813_vm1, %v1651_v25  ;;  %v830_v29 = vadd.f32 %v2978_v63, %v829_v27  ;;  %1907 = vst.msk [vmem:[%s3993_s3 + $0x2e8] sm:$0xff] %vm1813_vm1, %v1737_v26  ;;  %v2208_v30 = vpop.f32.mrb[17].mxu0  ;;  %v1174_v32 = vadd.f32 %v2978_v63, %v1173_v28  ;;  %v2380_v33 = vpop.f32.mrb[17].mxu1 }
 0x117   :  { %v832_v35 = vpop.f32.mrb[18].mxu0  ;;  %v1176_v36 = vpop.f32.mrb[18].mxu1 }
 0x118   :  { %v1483_v37 = vmul.f32 0.1, %v830_v29  ;;  %v833_v38 = vadd.f32 %v2978_v63, %v832_v35  ;;  %v2209_v39 = vpop.f32.mrb[19].mxu0  ;;  %v1569_v40 = vmul.f32 0.1, %v1174_v32  ;;  %v1177_v41 = vadd.f32 %v2978_v63, %v1176_v36  ;;  %v2381_v42 = vpop.f32.mrb[19].mxu1 }
 0x119   :  { %v2624_v35 = vld [vmem:[%s3991_s0 + $0x110] sm:$0xff]  }
 0x11a   :  { %v1652_v43 = vmax.f32 %v830_v29, %v1483_v37  ;;  %v1484_v44 = vmul.f32 0.1, %v833_v38  ;;  %2315 = vmatmul.mubr.bf16.gmra.mrb[124].mxu0 %v2618_v31  ;;  %v1738_v45 = vmax.f32 %v1174_v32, %v1569_v40  ;;  %v1570_v46 = vmul.f32 0.1, %v1177_v41  ;;  %2487 = vmatmul.mubr.bf16.gmra.mrb[124].mxu1 %v2619_v34 }
 0x11b   :  { %2318 = vmatprep.mubr.msk.bf16.mxu0 %vm2644_vm0, %v2643_v0  ;;  %2490 = vmatprep.mubr.msk.bf16.mxu1 %vm2644_vm0, %v2643_v0 }
 0x11c   :  { %1822 = vst.msk [vmem:[%s3993_s3 + $0x40] sm:$0xff] %vm1813_vm1, %v1652_v43  ;;  %v1653_v47 = vmax.f32 %v833_v38, %v1484_v44  ;;  %1908 = vst.msk [vmem:[%s3993_s3 + $0x2f0] sm:$0xff] %vm1813_vm1, %v1738_v45  ;;  %v1739_v48 = vmax.f32 %v1177_v41, %v1570_v46  ;;  %v2625_v38 = vld [vmem:[%s3991_s0 + $0x268] sm:$0xff]  }
 0x11d   :  { %v837_v49 = vpop.f32.mrb[20].mxu0  ;;  %v1181_v50 = vpop.f32.mrb[20].mxu1 }
 0x11e   :  { %1823 = vst.msk [vmem:[%s3993_s3 + $0x48] sm:$0xff] %vm1813_vm1, %v1653_v47  ;;  %v838_v51 = vadd.f32 %v2978_v63, %v837_v49  ;;  %1909 = vst.msk [vmem:[%s3993_s3 + $0x2f8] sm:$0xff] %vm1813_vm1, %v1739_v48  ;;  %v2212_v52 = vpop.f32.mrb[21].mxu0  ;;  %v1182_v54 = vadd.f32 %v2978_v63, %v1181_v50  ;;  %v2384_v55 = vpop.f32.mrb[21].mxu1 }
 0x11f   :  { %v840_v57 = vpop.f32.mrb[22].mxu0  ;;  %v1184_v58 = vpop.f32.mrb[22].mxu1 }
 0x120   :  { %v1485_v59 = vmul.f32 0.1, %v838_v51  ;;  %v841_v60 = vadd.f32 %v2978_v63, %v840_v57  ;;  %v2213_v61 = vpop.f32.mrb[23].mxu0  ;;  %v1571_v62 = vmul.f32 0.1, %v1182_v54  ;;  %v1185_v1 = vadd.f32 %v2978_v63, %v1184_v58  ;;  %v2385_v2 = vpop.f32.mrb[23].mxu1 }
 0x121   :  { %v2626_v57 = vld [vmem:[%s3991_s0 + $0x118] sm:$0xff]  }
 0x122   :  { %v1654_v3 = vmax.f32 %v838_v51, %v1485_v59  ;;  %v1486_v4 = vmul.f32 0.1, %v841_v60  ;;  %2319 = vmatmul.mubr.bf16.gmra.mrb[128].mxu0 %v2620_v53  ;;  %v1740_v5 = vmax.f32 %v1182_v54, %v1571_v62  ;;  %v1572_v6 = vmul.f32 0.1, %v1185_v1  ;;  %2491 = vmatmul.mubr.bf16.gmra.mrb[128].mxu1 %v2621_v56 }
 0x123   :  { %2322 = vmatprep.mubr.msk.bf16.mxu0 %vm2644_vm0, %v2643_v0  ;;  %2494 = vmatprep.mubr.msk.bf16.mxu1 %vm2644_vm0, %v2643_v0 }
 0x124   :  { %1824 = vst.msk [vmem:[%s3993_s3 + $0x50] sm:$0xff] %vm1813_vm1, %v1654_v3  ;;  %v1655_v7 = vmax.f32 %v841_v60, %v1486_v4  ;;  %1910 = vst.msk [vmem:[%s3993_s3 + $0x300] sm:$0xff] %vm1813_vm1, %v1740_v5  ;;  %v1741_v8 = vmax.f32 %v1185_v1, %v1572_v6  ;;  %v2627_v60 = vld [vmem:[%s3991_s0 + $0x270] sm:$0xff]  }
 0x125   :  { %v845_v9 = vpop.f32.mrb[24].mxu0  ;;  %v1189_v10 = vpop.f32.mrb[24].mxu1 }
 0x126   :  { %1825 = vst.msk [vmem:[%s3993_s3 + $0x58] sm:$0xff] %vm1813_vm1, %v1655_v7  ;;  %v846_v11 = vadd.f32 %v2978_v63, %v845_v9  ;;  %1911 = vst.msk [vmem:[%s3993_s3 + $0x308] sm:$0xff] %vm1813_vm1, %v1741_v8  ;;  %v2216_v12 = vpop.f32.mrb[25].mxu0  ;;  %v1190_v14 = vadd.f32 %v2978_v63, %v1189_v10  ;;  %v2388_v15 = vpop.f32.mrb[25].mxu1 }
 0x127   :  { %v848_v17 = vpop.f32.mrb[26].mxu0  ;;  %v1192_v18 = vpop.f32.mrb[26].mxu1 }
 0x128   :  { %v1487_v19 = vmul.f32 0.1, %v846_v11  ;;  %v849_v20 = vadd.f32 %v2978_v63, %v848_v17  ;;  %v2217_v21 = vpop.f32.mrb[27].mxu0  ;;  %v1573_v22 = vmul.f32 0.1, %v1190_v14  ;;  %v1193_v23 = vadd.f32 %v2978_v63, %v1192_v18  ;;  %v2389_v24 = vpop.f32.mrb[27].mxu1 }
 0x129   :  { %v2628_v17 = vld [vmem:[%s3991_s0 + $0x120] sm:$0xff]  }
 0x12a   :  { %v1656_v25 = vmax.f32 %v846_v11, %v1487_v19  ;;  %v1488_v26 = vmul.f32 0.1, %v849_v20  ;;  %2323 = vmatmul.mubr.bf16.gmra.mrb[132].mxu0 %v2622_v13  ;;  %v1742_v27 = vmax.f32 %v1190_v14, %v1573_v22  ;;  %v1574_v28 = vmul.f32 0.1, %v1193_v23  ;;  %2495 = vmatmul.mubr.bf16.gmra.mrb[132].mxu1 %v2623_v16 }
 0x12b   :  { %2326 = vmatprep.mubr.msk.bf16.mxu0 %vm2644_vm0, %v2643_v0  ;;  %2498 = vmatprep.mubr.msk.bf16.mxu1 %vm2644_vm0, %v2643_v0 }
 0x12c   :  { %1826 = vst.msk [vmem:[%s3993_s3 + $0x60] sm:$0xff] %vm1813_vm1, %v1656_v25  ;;  %v1657_v29 = vmax.f32 %v849_v20, %v1488_v26  ;;  %1912 = vst.msk [vmem:[%s3993_s3 + $0x310] sm:$0xff] %vm1813_vm1, %v1742_v27  ;;  %v1743_v30 = vmax.f32 %v1193_v23, %v1574_v28  ;;  %v2629_v20 = vld [vmem:[%s3991_s0 + $0x278] sm:$0xff]  }
 0x12d   :  { %v853_v31 = vpop.f32.mrb[28].mxu0  ;;  %v1197_v32 = vpop.f32.mrb[28].mxu1 }
 0x12e   :  { %1827 = vst.msk [vmem:[%s3993_s3 + $0x68] sm:$0xff] %vm1813_vm1, %v1657_v29  ;;  %v854_v33 = vadd.f32 %v2978_v63, %v853_v31  ;;  %1913 = vst.msk [vmem:[%s3993_s3 + $0x318] sm:$0xff] %vm1813_vm1, %v1743_v30  ;;  %v2220_v34 = vpop.f32.mrb[29].mxu0  ;;  %v1198_v36 = vadd.f32 %v2978_v63, %v1197_v32  ;;  %v2392_v37 = vpop.f32.mrb[29].mxu1 }
 0x12f   :  { %v856_v39 = vpop.f32.mrb[30].mxu0  ;;  %v1200_v40 = vpop.f32.mrb[30].mxu1 }
 0x130   :  { %v1489_v41 = vmul.f32 0.1, %v854_v33  ;;  %v857_v42 = vadd.f32 %v2978_v63, %v856_v39  ;;  %v2221_v43 = vpop.f32.mrb[31].mxu0  ;;  %v1575_v44 = vmul.f32 0.1, %v1198_v36  ;;  %v1201_v45 = vadd.f32 %v2978_v63, %v1200_v40  ;;  %v2393_v46 = vpop.f32.mrb[31].mxu1 }
 0x131   :  { %v2630_v39 = vld [vmem:[%s3991_s0 + $0x128] sm:$0xff]  }
 0x132   :  { %v1658_v47 = vmax.f32 %v854_v33, %v1489_v41  ;;  %v1490_v48 = vmul.f32 0.1, %v857_v42  ;;  %2327 = vmatmul.mubr.bf16.gmra.mrb[136].mxu0 %v2624_v35  ;;  %v1744_v49 = vmax.f32 %v1198_v36, %v1575_v44  ;;  %v1576_v50 = vmul.f32 0.1, %v1201_v45  ;;  %2499 = vmatmul.mubr.bf16.gmra.mrb[136].mxu1 %v2625_v38 }
 0x133   :  { %2330 = vmatprep.mubr.msk.bf16.mxu0 %vm2644_vm0, %v2643_v0  ;;  %2502 = vmatprep.mubr.msk.bf16.mxu1 %vm2644_vm0, %v2643_v0 }
 0x134   :  { %1828 = vst.msk [vmem:[%s3993_s3 + $0x70] sm:$0xff] %vm1813_vm1, %v1658_v47  ;;  %v1659_v51 = vmax.f32 %v857_v42, %v1490_v48  ;;  %1914 = vst.msk [vmem:[%s3993_s3 + $0x320] sm:$0xff] %vm1813_vm1, %v1744_v49  ;;  %v1745_v52 = vmax.f32 %v1201_v45, %v1576_v50  ;;  %v2631_v42 = vld [vmem:[%s3991_s0 + $0x280] sm:$0xff]  }
 0x135   :  { %v861_v53 = vpop.f32.mrb[32].mxu0  ;;  %v1205_v54 = vpop.f32.mrb[32].mxu1 }
 0x136   :  { %1829 = vst.msk [vmem:[%s3993_s3 + $0x78] sm:$0xff] %vm1813_vm1, %v1659_v51  ;;  %v862_v55 = vadd.f32 %v2978_v63, %v861_v53  ;;  %1915 = vst.msk [vmem:[%s3993_s3 + $0x328] sm:$0xff] %vm1813_vm1, %v1745_v52  ;;  %v2224_v56 = vpop.f32.mrb[33].mxu0  ;;  %v1206_v58 = vadd.f32 %v2978_v63, %v1205_v54  ;;  %v2396_v59 = vpop.f32.mrb[33].mxu1 }
 0x137   :  { %v864_v61 = vpop.f32.mrb[34].mxu0  ;;  %v1208_v62 = vpop.f32.mrb[34].mxu1 }
 0x138   :  { %v1491_v1 = vmul.f32 0.1, %v862_v55  ;;  %v865_v2 = vadd.f32 %v2978_v63, %v864_v61  ;;  %v2225_v3 = vpop.f32.mrb[35].mxu0  ;;  %v1577_v4 = vmul.f32 0.1, %v1206_v58  ;;  %v1209_v5 = vadd.f32 %v2978_v63, %v1208_v62  ;;  %v2397_v6 = vpop.f32.mrb[35].mxu1 }
 0x139   :  { %v2632_v61 = vld [vmem:[%s3991_s0 + $0x130] sm:$0xff]  }
 0x13a   :  { %v1660_v7 = vmax.f32 %v862_v55, %v1491_v1  ;;  %v1492_v8 = vmul.f32 0.1, %v865_v2  ;;  %2331 = vmatmul.mubr.bf16.gmra.mrb[140].mxu0 %v2626_v57  ;;  %v1746_v9 = vmax.f32 %v1206_v58, %v1577_v4  ;;  %v1578_v10 = vmul.f32 0.1, %v1209_v5  ;;  %2503 = vmatmul.mubr.bf16.gmra.mrb[140].mxu1 %v2627_v60 }
 0x13b   :  { %2334 = vmatprep.mubr.msk.bf16.mxu0 %vm2644_vm0, %v2643_v0  ;;  %2506 = vmatprep.mubr.msk.bf16.mxu1 %vm2644_vm0, %v2643_v0 }
 0x13c   :  { %1830 = vst.msk [vmem:[%s3993_s3 + $0x80] sm:$0xff] %vm1813_vm1, %v1660_v7  ;;  %v1661_v11 = vmax.f32 %v865_v2, %v1492_v8  ;;  %1916 = vst.msk [vmem:[%s3993_s3 + $0x330] sm:$0xff] %vm1813_vm1, %v1746_v9  ;;  %v1747_v12 = vmax.f32 %v1209_v5, %v1578_v10  ;;  %v2633_v2 = vld [vmem:[%s3991_s0 + $0x288] sm:$0xff]  }
 0x13d   :  { %v869_v13 = vpop.f32.mrb[36].mxu0  ;;  %v1213_v14 = vpop.f32.mrb[36].mxu1 }
 0x13e   :  { %1831 = vst.msk [vmem:[%s3993_s3 + $0x88] sm:$0xff] %vm1813_vm1, %v1661_v11  ;;  %v870_v15 = vadd.f32 %v2978_v63, %v869_v13  ;;  %1917 = vst.msk [vmem:[%s3993_s3 + $0x338] sm:$0xff] %vm1813_vm1, %v1747_v12  ;;  %v2228_v16 = vpop.f32.mrb[37].mxu0  ;;  %v1214_v18 = vadd.f32 %v2978_v63, %v1213_v14  ;;  %v2400_v19 = vpop.f32.mrb[37].mxu1 }
 0x13f   :  { %v872_v21 = vpop.f32.mrb[38].mxu0  ;;  %v1216_v22 = vpop.f32.mrb[38].mxu1 }
 0x140   :  { %v1493_v23 = vmul.f32 0.1, %v870_v15  ;;  %v873_v24 = vadd.f32 %v2978_v63, %v872_v21  ;;  %v2229_v25 = vpop.f32.mrb[39].mxu0  ;;  %v1579_v26 = vmul.f32 0.1, %v1214_v18  ;;  %v1217_v27 = vadd.f32 %v2978_v63, %v1216_v22  ;;  %v2401_v28 = vpop.f32.mrb[39].mxu1 }
 0x141   :  { %v2634_v21 = vld [vmem:[%s3991_s0 + $0x138] sm:$0xff]  }
 0x142   :  { %v1662_v29 = vmax.f32 %v870_v15, %v1493_v23  ;;  %v1494_v30 = vmul.f32 0.1, %v873_v24  ;;  %2335 = vmatmul.mubr.bf16.gmra.mrb[144].mxu0 %v2628_v17  ;;  %v1748_v31 = vmax.f32 %v1214_v18, %v1579_v26  ;;  %v1580_v32 = vmul.f32 0.1, %v1217_v27  ;;  %2507 = vmatmul.mubr.bf16.gmra.mrb[144].mxu1 %v2629_v20 }
 0x143   :  { %2338 = vmatprep.mubr.msk.bf16.mxu0 %vm2644_vm0, %v2643_v0  ;;  %2510 = vmatprep.mubr.msk.bf16.mxu1 %vm2644_vm0, %v2643_v0 }
 0x144   :  { %1832 = vst.msk [vmem:[%s3993_s3 + $0x90] sm:$0xff] %vm1813_vm1, %v1662_v29  ;;  %v1663_v33 = vmax.f32 %v873_v24, %v1494_v30  ;;  %1918 = vst.msk [vmem:[%s3993_s3 + $0x340] sm:$0xff] %vm1813_vm1, %v1748_v31  ;;  %v1749_v34 = vmax.f32 %v1217_v27, %v1580_v32  ;;  %v2635_v24 = vld [vmem:[%s3991_s0 + $0x290] sm:$0xff]  }
 0x145   :  { %v877_v35 = vpop.f32.mrb[40].mxu0  ;;  %v1221_v36 = vpop.f32.mrb[40].mxu1 }
 0x146   :  { %1833 = vst.msk [vmem:[%s3993_s3 + $0x98] sm:$0xff] %vm1813_vm1, %v1663_v33  ;;  %v878_v37 = vadd.f32 %v2978_v63, %v877_v35  ;;  %1919 = vst.msk [vmem:[%s3993_s3 + $0x348] sm:$0xff] %vm1813_vm1, %v1749_v34  ;;  %v2232_v38 = vpop.f32.mrb[41].mxu0  ;;  %v1222_v40 = vadd.f32 %v2978_v63, %v1221_v36  ;;  %v2404_v41 = vpop.f32.mrb[41].mxu1 }
 0x147   :  { %v880_v43 = vpop.f32.mrb[42].mxu0  ;;  %v1224_v44 = vpop.f32.mrb[42].mxu1 }
 0x148   :  { %v1495_v45 = vmul.f32 0.1, %v878_v37  ;;  %v881_v46 = vadd.f32 %v2978_v63, %v880_v43  ;;  %v2233_v47 = vpop.f32.mrb[43].mxu0  ;;  %v1581_v48 = vmul.f32 0.1, %v1222_v40  ;;  %v1225_v49 = vadd.f32 %v2978_v63, %v1224_v44  ;;  %v2405_v50 = vpop.f32.mrb[43].mxu1 }
 0x149   :  { %v2636_v43 = vld [vmem:[%s3991_s0 + $0x140] sm:$0xff]  }
 0x14a   :  { %v1664_v51 = vmax.f32 %v878_v37, %v1495_v45  ;;  %v1496_v52 = vmul.f32 0.1, %v881_v46  ;;  %2339 = vmatmul.mubr.bf16.gmra.mrb[148].mxu0 %v2630_v39  ;;  %v1750_v53 = vmax.f32 %v1222_v40, %v1581_v48  ;;  %v1582_v54 = vmul.f32 0.1, %v1225_v49  ;;  %2511 = vmatmul.mubr.bf16.gmra.mrb[148].mxu1 %v2631_v42 }
 0x14b   :  { %2342 = vmatprep.mubr.msk.bf16.mxu0 %vm2644_vm0, %v2643_v0  ;;  %2514 = vmatprep.mubr.msk.bf16.mxu1 %vm2644_vm0, %v2643_v0 }
 0x14c   :  { %1834 = vst.msk [vmem:[%s3993_s3 + $0xa0] sm:$0xff] %vm1813_vm1, %v1664_v51  ;;  %v1665_v55 = vmax.f32 %v881_v46, %v1496_v52  ;;  %1920 = vst.msk [vmem:[%s3993_s3 + $0x350] sm:$0xff] %vm1813_vm1, %v1750_v53  ;;  %v1751_v56 = vmax.f32 %v1225_v49, %v1582_v54  ;;  %v2637_v46 = vld [vmem:[%s3991_s0 + $0x298] sm:$0xff]  }
 0x14d   :  { %v885_v57 = vpop.f32.mrb[44].mxu0  ;;  %v1229_v58 = vpop.f32.mrb[44].mxu1 }
 0x14e   :  { %1835 = vst.msk [vmem:[%s3993_s3 + $0xa8] sm:$0xff] %vm1813_vm1, %v1665_v55  ;;  %v886_v59 = vadd.f32 %v2978_v63, %v885_v57  ;;  %1921 = vst.msk [vmem:[%s3993_s3 + $0x358] sm:$0xff] %vm1813_vm1, %v1751_v56  ;;  %v2236_v60 = vpop.f32.mrb[45].mxu0  ;;  %v1230_v62 = vadd.f32 %v2978_v63, %v1229_v58  ;;  %v2408_v1 = vpop.f32.mrb[45].mxu1 }
 0x14f   :  { %v888_v3 = vpop.f32.mrb[46].mxu0  ;;  %v1232_v4 = vpop.f32.mrb[46].mxu1 }
 0x150   :  { %v1497_v5 = vmul.f32 0.1, %v886_v59  ;;  %v889_v6 = vadd.f32 %v2978_v63, %v888_v3  ;;  %v2237_v7 = vpop.f32.mrb[47].mxu0  ;;  %v1583_v8 = vmul.f32 0.1, %v1230_v62  ;;  %v1233_v9 = vadd.f32 %v2978_v63, %v1232_v4  ;;  %v2409_v10 = vpop.f32.mrb[47].mxu1 }
 0x151   :  { %v2638_v3 = vld [vmem:[%s3991_s0 + $0x148] sm:$0xff]  }
 0x152   :  { %v1666_v11 = vmax.f32 %v886_v59, %v1497_v5  ;;  %v1498_v12 = vmul.f32 0.1, %v889_v6  ;;  %2343 = vmatmul.mubr.bf16.gmra.mrb[152].mxu0 %v2632_v61  ;;  %v1752_v13 = vmax.f32 %v1230_v62, %v1583_v8  ;;  %v1584_v14 = vmul.f32 0.1, %v1233_v9  ;;  %2515 = vmatmul.mubr.bf16.gmra.mrb[152].mxu1 %v2633_v2 }
 0x153   :  { %2346 = vmatprep.mubr.msk.bf16.mxu0 %vm2644_vm0, %v2643_v0  ;;  %2518 = vmatprep.mubr.msk.bf16.mxu1 %vm2644_vm0, %v2643_v0 }
 0x154   :  { %1836 = vst.msk [vmem:[%s3993_s3 + $0xb0] sm:$0xff] %vm1813_vm1, %v1666_v11  ;;  %v1667_v15 = vmax.f32 %v889_v6, %v1498_v12  ;;  %1922 = vst.msk [vmem:[%s3993_s3 + $0x360] sm:$0xff] %vm1813_vm1, %v1752_v13  ;;  %v1753_v16 = vmax.f32 %v1233_v9, %v1584_v14  ;;  %v2639_v6 = vld [vmem:[%s3991_s0 + $0x2a0] ss:$0 sps:$4 sm:$0xff]  }
 0x155   :  { %v893_v17 = vpop.f32.mrb[48].mxu0  ;;  %v1237_v18 = vpop.f32.mrb[48].mxu1 }
 0x156   :  { %1837 = vst.msk [vmem:[%s3993_s3 + $0xb8] sm:$0xff] %vm1813_vm1, %v1667_v15  ;;  %v894_v19 = vadd.f32 %v2978_v63, %v893_v17  ;;  %1923 = vst.msk [vmem:[%s3993_s3 + $0x368] sm:$0xff] %vm1813_vm1, %v1753_v16  ;;  %v2240_v20 = vpop.f32.mrb[49].mxu0  ;;  %v1238_v22 = vadd.f32 %v2978_v63, %v1237_v18  ;;  %v2412_v23 = vpop.f32.mrb[49].mxu1 }
 0x157   :  { %v896_v25 = vpop.f32.mrb[50].mxu0  ;;  %v1240_v26 = vpop.f32.mrb[50].mxu1 }
 0x158   :  { %v1499_v27 = vmul.f32 0.1, %v894_v19  ;;  %v897_v28 = vadd.f32 %v2978_v63, %v896_v25  ;;  %v2241_v29 = vpop.f32.mrb[51].mxu0  ;;  %v1585_v30 = vmul.f32 0.1, %v1238_v22  ;;  %v1241_v31 = vadd.f32 %v2978_v63, %v1240_v26  ;;  %v2413_v32 = vpop.f32.mrb[51].mxu1 }
 0x15a   :  { %v1668_v33 = vmax.f32 %v894_v19, %v1499_v27  ;;  %v1500_v34 = vmul.f32 0.1, %v897_v28  ;;  %2347 = vmatmul.mubr.bf16.gmra.mrb[156].mxu0 %v2634_v21  ;;  %v1754_v35 = vmax.f32 %v1238_v22, %v1585_v30  ;;  %v1586_v36 = vmul.f32 0.1, %v1241_v31  ;;  %2519 = vmatmul.mubr.bf16.gmra.mrb[156].mxu1 %v2635_v24  ;;  %v2640_v24 = vld [vmem:[%s3991_s0 + $0x150] sm:$0xff]  }
 0x15b   :  { %2350 = vmatprep.mubr.msk.bf16.mxu0 %vm2644_vm0, %v2643_v0  ;;  %2522 = vmatprep.mubr.msk.bf16.mxu1 %vm2644_vm0, %v2643_v0 }
 0x15c   :  { %1838 = vst.msk [vmem:[%s3993_s3 + $0xc0] sm:$0xff] %vm1813_vm1, %v1668_v33  ;;  %v1669_v37 = vmax.f32 %v897_v28, %v1500_v34  ;;  %1924 = vst.msk [vmem:[%s3993_s3 + $0x370] sm:$0xff] %vm1813_vm1, %v1754_v35  ;;  %v1755_v38 = vmax.f32 %v1241_v31, %v1586_v36 }
 0x15d   :  { %v901_v39 = vpop.f32.mrb[52].mxu0  ;;  %v1245_v40 = vpop.f32.mrb[52].mxu1 }
 0x15e   :  { %1839 = vst.msk [vmem:[%s3993_s3 + $0xc8] sm:$0xff] %vm1813_vm1, %v1669_v37  ;;  %v902_v41 = vadd.f32 %v2978_v63, %v901_v39  ;;  %1925 = vst.msk [vmem:[%s3993_s3 + $0x378] sm:$0xff] %vm1813_vm1, %v1755_v38  ;;  %v2244_v42 = vpop.f32.mrb[53].mxu0  ;;  %v1246_v44 = vadd.f32 %v2978_v63, %v1245_v40  ;;  %v2416_v45 = vpop.f32.mrb[53].mxu1 }
 0x15f   :  { %v904_v47 = vpop.f32.mrb[54].mxu0  ;;  %v1248_v48 = vpop.f32.mrb[54].mxu1 }
 0x160   :  { %v1501_v49 = vmul.f32 0.1, %v902_v41  ;;  %v905_v50 = vadd.f32 %v2978_v63, %v904_v47  ;;  %v2245_v51 = vpop.f32.mrb[55].mxu0  ;;  %v1587_v52 = vmul.f32 0.1, %v1246_v44  ;;  %v1249_v53 = vadd.f32 %v2978_v63, %v1248_v48  ;;  %v2417_v54 = vpop.f32.mrb[55].mxu1 }
 0x162   :  { %v1670_v55 = vmax.f32 %v902_v41, %v1501_v49  ;;  %v1502_v56 = vmul.f32 0.1, %v905_v50  ;;  %2351 = vmatmul.mubr.bf16.gmra.mrb[160].mxu0 %v2636_v43  ;;  %v1756_v57 = vmax.f32 %v1246_v44, %v1587_v52  ;;  %v1588_v58 = vmul.f32 0.1, %v1249_v53  ;;  %2523 = vmatmul.mubr.bf16.gmra.mrb[160].mxu1 %v2637_v46 }
 0x163   :  { %2354 = vmatprep.mubr.msk.bf16.mxu0 %vm2644_vm0, %v2643_v0  ;;  %2526 = vmatprep.mubr.msk.bf16.mxu1 %vm2644_vm0, %v2643_v0 }
 0x164   :  { %1840 = vst.msk [vmem:[%s3993_s3 + $0xd0] sm:$0xff] %vm1813_vm1, %v1670_v55  ;;  %v1671_v59 = vmax.f32 %v905_v50, %v1502_v56  ;;  %1926 = vst.msk [vmem:[%s3993_s3 + $0x380] sm:$0xff] %vm1813_vm1, %v1756_v57  ;;  %v1757_v60 = vmax.f32 %v1249_v53, %v1588_v58 }
 0x165   :  { %v909_v61 = vpop.f32.mrb[56].mxu0  ;;  %v1253_v62 = vpop.f32.mrb[56].mxu1 }
 0x166   :  { %1841 = vst.msk [vmem:[%s3993_s3 + $0xd8] sm:$0xff] %vm1813_vm1, %v1671_v59  ;;  %v910_v1 = vadd.f32 %v2978_v63, %v909_v61  ;;  %1927 = vst.msk [vmem:[%s3993_s3 + $0x388] sm:$0xff] %vm1813_vm1, %v1757_v60  ;;  %v2248_v2 = vpop.f32.mrb[57].mxu0  ;;  %v1254_v4 = vadd.f32 %v2978_v63, %v1253_v62  ;;  %v2420_v5 = vpop.f32.mrb[57].mxu1 }
 0x167   :  { %v912_v7 = vpop.f32.mrb[58].mxu0  ;;  %v1256_v8 = vpop.f32.mrb[58].mxu1 }
 0x168   :  { %v1503_v9 = vmul.f32 0.1, %v910_v1  ;;  %v913_v10 = vadd.f32 %v2978_v63, %v912_v7  ;;  %v2249_v11 = vpop.f32.mrb[59].mxu0  ;;  %v1589_v12 = vmul.f32 0.1, %v1254_v4  ;;  %v1257_v13 = vadd.f32 %v2978_v63, %v1256_v8  ;;  %v2421_v14 = vpop.f32.mrb[59].mxu1 }
 0x169   :  { %v3480_v8 = vld [vmem:[%s3992_s2] ss:$0 sm:$0xff] }
 0x16a   :  { %v1672_v15 = vmax.f32 %v910_v1, %v1503_v9  ;;  %v1504_v16 = vmul.f32 0.1, %v913_v10  ;;  %2355 = vmatmul.mubr.bf16.gmra.mrb[164].mxu0 %v2638_v3  ;;  %v1758_v17 = vmax.f32 %v1254_v4, %v1589_v12  ;;  %v1590_v18 = vmul.f32 0.1, %v1257_v13  ;;  %2527 = vmatmul.mubr.bf16.gmra.mrb[164].mxu1 %v2639_v6 }
 0x16b   :  { %2358 = vmatprep.mubr.msk.bf16.mxu0 %vm2644_vm0, %v2643_v0 }
 0x16c   :  { %1842 = vst.msk [vmem:[%s3993_s3 + $0xe0] sm:$0xff] %vm1813_vm1, %v1672_v15  ;;  %v1673_v19 = vmax.f32 %v913_v10, %v1504_v16  ;;  %1928 = vst.msk [vmem:[%s3993_s3 + $0x390] sm:$0xff] %vm1813_vm1, %v1758_v17  ;;  %v1759_v20 = vmax.f32 %v1257_v13, %v1590_v18 }
 0x16d   :  { %v917_v21 = vpop.f32.mrb[60].mxu0  ;;  %v1261_v22 = vpop.f32.mrb[60].mxu1 }
 0x16e   :  { %1843 = vst.msk [vmem:[%s3993_s3 + $0xe8] sm:$0xff] %vm1813_vm1, %v1673_v19  ;;  %v918_v0 = vadd.f32 %v2978_v63, %v917_v21  ;;  %1929 = vst.msk [vmem:[%s3993_s3 + $0x398] sm:$0xff] %vm1813_vm1, %v1759_v20  ;;  %v2252_v23 = vpop.f32.mrb[61].mxu0  ;;  %v1262_v25 = vadd.f32 %v2978_v63, %v1261_v22  ;;  %v2424_v26 = vpop.f32.mrb[61].mxu1 }
 0x16f   :  { %v920_v27 = vpop.f32.mrb[62].mxu0  ;;  %v1264_v28 = vpop.f32.mrb[62].mxu1 }
 0x170   :  { %v1505_v29 = vmul.f32 0.1, %v918_v0  ;;  %v921_v30 = vadd.f32 %v2978_v63, %v920_v27  ;;  %v2253_v31 = vpop.f32.mrb[63].mxu0  ;;  %v1591_v32 = vmul.f32 0.1, %v1262_v25  ;;  %v1265_v33 = vadd.f32 %v2978_v63, %v1264_v28  ;;  %v2425_v34 = vpop.f32.mrb[63].mxu1 }
 0x172   :  { %v1674_v35 = vmax.f32 %v918_v0, %v1505_v29  ;;  %v1506_v36 = vmul.f32 0.1, %v921_v30  ;;  %2359 = vmatmul.mubr.bf16.gmra.mrb[168].mxu0 %v2640_v24  ;;  %v1760_v37 = vmax.f32 %v1262_v25, %v1591_v32  ;;  %v1592_v38 = vmul.f32 0.1, %v1265_v33 }
 0x174   :  { %1844 = vst.msk [vmem:[%s3993_s3 + $0xf0] sm:$0xff] %vm1813_vm1, %v1674_v35  ;;  %v1675_v39 = vmax.f32 %v921_v30, %v1506_v36  ;;  %1930 = vst.msk [vmem:[%s3993_s3 + $0x3a0] sm:$0xff] %vm1813_vm1, %v1760_v37  ;;  %v1761_v40 = vmax.f32 %v1265_v33, %v1592_v38 }
 0x175   :  { %v925_v41 = vpop.f32.mrb[64].mxu0  ;;  %v1269_v42 = vpop.f32.mrb[64].mxu1 }
 0x176   :  { %1845 = vst.msk [vmem:[%s3993_s3 + $0xf8] sm:$0xff] %vm1813_vm1, %v1675_v39  ;;  %v926_v43 = vadd.f32 %v2978_v63, %v925_v41  ;;  %1931 = vst.msk [vmem:[%s3993_s3 + $0x3a8] sm:$0xff] %vm1813_vm1, %v1761_v40  ;;  %v2256_v44 = vpop.f32.mrb[65].mxu0  ;;  %v1270_v45 = vadd.f32 %v2978_v63, %v1269_v42  ;;  %v2428_v46 = vpop.f32.mrb[65].mxu1 }
 0x177   :  { %v928_v47 = vpop.f32.mrb[66].mxu0  ;;  %v1272_v48 = vpop.f32.mrb[66].mxu1 }
 0x178   :  { %v1507_v49 = vmul.f32 0.1, %v926_v43  ;;  %v929_v50 = vadd.f32 %v2978_v63, %v928_v47  ;;  %v2257_v51 = vpop.f32.mrb[67].mxu0  ;;  %v1593_v52 = vmul.f32 0.1, %v1270_v45  ;;  %v1273_v53 = vadd.f32 %v2978_v63, %v1272_v48  ;;  %v2429_v54 = vpop.f32.mrb[67].mxu1 }
 0x17a   :  { %v1676_v55 = vmax.f32 %v926_v43, %v1507_v49  ;;  %v1508_v56 = vmul.f32 0.1, %v929_v50  ;;  %v1762_v57 = vmax.f32 %v1270_v45, %v1593_v52  ;;  %v1594_v58 = vmul.f32 0.1, %v1273_v53 }
 0x17c   :  { %1846 = vst.msk [vmem:[%s3993_s3 + $0x100] sm:$0xff] %vm1813_vm1, %v1676_v55  ;;  %v1677_v59 = vmax.f32 %v929_v50, %v1508_v56  ;;  %1932 = vst.msk [vmem:[%s3993_s3 + $0x3b0] sm:$0xff] %vm1813_vm1, %v1762_v57  ;;  %v1763_v60 = vmax.f32 %v1273_v53, %v1594_v58 }
 0x17d   :  { %v933_v61 = vpop.f32.mrb[68].mxu0  ;;  %v1277_v62 = vpop.f32.mrb[68].mxu1 }
 0x17e   :  { %1847 = vst.msk [vmem:[%s3993_s3 + $0x108] sm:$0xff] %vm1813_vm1, %v1677_v59  ;;  %v934_v1 = vadd.f32 %v2978_v63, %v933_v61  ;;  %1933 = vst.msk [vmem:[%s3993_s3 + $0x3b8] sm:$0xff] %vm1813_vm1, %v1763_v60  ;;  %v2260_v2 = vpop.f32.mrb[69].mxu0  ;;  %v1278_v3 = vadd.f32 %v2978_v63, %v1277_v62  ;;  %v2432_v4 = vpop.f32.mrb[69].mxu1 }
 0x17f   :  { %v936_v5 = vpop.f32.mrb[70].mxu0  ;;  %v1280_v6 = vpop.f32.mrb[70].mxu1 }
 0x180   :  { %v1509_v7 = vmul.f32 0.1, %v934_v1  ;;  %v937_v9 = vadd.f32 %v3480_v8, %v936_v5  ;;  %v2261_v10 = vpop.f32.mrb[71].mxu0  ;;  %v1595_v11 = vmul.f32 0.1, %v1278_v3  ;;  %v1281_v12 = vadd.f32 %v3480_v8, %v1280_v6  ;;  %v2433_v13 = vpop.f32.mrb[71].mxu1 }
 0x182   :  { %v1678_v14 = vmax.f32 %v934_v1, %v1509_v7  ;;  %v1510_v15 = vmul.f32 0.1, %v937_v9  ;;  %v1764_v16 = vmax.f32 %v1278_v3, %v1595_v11  ;;  %v1596_v63 = vmul.f32 0.1, %v1281_v12 }
 0x184   :  { %1848 = vst.msk [vmem:[%s3993_s3 + $0x110] sm:$0xff] %vm1813_vm1, %v1678_v14  ;;  %v1679_v17 = vmax.f32 %v937_v9, %v1510_v15  ;;  %1934 = vst.msk [vmem:[%s3993_s3 + $0x3c0] sm:$0xff] %vm1813_vm1, %v1764_v16  ;;  %v1765_v18 = vmax.f32 %v1281_v12, %v1596_v63 }
 0x185   :  { %v941_v19 = vpop.f32.mrb[72].mxu0  ;;  %v1285_v20 = vpop.f32.mrb[72].mxu1 }
 0x186   :  { %1849 = vst.msk [vmem:[%s3993_s3 + $0x118] sm:$0xff] %vm1813_vm1, %v1679_v17  ;;  %v942_v21 = vadd.f32 %v3480_v8, %v941_v19  ;;  %1935 = vst.msk [vmem:[%s3993_s3 + $0x3c8] sm:$0xff] %vm1813_vm1, %v1765_v18  ;;  %v2264_v22 = vpop.f32.mrb[73].mxu0  ;;  %v1286_v0 = vadd.f32 %v3480_v8, %v1285_v20  ;;  %v2436_v23 = vpop.f32.mrb[73].mxu1 }
 0x187   :  { %v944_v24 = vpop.f32.mrb[74].mxu0  ;;  %v1288_v25 = vpop.f32.mrb[74].mxu1 }
 0x188   :  { %v1511_v26 = vmul.f32 0.1, %v942_v21  ;;  %v945_v27 = vadd.f32 %v3480_v8, %v944_v24  ;;  %v2265_v28 = vpop.f32.mrb[75].mxu0  ;;  %v1597_v29 = vmul.f32 0.1, %v1286_v0  ;;  %v1289_v30 = vadd.f32 %v3480_v8, %v1288_v25  ;;  %v2437_v31 = vpop.f32.mrb[75].mxu1 }
 0x18a   :  { %v1680_v32 = vmax.f32 %v942_v21, %v1511_v26  ;;  %v1512_v33 = vmul.f32 0.1, %v945_v27  ;;  %v1766_v34 = vmax.f32 %v1286_v0, %v1597_v29  ;;  %v1598_v35 = vmul.f32 0.1, %v1289_v30 }
 0x18c   :  { %1850 = vst.msk [vmem:[%s3993_s3 + $0x120] sm:$0xff] %vm1813_vm1, %v1680_v32  ;;  %v1681_v36 = vmax.f32 %v945_v27, %v1512_v33  ;;  %1936 = vst.msk [vmem:[%s3993_s3 + $0x3d0] sm:$0xff] %vm1813_vm1, %v1766_v34  ;;  %v1767_v37 = vmax.f32 %v1289_v30, %v1598_v35 }
 0x18d   :  { %v949_v38 = vpop.f32.mrb[76].mxu0  ;;  %v1293_v39 = vpop.f32.mrb[76].mxu1 }
 0x18e   :  { %1851 = vst.msk [vmem:[%s3993_s3 + $0x128] sm:$0xff] %vm1813_vm1, %v1681_v36  ;;  %v950_v40 = vadd.f32 %v3480_v8, %v949_v38  ;;  %1937 = vst.msk [vmem:[%s3993_s3 + $0x3d8] sm:$0xff] %vm1813_vm1, %v1767_v37  ;;  %v2268_v41 = vpop.f32.mrb[77].mxu0  ;;  %v1294_v42 = vadd.f32 %v3480_v8, %v1293_v39  ;;  %v2440_v43 = vpop.f32.mrb[77].mxu1 }
 0x18f   :  { %v952_v44 = vpop.f32.mrb[78].mxu0  ;;  %v1296_v45 = vpop.f32.mrb[78].mxu1 }
 0x190   :  { %v1513_v46 = vmul.f32 0.1, %v950_v40  ;;  %v953_v47 = vadd.f32 %v3480_v8, %v952_v44  ;;  %v2269_v48 = vpop.f32.mrb[79].mxu0  ;;  %v1599_v49 = vmul.f32 0.1, %v1294_v42  ;;  %v1297_v50 = vadd.f32 %v3480_v8, %v1296_v45  ;;  %v2441_v51 = vpop.f32.mrb[79].mxu1 }
 0x192   :  { %v1682_v52 = vmax.f32 %v950_v40, %v1513_v46  ;;  %v1514_v53 = vmul.f32 0.1, %v953_v47  ;;  %v1768_v54 = vmax.f32 %v1294_v42, %v1599_v49  ;;  %v1600_v55 = vmul.f32 0.1, %v1297_v50 }
 0x194   :  { %1852 = vst.msk [vmem:[%s3993_s3 + $0x130] sm:$0xff] %vm1813_vm1, %v1682_v52  ;;  %v1683_v56 = vmax.f32 %v953_v47, %v1514_v53  ;;  %1938 = vst.msk [vmem:[%s3993_s3 + $0x3e0] sm:$0xff] %vm1813_vm1, %v1768_v54  ;;  %v1769_v57 = vmax.f32 %v1297_v50, %v1600_v55 }
 0x195   :  { %v957_v58 = vpop.f32.mrb[80].mxu0  ;;  %v1301_v59 = vpop.f32.mrb[80].mxu1 }
 0x196   :  { %1853 = vst.msk [vmem:[%s3993_s3 + $0x138] sm:$0xff] %vm1813_vm1, %v1683_v56  ;;  %v958_v60 = vadd.f32 %v3480_v8, %v957_v58  ;;  %1939 = vst.msk [vmem:[%s3993_s3 + $0x3e8] sm:$0xff] %vm1813_vm1, %v1769_v57  ;;  %v2272_v61 = vpop.f32.mrb[81].mxu0  ;;  %v1302_v62 = vadd.f32 %v3480_v8, %v1301_v59  ;;  %v2444_v1 = vpop.f32.mrb[81].mxu1 }
 0x197   :  { %v960_v2 = vpop.f32.mrb[82].mxu0  ;;  %v1304_v3 = vpop.f32.mrb[82].mxu1 }
 0x198   :  { %v1515_v4 = vmul.f32 0.1, %v958_v60  ;;  %v961_v5 = vadd.f32 %v3480_v8, %v960_v2  ;;  %v2273_v6 = vpop.f32.mrb[83].mxu0  ;;  %v1601_v7 = vmul.f32 0.1, %v1302_v62  ;;  %v1305_v9 = vadd.f32 %v3480_v8, %v1304_v3  ;;  %v2445_v10 = vpop.f32.mrb[83].mxu1 }
 0x19a   :  { %v1684_v11 = vmax.f32 %v958_v60, %v1515_v4  ;;  %v1516_v12 = vmul.f32 0.1, %v961_v5  ;;  %v1770_v13 = vmax.f32 %v1302_v62, %v1601_v7  ;;  %v1602_v14 = vmul.f32 0.1, %v1305_v9 }
 0x19c   :  { %1854 = vst.msk [vmem:[%s3993_s3 + $0x140] sm:$0xff] %vm1813_vm1, %v1684_v11  ;;  %v1685_v15 = vmax.f32 %v961_v5, %v1516_v12  ;;  %1940 = vst.msk [vmem:[%s3993_s3 + $0x3f0] sm:$0xff] %vm1813_vm1, %v1770_v13  ;;  %v1771_v16 = vmax.f32 %v1305_v9, %v1602_v14 }
 0x19d   :  { %v965_v63 = vpop.f32.mrb[84].mxu0  ;;  %v1309_v17 = vpop.f32.mrb[84].mxu1 }
 0x19e   :  { %1855 = vst.msk [vmem:[%s3993_s3 + $0x148] sm:$0xff] %vm1813_vm1, %v1685_v15  ;;  %v966_v18 = vadd.f32 %v3480_v8, %v965_v63  ;;  %1941 = vst.msk [vmem:[%s3993_s3 + $0x3f8] sm:$0xff] %vm1813_vm1, %v1771_v16  ;;  %v2276_v19 = vpop.f32.mrb[85].mxu0  ;;  %v1310_v20 = vadd.f32 %v3480_v8, %v1309_v17  ;;  %v2448_v21 = vpop.f32.mrb[85].mxu1 }
 0x19f   :  { %v968_v22 = vpop.f32.mrb[86].mxu0  ;;  %v1312_v0 = vpop.f32.mrb[86].mxu1 }
 0x1a0   :  { %v1517_v23 = vmul.f32 0.1, %v966_v18  ;;  %v969_v24 = vadd.f32 %v3480_v8, %v968_v22  ;;  %v2277_v25 = vpop.f32.mrb[87].mxu0  ;;  %v1603_v26 = vmul.f32 0.1, %v1310_v20  ;;  %v1313_v27 = vadd.f32 %v3480_v8, %v1312_v0  ;;  %v2449_v28 = vpop.f32.mrb[87].mxu1 }
 0x1a2   :  { %v1686_v29 = vmax.f32 %v966_v18, %v1517_v23  ;;  %v1518_v30 = vmul.f32 0.1, %v969_v24  ;;  %v1772_v31 = vmax.f32 %v1310_v20, %v1603_v26  ;;  %v1604_v32 = vmul.f32 0.1, %v1313_v27 }
 0x1a4   :  { %1856 = vst.msk [vmem:[%s3993_s3 + $0x150] sm:$0xff] %vm1813_vm1, %v1686_v29  ;;  %v1687_v33 = vmax.f32 %v969_v24, %v1518_v30  ;;  %1942 = vst.msk [vmem:[%s3993_s3 + $0x400] sm:$0xff] %vm1813_vm1, %v1772_v31  ;;  %v1773_v34 = vmax.f32 %v1313_v27, %v1604_v32 }
 0x1a5   :  { %v973_v35 = vpop.f32.mrb[88].mxu0  ;;  %v1317_v36 = vpop.f32.mrb[88].mxu1 }
 0x1a6   :  { %1857 = vst.msk [vmem:[%s3993_s3 + $0x158] sm:$0xff] %vm1813_vm1, %v1687_v33  ;;  %v974_v37 = vadd.f32 %v3480_v8, %v973_v35  ;;  %1943 = vst.msk [vmem:[%s3993_s3 + $0x408] sm:$0xff] %vm1813_vm1, %v1773_v34  ;;  %v2280_v38 = vpop.f32.mrb[89].mxu0  ;;  %v1318_v39 = vadd.f32 %v3480_v8, %v1317_v36  ;;  %v2452_v40 = vpop.f32.mrb[89].mxu1 }
 0x1a7   :  { %v976_v41 = vpop.f32.mrb[90].mxu0  ;;  %v1320_v42 = vpop.f32.mrb[90].mxu1 }
 0x1a8   :  { %v1519_v43 = vmul.f32 0.1, %v974_v37  ;;  %v977_v44 = vadd.f32 %v3480_v8, %v976_v41  ;;  %v2281_v45 = vpop.f32.mrb[91].mxu0  ;;  %v1605_v46 = vmul.f32 0.1, %v1318_v39  ;;  %v1321_v47 = vadd.f32 %v3480_v8, %v1320_v42  ;;  %v2453_v48 = vpop.f32.mrb[91].mxu1 }
 0x1aa   :  { %v1688_v49 = vmax.f32 %v974_v37, %v1519_v43  ;;  %v1520_v50 = vmul.f32 0.1, %v977_v44  ;;  %v1774_v51 = vmax.f32 %v1318_v39, %v1605_v46  ;;  %v1606_v52 = vmul.f32 0.1, %v1321_v47 }
 0x1ac   :  { %1858 = vst.msk [vmem:[%s3993_s3 + $0x160] sm:$0xff] %vm1813_vm1, %v1688_v49  ;;  %v1689_v53 = vmax.f32 %v977_v44, %v1520_v50  ;;  %1944 = vst.msk [vmem:[%s3993_s3 + $0x410] sm:$0xff] %vm1813_vm1, %v1774_v51  ;;  %v1775_v54 = vmax.f32 %v1321_v47, %v1606_v52 }
 0x1ad   :  { %v981_v55 = vpop.f32.mrb[92].mxu0  ;;  %v1325_v56 = vpop.f32.mrb[92].mxu1 }
 0x1ae   :  { %1859 = vst.msk [vmem:[%s3993_s3 + $0x168] sm:$0xff] %vm1813_vm1, %v1689_v53  ;;  %v982_v57 = vadd.f32 %v3480_v8, %v981_v55  ;;  %1945 = vst.msk [vmem:[%s3993_s3 + $0x418] sm:$0xff] %vm1813_vm1, %v1775_v54  ;;  %v2284_v58 = vpop.f32.mrb[93].mxu0  ;;  %v1326_v59 = vadd.f32 %v3480_v8, %v1325_v56  ;;  %v2456_v60 = vpop.f32.mrb[93].mxu1 }
 0x1af   :  { %v984_v61 = vpop.f32.mrb[94].mxu0  ;;  %v1328_v62 = vpop.f32.mrb[94].mxu1 }
 0x1b0   :  { %v1521_v1 = vmul.f32 0.1, %v982_v57  ;;  %v985_v2 = vadd.f32 %v3480_v8, %v984_v61  ;;  %v2285_v3 = vpop.f32.mrb[95].mxu0  ;;  %v1607_v4 = vmul.f32 0.1, %v1326_v59  ;;  %v1329_v5 = vadd.f32 %v3480_v8, %v1328_v62  ;;  %v2457_v6 = vpop.f32.mrb[95].mxu1 }
 0x1b2   :  { %v1690_v7 = vmax.f32 %v982_v57, %v1521_v1  ;;  %v1522_v9 = vmul.f32 0.1, %v985_v2  ;;  %v1776_v10 = vmax.f32 %v1326_v59, %v1607_v4  ;;  %v1608_v11 = vmul.f32 0.1, %v1329_v5 }
 0x1b4   :  { %1860 = vst.msk [vmem:[%s3993_s3 + $0x170] sm:$0xff] %vm1813_vm1, %v1690_v7  ;;  %v1691_v12 = vmax.f32 %v985_v2, %v1522_v9  ;;  %1946 = vst.msk [vmem:[%s3993_s3 + $0x420] sm:$0xff] %vm1813_vm1, %v1776_v10  ;;  %v1777_v13 = vmax.f32 %v1329_v5, %v1608_v11 }
 0x1b5   :  { %v989_v14 = vpop.f32.mrb[96].mxu0  ;;  %v1333_v15 = vpop.f32.mrb[96].mxu1 }
 0x1b6   :  { %1861 = vst.msk [vmem:[%s3993_s3 + $0x178] sm:$0xff] %vm1813_vm1, %v1691_v12  ;;  %v990_v16 = vadd.f32 %v3480_v8, %v989_v14  ;;  %1947 = vst.msk [vmem:[%s3993_s3 + $0x428] sm:$0xff] %vm1813_vm1, %v1777_v13  ;;  %v2288_v63 = vpop.f32.mrb[97].mxu0  ;;  %v1334_v17 = vadd.f32 %v3480_v8, %v1333_v15  ;;  %v2460_v18 = vpop.f32.mrb[97].mxu1 }
 0x1b7   :  { %v992_v19 = vpop.f32.mrb[98].mxu0  ;;  %v1336_v20 = vpop.f32.mrb[98].mxu1 }
 0x1b8   :  { %v1523_v21 = vmul.f32 0.1, %v990_v16  ;;  %v993_v22 = vadd.f32 %v3480_v8, %v992_v19  ;;  %v2289_v0 = vpop.f32.mrb[99].mxu0  ;;  %v1609_v23 = vmul.f32 0.1, %v1334_v17  ;;  %v1337_v24 = vadd.f32 %v3480_v8, %v1336_v20  ;;  %v2461_v25 = vpop.f32.mrb[99].mxu1 }
 0x1ba   :  { %v1692_v26 = vmax.f32 %v990_v16, %v1523_v21  ;;  %v1524_v27 = vmul.f32 0.1, %v993_v22  ;;  %v1778_v28 = vmax.f32 %v1334_v17, %v1609_v23  ;;  %v1610_v29 = vmul.f32 0.1, %v1337_v24 }
 0x1bc   :  { %1862 = vst.msk [vmem:[%s3993_s3 + $0x180] sm:$0xff] %vm1813_vm1, %v1692_v26  ;;  %v1693_v30 = vmax.f32 %v993_v22, %v1524_v27  ;;  %1948 = vst.msk [vmem:[%s3993_s3 + $0x430] sm:$0xff] %vm1813_vm1, %v1778_v28  ;;  %v1779_v31 = vmax.f32 %v1337_v24, %v1610_v29 }
 0x1bd   :  { %v997_v32 = vpop.f32.mrb[100].mxu0  ;;  %v1341_v33 = vpop.f32.mrb[100].mxu1 }
 0x1be   :  { %1863 = vst.msk [vmem:[%s3993_s3 + $0x188] sm:$0xff] %vm1813_vm1, %v1693_v30  ;;  %v998_v34 = vadd.f32 %v3480_v8, %v997_v32  ;;  %1949 = vst.msk [vmem:[%s3993_s3 + $0x438] sm:$0xff] %vm1813_vm1, %v1779_v31  ;;  %v2292_v35 = vpop.f32.mrb[101].mxu0  ;;  %v1342_v36 = vadd.f32 %v3480_v8, %v1341_v33  ;;  %v2464_v37 = vpop.f32.mrb[101].mxu1 }
 0x1bf   :  { %v1000_v38 = vpop.f32.mrb[102].mxu0  ;;  %v1344_v39 = vpop.f32.mrb[102].mxu1 }
 0x1c0   :  { %v1525_v40 = vmul.f32 0.1, %v998_v34  ;;  %v1001_v41 = vadd.f32 %v3480_v8, %v1000_v38  ;;  %v2293_v42 = vpop.f32.mrb[103].mxu0  ;;  %v1611_v43 = vmul.f32 0.1, %v1342_v36  ;;  %v1345_v44 = vadd.f32 %v3480_v8, %v1344_v39  ;;  %v2465_v45 = vpop.f32.mrb[103].mxu1 }
 0x1c2   :  { %v1694_v46 = vmax.f32 %v998_v34, %v1525_v40  ;;  %v1526_v47 = vmul.f32 0.1, %v1001_v41  ;;  %v1780_v48 = vmax.f32 %v1342_v36, %v1611_v43  ;;  %v1612_v49 = vmul.f32 0.1, %v1345_v44 }
 0x1c4   :  { %1864 = vst.msk [vmem:[%s3993_s3 + $0x190] sm:$0xff] %vm1813_vm1, %v1694_v46  ;;  %v1695_v50 = vmax.f32 %v1001_v41, %v1526_v47  ;;  %1950 = vst.msk [vmem:[%s3993_s3 + $0x440] sm:$0xff] %vm1813_vm1, %v1780_v48  ;;  %v1781_v51 = vmax.f32 %v1345_v44, %v1612_v49 }
 0x1c5   :  { %v1005_v52 = vpop.f32.mrb[104].mxu0  ;;  %v1349_v53 = vpop.f32.mrb[104].mxu1 }
 0x1c6   :  { %1865 = vst.msk [vmem:[%s3993_s3 + $0x198] sm:$0xff] %vm1813_vm1, %v1695_v50  ;;  %v1006_v54 = vadd.f32 %v3480_v8, %v1005_v52  ;;  %1951 = vst.msk [vmem:[%s3993_s3 + $0x448] sm:$0xff] %vm1813_vm1, %v1781_v51  ;;  %v2296_v55 = vpop.f32.mrb[105].mxu0  ;;  %v1350_v56 = vadd.f32 %v3480_v8, %v1349_v53  ;;  %v2468_v57 = vpop.f32.mrb[105].mxu1 }
 0x1c7   :  { %v1008_v58 = vpop.f32.mrb[106].mxu0  ;;  %v1352_v59 = vpop.f32.mrb[106].mxu1 }
 0x1c8   :  { %v1527_v60 = vmul.f32 0.1, %v1006_v54  ;;  %v1009_v61 = vadd.f32 %v3480_v8, %v1008_v58  ;;  %v2297_v62 = vpop.f32.mrb[107].mxu0  ;;  %v1613_v1 = vmul.f32 0.1, %v1350_v56  ;;  %v1353_v2 = vadd.f32 %v3480_v8, %v1352_v59  ;;  %v2469_v3 = vpop.f32.mrb[107].mxu1 }
 0x1ca   :  { %v1696_v4 = vmax.f32 %v1006_v54, %v1527_v60  ;;  %v1528_v5 = vmul.f32 0.1, %v1009_v61  ;;  %v1782_v6 = vmax.f32 %v1350_v56, %v1613_v1  ;;  %v1614_v7 = vmul.f32 0.1, %v1353_v2 }
 0x1cc   :  { %1866 = vst.msk [vmem:[%s3993_s3 + $0x1a0] sm:$0xff] %vm1813_vm1, %v1696_v4  ;;  %v1697_v9 = vmax.f32 %v1009_v61, %v1528_v5  ;;  %1952 = vst.msk [vmem:[%s3993_s3 + $0x450] sm:$0xff] %vm1813_vm1, %v1782_v6  ;;  %v1783_v10 = vmax.f32 %v1353_v2, %v1614_v7 }
 0x1cd   :  { %v1013_v11 = vpop.f32.mrb[108].mxu0  ;;  %v1357_v12 = vpop.f32.mrb[108].mxu1 }
 0x1ce   :  { %1867 = vst.msk [vmem:[%s3993_s3 + $0x1a8] sm:$0xff] %vm1813_vm1, %v1697_v9  ;;  %v1014_v13 = vadd.f32 %v3480_v8, %v1013_v11  ;;  %1953 = vst.msk [vmem:[%s3993_s3 + $0x458] sm:$0xff] %vm1813_vm1, %v1783_v10  ;;  %v2300_v14 = vpop.f32.mrb[109].mxu0  ;;  %v1358_v15 = vadd.f32 %v3480_v8, %v1357_v12  ;;  %v2472_v16 = vpop.f32.mrb[109].mxu1 }
 0x1cf   :  { %v1016_v63 = vpop.f32.mrb[110].mxu0  ;;  %v1360_v17 = vpop.f32.mrb[110].mxu1 }
 0x1d0   :  { %v1529_v18 = vmul.f32 0.1, %v1014_v13  ;;  %v1017_v19 = vadd.f32 %v3480_v8, %v1016_v63  ;;  %v2301_v20 = vpop.f32.mrb[111].mxu0  ;;  %v1615_v21 = vmul.f32 0.1, %v1358_v15  ;;  %v1361_v22 = vadd.f32 %v3480_v8, %v1360_v17  ;;  %v2473_v0 = vpop.f32.mrb[111].mxu1 }
 0x1d2   :  { %v1698_v23 = vmax.f32 %v1014_v13, %v1529_v18  ;;  %v1530_v24 = vmul.f32 0.1, %v1017_v19  ;;  %v1784_v25 = vmax.f32 %v1358_v15, %v1615_v21  ;;  %v1616_v26 = vmul.f32 0.1, %v1361_v22 }
 0x1d4   :  { %1868 = vst.msk [vmem:[%s3993_s3 + $0x1b0] sm:$0xff] %vm1813_vm1, %v1698_v23  ;;  %v1699_v27 = vmax.f32 %v1017_v19, %v1530_v24  ;;  %1954 = vst.msk [vmem:[%s3993_s3 + $0x460] sm:$0xff] %vm1813_vm1, %v1784_v25  ;;  %v1785_v28 = vmax.f32 %v1361_v22, %v1616_v26 }
 0x1d5   :  { %v1021_v29 = vpop.f32.mrb[112].mxu0  ;;  %v1365_v30 = vpop.f32.mrb[112].mxu1 }
 0x1d6   :  { %1869 = vst.msk [vmem:[%s3993_s3 + $0x1b8] sm:$0xff] %vm1813_vm1, %v1699_v27  ;;  %v1022_v31 = vadd.f32 %v3480_v8, %v1021_v29  ;;  %1955 = vst.msk [vmem:[%s3993_s3 + $0x468] sm:$0xff] %vm1813_vm1, %v1785_v28  ;;  %v2304_v32 = vpop.f32.mrb[113].mxu0  ;;  %v1366_v33 = vadd.f32 %v3480_v8, %v1365_v30  ;;  %v2476_v34 = vpop.f32.mrb[113].mxu1 }
 0x1d7   :  { %v1024_v35 = vpop.f32.mrb[114].mxu0  ;;  %v1368_v36 = vpop.f32.mrb[114].mxu1 }
 0x1d8   :  { %v1531_v37 = vmul.f32 0.1, %v1022_v31  ;;  %v1025_v38 = vadd.f32 %v3480_v8, %v1024_v35  ;;  %v2305_v39 = vpop.f32.mrb[115].mxu0  ;;  %v1617_v40 = vmul.f32 0.1, %v1366_v33  ;;  %v1369_v41 = vadd.f32 %v3480_v8, %v1368_v36  ;;  %v2477_v42 = vpop.f32.mrb[115].mxu1 }
 0x1da   :  { %v1700_v43 = vmax.f32 %v1022_v31, %v1531_v37  ;;  %v1532_v44 = vmul.f32 0.1, %v1025_v38  ;;  %v1786_v45 = vmax.f32 %v1366_v33, %v1617_v40  ;;  %v1618_v46 = vmul.f32 0.1, %v1369_v41 }
 0x1dc   :  { %1870 = vst.msk [vmem:[%s3993_s3 + $0x1c0] sm:$0xff] %vm1813_vm1, %v1700_v43  ;;  %v1701_v47 = vmax.f32 %v1025_v38, %v1532_v44  ;;  %1956 = vst.msk [vmem:[%s3993_s3 + $0x470] sm:$0xff] %vm1813_vm1, %v1786_v45  ;;  %v1787_v48 = vmax.f32 %v1369_v41, %v1618_v46 }
 0x1dd   :  { %v1029_v49 = vpop.f32.mrb[116].mxu0  ;;  %v1373_v50 = vpop.f32.mrb[116].mxu1 }
 0x1de   :  { %1871 = vst.msk [vmem:[%s3993_s3 + $0x1c8] sm:$0xff] %vm1813_vm1, %v1701_v47  ;;  %v1030_v51 = vadd.f32 %v3480_v8, %v1029_v49  ;;  %1957 = vst.msk [vmem:[%s3993_s3 + $0x478] sm:$0xff] %vm1813_vm1, %v1787_v48  ;;  %v2308_v52 = vpop.f32.mrb[117].mxu0  ;;  %v1374_v53 = vadd.f32 %v3480_v8, %v1373_v50  ;;  %v2480_v54 = vpop.f32.mrb[117].mxu1 }
 0x1df   :  { %v1032_v55 = vpop.f32.mrb[118].mxu0  ;;  %v1376_v56 = vpop.f32.mrb[118].mxu1 }
 0x1e0   :  { %v1533_v57 = vmul.f32 0.1, %v1030_v51  ;;  %v1033_v58 = vadd.f32 %v3480_v8, %v1032_v55  ;;  %v2309_v59 = vpop.f32.mrb[119].mxu0  ;;  %v1619_v60 = vmul.f32 0.1, %v1374_v53  ;;  %v1377_v61 = vadd.f32 %v3480_v8, %v1376_v56  ;;  %v2481_v62 = vpop.f32.mrb[119].mxu1 }
 0x1e2   :  { %v1702_v1 = vmax.f32 %v1030_v51, %v1533_v57  ;;  %v1534_v2 = vmul.f32 0.1, %v1033_v58  ;;  %v1788_v3 = vmax.f32 %v1374_v53, %v1619_v60  ;;  %v1620_v4 = vmul.f32 0.1, %v1377_v61 }
 0x1e4   :  { %1872 = vst.msk [vmem:[%s3993_s3 + $0x1d0] sm:$0xff] %vm1813_vm1, %v1702_v1  ;;  %v1703_v5 = vmax.f32 %v1033_v58, %v1534_v2  ;;  %1958 = vst.msk [vmem:[%s3993_s3 + $0x480] sm:$0xff] %vm1813_vm1, %v1788_v3  ;;  %v1789_v6 = vmax.f32 %v1377_v61, %v1620_v4 }
 0x1e5   :  { %v1037_v7 = vpop.f32.mrb[120].mxu0  ;;  %v1381_v9 = vpop.f32.mrb[120].mxu1 }
 0x1e6   :  { %1873 = vst.msk [vmem:[%s3993_s3 + $0x1d8] sm:$0xff] %vm1813_vm1, %v1703_v5  ;;  %v1038_v10 = vadd.f32 %v3480_v8, %v1037_v7  ;;  %1959 = vst.msk [vmem:[%s3993_s3 + $0x488] sm:$0xff] %vm1813_vm1, %v1789_v6  ;;  %v2312_v11 = vpop.f32.mrb[121].mxu0  ;;  %v1382_v12 = vadd.f32 %v3480_v8, %v1381_v9  ;;  %v2484_v13 = vpop.f32.mrb[121].mxu1 }
 0x1e7   :  { %v1040_v14 = vpop.f32.mrb[122].mxu0  ;;  %v1384_v15 = vpop.f32.mrb[122].mxu1 }
 0x1e8   :  { %v1535_v16 = vmul.f32 0.1, %v1038_v10  ;;  %v1041_v63 = vadd.f32 %v3480_v8, %v1040_v14  ;;  %v2313_v17 = vpop.f32.mrb[123].mxu0  ;;  %v1621_v18 = vmul.f32 0.1, %v1382_v12  ;;  %v1385_v19 = vadd.f32 %v3480_v8, %v1384_v15  ;;  %v2485_v20 = vpop.f32.mrb[123].mxu1 }
 0x1ea   :  { %v1704_v21 = vmax.f32 %v1038_v10, %v1535_v16  ;;  %v1536_v22 = vmul.f32 0.1, %v1041_v63  ;;  %v1790_v0 = vmax.f32 %v1382_v12, %v1621_v18  ;;  %v1622_v23 = vmul.f32 0.1, %v1385_v19 }
 0x1ec   :  { %1874 = vst.msk [vmem:[%s3993_s3 + $0x1e0] sm:$0xff] %vm1813_vm1, %v1704_v21  ;;  %v1705_v24 = vmax.f32 %v1041_v63, %v1536_v22  ;;  %1960 = vst.msk [vmem:[%s3993_s3 + $0x490] sm:$0xff] %vm1813_vm1, %v1790_v0  ;;  %v1791_v25 = vmax.f32 %v1385_v19, %v1622_v23 }
 0x1ed   :  { %v1045_v26 = vpop.f32.mrb[124].mxu0  ;;  %v1389_v27 = vpop.f32.mrb[124].mxu1 }
 0x1ee   :  { %1875 = vst.msk [vmem:[%s3993_s3 + $0x1e8] sm:$0xff] %vm1813_vm1, %v1705_v24  ;;  %v1046_v28 = vadd.f32 %v3480_v8, %v1045_v26  ;;  %1961 = vst.msk [vmem:[%s3993_s3 + $0x498] sm:$0xff] %vm1813_vm1, %v1791_v25  ;;  %v2316_v29 = vpop.f32.mrb[125].mxu0  ;;  %v1390_v30 = vadd.f32 %v3480_v8, %v1389_v27  ;;  %v2488_v31 = vpop.f32.mrb[125].mxu1 }
 0x1ef   :  { %v1048_v32 = vpop.f32.mrb[126].mxu0  ;;  %v1392_v33 = vpop.f32.mrb[126].mxu1 }
 0x1f0   :  { %v1537_v34 = vmul.f32 0.1, %v1046_v28  ;;  %v1049_v35 = vadd.f32 %v3480_v8, %v1048_v32  ;;  %v2317_v36 = vpop.f32.mrb[127].mxu0  ;;  %v1623_v37 = vmul.f32 0.1, %v1390_v30  ;;  %v1393_v38 = vadd.f32 %v3480_v8, %v1392_v33  ;;  %v2489_v39 = vpop.f32.mrb[127].mxu1 }
 0x1f2   :  { %v1706_v40 = vmax.f32 %v1046_v28, %v1537_v34  ;;  %v1538_v41 = vmul.f32 0.1, %v1049_v35  ;;  %v1792_v42 = vmax.f32 %v1390_v30, %v1623_v37  ;;  %v1624_v43 = vmul.f32 0.1, %v1393_v38 }
 0x1f4   :  { %1876 = vst.msk [vmem:[%s3993_s3 + $0x1f0] sm:$0xff] %vm1813_vm1, %v1706_v40  ;;  %v1707_v44 = vmax.f32 %v1049_v35, %v1538_v41  ;;  %1962 = vst.msk [vmem:[%s3993_s3 + $0x4a0] sm:$0xff] %vm1813_vm1, %v1792_v42  ;;  %v1793_v45 = vmax.f32 %v1393_v38, %v1624_v43 }
 0x1f5   :  { %v1053_v46 = vpop.f32.mrb[128].mxu0  ;;  %v1397_v47 = vpop.f32.mrb[128].mxu1 }
 0x1f6   :  { %1877 = vst.msk [vmem:[%s3993_s3 + $0x1f8] sm:$0xff] %vm1813_vm1, %v1707_v44  ;;  %v1054_v48 = vadd.f32 %v3480_v8, %v1053_v46  ;;  %1963 = vst.msk [vmem:[%s3993_s3 + $0x4a8] sm:$0xff] %vm1813_vm1, %v1793_v45  ;;  %v2320_v49 = vpop.f32.mrb[129].mxu0  ;;  %v1398_v50 = vadd.f32 %v3480_v8, %v1397_v47  ;;  %v2492_v51 = vpop.f32.mrb[129].mxu1 }
 0x1f7   :  { %v1056_v52 = vpop.f32.mrb[130].mxu0  ;;  %v1400_v53 = vpop.f32.mrb[130].mxu1 }
 0x1f8   :  { %v1539_v54 = vmul.f32 0.1, %v1054_v48  ;;  %v1057_v55 = vadd.f32 %v3480_v8, %v1056_v52  ;;  %v2321_v56 = vpop.f32.mrb[131].mxu0  ;;  %v1625_v57 = vmul.f32 0.1, %v1398_v50  ;;  %v1401_v58 = vadd.f32 %v3480_v8, %v1400_v53  ;;  %v2493_v59 = vpop.f32.mrb[131].mxu1 }
 0x1fa   :  { %v1708_v60 = vmax.f32 %v1054_v48, %v1539_v54  ;;  %v1540_v61 = vmul.f32 0.1, %v1057_v55  ;;  %v1794_v62 = vmax.f32 %v1398_v50, %v1625_v57  ;;  %v1626_v1 = vmul.f32 0.1, %v1401_v58 }
 0x1fc   :  { %1878 = vst.msk [vmem:[%s3993_s3 + $0x200] sm:$0xff] %vm1813_vm1, %v1708_v60  ;;  %v1709_v2 = vmax.f32 %v1057_v55, %v1540_v61  ;;  %1964 = vst.msk [vmem:[%s3993_s3 + $0x4b0] sm:$0xff] %vm1813_vm1, %v1794_v62  ;;  %v1795_v3 = vmax.f32 %v1401_v58, %v1626_v1 }
 0x1fd   :  { %v1061_v4 = vpop.f32.mrb[132].mxu0  ;;  %v1405_v5 = vpop.f32.mrb[132].mxu1 }
 0x1fe   :  { %1879 = vst.msk [vmem:[%s3993_s3 + $0x208] sm:$0xff] %vm1813_vm1, %v1709_v2  ;;  %v1062_v6 = vadd.f32 %v3480_v8, %v1061_v4  ;;  %1965 = vst.msk [vmem:[%s3993_s3 + $0x4b8] sm:$0xff] %vm1813_vm1, %v1795_v3  ;;  %v2324_v7 = vpop.f32.mrb[133].mxu0  ;;  %v1406_v9 = vadd.f32 %v3480_v8, %v1405_v5  ;;  %v2496_v10 = vpop.f32.mrb[133].mxu1 }
 0x1ff   :  { %v1064_v11 = vpop.f32.mrb[134].mxu0  ;;  %v1408_v12 = vpop.f32.mrb[134].mxu1 }
 0x200   :  { %v1541_v13 = vmul.f32 0.1, %v1062_v6  ;;  %v1065_v14 = vadd.f32 %v3480_v8, %v1064_v11  ;;  %v2325_v15 = vpop.f32.mrb[135].mxu0  ;;  %v1627_v16 = vmul.f32 0.1, %v1406_v9  ;;  %v1409_v63 = vadd.f32 %v3480_v8, %v1408_v12  ;;  %v2497_v17 = vpop.f32.mrb[135].mxu1 }
 0x202   :  { %v1710_v18 = vmax.f32 %v1062_v6, %v1541_v13  ;;  %v1542_v19 = vmul.f32 0.1, %v1065_v14  ;;  %v1796_v20 = vmax.f32 %v1406_v9, %v1627_v16  ;;  %v1628_v21 = vmul.f32 0.1, %v1409_v63 }
 0x204   :  { %1880 = vst.msk [vmem:[%s3993_s3 + $0x210] sm:$0xff] %vm1813_vm1, %v1710_v18  ;;  %v1711_v22 = vmax.f32 %v1065_v14, %v1542_v19  ;;  %1966 = vst.msk [vmem:[%s3993_s3 + $0x4c0] sm:$0xff] %vm1813_vm1, %v1796_v20  ;;  %v1797_v0 = vmax.f32 %v1409_v63, %v1628_v21 }
 0x205   :  { %v1069_v23 = vpop.f32.mrb[136].mxu0  ;;  %v1413_v24 = vpop.f32.mrb[136].mxu1 }
 0x206   :  { %1881 = vst.msk [vmem:[%s3993_s3 + $0x218] sm:$0xff] %vm1813_vm1, %v1711_v22  ;;  %v1070_v25 = vadd.f32 %v3480_v8, %v1069_v23  ;;  %1967 = vst.msk [vmem:[%s3993_s3 + $0x4c8] sm:$0xff] %vm1813_vm1, %v1797_v0  ;;  %v2328_v26 = vpop.f32.mrb[137].mxu0  ;;  %v1414_v27 = vadd.f32 %v3480_v8, %v1413_v24  ;;  %v2500_v28 = vpop.f32.mrb[137].mxu1 }
 0x207   :  { %v1072_v29 = vpop.f32.mrb[138].mxu0  ;;  %v1416_v30 = vpop.f32.mrb[138].mxu1 }
 0x208   :  { %v1543_v31 = vmul.f32 0.1, %v1070_v25  ;;  %v1073_v32 = vadd.f32 %v3480_v8, %v1072_v29  ;;  %v2329_v33 = vpop.f32.mrb[139].mxu0  ;;  %v1629_v34 = vmul.f32 0.1, %v1414_v27  ;;  %v1417_v35 = vadd.f32 %v3480_v8, %v1416_v30  ;;  %v2501_v36 = vpop.f32.mrb[139].mxu1 }
 0x20a   :  { %v1712_v37 = vmax.f32 %v1070_v25, %v1543_v31  ;;  %v1544_v38 = vmul.f32 0.1, %v1073_v32  ;;  %v1798_v39 = vmax.f32 %v1414_v27, %v1629_v34  ;;  %v1630_v40 = vmul.f32 0.1, %v1417_v35 }
 0x20c   :  { %1882 = vst.msk [vmem:[%s3993_s3 + $0x220] sm:$0xff] %vm1813_vm1, %v1712_v37  ;;  %v1713_v41 = vmax.f32 %v1073_v32, %v1544_v38  ;;  %1968 = vst.msk [vmem:[%s3993_s3 + $0x4d0] sm:$0xff] %vm1813_vm1, %v1798_v39  ;;  %v1799_v42 = vmax.f32 %v1417_v35, %v1630_v40 }
 0x20d   :  { %v1077_v43 = vpop.f32.mrb[140].mxu0  ;;  %v1421_v44 = vpop.f32.mrb[140].mxu1 }
 0x20e   :  { %1883 = vst.msk [vmem:[%s3993_s3 + $0x228] sm:$0xff] %vm1813_vm1, %v1713_v41  ;;  %v1078_v45 = vadd.f32 %v3480_v8, %v1077_v43  ;;  %1969 = vst.msk [vmem:[%s3993_s3 + $0x4d8] sm:$0xff] %vm1813_vm1, %v1799_v42  ;;  %v2332_v46 = vpop.f32.mrb[141].mxu0  ;;  %v1422_v47 = vadd.f32 %v3480_v8, %v1421_v44  ;;  %v2504_v48 = vpop.f32.mrb[141].mxu1 }
 0x20f   :  { %v1080_v49 = vpop.f32.mrb[142].mxu0  ;;  %v1424_v50 = vpop.f32.mrb[142].mxu1 }
 0x210   :  { %v1545_v51 = vmul.f32 0.1, %v1078_v45  ;;  %v1081_v52 = vadd.f32 %v3480_v8, %v1080_v49  ;;  %v2333_v53 = vpop.f32.mrb[143].mxu0  ;;  %v1631_v54 = vmul.f32 0.1, %v1422_v47  ;;  %v1425_v55 = vadd.f32 %v3480_v8, %v1424_v50  ;;  %v2505_v56 = vpop.f32.mrb[143].mxu1 }
 0x212   :  { %v1714_v57 = vmax.f32 %v1078_v45, %v1545_v51  ;;  %v1546_v58 = vmul.f32 0.1, %v1081_v52  ;;  %v1800_v59 = vmax.f32 %v1422_v47, %v1631_v54  ;;  %v1632_v60 = vmul.f32 0.1, %v1425_v55 }
 0x214   :  { %1884 = vst.msk [vmem:[%s3993_s3 + $0x230] sm:$0xff] %vm1813_vm1, %v1714_v57  ;;  %v1715_v61 = vmax.f32 %v1081_v52, %v1546_v58  ;;  %1970 = vst.msk [vmem:[%s3993_s3 + $0x4e0] sm:$0xff] %vm1813_vm1, %v1800_v59  ;;  %v1801_v62 = vmax.f32 %v1425_v55, %v1632_v60 }
 0x215   :  { %v1085_v1 = vpop.f32.mrb[144].mxu0  ;;  %v1429_v2 = vpop.f32.mrb[144].mxu1 }
 0x216   :  { %1885 = vst.msk [vmem:[%s3993_s3 + $0x238] sm:$0xff] %vm1813_vm1, %v1715_v61  ;;  %v1086_v3 = vadd.f32 %v3480_v8, %v1085_v1  ;;  %1971 = vst.msk [vmem:[%s3993_s3 + $0x4e8] sm:$0xff] %vm1813_vm1, %v1801_v62  ;;  %v2336_v4 = vpop.f32.mrb[145].mxu0  ;;  %v1430_v5 = vadd.f32 %v3480_v8, %v1429_v2  ;;  %v2508_v6 = vpop.f32.mrb[145].mxu1 }
 0x217   :  { %v1088_v7 = vpop.f32.mrb[146].mxu0  ;;  %v1432_v9 = vpop.f32.mrb[146].mxu1 }
 0x218   :  { %v1547_v10 = vmul.f32 0.1, %v1086_v3  ;;  %v1089_v11 = vadd.f32 %v3480_v8, %v1088_v7  ;;  %v2337_v12 = vpop.f32.mrb[147].mxu0  ;;  %v1633_v13 = vmul.f32 0.1, %v1430_v5  ;;  %v1433_v14 = vadd.f32 %v3480_v8, %v1432_v9  ;;  %v2509_v15 = vpop.f32.mrb[147].mxu1 }
 0x21a   :  { %v1716_v16 = vmax.f32 %v1086_v3, %v1547_v10  ;;  %v1548_v63 = vmul.f32 0.1, %v1089_v11  ;;  %v1802_v17 = vmax.f32 %v1430_v5, %v1633_v13  ;;  %v1634_v18 = vmul.f32 0.1, %v1433_v14 }
 0x21c   :  { %1886 = vst.msk [vmem:[%s3993_s3 + $0x240] sm:$0xff] %vm1813_vm1, %v1716_v16  ;;  %v1717_v19 = vmax.f32 %v1089_v11, %v1548_v63  ;;  %1972 = vst.msk [vmem:[%s3993_s3 + $0x4f0] sm:$0xff] %vm1813_vm1, %v1802_v17  ;;  %v1803_v20 = vmax.f32 %v1433_v14, %v1634_v18 }
 0x21d   :  { %v1093_v21 = vpop.f32.mrb[148].mxu0  ;;  %v1437_v22 = vpop.f32.mrb[148].mxu1 }
 0x21e   :  { %1887 = vst.msk [vmem:[%s3993_s3 + $0x248] sm:$0xff] %vm1813_vm1, %v1717_v19  ;;  %v1094_v0 = vadd.f32 %v3480_v8, %v1093_v21  ;;  %1973 = vst.msk [vmem:[%s3993_s3 + $0x4f8] sm:$0xff] %vm1813_vm1, %v1803_v20  ;;  %v2340_v23 = vpop.f32.mrb[149].mxu0  ;;  %v1438_v24 = vadd.f32 %v3480_v8, %v1437_v22  ;;  %v2512_v25 = vpop.f32.mrb[149].mxu1 }
 0x21f   :  { %v1096_v26 = vpop.f32.mrb[150].mxu0  ;;  %v1440_v27 = vpop.f32.mrb[150].mxu1 }
 0x220   :  { %v1549_v28 = vmul.f32 0.1, %v1094_v0  ;;  %v1097_v29 = vadd.f32 %v3480_v8, %v1096_v26  ;;  %v2341_v30 = vpop.f32.mrb[151].mxu0  ;;  %v1635_v31 = vmul.f32 0.1, %v1438_v24  ;;  %v1441_v32 = vadd.f32 %v3480_v8, %v1440_v27  ;;  %v2513_v33 = vpop.f32.mrb[151].mxu1 }
 0x222   :  { %v1718_v34 = vmax.f32 %v1094_v0, %v1549_v28  ;;  %v1550_v35 = vmul.f32 0.1, %v1097_v29  ;;  %v1804_v36 = vmax.f32 %v1438_v24, %v1635_v31  ;;  %v1636_v37 = vmul.f32 0.1, %v1441_v32 }
 0x224   :  { %1888 = vst.msk [vmem:[%s3993_s3 + $0x250] sm:$0xff] %vm1813_vm1, %v1718_v34  ;;  %v1719_v38 = vmax.f32 %v1097_v29, %v1550_v35  ;;  %1974 = vst.msk [vmem:[%s3993_s3 + $0x500] sm:$0xff] %vm1813_vm1, %v1804_v36  ;;  %v1805_v39 = vmax.f32 %v1441_v32, %v1636_v37 }
 0x225   :  { %v1101_v40 = vpop.f32.mrb[152].mxu0  ;;  %v1445_v41 = vpop.f32.mrb[152].mxu1 }
 0x226   :  { %1889 = vst.msk [vmem:[%s3993_s3 + $0x258] sm:$0xff] %vm1813_vm1, %v1719_v38  ;;  %v1102_v42 = vadd.f32 %v3480_v8, %v1101_v40  ;;  %1975 = vst.msk [vmem:[%s3993_s3 + $0x508] sm:$0xff] %vm1813_vm1, %v1805_v39  ;;  %v2344_v43 = vpop.f32.mrb[153].mxu0  ;;  %v1446_v44 = vadd.f32 %v3480_v8, %v1445_v41  ;;  %v2516_v45 = vpop.f32.mrb[153].mxu1 }
 0x227   :  { %v1104_v46 = vpop.f32.mrb[154].mxu0  ;;  %v1448_v47 = vpop.f32.mrb[154].mxu1 }
 0x228   :  { %v1551_v48 = vmul.f32 0.1, %v1102_v42  ;;  %v1105_v49 = vadd.f32 %v3480_v8, %v1104_v46  ;;  %v2345_v50 = vpop.f32.mrb[155].mxu0  ;;  %v1637_v51 = vmul.f32 0.1, %v1446_v44  ;;  %v1449_v52 = vadd.f32 %v3480_v8, %v1448_v47  ;;  %v2517_v53 = vpop.f32.mrb[155].mxu1 }
 0x229   :  { %v3919_v8 = vld [vmem:[%s3992_s2] ss:$0 sm:$0xff] }
 0x22a   :  { %v1720_v54 = vmax.f32 %v1102_v42, %v1551_v48  ;;  %v1552_v55 = vmul.f32 0.1, %v1105_v49  ;;  %v1806_v56 = vmax.f32 %v1446_v44, %v1637_v51  ;;  %v1638_v57 = vmul.f32 0.1, %v1449_v52 }
 0x22c   :  { %1890 = vst.msk [vmem:[%s3993_s3 + $0x260] sm:$0xff] %vm1813_vm1, %v1720_v54  ;;  %v1721_v58 = vmax.f32 %v1105_v49, %v1552_v55  ;;  %1976 = vst.msk [vmem:[%s3993_s3 + $0x510] sm:$0xff] %vm1813_vm1, %v1806_v56  ;;  %v1807_v59 = vmax.f32 %v1449_v52, %v1638_v57 }
 0x22d   :  { %v1109_v60 = vpop.f32.mrb[156].mxu0  ;;  %v1453_v61 = vpop.f32.mrb[156].mxu1 }
 0x22e   :  { %1891 = vst.msk [vmem:[%s3993_s3 + $0x268] sm:$0xff] %vm1813_vm1, %v1721_v58  ;;  %v1110_v62 = vadd.f32 %v3919_v8, %v1109_v60  ;;  %1977 = vst.msk [vmem:[%s3993_s3 + $0x518] sm:$0xff] %vm1813_vm1, %v1807_v59  ;;  %v2348_v1 = vpop.f32.mrb[157].mxu0  ;;  %v1454_v2 = vadd.f32 %v3919_v8, %v1453_v61  ;;  %v2520_v3 = vpop.f32.mrb[157].mxu1 }
 0x22f   :  { %v1112_v4 = vpop.f32.mrb[158].mxu0  ;;  %v1456_v5 = vpop.f32.mrb[158].mxu1 }
 0x230   :  { %v1553_v6 = vmul.f32 0.1, %v1110_v62  ;;  %v1113_v7 = vadd.f32 %v3919_v8, %v1112_v4  ;;  %v2349_v9 = vpop.f32.mrb[159].mxu0  ;;  %v1639_v10 = vmul.f32 0.1, %v1454_v2  ;;  %v1457_v11 = vadd.f32 %v3919_v8, %v1456_v5  ;;  %v2521_v12 = vpop.f32.mrb[159].mxu1 }
 0x232   :  { %v1722_v13 = vmax.f32 %v1110_v62, %v1553_v6  ;;  %v1554_v14 = vmul.f32 0.1, %v1113_v7  ;;  %v1808_v15 = vmax.f32 %v1454_v2, %v1639_v10  ;;  %v1640_v16 = vmul.f32 0.1, %v1457_v11 }
 0x234   :  { %1892 = vst.msk [vmem:[%s3993_s3 + $0x270] sm:$0xff] %vm1813_vm1, %v1722_v13  ;;  %v1723_v63 = vmax.f32 %v1113_v7, %v1554_v14  ;;  %1978 = vst.msk [vmem:[%s3993_s3 + $0x520] sm:$0xff] %vm1813_vm1, %v1808_v15  ;;  %v1809_v17 = vmax.f32 %v1457_v11, %v1640_v16 }
 0x235   :  { %v1117_v18 = vpop.f32.mrb[160].mxu0  ;;  %v1461_v19 = vpop.f32.mrb[160].mxu1 }
 0x236   :  { %1893 = vst.msk [vmem:[%s3993_s3 + $0x278] sm:$0xff] %vm1813_vm1, %v1723_v63  ;;  %v1118_v20 = vadd.f32 %v3919_v8, %v1117_v18  ;;  %1979 = vst.msk [vmem:[%s3993_s3 + $0x528] sm:$0xff] %vm1813_vm1, %v1809_v17  ;;  %v2352_v21 = vpop.f32.mrb[161].mxu0  ;;  %v1462_v22 = vadd.f32 %v3919_v8, %v1461_v19  ;;  %v2524_v0 = vpop.f32.mrb[161].mxu1 }
 0x237   :  { %v1120_v23 = vpop.f32.mrb[162].mxu0  ;;  %v1464_v24 = vpop.f32.mrb[162].mxu1 }
 0x238   :  { %v1555_v25 = vmul.f32 0.1, %v1118_v20  ;;  %v1121_v26 = vadd.f32 %v3919_v8, %v1120_v23  ;;  %v2353_v27 = vpop.f32.mrb[163].mxu0  ;;  %v1641_v28 = vmul.f32 0.1, %v1462_v22  ;;  %v1465_v29 = vadd.f32 %v3919_v8, %v1464_v24  ;;  %v2525_v30 = vpop.f32.mrb[163].mxu1 }
 0x23a   :  { %v1724_v31 = vmax.f32 %v1118_v20, %v1555_v25  ;;  %v1556_v32 = vmul.f32 0.1, %v1121_v26  ;;  %v1810_v33 = vmax.f32 %v1462_v22, %v1641_v28  ;;  %v1642_v34 = vmul.f32 0.1, %v1465_v29 }
 0x23c   :  { %1894 = vst.msk [vmem:[%s3993_s3 + $0x280] sm:$0xff] %vm1813_vm1, %v1724_v31  ;;  %v1725_v35 = vmax.f32 %v1121_v26, %v1556_v32  ;;  %1980 = vst.msk [vmem:[%s3993_s3 + $0x530] sm:$0xff] %vm1813_vm1, %v1810_v33  ;;  %v1811_v36 = vmax.f32 %v1465_v29, %v1642_v34 }
 0x23d   :  { %v1125_v37 = vpop.f32.mrb[164].mxu0  ;;  %v1469_v38 = vpop.f32.mrb[164].mxu1 }
 0x23e   :  { %1895 = vst.msk [vmem:[%s3993_s3 + $0x288] sm:$0xff] %vm1813_vm1, %v1725_v35  ;;  %v1126_v39 = vadd.f32 %v3919_v8, %v1125_v37  ;;  %1981 = vst.msk [vmem:[%s3993_s3 + $0x538] sm:$0xff] %vm1813_vm1, %v1811_v36  ;;  %v2356_v40 = vpop.f32.mrb[165].mxu0  ;;  %v1470_v41 = vadd.f32 %v3919_v8, %v1469_v38  ;;  %v2528_v42 = vpop.f32.mrb[165].mxu1 }
 0x23f   :  { %v1128_v43 = vpop.f32.mrb[166].mxu0  ;;  %v1472_v44 = vpop.f32.mrb[166].mxu1 }
 0x240   :  { %v1557_v45 = vmul.f32 0.1, %v1126_v39  ;;  %v1129_v46 = vadd.f32 %v3919_v8, %v1128_v43  ;;  %v2357_v47 = vpop.f32.mrb[167].mxu0  ;;  %v1643_v48 = vmul.f32 0.1, %v1470_v41  ;;  %v2529_v49 = vpop.f32.mrb[167].mxu1 }
 0x242   :  { %v1726_v50 = vmax.f32 %v1126_v39, %v1557_v45  ;;  %v1558_v51 = vmul.f32 0.1, %v1129_v46  ;;  %v1812_v52 = vmax.f32 %v1470_v41, %v1643_v48 }
 0x244   :  { %1896 = vst.msk [vmem:[%s3993_s3 + $0x290] sm:$0xff] %vm1813_vm1, %v1726_v50  ;;  %v1727_v53 = vmax.f32 %v1129_v46, %v1558_v51  ;;  %1982 = vst.msk [vmem:[%s3993_s3 + $0x540] sm:$0xff] %vm1813_vm1, %v1812_v52 }
 0x245   :  { %v1133_v54 = vpop.f32.mrb[168].mxu0 }
 0x246   :  { %1897 = vst.msk [vmem:[%s3993_s3 + $0x298] sm:$0xff] %vm1813_vm1, %v1727_v53  ;;  %v1134_v55 = vadd.f32 %v3919_v8, %v1133_v54  ;;  %v2360_v56 = vpop.f32.mrb[169].mxu0 }
 0x247   :  { %v1136_v57 = vpop.f32.mrb[170].mxu0 }
 0x248   :  { %v1559_v58 = vmul.f32 0.1, %v1134_v55  ;;  %v1137_v59 = vadd.f32 %v3919_v8, %v1136_v57  ;;  %v2361_v60 = vpop.f32.mrb[171].mxu0 }
 0x24a   :  { %v1728_v61 = vmax.f32 %v1134_v55, %v1559_v58  ;;  %v1560_v62 = vmul.f32 0.1, %v1137_v59 }
 0x24c   :  { %1898 = vst.msk [vmem:[%s3993_s3 + $0x2a0] sm:$0xff] %vm1813_vm1, %v1728_v61  ;;  %v1729_v1 = vmax.f32 %v1137_v59, %v1560_v62 }
 0x24e   :  { %1899 = vst.msk [vmem:[%s3993_s3 + $0x2a8] sm:$0xff] %vm1813_vm1, %v1729_v1 }

// kernel: encoder_28_forward.5
= control target key start
LH: loop header
LB: loop body
LE: loop exit
PB: predicated region body
PF: predicated region fallthrough
CT: control target
= control target key end

     0   :  { %v2305_v0 = vmov 0   ;;  %s3591_s1 = inlined_call_operand.vmem [shape: bf16[640,128], index: 1, kind: input, shape index: {}]   ;;  %s3592_s0 = inlined_call_operand.vmem [shape: bf16[288,640], index: 0, kind: input, shape index: {}]   ;;  %s3593_s2 = inlined_call_operand.vmem [shape: f32[1,128], index: 2, kind: input, shape index: {}]   ;;  %s3594_s3 = inlined_call_operand.vmem [shape: f32[1,128], index: 3, kind: input, shape index: {}]   ;;  %s3595_s4 = inlined_call_operand.vmem [shape: f32[1,128], index: 4, kind: input, shape index: {}]   ;;  %s3596_s5 = inlined_call_operand.vmem [shape: f32[288,128], index: 5, kind: output, shape index: {}]  }
   0x1   :  { %924 = vmatprep.subr.bf16.mxu0 %v2305_v0  ;;  %2022 = vmatprep.subr.bf16.mxu1 %v2305_v0  ;;  %v2137_v1 = vld [vmem:[%s3591_s1] sm:$0xff]   ;;  %v2139_v3 = vld [vmem:[%s3591_s1 + $0x8] sm:$0xff]   ;;  %v2141_v5 = vld [vmem:[%s3591_s1 + $0x10] sm:$0xff]  }
   0x2   :  { %v2344_v2 = vld [vmem:[%s3591_s1 + $0x80] sm:$0xff]   ;;  %925 = vmatpush1.bf16.msra.mxu0 %v2137_v1  ;;  %v2354_v4 = vld [vmem:[%s3591_s1 + $0x88] sm:$0xff]   ;;  %v2365_v6 = vld [vmem:[%s3591_s1 + $0x90] sm:$0xff]  }
   0x3   :  { %2038 = vmatpush1.bf16.msra.mxu1 %v2344_v2  ;;  %926 = vmatprep.subr.bf16.mxu0 %v2305_v0  ;;  %v2143_v7 = vld [vmem:[%s3591_s1 + $0x18] sm:$0xff]   ;;  %v2145_v9 = vld [vmem:[%s3591_s1 + $0x20] sm:$0xff]   ;;  %v2147_v11 = vld [vmem:[%s3591_s1 + $0x28] sm:$0xff]  }
   0x4   :  { %2023 = vmatprep.subr.bf16.mxu1 %v2305_v0  ;;  %v2376_v8 = vld [vmem:[%s3591_s1 + $0x98] sm:$0xff]   ;;  %v2387_v10 = vld [vmem:[%s3591_s1 + $0xa0] sm:$0xff]   ;;  %v2398_v12 = vld [vmem:[%s3591_s1 + $0xa8] sm:$0xff]  }
   0x5   :  { %v2149_v13 = vld [vmem:[%s3591_s1 + $0x30] sm:$0xff]   ;;  %v2151_v15 = vld [vmem:[%s3591_s1 + $0x38] sm:$0xff]   ;;  %v2153_v17 = vld [vmem:[%s3591_s1 + $0x40] sm:$0xff]  }
   0x6   :  { %927 = vmatpush1.bf16.msra.mxu0 %v2139_v3  ;;  %v2409_v14 = vld [vmem:[%s3591_s1 + $0xb0] sm:$0xff]   ;;  %v2420_v16 = vld [vmem:[%s3591_s1 + $0xb8] sm:$0xff]   ;;  %v2431_v18 = vld [vmem:[%s3591_s1 + $0xc0] sm:$0xff]  }
   0x7   :  { %2039 = vmatpush1.bf16.msra.mxu1 %v2354_v4  ;;  %928 = vmatprep.subr.bf16.mxu0 %v2305_v0  ;;  %v2171_v19 = vld [vmem:[%s3592_s0 + $0x4] ss:$20 sps:$4 sm:$0xff]   ;;  %v2155_v20 = vld [vmem:[%s3591_s1 + $0x48] sm:$0xff]   ;;  %v2157_v23 = vld [vmem:[%s3591_s1 + $0x50] sm:$0xff]  }
   0x8   :  { %2024 = vmatprep.subr.bf16.mxu1 %v2305_v0  ;;  %v2174_v21 = vld [vmem:[%s3592_s0 + $0xd4] ss:$20 sps:$4 sm:$0xff]   ;;  %956 = vmatprep.mubr.bf16.mxu0 %v2171_v19  ;;  %v2159_v25 = vld [vmem:[%s3591_s1 + $0x58] sm:$0xff]   ;;  %v2161_v27 = vld [vmem:[%s3591_s1 + $0x60] sm:$0xff]  }
   0x9   :  { %v2448_v22 = vld [vmem:[%s3591_s1 + $0xc8] sm:$0xff]   ;;  %1173 = vmatprep.mubr.bf16.mxu1 %v2174_v21  ;;  %v2459_v24 = vld [vmem:[%s3591_s1 + $0xd0] sm:$0xff]   ;;  %v2470_v26 = vld [vmem:[%s3591_s1 + $0xd8] sm:$0xff]  }
   0xa   :  { %929 = vmatpush1.bf16.msra.mxu0 %v2141_v5  ;;  %v2481_v28 = vld [vmem:[%s3591_s1 + $0xe0] sm:$0xff]   ;;  %v2163_v29 = vld [vmem:[%s3591_s1 + $0x68] sm:$0xff]   ;;  %v2165_v31 = vld [vmem:[%s3591_s1 + $0x70] sm:$0xff]  }
   0xb   :  { %2040 = vmatpush1.bf16.msra.mxu1 %v2365_v6  ;;  %930 = vmatprep.subr.bf16.mxu0 %v2305_v0  ;;  %v2492_v30 = vld [vmem:[%s3591_s1 + $0xe8] sm:$0xff]   ;;  %v2503_v32 = vld [vmem:[%s3591_s1 + $0xf0] sm:$0xff]   ;;  %v2167_v33 = vld [vmem:[%s3591_s1 + $0x78] sm:$0xff]  }
   0xc   :  { %2025 = vmatprep.subr.bf16.mxu1 %v2305_v0  ;;  %v2514_v34 = vld [vmem:[%s3591_s1 + $0xf8] sm:$0xff]   ;;  %v2217_v35 = vld [vmem:[%s3591_s1 + $0x100] sm:$0xff]   ;;  %v2224_v40 = vld [vmem:[%s3591_s1 + $0x108] sm:$0xff]  }
   0xd   :  { %v2169_v36 = vld [vmem:[%s3592_s0] ss:$20 sps:$4 sm:$0xff]   ;;  %v2172_v37 = vld [vmem:[%s3592_s0 + $0xd0] ss:$20 sps:$4 sm:$0xff]   ;;  %v2179_v41 = vld [vmem:[%s3592_s0 + $0x28] ss:$20 sps:$4 sm:$0xff]  }
   0xe   :  { %931 = vmatpush1.bf16.msra.mxu0 %v2143_v7  ;;  %v2175_v38 = vld [vmem:[%s3592_s0 + $0x2c] ss:$20 sps:$4 sm:$0xff]   ;;  %v2177_v39 = vld [vmem:[%s3592_s0 + $0xfc] ss:$20 sps:$4 sm:$0xff]   ;;  %v2181_v44 = vld [vmem:[%s3592_s0 + $0x54] ss:$20 sps:$4 sm:$0xff]  }
   0xf   :  { %2041 = vmatpush1.bf16.msra.mxu1 %v2376_v8  ;;  %932 = vmatprep.subr.bf16.mxu0 %v2305_v0  ;;  %v2180_v42 = vld [vmem:[%s3592_s0 + $0xf8] ss:$20 sps:$4 sm:$0xff]   ;;  %v2237_v43 = vld [vmem:[%s3591_s1 + $0x110] sm:$0xff]   ;;  %v2245_v49 = vld [vmem:[%s3591_s1 + $0x120] sm:$0xff]  }
  0x10   :  { %2026 = vmatprep.subr.bf16.mxu1 %v2305_v0  ;;  %v2183_v45 = vld [vmem:[%s3592_s0 + $0x124] ss:$20 sps:$4 sm:$0xff]   ;;  %v2186_v48 = vld [vmem:[%s3592_s0 + $0x120] ss:$20 sps:$4 sm:$0xff]   ;;  %v2187_v50 = vld [vmem:[%s3592_s0 + $0x7c] ss:$20 sps:$4 sm:$0xff]  }
  0x11   :  { %v2238_v46 = vld [vmem:[%s3591_s1 + $0x118] sm:$0xff]   ;;  %v2185_v47 = vld [vmem:[%s3592_s0 + $0x50] ss:$20 sps:$4 sm:$0xff]   ;;  %v2189_v51 = vld [vmem:[%s3592_s0 + $0x14c] ss:$20 sps:$4 sm:$0xff]  }
  0x12   :  { %933 = vmatpush1.bf16.msra.mxu0 %v2145_v9  ;;  %v2246_v52 = vld [vmem:[%s3591_s1 + $0x128] sm:$0xff]   ;;  %v2253_v54 = vld [vmem:[%s3591_s1 + $0x130] sm:$0xff]   ;;  %v2193_v56 = vld [vmem:[%s3592_s0 + $0xa4] ss:$20 sps:$4 sm:$0xff]  }
  0x13   :  { %2042 = vmatpush1.bf16.msra.mxu1 %v2387_v10  ;;  %934 = vmatprep.subr.bf16.mxu0 %v2305_v0  ;;  %v2191_v53 = vld [vmem:[%s3592_s0 + $0x78] ss:$20 sps:$4 sm:$0xff]   ;;  %v2192_v55 = vld [vmem:[%s3592_s0 + $0x148] ss:$20 sps:$4 sm:$0xff]   ;;  %v2197_v59 = vld [vmem:[%s3592_s0 + $0xa0] ss:$20 sps:$4 sm:$0xff]  }
  0x14   :  { %2027 = vmatprep.subr.bf16.mxu1 %v2305_v0  ;;  %v2195_v57 = vld [vmem:[%s3592_s0 + $0x174] ss:$20 sps:$4 sm:$0xff]   ;;  %v2254_v58 = vld [vmem:[%s3591_s1 + $0x138] sm:$0xff]   ;;  %v2198_v60 = vld [vmem:[%s3592_s0 + $0x170] ss:$20 sps:$4 sm:$0xff]  }
  0x15   :  { %v2199_v61 = vld [vmem:[%s3592_s0 + $0xcc] ss:$20 sps:$4 sm:$0xff]   ;;  %v2201_v62 = vld [vmem:[%s3592_s0 + $0x19c] ss:$20 sps:$4 sm:$0xff]   ;;  %v2207_v3 = vld [vmem:[%s3592_s0 + $0x1c4] ss:$20 sps:$4 sm:$0xff]  }
  0x16   :  { %935 = vmatpush1.bf16.msra.mxu0 %v2147_v11  ;;  %v2203_v63 = vld [vmem:[%s3592_s0 + $0xc8] ss:$20 sps:$4 sm:$0xff]   ;;  %v2204_v1 = vld [vmem:[%s3592_s0 + $0x198] ss:$20 sps:$4 sm:$0xff]   ;;  %v2210_v5 = vld [vmem:[%s3592_s0 + $0x1c0] ss:$20 sps:$4 sm:$0xff]  }
  0x17   :  { %2043 = vmatpush1.bf16.msra.mxu1 %v2398_v12  ;;  %936 = vmatprep.subr.bf16.mxu0 %v2305_v0  ;;  %v2213_v7 = vld [vmem:[%s3592_s0 + $0x1ec] ss:$20 sps:$4 sm:$0xff]   ;;  %v2216_v9 = vld [vmem:[%s3592_s0 + $0x1e8] ss:$20 sps:$4 sm:$0xff]   ;;  %v2235_v19 = vld [vmem:[%s3592_s0 + $0x190] ss:$20 sps:$4 sm:$0xff]  }
  0x18   :  { %2028 = vmatprep.subr.bf16.mxu1 %v2305_v0  ;;  %v2220_v11 = vld [vmem:[%s3592_s0 + $0x214] ss:$20 sps:$4 sm:$0xff]   ;;  %v2239_v21 = vld [vmem:[%s3592_s0 + $0x1bc] ss:$20 sps:$4 sm:$0xff]  }
  0x1a   :  { %937 = vmatpush1.bf16.msra.mxu0 %v2149_v13  ;;  %v2223_v13 = vld [vmem:[%s3592_s0 + $0x210] ss:$20 sps:$4 sm:$0xff]  }
  0x1b   :  { %2044 = vmatpush1.bf16.msra.mxu1 %v2409_v14  ;;  %938 = vmatprep.subr.bf16.mxu0 %v2305_v0 }
  0x1c   :  { %2029 = vmatprep.subr.bf16.mxu1 %v2305_v0 }
  0x1e   :  { %939 = vmatpush1.bf16.msra.mxu0 %v2151_v15  ;;  %v2227_v15 = vld [vmem:[%s3592_s0 + $0x23c] ss:$20 sps:$4 sm:$0xff]  }
  0x1f   :  { %2045 = vmatpush1.bf16.msra.mxu1 %v2420_v16  ;;  %940 = vmatprep.subr.bf16.mxu0 %v2305_v0 }
  0x20   :  { %2030 = vmatprep.subr.bf16.mxu1 %v2305_v0 }
  0x22   :  { %941 = vmatpush1.bf16.msra.mxu0 %v2153_v17  ;;  %v2231_v17 = vld [vmem:[%s3592_s0 + $0x194] ss:$20 sps:$4 sm:$0xff]  }
  0x23   :  { %2046 = vmatpush1.bf16.msra.mxu1 %v2431_v18  ;;  %942 = vmatprep.subr.bf16.mxu0 %v2305_v0 }
  0x24   :  { %2031 = vmatprep.subr.bf16.mxu1 %v2305_v0 }
  0x26   :  { %943 = vmatpush1.bf16.msra.mxu0 %v2155_v20  ;;  %v2236_v20 = vld [vmem:[%s3592_s0 + $0x260] ss:$20 sps:$4 sm:$0xff]  }
  0x27   :  { %2047 = vmatpush1.bf16.msra.mxu1 %v2448_v22  ;;  %944 = vmatprep.subr.bf16.mxu0 %v2305_v0 }
  0x28   :  { %2032 = vmatprep.subr.bf16.mxu1 %v2305_v0 }
  0x2a   :  { %945 = vmatpush1.bf16.msra.mxu0 %v2157_v23  ;;  %v2243_v23 = vld [vmem:[%s3592_s0 + $0x1b8] ss:$20 sps:$4 sm:$0xff]  }
  0x2b   :  { %2048 = vmatpush1.bf16.msra.mxu1 %v2459_v24  ;;  %946 = vmatprep.subr.bf16.mxu0 %v2305_v0 }
  0x2c   :  { %2033 = vmatprep.subr.bf16.mxu1 %v2305_v0 }
  0x2e   :  { %947 = vmatpush1.bf16.msra.mxu0 %v2159_v25  ;;  %v2247_v25 = vld [vmem:[%s3592_s0 + $0x1e4] ss:$20 sps:$4 sm:$0xff]  }
  0x2f   :  { %2049 = vmatpush1.bf16.msra.mxu1 %v2470_v26  ;;  %948 = vmatprep.subr.bf16.mxu0 %v2305_v0 }
  0x30   :  { %2034 = vmatprep.subr.bf16.mxu1 %v2305_v0 }
  0x32   :  { %949 = vmatpush1.bf16.msra.mxu0 %v2161_v27  ;;  %v2251_v27 = vld [vmem:[%s3592_s0 + $0x1e0] ss:$20 sps:$4 sm:$0xff]  }
  0x33   :  { %2050 = vmatpush1.bf16.msra.mxu1 %v2481_v28  ;;  %950 = vmatprep.subr.bf16.mxu0 %v2305_v0 }
  0x34   :  { %2035 = vmatprep.subr.bf16.mxu1 %v2305_v0 }
  0x36   :  { %951 = vmatpush1.bf16.msra.mxu0 %v2163_v29  ;;  %v2255_v29 = vld [vmem:[%s3592_s0 + $0x20c] ss:$20 sps:$4 sm:$0xff]  }
  0x37   :  { %2051 = vmatpush1.bf16.msra.mxu1 %v2492_v30  ;;  %952 = vmatprep.subr.bf16.mxu0 %v2305_v0 }
  0x38   :  { %2036 = vmatprep.subr.bf16.mxu1 %v2305_v0 }
  0x3a   :  { %953 = vmatpush1.bf16.msra.mxu0 %v2165_v31  ;;  %v2258_v31 = vld [vmem:[%s3592_s0 + $0x208] ss:$20 sps:$4 sm:$0xff]  }
  0x3b   :  { %2052 = vmatpush1.bf16.msra.mxu1 %v2503_v32  ;;  %954 = vmatprep.subr.bf16.mxu0 %v2305_v0 }
  0x3c   :  { %2037 = vmatprep.subr.bf16.mxu1 %v2305_v0 }
  0x3e   :  { %955 = vmatpush1.bf16.msra.mxu0 %v2167_v33  ;;  %v2260_v33 = vld [vmem:[%s3592_s0 + $0x234] ss:$20 sps:$4 sm:$0xff]  }
  0x3f   :  { %2053 = vmatpush1.bf16.msra.mxu1 %v2514_v34  ;;  %1101 = vmatprep.subr.bf16.mxu0 %v2305_v0 }
  0x40   :  { %1970 = vmatprep.subr.bf16.mxu1 %v2217_v35 }
  0x41   :  { %957 = vmatmul.mubr.bf16.vlgmr.msra.gmra.mrb[0].mxu0 %v2169_v36  ;;  %v2264_v36 = vld [vmem:[%s3592_s0 + $0x88] ss:$20 sps:$4 sm:$0xff]  }
  0x42   :  { %1174 = vmatmul.mubr.bf16.vlgmr.msra.gmra.mrb[0].mxu1 %v2172_v37  ;;  %1102 = vmatpush1.bf16.msra.mxu0 %v2344_v2  ;;  %v2205_v2 = vld [vmem:[%s3592_s0 + $0xf4] ss:$20 sps:$4 sm:$0xff]   ;;  %v2265_v37 = vld [vmem:[%s3592_s0 + $0x25c] ss:$20 sps:$4 sm:$0xff]  }
  0x43   :  { %964 = vmatprep.mubr.bf16.mxu0 %v2175_v38  ;;  %1181 = vmatprep.mubr.bf16.mxu1 %v2177_v39  ;;  %v2267_v38 = vld [vmem:[%s3592_s0 + $0xb0] ss:$20 sps:$4 sm:$0xff]   ;;  %v2268_v39 = vld [vmem:[%s3592_s0 + $0x258] ss:$20 sps:$4 sm:$0xff]  }
  0x44   :  { %1103 = vmatprep.subr.bf16.mxu0 %v2305_v0  ;;  %1971 = vmatpush3.bf16.msra.mxu1 %v2217_v35  ;;  %v2263_v35 = vld [vmem:[%s3592_s0 + $0x230] ss:$20 sps:$4 sm:$0xff]  }
  0x45   :  { %1972 = vmatprep.subr.bf16.mxu1 %v2224_v40 }
  0x46   :  { %1104 = vmatpush1.bf16.msra.mxu0 %v2354_v4  ;;  %v2209_v4 = vld [vmem:[%s3592_s0 + $0xf0] ss:$20 sps:$4 sm:$0xff]  }
  0x47   :  { %1105 = vmatprep.subr.bf16.mxu0 %v2305_v0 }
  0x48   :  { %1973 = vmatpush3.bf16.msra.mxu1 %v2224_v40  ;;  %v2269_v40 = vld [vmem:[%s3592_s0 + $0xd8] ss:$20 sps:$4 sm:$0xff]  }
  0x49   :  { %965 = vmatmul.mubr.bf16.gmra.mrb[4].mxu0 %v2179_v41  ;;  %1974 = vmatprep.subr.bf16.mxu1 %v2237_v43  ;;  %v2270_v41 = vld [vmem:[%s3592_s0 + $0x284] ss:$20 sps:$4 sm:$0xff]  }
  0x4a   :  { %1182 = vmatmul.mubr.bf16.gmra.mrb[4].mxu1 %v2180_v42  ;;  %972 = vmatprep.mubr.bf16.mxu0 %v2181_v44  ;;  %v2272_v42 = vld [vmem:[%s3592_s0 + $0x100] ss:$20 sps:$4 sm:$0xff]   ;;  %v2274_v44 = vld [vmem:[%s3592_s0 + $0x128] ss:$20 sps:$4 sm:$0xff]  }
  0x4b   :  { %1189 = vmatprep.mubr.bf16.mxu1 %v2183_v45  ;;  %1106 = vmatpush1.bf16.msra.mxu0 %v2365_v6  ;;  %v2211_v6 = vld [vmem:[%s3592_s0 + $0x11c] ss:$20 sps:$4 sm:$0xff]   ;;  %v2275_v45 = vld [vmem:[%s3592_s0 + $0x2ac] ss:$20 sps:$4 sm:$0xff]  }
  0x4c   :  { %1107 = vmatprep.subr.bf16.mxu0 %v2305_v0  ;;  %1975 = vmatpush3.bf16.msra.mxu1 %v2237_v43  ;;  %v2273_v43 = vld [vmem:[%s3592_s0 + $0x280] ss:$20 sps:$4 sm:$0xff]  }
  0x4d   :  { %1976 = vmatprep.subr.bf16.mxu1 %v2238_v46 }
  0x4f   :  { %1108 = vmatpush1.bf16.msra.mxu0 %v2376_v8  ;;  %v2215_v8 = vld [vmem:[%s3592_s0 + $0x118] ss:$20 sps:$4 sm:$0xff]  }
  0x50   :  { %1109 = vmatprep.subr.bf16.mxu0 %v2305_v0  ;;  %1977 = vmatpush3.bf16.msra.mxu1 %v2238_v46  ;;  %v2277_v46 = vld [vmem:[%s3592_s0 + $0x150] ss:$20 sps:$4 sm:$0xff]  }
  0x51   :  { %973 = vmatmul.mubr.bf16.gmra.mrb[8].mxu0 %v2185_v47  ;;  %1978 = vmatprep.subr.bf16.mxu1 %v2245_v49  ;;  %v2278_v47 = vld [vmem:[%s3592_s0 + $0x2a8] ss:$20 sps:$4 sm:$0xff]  }
  0x52   :  { %1190 = vmatmul.mubr.bf16.gmra.mrb[8].mxu1 %v2186_v48  ;;  %980 = vmatprep.mubr.bf16.mxu0 %v2187_v50  ;;  %v2279_v48 = vld [vmem:[%s3592_s0 + $0x178] ss:$20 sps:$4 sm:$0xff]   ;;  %v2283_v50 = vld [vmem:[%s3592_s0 + $0x1a0] ss:$20 sps:$4 sm:$0xff]  }
  0x53   :  { %1197 = vmatprep.mubr.bf16.mxu1 %v2189_v51  ;;  %1110 = vmatpush1.bf16.msra.mxu0 %v2387_v10  ;;  %v2218_v10 = vld [vmem:[%s3592_s0 + $0x144] ss:$20 sps:$4 sm:$0xff]   ;;  %v2280_v51 = vld [vmem:[%s3592_s0 + $0x8] ss:$20 sps:$4 sm:$0xff]  }
  0x54   :  { %1111 = vmatprep.subr.bf16.mxu0 %v2305_v0  ;;  %1979 = vmatpush3.bf16.msra.mxu1 %v2245_v49  ;;  %v2282_v49 = vld [vmem:[%s3592_s0 + $0xc] ss:$20 sps:$4 sm:$0xff]  }
  0x55   :  { %1980 = vmatprep.subr.bf16.mxu1 %v2246_v52 }
  0x57   :  { %1112 = vmatpush1.bf16.msra.mxu0 %v2398_v12  ;;  %v2222_v12 = vld [vmem:[%s3592_s0 + $0x140] ss:$20 sps:$4 sm:$0xff]  }
  0x58   :  { %1113 = vmatprep.subr.bf16.mxu0 %v2305_v0  ;;  %1981 = vmatpush3.bf16.msra.mxu1 %v2246_v52  ;;  %v2284_v52 = vld [vmem:[%s3592_s0 + $0x1c8] ss:$20 sps:$4 sm:$0xff]  }
  0x59   :  { %981 = vmatmul.mubr.bf16.gmra.mrb[12].mxu0 %v2191_v53  ;;  %1982 = vmatprep.subr.bf16.mxu1 %v2253_v54  ;;  %v2285_v53 = vld [vmem:[%s3592_s0 + $0x34] ss:$20 sps:$4 sm:$0xff]  }
  0x5a   :  { %1198 = vmatmul.mubr.bf16.gmra.mrb[12].mxu1 %v2192_v55  ;;  %988 = vmatprep.mubr.bf16.mxu0 %v2193_v56  ;;  %v2288_v55 = vld [vmem:[%s3592_s0 + $0x30] ss:$20 sps:$4 sm:$0xff]   ;;  %v2289_v56 = vld [vmem:[%s3592_s0 + $0x218] ss:$20 sps:$4 sm:$0xff]  }
  0x5b   :  { %1205 = vmatprep.mubr.bf16.mxu1 %v2195_v57  ;;  %1114 = vmatpush1.bf16.msra.mxu0 %v2409_v14  ;;  %v2225_v14 = vld [vmem:[%s3592_s0 + $0x16c] ss:$20 sps:$4 sm:$0xff]   ;;  %v2290_v57 = vld [vmem:[%s3592_s0 + $0x5c] ss:$20 sps:$4 sm:$0xff]  }
  0x5c   :  { %1115 = vmatprep.subr.bf16.mxu0 %v2305_v0  ;;  %1983 = vmatpush3.bf16.msra.mxu1 %v2253_v54  ;;  %v2287_v54 = vld [vmem:[%s3592_s0 + $0x1f0] ss:$20 sps:$4 sm:$0xff]  }
  0x5d   :  { %1984 = vmatprep.subr.bf16.mxu1 %v2254_v58 }
  0x5f   :  { %1116 = vmatpush1.bf16.msra.mxu0 %v2420_v16  ;;  %v2230_v16 = vld [vmem:[%s3592_s0 + $0x238] ss:$20 sps:$4 sm:$0xff]  }
  0x60   :  { %1117 = vmatprep.subr.bf16.mxu0 %v2305_v0  ;;  %1985 = vmatpush3.bf16.msra.mxu1 %v2254_v58  ;;  %v2292_v58 = vld [vmem:[%s3592_s0 + $0x240] ss:$20 sps:$4 sm:$0xff]  }
  0x61   :  { %989 = vmatmul.mubr.bf16.gmra.mrb[16].mxu0 %v2197_v59  ;;  %v2293_v59 = vld [vmem:[%s3592_s0 + $0x58] ss:$20 sps:$4 sm:$0xff]  }
  0x62   :  { %1206 = vmatmul.mubr.bf16.gmra.mrb[16].mxu1 %v2198_v60  ;;  %996 = vmatprep.mubr.bf16.mxu0 %v2199_v61  ;;  %v2294_v60 = vld [vmem:[%s3592_s0 + $0x268] ss:$20 sps:$4 sm:$0xff]   ;;  %v2295_v61 = vld [vmem:[%s3592_s0 + $0x84] ss:$20 sps:$4 sm:$0xff]  }
  0x63   :  { %1213 = vmatprep.mubr.bf16.mxu1 %v2201_v62  ;;  %1118 = vmatpush1.bf16.msra.mxu0 %v2431_v18  ;;  %v2233_v18 = vld [vmem:[%s3592_s0 + $0x264] ss:$20 sps:$4 sm:$0xff]  }
  0x64   :  { %1119 = vmatprep.subr.bf16.mxu0 %v2305_v0  ;;  %v2297_v62 = vld [vmem:[%s3592_s0 + $0x290] ss:$20 sps:$4 sm:$0xff]  }
  0x67   :  { %1120 = vmatpush1.bf16.msra.mxu0 %v2448_v22  ;;  %v2241_v22 = vld [vmem:[%s3592_s0 + $0x28c] ss:$20 sps:$4 sm:$0xff]  }
  0x68   :  { %1121 = vmatprep.subr.bf16.mxu0 %v2305_v0 }
  0x69   :  { %997 = vmatmul.mubr.bf16.gmra.mrb[20].mxu0 %v2203_v63  ;;  %v2298_v63 = vld [vmem:[%s3592_s0 + $0x80] ss:$20 sps:$4 sm:$0xff]  }
  0x6a   :  { %1214 = vmatmul.mubr.bf16.gmra.mrb[20].mxu1 %v2204_v1  ;;  %1004 = vmatprep.mubr.bf16.mxu0 %v2205_v2  ;;  %v2299_v1 = vld [vmem:[%s3592_s0 + $0x2b8] ss:$20 sps:$4 sm:$0xff]  }
  0x6b   :  { %1221 = vmatprep.mubr.bf16.mxu1 %v2207_v3  ;;  %1122 = vmatpush1.bf16.msra.mxu0 %v2459_v24  ;;  %v2244_v24 = vld [vmem:[%s3592_s0 + $0x288] ss:$20 sps:$4 sm:$0xff]   ;;  %v2300_v2 = vld [vmem:[%s3592_s0 + $0xac] ss:$20 sps:$4 sm:$0xff]  }
  0x6c   :  { %1123 = vmatprep.subr.bf16.mxu0 %v2305_v0  ;;  %v2302_v3 = vld [vmem:[%s3592_s0 + $0xa8] ss:$20 sps:$4 sm:$0xff]  }
  0x6f   :  { %1124 = vmatpush1.bf16.msra.mxu0 %v2470_v26  ;;  %v2249_v26 = vld [vmem:[%s3592_s0 + $0x2b4] ss:$20 sps:$4 sm:$0xff]  }
  0x70   :  { %1125 = vmatprep.subr.bf16.mxu0 %v2305_v0 }
  0x71   :  { %1005 = vmatmul.mubr.bf16.gmra.mrb[24].mxu0 %v2209_v4 }
  0x72   :  { %1222 = vmatmul.mubr.bf16.gmra.mrb[24].mxu1 %v2210_v5  ;;  %1012 = vmatprep.mubr.bf16.mxu0 %v2211_v6 }
  0x73   :  { %1229 = vmatprep.mubr.bf16.mxu1 %v2213_v7  ;;  %1126 = vmatpush1.bf16.msra.mxu0 %v2481_v28  ;;  %v2252_v28 = vld [vmem:[%s3592_s0 + $0x2b0] ss:$20 sps:$4 sm:$0xff]  }
  0x74   :  { %1127 = vmatprep.subr.bf16.mxu0 %v2305_v0 }
  0x77   :  { %1128 = vmatpush1.bf16.msra.mxu0 %v2492_v30  ;;  %v2257_v30 = vld [vmem:[%s3592_s0 + $0x10] ss:$20 sps:$4 sm:$0xff]  }
  0x78   :  { %1129 = vmatprep.subr.bf16.mxu0 %v2305_v0 }
  0x79   :  { %1013 = vmatmul.mubr.bf16.gmra.mrb[28].mxu0 %v2215_v8 }
  0x7a   :  { %1230 = vmatmul.mubr.bf16.gmra.mrb[28].mxu1 %v2216_v9  ;;  %1020 = vmatprep.mubr.bf16.mxu0 %v2218_v10 }
  0x7b   :  { %1237 = vmatprep.mubr.bf16.mxu1 %v2220_v11  ;;  %1130 = vmatpush1.bf16.msra.mxu0 %v2503_v32  ;;  %v2259_v32 = vld [vmem:[%s3592_s0 + $0x38] ss:$20 sps:$4 sm:$0xff]  }
  0x7c   :  { %1131 = vmatprep.subr.bf16.mxu0 %v2305_v0  ;;  %v2229_v0 = vld [vmem:[%s3592_s0 + $0x168] ss:$20 sps:$4 sm:$0xff]  }
  0x7f   :  { %1132 = vmatpush1.bf16.msra.mxu0 %v2514_v34  ;;  %v2262_v34 = vld [vmem:[%s3592_s0 + $0x60] ss:$20 sps:$4 sm:$0xff]  }
  0x81   :  { %1021 = vmatmul.mubr.bf16.gmra.mrb[32].mxu0 %v2222_v12 }
  0x82   :  { %1238 = vmatmul.mubr.bf16.gmra.mrb[32].mxu1 %v2223_v13  ;;  %1028 = vmatprep.mubr.bf16.mxu0 %v2225_v14 }
  0x83   :  { %1245 = vmatprep.mubr.bf16.mxu1 %v2227_v15 }
  0x89   :  { %1029 = vmatmul.mubr.bf16.gmra.mrb[36].mxu0 %v2229_v0 }
  0x8a   :  { %1246 = vmatmul.mubr.bf16.gmra.mrb[36].mxu1 %v2230_v16  ;;  %1036 = vmatprep.mubr.bf16.mxu0 %v2231_v17 }
  0x8b   :  { %1253 = vmatprep.mubr.bf16.mxu1 %v2233_v18 }
  0x91   :  { %1037 = vmatmul.mubr.bf16.gmra.mrb[40].mxu0 %v2235_v19 }
  0x92   :  { %1254 = vmatmul.mubr.bf16.gmra.mrb[40].mxu1 %v2236_v20  ;;  %1044 = vmatprep.mubr.bf16.mxu0 %v2239_v21 }
  0x93   :  { %1261 = vmatprep.mubr.bf16.mxu1 %v2241_v22 }
  0x99   :  { %1045 = vmatmul.mubr.bf16.gmra.mrb[44].mxu0 %v2243_v23  ;;  %v2841_v23 = vld [vmem:[%s3593_s2] ss:$0 sm:$0xff] }
  0x9a   :  { %1262 = vmatmul.mubr.bf16.gmra.mrb[44].mxu1 %v2244_v24  ;;  %1052 = vmatprep.mubr.bf16.mxu0 %v2247_v25 }
  0x9b   :  { %1269 = vmatprep.mubr.bf16.mxu1 %v2249_v26 }
  0xa1   :  { %1053 = vmatmul.mubr.bf16.gmra.mrb[48].mxu0 %v2251_v27 }
  0xa2   :  { %1270 = vmatmul.mubr.bf16.gmra.mrb[48].mxu1 %v2252_v28  ;;  %1060 = vmatprep.mubr.bf16.mxu0 %v2255_v29 }
  0xa3   :  { %1986 = vmatprep.mubr.bf16.mxu1 %v2257_v30 }
  0xa9   :  { %1061 = vmatmul.mubr.bf16.gmra.mrb[52].mxu0 %v2258_v31 }
  0xaa   :  { %1987 = vmatmul.mubr.bf16.vlgmr.msra.gmra.mrb[52].mxu1 %v2259_v32  ;;  %1068 = vmatprep.mubr.bf16.mxu0 %v2260_v33 }
  0xab   :  { %1990 = vmatprep.mubr.bf16.mxu1 %v2262_v34 }
  0xb1   :  { %1069 = vmatmul.mubr.bf16.gmra.mrb[56].mxu0 %v2263_v35 }
  0xb2   :  { %1991 = vmatmul.mubr.bf16.gmra.mrb[56].mxu1 %v2264_v36  ;;  %1076 = vmatprep.mubr.bf16.mxu0 %v2265_v37 }
  0xb3   :  { %1994 = vmatprep.mubr.bf16.mxu1 %v2267_v38 }
  0xb9   :  { %1077 = vmatmul.mubr.bf16.gmra.mrb[60].mxu0 %v2268_v39 }
  0xba   :  { %1995 = vmatmul.mubr.bf16.gmra.mrb[60].mxu1 %v2269_v40  ;;  %1084 = vmatprep.mubr.bf16.mxu0 %v2270_v41 }
  0xbb   :  { %1998 = vmatprep.mubr.bf16.mxu1 %v2272_v42 }
  0xc1   :  { %1085 = vmatmul.mubr.bf16.gmra.mrb[64].mxu0 %v2273_v43 }
  0xc2   :  { %1999 = vmatmul.mubr.bf16.gmra.mrb[64].mxu1 %v2274_v44  ;;  %1092 = vmatprep.mubr.bf16.mxu0 %v2275_v45 }
  0xc3   :  { %2002 = vmatprep.mubr.bf16.mxu1 %v2277_v46 }
  0xc9   :  { %1093 = vmatmul.mubr.bf16.gmra.mrb[68].mxu0 %v2278_v47 }
  0xca   :  { %2003 = vmatmul.mubr.bf16.gmra.mrb[68].mxu1 %v2279_v48  ;;  %1133 = vmatprep.mubr.bf16.mxu0 %v2282_v49 }
  0xcb   :  { %2006 = vmatprep.mubr.bf16.mxu1 %v2283_v50 }
  0xd1   :  { %1134 = vmatmul.mubr.bf16.vlgmr.msra.gmra.mrb[0].mxu0 %v2280_v51 }
  0xd2   :  { %2007 = vmatmul.mubr.bf16.gmra.mrb[72].mxu1 %v2284_v52  ;;  %1141 = vmatprep.mubr.bf16.mxu0 %v2285_v53 }
  0xd3   :  { %2010 = vmatprep.mubr.bf16.mxu1 %v2287_v54 }
  0xd9   :  { %1142 = vmatmul.mubr.bf16.gmra.mrb[4].mxu0 %v2288_v55 }
  0xda   :  { %2011 = vmatmul.mubr.bf16.gmra.mrb[76].mxu1 %v2289_v56  ;;  %1149 = vmatprep.mubr.bf16.mxu0 %v2290_v57 }
  0xdb   :  { %2014 = vmatprep.mubr.bf16.mxu1 %v2292_v58 }
  0xe1   :  { %1150 = vmatmul.mubr.bf16.gmra.mrb[8].mxu0 %v2293_v59 }
  0xe2   :  { %2015 = vmatmul.mubr.bf16.gmra.mrb[80].mxu1 %v2294_v60  ;;  %1157 = vmatprep.mubr.bf16.mxu0 %v2295_v61 }
  0xe3   :  { %2018 = vmatprep.mubr.bf16.mxu1 %v2297_v62 }
  0xe9   :  { %1158 = vmatmul.mubr.bf16.gmra.mrb[12].mxu0 %v2298_v63 }
  0xea   :  { %2019 = vmatmul.mubr.bf16.gmra.mrb[84].mxu1 %v2299_v1  ;;  %1165 = vmatprep.mubr.bf16.mxu0 %v2300_v2 }
  0xf1   :  { %1166 = vmatmul.mubr.bf16.gmra.mrb[16].mxu0 %v2302_v3 }
 0x115   :  { %v1175_v4 = vpop.f32.mrb[0].mxu1 }
 0x116   :  { %v1177_v5 = vpop.f32.mrb[1].mxu1 }
 0x117   :  { %v1178_v6 = vpop.f32.mrb[2].mxu1 }
 0x118   :  { %v1180_v7 = vpop.f32.mrb[3].mxu1 }
 0x11d   :  { %v1183_v8 = vpop.f32.mrb[4].mxu1 }
 0x11e   :  { %v1185_v9 = vpop.f32.mrb[5].mxu1 }
 0x11f   :  { %v1186_v10 = vpop.f32.mrb[6].mxu1 }
 0x120   :  { %v1188_v11 = vpop.f32.mrb[7].mxu1 }
 0x125   :  { %v1191_v12 = vpop.f32.mrb[8].mxu1 }
 0x126   :  { %v1193_v13 = vpop.f32.mrb[9].mxu1 }
 0x127   :  { %v1194_v14 = vpop.f32.mrb[10].mxu1 }
 0x128   :  { %v1196_v15 = vpop.f32.mrb[11].mxu1 }
 0x12d   :  { %v1199_v0 = vpop.f32.mrb[12].mxu1 }
 0x12e   :  { %v1201_v16 = vpop.f32.mrb[13].mxu1 }
 0x12f   :  { %v1202_v17 = vpop.f32.mrb[14].mxu1 }
 0x130   :  { %v1204_v18 = vpop.f32.mrb[15].mxu1 }
 0x135   :  { %v1207_v19 = vpop.f32.mrb[16].mxu1 }
 0x136   :  { %v1209_v20 = vpop.f32.mrb[17].mxu1 }
 0x137   :  { %v1210_v21 = vpop.f32.mrb[18].mxu1 }
 0x138   :  { %v1212_v22 = vpop.f32.mrb[19].mxu1 }
 0x13c   :  { %v998_v24 = vpop.f32.mrb[20].mxu0 }
 0x13d   :  { %v999_v25 = vadd.f32 %v2841_v23, %v998_v24  ;;  %v1000_v26 = vpop.f32.mrb[21].mxu0  ;;  %v2844_v27 = vpop.f32.mrb[20].mxu1 }
 0x13e   :  { %v1001_v28 = vpop.f32.mrb[22].mxu0  ;;  %v1217_v29 = vpop.f32.mrb[21].mxu1 }
 0x13f   :  { %v1002_v30 = vadd.f32 %v2841_v23, %v1001_v28  ;;  %v2847_v31 = vadd.f32 %v1175_v4, %v999_v25  ;;  %v1003_v32 = vpop.f32.mrb[23].mxu0  ;;  %v1218_v33 = vpop.f32.mrb[22].mxu1 }
 0x140   :  { %v1220_v34 = vpop.f32.mrb[23].mxu1 }
 0x141   :  { %v2849_v35 = vadd.f32 %v1178_v6, %v1002_v30 }
 0x144   :  { %v1006_v36 = vpop.f32.mrb[24].mxu0 }
 0x145   :  { %v1007_v37 = vadd.f32 %v2841_v23, %v1006_v36  ;;  %v1008_v38 = vpop.f32.mrb[25].mxu0  ;;  %v2852_v39 = vpop.f32.mrb[24].mxu1 }
 0x146   :  { %v1009_v40 = vpop.f32.mrb[26].mxu0  ;;  %v1225_v41 = vpop.f32.mrb[25].mxu1 }
 0x147   :  { %v1010_v42 = vadd.f32 %v2841_v23, %v1009_v40  ;;  %v2855_v43 = vadd.f32 %v1183_v8, %v1007_v37  ;;  %v1011_v44 = vpop.f32.mrb[27].mxu0  ;;  %v1226_v45 = vpop.f32.mrb[26].mxu1 }
 0x148   :  { %v1228_v46 = vpop.f32.mrb[27].mxu1 }
 0x149   :  { %v2857_v47 = vadd.f32 %v1186_v10, %v1010_v42 }
 0x14c   :  { %v1014_v48 = vpop.f32.mrb[28].mxu0 }
 0x14d   :  { %v1015_v49 = vadd.f32 %v2841_v23, %v1014_v48  ;;  %v1016_v50 = vpop.f32.mrb[29].mxu0  ;;  %v2860_v51 = vpop.f32.mrb[28].mxu1 }
 0x14e   :  { %v1017_v52 = vpop.f32.mrb[30].mxu0  ;;  %v1233_v53 = vpop.f32.mrb[29].mxu1 }
 0x14f   :  { %v1018_v54 = vadd.f32 %v2841_v23, %v1017_v52  ;;  %v2863_v55 = vadd.f32 %v1191_v12, %v1015_v49  ;;  %v1019_v56 = vpop.f32.mrb[31].mxu0  ;;  %v1234_v57 = vpop.f32.mrb[30].mxu1 }
 0x150   :  { %v1236_v58 = vpop.f32.mrb[31].mxu1 }
 0x151   :  { %v2865_v59 = vadd.f32 %v1194_v14, %v1018_v54 }
 0x154   :  { %v1022_v60 = vpop.f32.mrb[32].mxu0 }
 0x155   :  { %v1023_v61 = vadd.f32 %v2841_v23, %v1022_v60  ;;  %v1024_v62 = vpop.f32.mrb[33].mxu0  ;;  %v2868_v63 = vpop.f32.mrb[32].mxu1 }
 0x156   :  { %v1025_v1 = vpop.f32.mrb[34].mxu0  ;;  %v1241_v2 = vpop.f32.mrb[33].mxu1 }
 0x157   :  { %v1026_v3 = vadd.f32 %v2841_v23, %v1025_v1  ;;  %v2871_v4 = vadd.f32 %v1199_v0, %v1023_v61  ;;  %v1027_v5 = vpop.f32.mrb[35].mxu0  ;;  %v1242_v6 = vpop.f32.mrb[34].mxu1 }
 0x158   :  { %v1244_v7 = vpop.f32.mrb[35].mxu1 }
 0x159   :  { %v2873_v8 = vadd.f32 %v1202_v17, %v1026_v3 }
 0x15c   :  { %v1030_v9 = vpop.f32.mrb[36].mxu0 }
 0x15d   :  { %v1031_v10 = vadd.f32 %v2841_v23, %v1030_v9  ;;  %v1032_v11 = vpop.f32.mrb[37].mxu0  ;;  %v2876_v12 = vpop.f32.mrb[36].mxu1 }
 0x15e   :  { %v1033_v13 = vpop.f32.mrb[38].mxu0  ;;  %v1249_v14 = vpop.f32.mrb[37].mxu1 }
 0x15f   :  { %v1034_v15 = vadd.f32 %v2841_v23, %v1033_v13  ;;  %v2879_v16 = vadd.f32 %v1207_v19, %v1031_v10  ;;  %v1035_v18 = vpop.f32.mrb[39].mxu0  ;;  %v1250_v0 = vpop.f32.mrb[38].mxu1 }
 0x160   :  { %v1252_v20 = vpop.f32.mrb[39].mxu1 }
 0x161   :  { %v2881_v22 = vadd.f32 %v1210_v21, %v1034_v15 }
 0x164   :  { %v1038_v24 = vpop.f32.mrb[40].mxu0 }
 0x165   :  { %v1039_v17 = vadd.f32 %v2841_v23, %v1038_v24  ;;  %v1040_v25 = vpop.f32.mrb[41].mxu0  ;;  %v2884_v26 = vpop.f32.mrb[40].mxu1 }
 0x166   :  { %v1041_v28 = vpop.f32.mrb[42].mxu0  ;;  %v1257_v29 = vpop.f32.mrb[41].mxu1 }
 0x167   :  { %v2887_v30 = vadd.f32 %v2844_v27, %v1039_v17  ;;  %v1042_v32 = vadd.f32 %v2841_v23, %v1041_v28  ;;  %v1043_v19 = vpop.f32.mrb[43].mxu0  ;;  %v2890_v34 = vpop.f32.mrb[42].mxu1 }
 0x168   :  { %v1260_v36 = vpop.f32.mrb[43].mxu1 }
 0x169   :  { %v2892_v37 = vadd.f32 %v1218_v33, %v1042_v32 }
 0x16c   :  { %v1046_v21 = vpop.f32.mrb[44].mxu0 }
 0x16d   :  { %v1047_v38 = vadd.f32 %v2841_v23, %v1046_v21  ;;  %v1048_v40 = vpop.f32.mrb[45].mxu0  ;;  %v2895_v41 = vpop.f32.mrb[44].mxu1 }
 0x16e   :  { %v1049_v42 = vpop.f32.mrb[46].mxu0  ;;  %v1265_v44 = vpop.f32.mrb[45].mxu1 }
 0x16f   :  { %v1050_v46 = vadd.f32 %v2841_v23, %v1049_v42  ;;  %v1051_v27 = vpop.f32.mrb[47].mxu0  ;;  %v2898_v48 = vpop.f32.mrb[46].mxu1  ;;  %v2901_v49 = vadd.f32 %v2852_v39, %v1047_v38 }
 0x170   :  { %v1268_v50 = vpop.f32.mrb[47].mxu1 }
 0x171   :  { %v2903_v52 = vadd.f32 %v1226_v45, %v1050_v46 }
 0x174   :  { %v1054_v33 = vpop.f32.mrb[48].mxu0 }
 0x175   :  { %v1055_v53 = vadd.f32 %v2841_v23, %v1054_v33  ;;  %v1056_v54 = vpop.f32.mrb[49].mxu0  ;;  %v2906_v56 = vpop.f32.mrb[48].mxu1 }
 0x176   :  { %v1057_v58 = vpop.f32.mrb[50].mxu0  ;;  %v1273_v60 = vpop.f32.mrb[49].mxu1 }
 0x177   :  { %v1058_v61 = vadd.f32 %v2841_v23, %v1057_v58  ;;  %v1059_v62 = vpop.f32.mrb[51].mxu0  ;;  %v2909_v1 = vpop.f32.mrb[50].mxu1  ;;  %v2912_v2 = vadd.f32 %v2860_v51, %v1055_v53 }
 0x178   :  { %v1276_v39 = vpop.f32.mrb[51].mxu1 }
 0x179   :  { %v2914_v3 = vadd.f32 %v1234_v57, %v1058_v61 }
 0x17c   :  { %v1062_v45 = vpop.f32.mrb[52].mxu0 }
 0x17d   :  { %v1063_v5 = vadd.f32 %v2841_v23, %v1062_v45  ;;  %v1064_v7 = vpop.f32.mrb[53].mxu0  ;;  %v2917_v9 = vpop.f32.mrb[52].mxu1 }
 0x17e   :  { %v1065_v10 = vpop.f32.mrb[54].mxu0  ;;  %v2919_v11 = vpop.f32.mrb[53].mxu1 }
 0x17f   :  { %v1066_v13 = vadd.f32 %v2841_v23, %v1065_v10  ;;  %v1067_v14 = vpop.f32.mrb[55].mxu0  ;;  %v2922_v15 = vpop.f32.mrb[54].mxu1  ;;  %v2925_v51 = vadd.f32 %v2868_v63, %v1063_v5 }
 0x180   :  { %v2927_v18 = vpop.f32.mrb[55].mxu1 }
 0x181   :  { %v2929_v57 = vadd.f32 %v1242_v6, %v1066_v13 }
 0x184   :  { %v1070_v20 = vpop.f32.mrb[56].mxu0 }
 0x185   :  { %v1071_v24 = vadd.f32 %v2841_v23, %v1070_v20  ;;  %v1072_v17 = vpop.f32.mrb[57].mxu0  ;;  %v2932_v25 = vpop.f32.mrb[56].mxu1 }
 0x186   :  { %v1073_v28 = vpop.f32.mrb[58].mxu0  ;;  %v2934_v29 = vpop.f32.mrb[57].mxu1 }
 0x187   :  { %v1074_v32 = vadd.f32 %v2841_v23, %v1073_v28  ;;  %v1075_v19 = vpop.f32.mrb[59].mxu0  ;;  %v2937_v36 = vpop.f32.mrb[58].mxu1  ;;  %v2940_v63 = vadd.f32 %v2876_v12, %v1071_v24 }
 0x188   :  { %v2942_v21 = vpop.f32.mrb[59].mxu1 }
 0x189   :  { %v2944_v6 = vadd.f32 %v1250_v0, %v1074_v32 }
 0x18c   :  { %v1078_v38 = vpop.f32.mrb[60].mxu0 }
 0x18d   :  { %v1079_v40 = vadd.f32 %v2841_v23, %v1078_v38  ;;  %v1996_v42 = vpop.f32.mrb[60].mxu1  ;;  %v1080_v44 = vpop.f32.mrb[61].mxu0 }
 0x18e   :  { %v2948_v46 = vadd.f32 %v1996_v42, %v2847_v31  ;;  %v2950_v27 = vpop.f32.mrb[61].mxu1  ;;  %v1081_v50 = vpop.f32.mrb[62].mxu0 }
 0x18f   :  { %v1082_v33 = vadd.f32 %v2841_v23, %v1081_v50  ;;  %v1997_v53 = vpop.f32.mrb[62].mxu1  ;;  %v1083_v12 = vpop.f32.mrb[63].mxu0  ;;  %v2954_v54 = vadd.f32 %v2884_v26, %v1079_v40 }
 0x190   :  { %v2957_v0 = vadd.f32 %v1997_v53, %v2849_v35  ;;  %v2959_v58 = vpop.f32.mrb[63].mxu1 }
 0x191   :  { %v2962_v60 = vadd.f32 %v2890_v34, %v1082_v33 }
 0x194   :  { %v1086_v31 = vpop.f32.mrb[64].mxu0 }
 0x195   :  { %v1087_v61 = vadd.f32 %v2841_v23, %v1086_v31  ;;  %v2000_v62 = vpop.f32.mrb[64].mxu1  ;;  %v1088_v39 = vpop.f32.mrb[65].mxu0 }
 0x196   :  { %v2966_v45 = vadd.f32 %v2000_v62, %v2863_v55  ;;  %v1360_v5 = vpop.f32.mrb[65].mxu1  ;;  %v1089_v7 = vpop.f32.mrb[66].mxu0 }
 0x197   :  { %v2969_v26 = vadd.f32 %v1360_v5, %v2855_v43  ;;  %v1090_v35 = vadd.f32 %v2841_v23, %v1089_v7  ;;  %v2001_v10 = vpop.f32.mrb[66].mxu1  ;;  %v1091_v13 = vpop.f32.mrb[67].mxu0  ;;  %v2973_v34 = vadd.f32 %v2895_v41, %v1087_v61 }
 0x198   :  { %v2976_v14 = vadd.f32 %v2001_v10, %v2865_v59  ;;  %v1363_v20 = vpop.f32.mrb[67].mxu1 }
 0x199   :  { %v2979_v24 = vadd.f32 %v1363_v20, %v2857_v47  ;;  %v2982_v55 = vadd.f32 %v2898_v48, %v1090_v35 }
 0x19c   :  { %v1094_v17 = vpop.f32.mrb[68].mxu0 }
 0x19d   :  { %v1095_v43 = vadd.f32 %v2841_v23, %v1094_v17  ;;  %v2004_v28 = vpop.f32.mrb[68].mxu1  ;;  %v1096_v32 = vpop.f32.mrb[69].mxu0 }
 0x19e   :  { %v2986_v19 = vadd.f32 %v2004_v28, %v2879_v16  ;;  %v1376_v41 = vpop.f32.mrb[69].mxu1  ;;  %v1097_v38 = vpop.f32.mrb[70].mxu0 }
 0x19f   :  { %v2989_v59 = vadd.f32 %v1376_v41, %v2871_v4  ;;  %v1098_v40 = vadd.f32 %v2841_v23, %v1097_v38  ;;  %v2005_v47 = vpop.f32.mrb[70].mxu1  ;;  %v1099_v42 = vpop.f32.mrb[71].mxu0  ;;  %v1272_v48 = vadd.f32 %v2906_v56, %v1095_v43 }
 0x1a0   :  { %v2994_v44 = vadd.f32 %v2005_v47, %v2881_v22  ;;  %v1379_v50 = vpop.f32.mrb[71].mxu1 }
 0x1a1   :  { %v2997_v33 = vadd.f32 %v1379_v50, %v2873_v8  ;;  %v3000_v16 = vadd.f32 %v2909_v1, %v1098_v40 }
 0x1a4   :  { %v1135_v53 = vpop.f32.mrb[0].mxu0 }
 0x1a5   :  { %v2054_v4 = vadd.f32 %v2841_v23, %v1135_v53  ;;  %v2008_v12 = vpop.f32.mrb[72].mxu1  ;;  %v1137_v31 = vpop.f32.mrb[1].mxu0 }
 0x1a6   :  { %v3004_v61 = vadd.f32 %v2008_v12, %v2901_v49  ;;  %v1392_v62 = vpop.f32.mrb[73].mxu1  ;;  %v1138_v56 = vpop.f32.mrb[2].mxu0 }
 0x1a7   :  { %v3007_v22 = vadd.f32 %v2054_v4, %v2919_v11  ;;  %v3010_v39 = vadd.f32 %v1392_v62, %v2887_v30  ;;  %v2055_v8 = vadd.f32 %v2841_v23, %v1138_v56  ;;  %v2009_v1 = vpop.f32.mrb[74].mxu1  ;;  %v1140_v5 = vpop.f32.mrb[3].mxu0 }
 0x1a8   :  { %v3014_v7 = vadd.f32 %v2009_v1, %v2903_v52  ;;  %v1395_v35 = vpop.f32.mrb[75].mxu1 }
 0x1a9   :  { %v3017_v10 = vadd.f32 %v2055_v8, %v2927_v18  ;;  %v3020_v49 = vadd.f32 %v1395_v35, %v2892_v37 }
 0x1ac   :  { %v1143_v13 = vpop.f32.mrb[4].mxu0 }
 0x1ad   :  { %v2056_v11 = vadd.f32 %v2841_v23, %v1143_v13  ;;  %v2012_v20 = vpop.f32.mrb[76].mxu1  ;;  %v1145_v30 = vpop.f32.mrb[5].mxu0 }
 0x1ae   :  { %v3024_v17 = vadd.f32 %v2012_v20, %v2925_v51  ;;  %v1408_v43 = vpop.f32.mrb[77].mxu1  ;;  %v1146_v28 = vpop.f32.mrb[6].mxu0 }
 0x1af   :  { %v3027_v52 = vadd.f32 %v2056_v11, %v2917_v9  ;;  %v3030_v32 = vadd.f32 %v1408_v43, %v2912_v2  ;;  %v2057_v18 = vadd.f32 %v2841_v23, %v1146_v28  ;;  %v2013_v37 = vpop.f32.mrb[78].mxu1  ;;  %v1148_v41 = vpop.f32.mrb[7].mxu0  ;;  %v1455_v9 = vadd.f32 %v3017_v10, %v3007_v22 }
 0x1b0   :  { %v3034_v38 = vadd.f32 %v2013_v37, %v2929_v57  ;;  %v1411_v40 = vpop.f32.mrb[79].mxu1 }
 0x1b1   :  { %v3037_v47 = vadd.f32 %v2057_v18, %v2922_v15  ;;  %v3040_v51 = vadd.f32 %v1411_v40, %v2914_v3  ;;  %v1456_v31 = vadd.f32 %v1455_v9, %v3027_v52 }
 0x1b4   :  { %v1151_v42 = vpop.f32.mrb[8].mxu0 }
 0x1b5   :  { %v2058_v2 = vadd.f32 %v2841_v23, %v1151_v42  ;;  %v2016_v50 = vpop.f32.mrb[80].mxu1  ;;  %v1153_v53 = vpop.f32.mrb[9].mxu0 }
 0x1b6   :  { %v3046_v4 = vadd.f32 %v2016_v50, %v2954_v54  ;;  %v1424_v57 = vpop.f32.mrb[81].mxu1  ;;  %v1154_v12 = vpop.f32.mrb[10].mxu0 }
 0x1b7   :  { %v3050_v15 = vadd.f32 %v2058_v2, %v2934_v29  ;;  %v3053_v3 = vadd.f32 %v1424_v57, %v2940_v63  ;;  %v2059_v62 = vadd.f32 %v2841_v23, %v1154_v12  ;;  %v2017_v56 = vpop.f32.mrb[82].mxu1  ;;  %v1156_v8 = vpop.f32.mrb[11].mxu0  ;;  %v1457_v29 = vadd.f32 %v1456_v31, %v3037_v47 }
 0x1b8   :  { %v3057_v1 = vadd.f32 %v2017_v56, %v2962_v60  ;;  %v1427_v5 = vpop.f32.mrb[83].mxu1 }
 0x1b9   :  { %v3060_v54 = vadd.f32 %v2059_v62, %v2942_v21  ;;  %v3063_v35 = vadd.f32 %v1427_v5, %v2944_v6  ;;  %v1458_v63 = vadd.f32 %v1457_v29, %v3050_v15 }
 0x1bb   :  { %v1459_v9 = vadd.f32 %v1458_v63, %v3060_v54 }
 0x1bc   :  { %v1159_v13 = vpop.f32.mrb[12].mxu0 }
 0x1bd   :  { %v2060_v11 = vadd.f32 %v2841_v23, %v1159_v13  ;;  %v2020_v20 = vpop.f32.mrb[84].mxu1  ;;  %v1161_v30 = vpop.f32.mrb[13].mxu0 }
 0x1be   :  { %v3068_v43 = vadd.f32 %v2020_v20, %v1272_v48  ;;  %v1440_v60 = vpop.f32.mrb[85].mxu1  ;;  %v1162_v28 = vpop.f32.mrb[14].mxu0 }
 0x1bf   :  { %v3071_v18 = vadd.f32 %v2060_v11, %v2932_v25  ;;  %v3074_v21 = vadd.f32 %v1440_v60, %v2973_v34  ;;  %v2061_v6 = vadd.f32 %v2841_v23, %v1162_v28  ;;  %v2021_v37 = vpop.f32.mrb[86].mxu1  ;;  %v1164_v41 = vpop.f32.mrb[15].mxu0 }
 0x1c0   :  { %v3078_v40 = vadd.f32 %v2021_v37, %v3000_v16  ;;  %v1443_v42 = vpop.f32.mrb[87].mxu1 }
 0x1c1   :  { %v3082_v48 = vadd.f32 %v2061_v6, %v2937_v36  ;;  %v3085_v2 = vadd.f32 %v1443_v42, %v2982_v55  ;;  %v1460_v25 = vadd.f32 %v1459_v9, %v3071_v18 }
 0x1c3   :  { %v1461_v12 = vadd.f32 %v1460_v25, %v3082_v48 }
 0x1c4   :  { %v1167_v34 = vpop.f32.mrb[16].mxu0 }
 0x1c5   :  { %v2062_v50 = vadd.f32 %v2841_v23, %v1167_v34  ;;  %v1169_v53 = vpop.f32.mrb[17].mxu0 }
 0x1c6   :  { %v1170_v57 = vpop.f32.mrb[18].mxu0 }
 0x1c7   :  { %v3091_v16 = vadd.f32 %v2062_v50, %v2950_v27  ;;  %v2063_v31 = vadd.f32 %v2841_v23, %v1170_v57  ;;  %v1172_v62 = vpop.f32.mrb[19].mxu0 }
 0x1c9   :  { %v1462_v36 = vadd.f32 %v1461_v12, %v3091_v16  ;;  %v3096_v55 = vadd.f32 %v2063_v31, %v2959_v58 }
 0x1cb   :  { %v1463_v56 = vadd.f32 %v1462_v36, %v3096_v55 }
 0x1cd   :  { %v1464_v8 = vadd.f32 %v1463_v56, %v2948_v46 }
 0x1cf   :  { %v1465_v5 = vadd.f32 %v1464_v8, %v2957_v0 }
 0x1d1   :  { %v1466_v29 = vadd.f32 %v1465_v5, %v2969_v26 }
 0x1d3   :  { %v1467_v13 = vadd.f32 %v1466_v29, %v2979_v24 }
 0x1d5   :  { %v1468_v27 = vadd.f32 %v1467_v13, %v2966_v45 }
 0x1d7   :  { %v1469_v23 = vadd.f32 %v1468_v27, %v2976_v14 }
 0x1d9   :  { %v1470_v63 = vadd.f32 %v1469_v23, %v2989_v59 }
 0x1db   :  { %v1471_v11 = vadd.f32 %v1470_v63, %v2997_v33 }
 0x1dd   :  { %v1472_v58 = vadd.f32 %v1471_v11, %v2986_v19 }
 0x1df   :  { %v1473_v20 = vadd.f32 %v1472_v58, %v2994_v44 }
 0x1e1   :  { %v1474_v30 = vadd.f32 %v1473_v20, %v3010_v39 }
 0x1e3   :  { %v1475_v60 = vadd.f32 %v1474_v30, %v3020_v49 }
 0x1e5   :  { %v1476_v28 = vadd.f32 %v1475_v60, %v3004_v61 }
 0x1e7   :  { %v1477_v6 = vadd.f32 %v1476_v28, %v3014_v7 }
 0x1e9   :  { %v1478_v37 = vadd.f32 %v1477_v6, %v3030_v32 }
 0x1eb   :  { %v1479_v41 = vadd.f32 %v1478_v37, %v3040_v51 }
 0x1ed   :  { %v1480_v42 = vadd.f32 %v1479_v41, %v3024_v17 }
 0x1ef   :  { %v1481_v9 = vadd.f32 %v1480_v42, %v3034_v38 }
 0x1f1   :  { %v1482_v25 = vadd.f32 %v1481_v9, %v3053_v3 }
 0x1f3   :  { %v1483_v34 = vadd.f32 %v1482_v25, %v3063_v35 }
 0x1f5   :  { %v1484_v50 = vadd.f32 %v1483_v34, %v3046_v4 }
 0x1f7   :  { %v1485_v53 = vadd.f32 %v1484_v50, %v3057_v1 }
 0x1f9   :  { %v1486_v57 = vadd.f32 %v1485_v53, %v3074_v21 }
 0x1fb   :  { %v1487_v12 = vadd.f32 %v1486_v57, %v3085_v2 }
 0x1fd   :  { %v1488_v31 = vadd.f32 %v1487_v12, %v3068_v43 }
 0x1ff   :  { %v1489_v62 = vadd.f32 %v1488_v31, %v3078_v40 }
 0x201   :  { %v1490_v36 = vrot.slane %v1489_v62, 4 }
 0x203   :  { %v1491_v56 = vadd.f32 %v1490_v36, %v1489_v62 }
 0x205   :  { %v1492_v8 = vrot.slane %v1491_v56, 2 }
 0x207   :  { %v1493_v5 = vadd.f32 %v1492_v8, %v1491_v56 }
 0x209   :  { %v1494_v29 = vrot.slane %v1493_v5, 1 }
 0x20b   :  { %v1495_v13 = vadd.f32 %v1494_v29, %v1493_v5 }
 0x20d   :  { %v1496_v27 = vmul.f32 0.0034722222, %v1495_v13 }
 0x20f   :  { %v3126_v23 = vsub.f32 %v2979_v24, %v1496_v27  ;;  %v3129_v63 = vsub.f32 %v2966_v45, %v1496_v27  ;;  %v3132_v11 = vsub.f32 %v2976_v14, %v1496_v27  ;;  %v3135_v58 = vsub.f32 %v2989_v59, %v1496_v27 }
 0x210   :  { %v3138_v20 = vsub.f32 %v2997_v33, %v1496_v27  ;;  %v3141_v30 = vsub.f32 %v2986_v19, %v1496_v27  ;;  %v3144_v60 = vsub.f32 %v2994_v44, %v1496_v27  ;;  %v3147_v24 = vsub.f32 %v3010_v39, %v1496_v27 }
 0x211   :  { %v3150_v45 = vsub.f32 %v3020_v49, %v1496_v27  ;;  %v3153_v14 = vsub.f32 %v3004_v61, %v1496_v27  ;;  %v3156_v59 = vsub.f32 %v3014_v7, %v1496_v27  ;;  %v3159_v33 = vsub.f32 %v3030_v32, %v1496_v27 }
 0x212   :  { %v3162_v19 = vsub.f32 %v3040_v51, %v1496_v27  ;;  %v3165_v44 = vsub.f32 %v3024_v17, %v1496_v27  ;;  %v3168_v39 = vsub.f32 %v3034_v38, %v1496_v27  ;;  %v3171_v49 = vsub.f32 %v3053_v3, %v1496_v27 }
 0x213   :  { %v3174_v61 = vsub.f32 %v3063_v35, %v1496_v27  ;;  %v3177_v7 = vsub.f32 %v3046_v4, %v1496_v27  ;;  %v3180_v32 = vsub.f32 %v3057_v1, %v1496_v27  ;;  %v3183_v51 = vsub.f32 %v3074_v21, %v1496_v27 }
 0x214   :  { %v3186_v17 = vsub.f32 %v3085_v2, %v1496_v27  ;;  %v3189_v38 = vsub.f32 %v3068_v43, %v1496_v27  ;;  %v3192_v3 = vsub.f32 %v3078_v40, %v1496_v27  ;;  %v3195_v35 = vsub.f32 %v3007_v22, %v1496_v27 }
 0x215   :  { %v3198_v4 = vsub.f32 %v3017_v10, %v1496_v27  ;;  %v3201_v1 = vsub.f32 %v3027_v52, %v1496_v27  ;;  %v3208_v43 = vsub.f32 %v3037_v47, %v1496_v27  ;;  %v3211_v40 = vsub.f32 %v3050_v15, %v1496_v27 }
 0x216   :  { %v1533_v21 = vmul.f32 %v3195_v35, %v3195_v35  ;;  %v3216_v28 = vsub.f32 %v3060_v54, %v1496_v27  ;;  %v3221_v37 = vsub.f32 %v3071_v18, %v1496_v27  ;;  %v3226_v15 = vsub.f32 %v3082_v48, %v1496_v27 }
 0x217   :  { %v1534_v2 = vmul.f32 %v3198_v4, %v3198_v4  ;;  %v1535_v22 = vmul.f32 %v3201_v1, %v3201_v1  ;;  %v1536_v52 = vmul.f32 %v3208_v43, %v3208_v43  ;;  %v1537_v47 = vmul.f32 %v3211_v40, %v3211_v40 }
 0x218   :  { %v1538_v42 = vmul.f32 %v3216_v28, %v3216_v28  ;;  %v3231_v54 = vsub.f32 %v3091_v16, %v1496_v27  ;;  %v1539_v25 = vmul.f32 %v3221_v37, %v3221_v37  ;;  %v3236_v18 = vsub.f32 %v3096_v55, %v1496_v27 }
 0x219   :  { %v1569_v10 = vadd.f32 %v1534_v2, %v1533_v21  ;;  %v1540_v50 = vmul.f32 %v3226_v15, %v3226_v15  ;;  %v3241_v48 = vsub.f32 %v2948_v46, %v1496_v27  ;;  %v3246_v16 = vsub.f32 %v2957_v0, %v1496_v27 }
 0x21a   :  { %v1541_v57 = vmul.f32 %v3231_v54, %v3231_v54  ;;  %v1542_v31 = vmul.f32 %v3236_v18, %v3236_v18  ;;  %v3251_v55 = vsub.f32 %v2969_v26, %v1496_v27  ;;  %v1546_v29 = vmul.f32 %v3126_v23, %v3126_v23 }
 0x21b   :  { %v1570_v6 = vadd.f32 %v1569_v10, %v1535_v22  ;;  %v1543_v36 = vmul.f32 %v3241_v48, %v3241_v48  ;;  %v1544_v46 = vmul.f32 %v3246_v16, %v3246_v16  ;;  %v1547_v26 = vmul.f32 %v3129_v63, %v3129_v63 }
 0x21c   :  { %v1545_v5 = vmul.f32 %v3251_v55, %v3251_v55  ;;  %v1548_v21 = vmul.f32 %v3132_v11, %v3132_v11  ;;  %v1549_v22 = vmul.f32 %v3135_v58, %v3135_v58 }
 0x21d   :  { %v1571_v41 = vadd.f32 %v1570_v6, %v1536_v52  ;;  %v1550_v52 = vmul.f32 %v3138_v20, %v3138_v20 }
 0x21f   :  { %v1572_v9 = vadd.f32 %v1571_v41, %v1537_v47  ;;  %v1551_v47 = vmul.f32 %v3141_v30, %v3141_v30 }
 0x221   :  { %v1573_v34 = vadd.f32 %v1572_v9, %v1538_v42  ;;  %v1552_v42 = vmul.f32 %v3144_v60, %v3144_v60 }
 0x223   :  { %v1574_v53 = vadd.f32 %v1573_v34, %v1539_v25  ;;  %v1553_v25 = vmul.f32 %v3147_v24, %v3147_v24 }
 0x225   :  { %v1575_v12 = vadd.f32 %v1574_v53, %v1540_v50  ;;  %v1554_v50 = vmul.f32 %v3150_v45, %v3150_v45 }
 0x227   :  { %v1576_v62 = vadd.f32 %v1575_v12, %v1541_v57  ;;  %v1555_v57 = vmul.f32 %v3153_v14, %v3153_v14 }
 0x229   :  { %v1577_v56 = vadd.f32 %v1576_v62, %v1542_v31  ;;  %v1556_v31 = vmul.f32 %v3156_v59, %v3156_v59 }
 0x22b   :  { %v1578_v8 = vadd.f32 %v1577_v56, %v1543_v36  ;;  %v1557_v36 = vmul.f32 %v3159_v33, %v3159_v33 }
 0x22d   :  { %v1579_v0 = vadd.f32 %v1578_v8, %v1544_v46  ;;  %v1558_v46 = vmul.f32 %v3162_v19, %v3162_v19 }
 0x22f   :  { %v1580_v13 = vadd.f32 %v1579_v0, %v1545_v5  ;;  %v1559_v5 = vmul.f32 %v3165_v44, %v3165_v44 }
 0x231   :  { %v1581_v27 = vadd.f32 %v1580_v13, %v1546_v29  ;;  %v1560_v29 = vmul.f32 %v3168_v39, %v3168_v39 }
 0x233   :  { %v1582_v2 = vadd.f32 %v1581_v27, %v1547_v26  ;;  %v1561_v26 = vmul.f32 %v3171_v49, %v3171_v49 }
 0x235   :  { %v1583_v10 = vadd.f32 %v1582_v2, %v1548_v21  ;;  %v1562_v21 = vmul.f32 %v3174_v61, %v3174_v61 }
 0x237   :  { %v1584_v6 = vadd.f32 %v1583_v10, %v1549_v22  ;;  %v1563_v22 = vmul.f32 %v3177_v7, %v3177_v7 }
 0x239   :  { %v1585_v41 = vadd.f32 %v1584_v6, %v1550_v52  ;;  %v1564_v52 = vmul.f32 %v3180_v32, %v3180_v32 }
 0x23b   :  { %v1586_v9 = vadd.f32 %v1585_v41, %v1551_v47  ;;  %v1565_v47 = vmul.f32 %v3183_v51, %v3183_v51 }
 0x23d   :  { %v1587_v34 = vadd.f32 %v1586_v9, %v1552_v42  ;;  %v1566_v42 = vmul.f32 %v3186_v17, %v3186_v17 }
 0x23f   :  { %v1588_v53 = vadd.f32 %v1587_v34, %v1553_v25  ;;  %v1567_v25 = vmul.f32 %v3189_v38, %v3189_v38 }
 0x241   :  { %v1589_v12 = vadd.f32 %v1588_v53, %v1554_v50  ;;  %v1568_v50 = vmul.f32 %v3192_v3, %v3192_v3 }
 0x243   :  { %v1590_v62 = vadd.f32 %v1589_v12, %v1555_v57 }
 0x245   :  { %v1591_v56 = vadd.f32 %v1590_v62, %v1556_v31 }
 0x247   :  { %v1592_v8 = vadd.f32 %v1591_v56, %v1557_v36 }
 0x249   :  { %v1593_v0 = vadd.f32 %v1592_v8, %v1558_v46 }
 0x24b   :  { %v1594_v13 = vadd.f32 %v1593_v0, %v1559_v5  ;;  %v1616_v0 = vlaneseq }
 0x24d   :  { %v1595_v27 = vadd.f32 %v1594_v13, %v1560_v29  ;;  %v1617_v29 = vshrl.u32 %v1616_v0, 7  ;;  %v1611_v13 = vld [vmem:[%s3594_s3] sm:$0x1] }
 0x24f   :  { %v1596_v2 = vadd.f32 %v1595_v27, %v1561_v26  ;;  %v1618_v26 = vsub.s32 0, %v1617_v29 }
 0x251   :  { %v1597_v10 = vadd.f32 %v1596_v2, %v1562_v21 }
 0x253   :  { %v1598_v6 = vadd.f32 %v1597_v10, %v1563_v22 }
 0x255   :  { %v1599_v41 = vadd.f32 %v1598_v6, %v1564_v52 }
 0x257   :  { %v1600_v9 = vadd.f32 %v1599_v41, %v1565_v47 }
 0x259   :  { %v1601_v34 = vadd.f32 %v1600_v9, %v1566_v42 }
 0x25b   :  { %v1602_v53 = vadd.f32 %v1601_v34, %v1567_v25 }
 0x25d   :  { %v1603_v57 = vadd.f32 %v1602_v53, %v1568_v50 }
 0x25f   :  { %v1604_v12 = vrot.slane %v1603_v57, 4 }
 0x261   :  { %v1605_v31 = vadd.f32 %v1604_v12, %v1603_v57 }
 0x263   :  { %v1606_v62 = vrot.slane %v1605_v31, 2 }
 0x265   :  { %v1607_v36 = vadd.f32 %v1606_v62, %v1605_v31 }
 0x267   :  { %v1608_v56 = vrot.slane %v1607_v36, 1 }
 0x269   :  { %v1609_v46 = vadd.f32 %v1608_v56, %v1607_v36 }
 0x26b   :  { %v1610_v8 = vmul.f32 0.0034722222, %v1609_v46 }
 0x26d   :  { %v1612_v5 = vadd.f32 1e-05, %v1610_v8 }
 0x26f   :  { %2303 = vrsqrt.f32 %v1612_v5 }
 0x279   :  { %v2304_v27 = vpop.eup %2303 }
 0x27a   :  { %v1614_v21 = vmul.f32 %v2304_v27, %v1611_v13 }
 0x27c   :  { %v1619_v2 = vrot.slane %v1614_v21, %v1618_v26 }
 0x27e   :  { %v1621_v22 = vmul.f32 %v1619_v2, %v3195_v35  ;;  %v1622_v10 = vmul.f32 %v1619_v2, %v3198_v4  ;;  %v1623_v52 = vmul.f32 %v1619_v2, %v3201_v1  ;;  %v1624_v6 = vmul.f32 %v1619_v2, %v3208_v43 }
 0x27f   :  { %v1625_v47 = vmul.f32 %v1619_v2, %v3211_v40  ;;  %v1626_v41 = vmul.f32 %v1619_v2, %v3216_v28  ;;  %v1627_v42 = vmul.f32 %v1619_v2, %v3221_v37  ;;  %v1628_v9 = vmul.f32 %v1619_v2, %v3226_v15 }
 0x280   :  { %v1629_v25 = vmul.f32 %v1619_v2, %v3231_v54  ;;  %v1630_v34 = vmul.f32 %v1619_v2, %v3236_v18  ;;  %v1631_v35 = vmul.f32 %v1619_v2, %v3241_v48  ;;  %v1632_v4 = vmul.f32 %v1619_v2, %v3246_v16 }
 0x281   :  { %v1633_v1 = vmul.f32 %v1619_v2, %v3251_v55  ;;  %v1634_v43 = vmul.f32 %v1619_v2, %v3126_v23  ;;  %v1635_v40 = vmul.f32 %v1619_v2, %v3129_v63  ;;  %v1636_v28 = vmul.f32 %v1619_v2, %v3132_v11 }
 0x282   :  { %v1637_v37 = vmul.f32 %v1619_v2, %v3135_v58  ;;  %v1638_v15 = vmul.f32 %v1619_v2, %v3138_v20  ;;  %v1639_v54 = vmul.f32 %v1619_v2, %v3141_v30  ;;  %v1640_v18 = vmul.f32 %v1619_v2, %v3144_v60  ;;  %v1943_v58 = vld [vmem:[%s3595_s4] ss:$0 sm:$0xff] }
 0x283   :  { %v1641_v48 = vmul.f32 %v1619_v2, %v3147_v24  ;;  %v1642_v16 = vmul.f32 %v1619_v2, %v3150_v45  ;;  %v1643_v55 = vmul.f32 %v1619_v2, %v3153_v14  ;;  %v1644_v23 = vmul.f32 %v1619_v2, %v3156_v59 }
 0x284   :  { %v1645_v63 = vmul.f32 %v1619_v2, %v3159_v33  ;;  %v1646_v11 = vmul.f32 %v1619_v2, %v3162_v19  ;;  %v1649_v20 = vmul.f32 %v1619_v2, %v3171_v49  ;;  %v1650_v30 = vmul.f32 %v1619_v2, %v3174_v61 }
 0x285   :  { %v1651_v60 = vmul.f32 %v1619_v2, %v3177_v7  ;;  %v1652_v24 = vmul.f32 %v1619_v2, %v3180_v32  ;;  %v1653_v45 = vmul.f32 %v1619_v2, %v3183_v51  ;;  %v1654_v14 = vmul.f32 %v1619_v2, %v3186_v17 }
 0x286   :  { %v1655_v59 = vmul.f32 %v1619_v2, %v3189_v38  ;;  %v1656_v33 = vmul.f32 %v1619_v2, %v3192_v3  ;;  %v1647_v19 = vmul.f32 %v1619_v2, %v3165_v44  ;;  %v1648_v50 = vmul.f32 %v1619_v2, %v3168_v39 }
 0x287   :  { %v1664_v53 = vadd.f32 %v1943_v58, %v1621_v22  ;;  %v1665_v49 = vadd.f32 %v1943_v58, %v1622_v10  ;;  %v3347_v57 = vadd.f32 %v1943_v58, %v1623_v52  ;;  %v3349_v61 = vadd.f32 %v1943_v58, %v1624_v6 }
 0x288   :  { %v3351_v7 = vadd.f32 %v1943_v58, %v1625_v47  ;;  %v3353_v32 = vadd.f32 %v1943_v58, %v1626_v41  ;;  %v3355_v51 = vadd.f32 %v1943_v58, %v1627_v42  ;;  %v3357_v17 = vadd.f32 %v1943_v58, %v1628_v9 }
 0x289   :  { %v3359_v38 = vadd.f32 %v1943_v58, %v1629_v25  ;;  %v3361_v3 = vadd.f32 %v1943_v58, %v1630_v34  ;;  %v3363_v44 = vadd.f32 %v1943_v58, %v1631_v35  ;;  %v3365_v39 = vadd.f32 %v1943_v58, %v1632_v4 }
 0x28a   :  { %v3367_v12 = vadd.f32 %v1943_v58, %v1633_v1  ;;  %v3369_v31 = vadd.f32 %v1943_v58, %v1634_v43  ;;  %v3371_v62 = vadd.f32 %v1943_v58, %v1635_v40  ;;  %v3373_v36 = vadd.f32 %v1943_v58, %v1636_v28 }
 0x28b   :  { %v3375_v56 = vadd.f32 %v1943_v58, %v1637_v37  ;;  %v3377_v46 = vadd.f32 %v1943_v58, %v1638_v15  ;;  %v3379_v8 = vadd.f32 %v1943_v58, %v1639_v54  ;;  %v3381_v5 = vadd.f32 %v1943_v58, %v1640_v18 }
 0x28c   :  { %v3383_v0 = vadd.f32 %v1943_v58, %v1641_v48  ;;  %v3385_v29 = vadd.f32 %v1943_v58, %v1642_v16  ;;  %v3387_v13 = vadd.f32 %v1943_v58, %v1643_v55  ;;  %v3389_v26 = vadd.f32 %v1943_v58, %v1644_v23 }
 0x28d   :  { %v3391_v27 = vadd.f32 %v1943_v58, %v1645_v63  ;;  %v3393_v21 = vadd.f32 %v1943_v58, %v1646_v11  ;;  %v3395_v2 = vadd.f32 %v1943_v58, %v1647_v19  ;;  %v3397_v22 = vadd.f32 %v1943_v58, %v1648_v50 }
 0x28e   :  { %v3399_v10 = vadd.f32 %v1943_v58, %v1649_v20  ;;  %v3401_v52 = vadd.f32 %v1943_v58, %v1650_v30  ;;  %v3403_v6 = vadd.f32 %v1943_v58, %v1651_v60  ;;  %v3405_v47 = vadd.f32 %v1943_v58, %v1652_v24 }
 0x28f   :  { %v3407_v41 = vadd.f32 %v1943_v58, %v1653_v45  ;;  %v3409_v42 = vadd.f32 %v1943_v58, %v1654_v14  ;;  %v3411_v9 = vadd.f32 %v1943_v58, %v1655_v59  ;;  %v1700_v25 = vmul.f32 0.1, %v1664_v53 }
 0x290   :  { %v1701_v34 = vmul.f32 0.1, %v1665_v49  ;;  %v1702_v35 = vmul.f32 0.1, %v3347_v57  ;;  %v3414_v4 = vadd.f32 %v1943_v58, %v1656_v33  ;;  %v1703_v1 = vmul.f32 0.1, %v3349_v61 }
 0x291   :  { %v1704_v43 = vmul.f32 0.1, %v3351_v7  ;;  %v1705_v40 = vmul.f32 0.1, %v3353_v32  ;;  %v1706_v28 = vmul.f32 0.1, %v3355_v51  ;;  %v1736_v54 = vmax.f32 %v1664_v53, %v1700_v25 }
 0x292   :  { %v1707_v37 = vmul.f32 0.1, %v3357_v17  ;;  %v1708_v15 = vmul.f32 0.1, %v3359_v38  ;;  %v1709_v18 = vmul.f32 0.1, %v3361_v3  ;;  %v1737_v55 = vmax.f32 %v1665_v49, %v1701_v34 }
 0x293   :  { %v1710_v48 = vmul.f32 0.1, %v3363_v44  ;;  %v1711_v16 = vmul.f32 0.1, %v3365_v39  ;;  %v1712_v23 = vmul.f32 0.1, %v3367_v12  ;;  %v1738_v58 = vmax.f32 %v3347_v57, %v1702_v35  ;;  %1772 = vst [vmem:[%s3596_s5] sm:$0xff] %v1736_v54 }
 0x294   :  { %v1713_v63 = vmul.f32 0.1, %v3369_v31  ;;  %v1714_v11 = vmul.f32 0.1, %v3371_v62  ;;  %v1715_v20 = vmul.f32 0.1, %v3373_v36  ;;  %v1739_v24 = vmax.f32 %v3349_v61, %v1703_v1 }
 0x295   :  { %v1716_v30 = vmul.f32 0.1, %v3375_v56  ;;  %v1717_v60 = vmul.f32 0.1, %v3377_v46  ;;  %1773 = vst [vmem:[%s3596_s5 + $0x8] sm:$0xff] %v1737_v55  ;;  %v1740_v33 = vmax.f32 %v3351_v7, %v1704_v43  ;;  %1774 = vst [vmem:[%s3596_s5 + $0x10] sm:$0xff] %v1738_v58  ;;  %v1741_v49 = vmax.f32 %v3353_v32, %v1705_v40 }
 0x296   :  { %v1718_v45 = vmul.f32 0.1, %v3379_v8  ;;  %v1719_v14 = vmul.f32 0.1, %v3381_v5  ;;  %v1720_v59 = vmul.f32 0.1, %v3383_v0  ;;  %v1742_v25 = vmax.f32 %v3355_v51, %v1706_v28 }
 0x297   :  { %v1721_v19 = vmul.f32 0.1, %v3385_v29  ;;  %v1722_v50 = vmul.f32 0.1, %v3387_v13  ;;  %v1723_v53 = vmul.f32 0.1, %v3389_v26  ;;  %v1743_v1 = vmax.f32 %v3357_v17, %v1707_v37 }
 0x298   :  { %1775 = vst [vmem:[%s3596_s5 + $0x18] sm:$0xff] %v1739_v24  ;;  %v1724_v57 = vmul.f32 0.1, %v3391_v27  ;;  %v1725_v61 = vmul.f32 0.1, %v3393_v21  ;;  %1776 = vst [vmem:[%s3596_s5 + $0x20] sm:$0xff] %v1740_v33  ;;  %v1744_v28 = vmax.f32 %v3359_v38, %v1708_v15  ;;  %v1745_v55 = vmax.f32 %v3361_v3, %v1709_v18 }
 0x299   :  { %v1726_v7 = vmul.f32 0.1, %v3395_v2  ;;  %v1727_v34 = vmul.f32 0.1, %v3397_v22  ;;  %v1728_v32 = vmul.f32 0.1, %v3399_v10  ;;  %v1746_v58 = vmax.f32 %v3363_v44, %v1710_v48 }
 0x29a   :  { %v1729_v35 = vmul.f32 0.1, %v3401_v52  ;;  %1777 = vst [vmem:[%s3596_s5 + $0x28] sm:$0xff] %v1741_v49  ;;  %v1730_v43 = vmul.f32 0.1, %v3403_v6  ;;  %1778 = vst [vmem:[%s3596_s5 + $0x30] sm:$0xff] %v1742_v25  ;;  %v1747_v38 = vmax.f32 %v3365_v39, %v1711_v16  ;;  %v1748_v15 = vmax.f32 %v3367_v12, %v1712_v23 }
 0x29b   :  { %v1731_v51 = vmul.f32 0.1, %v3405_v47  ;;  %v1732_v40 = vmul.f32 0.1, %v3407_v41  ;;  %v1733_v54 = vmul.f32 0.1, %v3409_v42  ;;  %v1749_v24 = vmax.f32 %v3369_v31, %v1713_v63 }
 0x29c   :  { %v1734_v17 = vmul.f32 0.1, %v3411_v9  ;;  %v1735_v37 = vmul.f32 0.1, %v3414_v4  ;;  %1779 = vst [vmem:[%s3596_s5 + $0x38] sm:$0xff] %v1743_v1  ;;  %1780 = vst [vmem:[%s3596_s5 + $0x40] sm:$0xff] %v1744_v28  ;;  %v1750_v33 = vmax.f32 %v3371_v62, %v1714_v11  ;;  %v1751_v3 = vmax.f32 %v3373_v36, %v1715_v20 }
 0x29d   :  { %v1752_v18 = vmax.f32 %v3375_v56, %v1716_v30  ;;  %v1753_v49 = vmax.f32 %v3377_v46, %v1717_v60  ;;  %1781 = vst [vmem:[%s3596_s5 + $0x48] sm:$0xff] %v1745_v55  ;;  %v1754_v44 = vmax.f32 %v3379_v8, %v1718_v45  ;;  %v1755_v39 = vmax.f32 %v3381_v5, %v1719_v14 }
 0x29e   :  { %v1756_v12 = vmax.f32 %v3383_v0, %v1720_v59  ;;  %v1757_v31 = vmax.f32 %v3385_v29, %v1721_v19  ;;  %1782 = vst [vmem:[%s3596_s5 + $0x50] sm:$0xff] %v1746_v58  ;;  %1783 = vst [vmem:[%s3596_s5 + $0x58] sm:$0xff] %v1747_v38  ;;  %v1758_v62 = vmax.f32 %v3387_v13, %v1722_v50 }
 0x29f   :  { %1784 = vst [vmem:[%s3596_s5 + $0x60] sm:$0xff] %v1748_v15  ;;  %1785 = vst [vmem:[%s3596_s5 + $0x68] sm:$0xff] %v1749_v24  ;;  %v1759_v36 = vmax.f32 %v3389_v26, %v1723_v53  ;;  %v1760_v56 = vmax.f32 %v3391_v27, %v1724_v57  ;;  %v1761_v46 = vmax.f32 %v3393_v21, %v1725_v61 }
 0x2a0   :  { %1786 = vst [vmem:[%s3596_s5 + $0x70] sm:$0xff] %v1750_v33  ;;  %1787 = vst [vmem:[%s3596_s5 + $0x78] sm:$0xff] %v1751_v3  ;;  %v1762_v8 = vmax.f32 %v3395_v2, %v1726_v7  ;;  %v1763_v5 = vmax.f32 %v3397_v22, %v1727_v34  ;;  %v1764_v0 = vmax.f32 %v3399_v10, %v1728_v32 }
 0x2a1   :  { %1788 = vst [vmem:[%s3596_s5 + $0x80] sm:$0xff] %v1752_v18  ;;  %1789 = vst [vmem:[%s3596_s5 + $0x88] sm:$0xff] %v1753_v49  ;;  %v1765_v29 = vmax.f32 %v3401_v52, %v1729_v35  ;;  %v1766_v13 = vmax.f32 %v3403_v6, %v1730_v43  ;;  %v1767_v26 = vmax.f32 %v3405_v47, %v1731_v51 }
 0x2a2   :  { %1790 = vst [vmem:[%s3596_s5 + $0x90] sm:$0xff] %v1754_v44  ;;  %1791 = vst [vmem:[%s3596_s5 + $0x98] sm:$0xff] %v1755_v39  ;;  %v1768_v27 = vmax.f32 %v3407_v41, %v1732_v40  ;;  %v1769_v21 = vmax.f32 %v3409_v42, %v1733_v54  ;;  %v1770_v2 = vmax.f32 %v3411_v9, %v1734_v17 }
 0x2a3   :  { %1792 = vst [vmem:[%s3596_s5 + $0xa0] sm:$0xff] %v1756_v12  ;;  %1793 = vst [vmem:[%s3596_s5 + $0xa8] sm:$0xff] %v1757_v31  ;;  %v1771_v22 = vmax.f32 %v3414_v4, %v1735_v37 }
 0x2a4   :  { %1794 = vst [vmem:[%s3596_s5 + $0xb0] sm:$0xff] %v1758_v62  ;;  %1795 = vst [vmem:[%s3596_s5 + $0xb8] sm:$0xff] %v1759_v36 }
 0x2a5   :  { %1796 = vst [vmem:[%s3596_s5 + $0xc0] sm:$0xff] %v1760_v56  ;;  %1797 = vst [vmem:[%s3596_s5 + $0xc8] sm:$0xff] %v1761_v46 }
 0x2a6   :  { %1798 = vst [vmem:[%s3596_s5 + $0xd0] sm:$0xff] %v1762_v8  ;;  %1799 = vst [vmem:[%s3596_s5 + $0xd8] sm:$0xff] %v1763_v5 }
 0x2a7   :  { %1800 = vst [vmem:[%s3596_s5 + $0xe0] sm:$0xff] %v1764_v0  ;;  %1801 = vst [vmem:[%s3596_s5 + $0xe8] sm:$0xff] %v1765_v29 }
 0x2a8   :  { %1802 = vst [vmem:[%s3596_s5 + $0xf0] sm:$0xff] %v1766_v13  ;;  %1803 = vst [vmem:[%s3596_s5 + $0xf8] sm:$0xff] %v1767_v26 }
 0x2a9   :  { %1804 = vst [vmem:[%s3596_s5 + $0x100] sm:$0xff] %v1768_v27  ;;  %1805 = vst [vmem:[%s3596_s5 + $0x108] sm:$0xff] %v1769_v21 }
 0x2aa   :  { %1806 = vst [vmem:[%s3596_s5 + $0x110] sm:$0xff] %v1770_v2  ;;  %1807 = vst [vmem:[%s3596_s5 + $0x118] sm:$0xff] %v1771_v22 }

// kernel: encoder_28_forward.6
= control target key start
LH: loop header
LB: loop body
LE: loop exit
PB: predicated region body
PF: predicated region fallthrough
CT: control target
= control target key end

     0   :  { %vm1462_vm0 = vcmask 1041408   ;;  %s2922_s1 = inlined_call_operand.vmem [shape: bf16[1152,256], index: 1, kind: input, shape index: {}]   ;;  %s2923_s0 = inlined_call_operand.vmem [shape: bf16[50,1152], index: 0, kind: input, shape index: {}]   ;;  %s2924_s2 = inlined_call_operand.vmem [shape: f32[1,256], index: 2, kind: input, shape index: {}]   ;;  %s2925_s3 = inlined_call_operand.vmem [shape: f32[1,256], index: 3, kind: input, shape index: {}]   ;;  %s2926_s4 = inlined_call_operand.vmem [shape: f32[1,256], index: 4, kind: input, shape index: {}]   ;;  %s2927_s5 = inlined_call_operand.vmem [shape: f32[50,256], index: 5, kind: output, shape index: {}]  }
   0x1   :  { %v1935_v0 = vld [vmem:[%s2922_s1 + $0x4] ss:$8 sps:$4 sm:$0xff]   ;;  %v1939_v2 = vld [vmem:[%s2922_s1] ss:$8 sps:$4 sm:$0xff]   ;;  %v1941_v4 = vld [vmem:[%s2922_s1 + $0x14] ss:$8 sps:$4 sm:$0xff]  }
   0x2   :  { %v1937_v1 = vld [vmem:[%s2922_s1 + $0x204] ss:$8 sps:$4 sm:$0xff]   ;;  %1102 = vmatprep.subr.bf16.mxu1 %v1935_v0  ;;  %v1940_v3 = vld [vmem:[%s2922_s1 + $0x200] ss:$8 sps:$4 sm:$0xff]   ;;  %v1943_v5 = vld [vmem:[%s2922_s1 + $0x214] ss:$8 sps:$4 sm:$0xff]  }
   0x3   :  { %1244 = vmatprep.subr.bf16.mxu0 %v1937_v1  ;;  %1103 = vmatpush1.bf16.msra.mxu1 %v1939_v2  ;;  %v1945_v6 = vld [vmem:[%s2922_s1 + $0x10] ss:$8 sps:$4 sm:$0xff]   ;;  %v1947_v8 = vld [vmem:[%s2922_s1 + $0x24] ss:$8 sps:$4 sm:$0xff]   ;;  %v1951_v10 = vld [vmem:[%s2922_s1 + $0x20] ss:$8 sps:$4 sm:$0xff]  }
   0x4   :  { %1245 = vmatpush1.bf16.msra.mxu0 %v1940_v3  ;;  %1104 = vmatprep.subr.bf16.mxu1 %v1941_v4  ;;  %v1946_v7 = vld [vmem:[%s2922_s1 + $0x210] ss:$8 sps:$4 sm:$0xff]   ;;  %v1949_v9 = vld [vmem:[%s2922_s1 + $0x224] ss:$8 sps:$4 sm:$0xff]   ;;  %v1952_v11 = vld [vmem:[%s2922_s1 + $0x220] ss:$8 sps:$4 sm:$0xff]  }
   0x5   :  { %1246 = vmatprep.subr.bf16.mxu0 %v1943_v5  ;;  %v1953_v12 = vld [vmem:[%s2922_s1 + $0x34] ss:$8 sps:$4 sm:$0xff]   ;;  %v1957_v14 = vld [vmem:[%s2922_s1 + $0x30] ss:$8 sps:$4 sm:$0xff]   ;;  %v1959_v16 = vld [vmem:[%s2922_s1 + $0x44] ss:$8 sps:$4 sm:$0xff]  }
   0x6   :  { %v1955_v13 = vld [vmem:[%s2922_s1 + $0x234] ss:$8 sps:$4 sm:$0xff]   ;;  %v1958_v15 = vld [vmem:[%s2922_s1 + $0x230] ss:$8 sps:$4 sm:$0xff]   ;;  %v1961_v17 = vld [vmem:[%s2922_s1 + $0x244] ss:$8 sps:$4 sm:$0xff]  }
   0x7   :  { %1105 = vmatpush1.bf16.msra.mxu1 %v1945_v6  ;;  %v1963_v18 = vld [vmem:[%s2922_s1 + $0x40] ss:$8 sps:$4 sm:$0xff]   ;;  %v1965_v20 = vld [vmem:[%s2922_s1 + $0x54] ss:$8 sps:$4 sm:$0xff]   ;;  %v1969_v22 = vld [vmem:[%s2922_s1 + $0x50] ss:$8 sps:$4 sm:$0xff]  }
   0x8   :  { %1247 = vmatpush1.bf16.msra.mxu0 %v1946_v7  ;;  %1106 = vmatprep.subr.bf16.mxu1 %v1947_v8  ;;  %v1964_v19 = vld [vmem:[%s2922_s1 + $0x240] ss:$8 sps:$4 sm:$0xff]   ;;  %v1967_v21 = vld [vmem:[%s2922_s1 + $0x254] ss:$8 sps:$4 sm:$0xff]   ;;  %v1970_v23 = vld [vmem:[%s2922_s1 + $0x250] ss:$8 sps:$4 sm:$0xff]  }
   0x9   :  { %1248 = vmatprep.subr.bf16.mxu0 %v1949_v9  ;;  %v1971_v24 = vld [vmem:[%s2922_s1 + $0x64] ss:$8 sps:$4 sm:$0xff]   ;;  %v1975_v26 = vld [vmem:[%s2922_s1 + $0x60] ss:$8 sps:$4 sm:$0xff]   ;;  %v1977_v28 = vld [vmem:[%s2922_s1 + $0x74] ss:$8 sps:$4 sm:$0xff]  }
   0xa   :  { %v1973_v25 = vld [vmem:[%s2922_s1 + $0x264] ss:$8 sps:$4 sm:$0xff]   ;;  %v1976_v27 = vld [vmem:[%s2922_s1 + $0x260] ss:$8 sps:$4 sm:$0xff]   ;;  %v1979_v29 = vld [vmem:[%s2922_s1 + $0x274] ss:$8 sps:$4 sm:$0xff]  }
   0xb   :  { %1107 = vmatpush1.bf16.msra.mxu1 %v1951_v10  ;;  %v1981_v30 = vld [vmem:[%s2922_s1 + $0x70] ss:$8 sps:$4 sm:$0xff]   ;;  %v1983_v32 = vld [vmem:[%s2922_s1 + $0x84] ss:$8 sps:$4 sm:$0xff]   ;;  %v1987_v34 = vld [vmem:[%s2922_s1 + $0x80] ss:$8 sps:$4 sm:$0xff]  }
   0xc   :  { %1249 = vmatpush1.bf16.msra.mxu0 %v1952_v11  ;;  %1108 = vmatprep.subr.bf16.mxu1 %v1953_v12  ;;  %v1982_v31 = vld [vmem:[%s2922_s1 + $0x270] ss:$8 sps:$4 sm:$0xff]   ;;  %v1985_v33 = vld [vmem:[%s2922_s1 + $0x284] ss:$8 sps:$4 sm:$0xff]   ;;  %v1988_v35 = vld [vmem:[%s2922_s1 + $0x280] ss:$8 sps:$4 sm:$0xff]  }
   0xd   :  { %1250 = vmatprep.subr.bf16.mxu0 %v1955_v13  ;;  %v1989_v36 = vld [vmem:[%s2922_s1 + $0x94] ss:$8 sps:$4 sm:$0xff]   ;;  %v1993_v38 = vld [vmem:[%s2922_s1 + $0x90] ss:$8 sps:$4 sm:$0xff]   ;;  %v1995_v40 = vld [vmem:[%s2922_s1 + $0xa4] ss:$8 sps:$4 sm:$0xff]  }
   0xe   :  { %v1991_v37 = vld [vmem:[%s2922_s1 + $0x294] ss:$8 sps:$4 sm:$0xff]   ;;  %v1994_v39 = vld [vmem:[%s2922_s1 + $0x290] ss:$8 sps:$4 sm:$0xff]   ;;  %v1997_v41 = vld [vmem:[%s2922_s1 + $0x2a4] ss:$8 sps:$4 sm:$0xff]  }
   0xf   :  { %1109 = vmatpush1.bf16.msra.mxu1 %v1957_v14  ;;  %v1999_v42 = vld [vmem:[%s2922_s1 + $0xa0] ss:$8 sps:$4 sm:$0xff]   ;;  %v2001_v44 = vld [vmem:[%s2922_s1 + $0xb4] ss:$8 sps:$4 sm:$0xff]   ;;  %v2005_v46 = vld [vmem:[%s2922_s1 + $0xb0] ss:$8 sps:$4 sm:$0xff]  }
  0x10   :  { %1251 = vmatpush1.bf16.msra.mxu0 %v1958_v15  ;;  %1110 = vmatprep.subr.bf16.mxu1 %v1959_v16  ;;  %v2000_v43 = vld [vmem:[%s2922_s1 + $0x2a0] ss:$8 sps:$4 sm:$0xff]   ;;  %v2003_v45 = vld [vmem:[%s2922_s1 + $0x2b4] ss:$8 sps:$4 sm:$0xff]   ;;  %v2006_v47 = vld [vmem:[%s2922_s1 + $0x2b0] ss:$8 sps:$4 sm:$0xff]  }
  0x11   :  { %1252 = vmatprep.subr.bf16.mxu0 %v1961_v17  ;;  %v2033_v48 = vld [vmem:[%s2923_s0 + $0x4] ss:$36 sps:$4 sm:$0xff]   ;;  %v2039_v51 = vld [vmem:[%s2923_s0 + $0x14] ss:$36 sps:$4 sm:$0xff]  }
  0x12   :  { %v2007_v49 = vld [vmem:[%s2922_s1 + $0xc4] ss:$8 sps:$4 sm:$0xff]   ;;  %1134 = vmatprep.mubr.bf16.mxu1 %v2033_v48  ;;  %v2011_v52 = vld [vmem:[%s2922_s1 + $0xc0] ss:$8 sps:$4 sm:$0xff]   ;;  %v2013_v54 = vld [vmem:[%s2922_s1 + $0xd4] ss:$8 sps:$4 sm:$0xff]   ;;  %1276 = vmatprep.mubr.bf16.mxu0 %v2039_v51 }
  0x13   :  { %1111 = vmatpush1.bf16.msra.mxu1 %v1963_v18  ;;  %v2009_v50 = vld [vmem:[%s2922_s1 + $0x2c4] ss:$8 sps:$4 sm:$0xff]   ;;  %v2012_v53 = vld [vmem:[%s2922_s1 + $0x2c0] ss:$8 sps:$4 sm:$0xff]   ;;  %v2015_v55 = vld [vmem:[%s2922_s1 + $0x2d4] ss:$8 sps:$4 sm:$0xff]  }
  0x14   :  { %1253 = vmatpush1.bf16.msra.mxu0 %v1964_v19  ;;  %1112 = vmatprep.subr.bf16.mxu1 %v1965_v20  ;;  %v2017_v56 = vld [vmem:[%s2922_s1 + $0xd0] ss:$8 sps:$4 sm:$0xff]   ;;  %v2019_v58 = vld [vmem:[%s2922_s1 + $0xe4] ss:$8 sps:$4 sm:$0xff]   ;;  %v2023_v60 = vld [vmem:[%s2922_s1 + $0xe0] ss:$8 sps:$4 sm:$0xff]  }
  0x15   :  { %1254 = vmatprep.subr.bf16.mxu0 %v1967_v21  ;;  %v2018_v57 = vld [vmem:[%s2922_s1 + $0x2d0] ss:$8 sps:$4 sm:$0xff]   ;;  %v2021_v59 = vld [vmem:[%s2922_s1 + $0x2e4] ss:$8 sps:$4 sm:$0xff]   ;;  %v2024_v61 = vld [vmem:[%s2922_s1 + $0x2e0] ss:$8 sps:$4 sm:$0xff]  }
  0x16   :  { %v2025_v62 = vld [vmem:[%s2922_s1 + $0xf4] ss:$8 sps:$4 sm:$0xff]   ;;  %v2029_v0 = vld [vmem:[%s2922_s1 + $0xf0] ss:$8 sps:$4 sm:$0xff]   ;;  %v2036_v2 = vld [vmem:[%s2922_s1 + $0x104] ss:$8 sps:$4 sm:$0xff]  }
  0x17   :  { %1113 = vmatpush1.bf16.msra.mxu1 %v1969_v22  ;;  %v2027_v63 = vld [vmem:[%s2922_s1 + $0x2f4] ss:$8 sps:$4 sm:$0xff]   ;;  %v2030_v1 = vld [vmem:[%s2922_s1 + $0x2f0] ss:$8 sps:$4 sm:$0xff]   ;;  %v2042_v3 = vld [vmem:[%s2922_s1 + $0x304] ss:$8 sps:$4 sm:$0xff]  }
  0x18   :  { %1255 = vmatpush1.bf16.msra.mxu0 %v1970_v23  ;;  %1114 = vmatprep.subr.bf16.mxu1 %v1971_v24  ;;  %v2031_v4 = vld [vmem:[%s2923_s0] ss:$36 sps:$4 sm:$0xff]   ;;  %v2037_v6 = vld [vmem:[%s2923_s0 + $0x10] ss:$36 sps:$4 sm:$0xff]   ;;  %v2101_v20 = vld [vmem:[%s2923_s0 + $0x48] ss:$36 sps:$4 sm:$0xff]  }
  0x19   :  { %1256 = vmatprep.subr.bf16.mxu0 %v1973_v25  ;;  %v2034_v5 = vld [vmem:[%s2922_s1 + $0x100] ss:$8 sps:$4 sm:$0xff]   ;;  %v2045_v8 = vld [vmem:[%s2922_s1 + $0x114] ss:$8 sps:$4 sm:$0xff]   ;;  %v2043_v10 = vld [vmem:[%s2922_s1 + $0x110] ss:$8 sps:$4 sm:$0xff]  }
  0x1a   :  { %v2040_v7 = vld [vmem:[%s2922_s1 + $0x300] ss:$8 sps:$4 sm:$0xff]   ;;  %v2048_v9 = vld [vmem:[%s2922_s1 + $0x314] ss:$8 sps:$4 sm:$0xff]   ;;  %v2046_v11 = vld [vmem:[%s2922_s1 + $0x310] ss:$8 sps:$4 sm:$0xff]  }
  0x1b   :  { %1115 = vmatpush1.bf16.msra.mxu1 %v1975_v26  ;;  %v2051_v12 = vld [vmem:[%s2922_s1 + $0x124] ss:$8 sps:$4 sm:$0xff]   ;;  %v2049_v14 = vld [vmem:[%s2922_s1 + $0x120] ss:$8 sps:$4 sm:$0xff]   ;;  %v2057_v16 = vld [vmem:[%s2922_s1 + $0x134] ss:$8 sps:$4 sm:$0xff]  }
  0x1c   :  { %1257 = vmatpush1.bf16.msra.mxu0 %v1976_v27  ;;  %1116 = vmatprep.subr.bf16.mxu1 %v1977_v28  ;;  %v2054_v13 = vld [vmem:[%s2922_s1 + $0x324] ss:$8 sps:$4 sm:$0xff]   ;;  %v2052_v15 = vld [vmem:[%s2922_s1 + $0x320] ss:$8 sps:$4 sm:$0xff]   ;;  %v2060_v17 = vld [vmem:[%s2922_s1 + $0x334] ss:$8 sps:$4 sm:$0xff]  }
  0x1d   :  { %1258 = vmatprep.subr.bf16.mxu0 %v1979_v29  ;;  %v2097_v18 = vld [vmem:[%s2923_s0 + $0x4c] ss:$36 sps:$4 sm:$0xff]   ;;  %v2099_v19 = vld [vmem:[%s2923_s0 + $0x5c] ss:$36 sps:$4 sm:$0xff]  }
  0x1e   :  { %v2055_v21 = vld [vmem:[%s2922_s1 + $0x130] ss:$8 sps:$4 sm:$0xff]   ;;  %v2063_v24 = vld [vmem:[%s2922_s1 + $0x144] ss:$8 sps:$4 sm:$0xff]   ;;  %v2061_v26 = vld [vmem:[%s2922_s1 + $0x140] ss:$8 sps:$4 sm:$0xff]  }
  0x1f   :  { %1117 = vmatpush1.bf16.msra.mxu1 %v1981_v30  ;;  %v2058_v22 = vld [vmem:[%s2922_s1 + $0x330] ss:$8 sps:$4 sm:$0xff]   ;;  %v2066_v25 = vld [vmem:[%s2922_s1 + $0x344] ss:$8 sps:$4 sm:$0xff]   ;;  %v2064_v27 = vld [vmem:[%s2922_s1 + $0x340] ss:$8 sps:$4 sm:$0xff]  }
  0x20   :  { %1259 = vmatpush1.bf16.msra.mxu0 %v1982_v31  ;;  %1118 = vmatprep.subr.bf16.mxu1 %v1983_v32  ;;  %v2105_v23 = vld [vmem:[%s2923_s0 + $0x58] ss:$36 sps:$4 sm:$0xff]   ;;  %v2117_v31 = vld [vmem:[%s2923_s0 + $0xa4] ss:$36 sps:$4 sm:$0xff]   ;;  %v2119_v32 = vld [vmem:[%s2923_s0 + $0x90] ss:$36 sps:$4 sm:$0xff]  }
  0x21   :  { %1260 = vmatprep.subr.bf16.mxu0 %v1985_v33  ;;  %v2069_v28 = vld [vmem:[%s2922_s1 + $0x154] ss:$8 sps:$4 sm:$0xff]   ;;  %v2067_v33 = vld [vmem:[%s2922_s1 + $0x150] ss:$8 sps:$4 sm:$0xff]   ;;  %v2090_v51 = vld [vmem:[%s2922_s1 + $0x384] ss:$8 sps:$4 sm:$0xff]  }
  0x22   :  { %v2072_v29 = vld [vmem:[%s2922_s1 + $0x354] ss:$8 sps:$4 sm:$0xff]   ;;  %v2079_v48 = vld [vmem:[%s2922_s1 + $0x170] ss:$8 sps:$4 sm:$0xff]  }
  0x23   :  { %1119 = vmatpush1.bf16.msra.mxu1 %v1987_v34  ;;  %v2115_v30 = vld [vmem:[%s2923_s0 + $0x94] ss:$36 sps:$4 sm:$0xff]  }
  0x24   :  { %1261 = vmatpush1.bf16.msra.mxu0 %v1988_v35  ;;  %1120 = vmatprep.subr.bf16.mxu1 %v1989_v36  ;;  %v2070_v34 = vld [vmem:[%s2922_s1 + $0x350] ss:$8 sps:$4 sm:$0xff]   ;;  %v2123_v35 = vld [vmem:[%s2923_s0 + $0xa0] ss:$36 sps:$4 sm:$0xff]  }
  0x25   :  { %1262 = vmatprep.subr.bf16.mxu0 %v1991_v37  ;;  %v2075_v36 = vld [vmem:[%s2922_s1 + $0x164] ss:$8 sps:$4 sm:$0xff]  }
  0x26   :  { %v2078_v37 = vld [vmem:[%s2922_s1 + $0x364] ss:$8 sps:$4 sm:$0xff]  }
  0x27   :  { %1121 = vmatpush1.bf16.msra.mxu1 %v1993_v38  ;;  %v2073_v38 = vld [vmem:[%s2922_s1 + $0x160] ss:$8 sps:$4 sm:$0xff]  }
  0x28   :  { %1263 = vmatpush1.bf16.msra.mxu0 %v1994_v39  ;;  %1122 = vmatprep.subr.bf16.mxu1 %v1995_v40  ;;  %v2076_v39 = vld [vmem:[%s2922_s1 + $0x360] ss:$8 sps:$4 sm:$0xff]   ;;  %v51_v40 = vld [vmem:[%s2923_s0 + $0xd8] sm:$0x11] }
  0x29   :  { %1264 = vmatprep.subr.bf16.mxu0 %v1997_v41  ;;  %v53_v41 = vld [vmem:[%s2923_s0 + $0xe8] sm:$0x11] }
  0x2b   :  { %1123 = vmatpush1.bf16.msra.mxu1 %v1999_v42  ;;  %v2081_v42 = vld [vmem:[%s2922_s1 + $0x174] ss:$8 sps:$4 sm:$0xff]  }
  0x2c   :  { %1265 = vmatpush1.bf16.msra.mxu0 %v2000_v43  ;;  %1124 = vmatprep.subr.bf16.mxu1 %v2001_v44  ;;  %v2084_v43 = vld [vmem:[%s2922_s1 + $0x374] ss:$8 sps:$4 sm:$0xff]   ;;  %v1691_v44 = vcombine.high %v51_v40, %v51_v40 }
  0x2d   :  { %1266 = vmatprep.subr.bf16.mxu0 %v2003_v45  ;;  %v1695_v45 = vcombine.high %v53_v41, %v53_v41 }
  0x2f   :  { %1125 = vmatpush1.bf16.msra.mxu1 %v2005_v46  ;;  %v1690_v46 = vcombine.low %v51_v40, %v51_v40  ;;  %v54_v40 = vld [vmem:[%s2923_s0 + $0xf0] sm:$0x11] }
  0x30   :  { %1267 = vmatpush1.bf16.msra.mxu0 %v2006_v47  ;;  %1126 = vmatprep.subr.bf16.mxu1 %v2007_v49  ;;  %v1694_v47 = vcombine.low %v53_v41, %v53_v41  ;;  %v2082_v49 = vld [vmem:[%s2922_s1 + $0x370] ss:$8 sps:$4 sm:$0xff]   ;;  %v2179_v41 = vld [vmem:[%s2922_s1 + $0x440] ss:$8 sps:$4 sm:$0xff]  }
  0x31   :  { %1268 = vmatprep.subr.bf16.mxu0 %v2009_v50  ;;  %v2087_v50 = vld [vmem:[%s2922_s1 + $0x184] ss:$8 sps:$4 sm:$0xff]  }
  0x33   :  { %1127 = vmatpush1.bf16.msra.mxu1 %v2011_v52  ;;  %v2085_v52 = vld [vmem:[%s2922_s1 + $0x180] ss:$8 sps:$4 sm:$0xff]  }
  0x34   :  { %1269 = vmatpush1.bf16.msra.mxu0 %v2012_v53  ;;  %1128 = vmatprep.subr.bf16.mxu1 %v2013_v54  ;;  %v2151_v53 = vld [vmem:[%s2923_s0 + $0xc] ss:$36 sps:$4 sm:$0xff]   ;;  %v2088_v54 = vld [vmem:[%s2922_s1 + $0x380] ss:$8 sps:$4 sm:$0xff]  }
  0x35   :  { %1270 = vmatprep.subr.bf16.mxu0 %v2015_v55  ;;  %v2154_v55 = vld [vmem:[%s2923_s0 + $0x1c] ss:$36 sps:$4 sm:$0xff]  }
  0x37   :  { %1129 = vmatpush1.bf16.msra.mxu1 %v2017_v56  ;;  %v2093_v56 = vld [vmem:[%s2922_s1 + $0x194] ss:$8 sps:$4 sm:$0xff]  }
  0x38   :  { %1271 = vmatpush1.bf16.msra.mxu0 %v2018_v57  ;;  %1130 = vmatprep.subr.bf16.mxu1 %v2019_v58  ;;  %v2096_v57 = vld [vmem:[%s2922_s1 + $0x394] ss:$8 sps:$4 sm:$0xff]   ;;  %v2091_v58 = vld [vmem:[%s2922_s1 + $0x190] ss:$8 sps:$4 sm:$0xff]  }
  0x39   :  { %1272 = vmatprep.subr.bf16.mxu0 %v2021_v59  ;;  %v2094_v59 = vld [vmem:[%s2922_s1 + $0x390] ss:$8 sps:$4 sm:$0xff]  }
  0x3b   :  { %1131 = vmatpush1.bf16.msra.mxu1 %v2023_v60  ;;  %v2104_v60 = vld [vmem:[%s2922_s1 + $0x1a4] ss:$8 sps:$4 sm:$0xff]  }
  0x3c   :  { %1273 = vmatpush1.bf16.msra.mxu0 %v2024_v61  ;;  %1132 = vmatprep.subr.bf16.mxu1 %v2025_v62  ;;  %v2108_v61 = vld [vmem:[%s2922_s1 + $0x3a4] ss:$8 sps:$4 sm:$0xff]   ;;  %v2102_v62 = vld [vmem:[%s2922_s1 + $0x1a0] ss:$8 sps:$4 sm:$0xff]  }
  0x3d   :  { %1274 = vmatprep.subr.bf16.mxu0 %v2027_v63  ;;  %v2106_v63 = vld [vmem:[%s2922_s1 + $0x3a0] ss:$8 sps:$4 sm:$0xff]  }
  0x3f   :  { %1133 = vmatpush1.bf16.msra.mxu1 %v2029_v0  ;;  %v2111_v0 = vld [vmem:[%s2922_s1 + $0x1b4] ss:$8 sps:$4 sm:$0xff]  }
  0x40   :  { %1275 = vmatpush1.bf16.msra.mxu0 %v2030_v1  ;;  %1173 = vmatprep.subr.bf16.mxu1 %v2036_v2  ;;  %v2114_v1 = vld [vmem:[%s2922_s1 + $0x3b4] ss:$8 sps:$4 sm:$0xff]   ;;  %v2109_v2 = vld [vmem:[%s2922_s1 + $0x1b0] ss:$8 sps:$4 sm:$0xff]  }
  0x41   :  { %1315 = vmatprep.subr.bf16.mxu0 %v2042_v3  ;;  %v2112_v3 = vld [vmem:[%s2922_s1 + $0x3b0] ss:$8 sps:$4 sm:$0xff]  }
  0x42   :  { %1135 = vmatmul.mubr.bf16.vlgmr.msra.gmra.mrb[0].mxu1 %v2031_v4  ;;  %v2122_v4 = vld [vmem:[%s2922_s1 + $0x1c4] ss:$8 sps:$4 sm:$0xff]  }
  0x43   :  { %1277 = vmatmul.mubr.bf16.vlgmr.msra.gmra.mrb[0].mxu0 %v2037_v6  ;;  %1174 = vmatpush1.bf16.msra.mxu1 %v2034_v5  ;;  %v2126_v5 = vld [vmem:[%s2922_s1 + $0x3c4] ss:$8 sps:$4 sm:$0xff]   ;;  %v2120_v6 = vld [vmem:[%s2922_s1 + $0x1c0] ss:$8 sps:$4 sm:$0xff]  }
  0x44   :  { %1316 = vmatpush1.bf16.msra.mxu0 %v2040_v7  ;;  %1175 = vmatprep.subr.bf16.mxu1 %v2045_v8  ;;  %v2124_v7 = vld [vmem:[%s2922_s1 + $0x3c0] ss:$8 sps:$4 sm:$0xff]   ;;  %v2129_v8 = vld [vmem:[%s2922_s1 + $0x1d4] ss:$8 sps:$4 sm:$0xff]  }
  0x45   :  { %1317 = vmatprep.subr.bf16.mxu0 %v2048_v9  ;;  %1144 = vmatprep.mubr.bf16.mxu1 %v2097_v18  ;;  %v2132_v9 = vld [vmem:[%s2922_s1 + $0x3d4] ss:$8 sps:$4 sm:$0xff]   ;;  %v2143_v18 = vld [vmem:[%s2922_s1 + $0x1f0] ss:$8 sps:$4 sm:$0xff]  }
  0x46   :  { %1286 = vmatprep.mubr.bf16.mxu0 %v2099_v19  ;;  %v2146_v19 = vld [vmem:[%s2922_s1 + $0x3f0] ss:$8 sps:$4 sm:$0xff]  }
  0x47   :  { %1176 = vmatpush1.bf16.msra.mxu1 %v2043_v10  ;;  %v2127_v10 = vld [vmem:[%s2922_s1 + $0x1d0] ss:$8 sps:$4 sm:$0xff]  }
  0x48   :  { %1318 = vmatpush1.bf16.msra.mxu0 %v2046_v11  ;;  %1177 = vmatprep.subr.bf16.mxu1 %v2051_v12  ;;  %v2130_v11 = vld [vmem:[%s2922_s1 + $0x3d0] ss:$8 sps:$4 sm:$0xff]   ;;  %v2138_v12 = vld [vmem:[%s2922_s1 + $0x1e4] ss:$8 sps:$4 sm:$0xff]  }
  0x49   :  { %1319 = vmatprep.subr.bf16.mxu0 %v2054_v13  ;;  %v2142_v13 = vld [vmem:[%s2922_s1 + $0x3e4] ss:$8 sps:$4 sm:$0xff]  }
  0x4a   :  { %1145 = vmatmul.mubr.bf16.gmra.mrb[4].mxu1 %v2101_v20  ;;  %v2157_v20 = vld [vmem:[%s2922_s1 + $0x404] ss:$8 sps:$4 sm:$0xff]  }
  0x4b   :  { %1178 = vmatpush1.bf16.msra.mxu1 %v2049_v14  ;;  %1287 = vmatmul.mubr.bf16.gmra.mrb[4].mxu0 %v2105_v23  ;;  %v2136_v14 = vld [vmem:[%s2922_s1 + $0x1e0] ss:$8 sps:$4 sm:$0xff]  }
  0x4c   :  { %1320 = vmatpush1.bf16.msra.mxu0 %v2052_v15  ;;  %1179 = vmatprep.subr.bf16.mxu1 %v2057_v16  ;;  %v2140_v15 = vld [vmem:[%s2922_s1 + $0x3e0] ss:$8 sps:$4 sm:$0xff]   ;;  %v2145_v16 = vld [vmem:[%s2922_s1 + $0x1f4] ss:$8 sps:$4 sm:$0xff]  }
  0x4d   :  { %1321 = vmatprep.subr.bf16.mxu0 %v2060_v17  ;;  %1154 = vmatprep.mubr.bf16.mxu1 %v2115_v30  ;;  %v2148_v17 = vld [vmem:[%s2922_s1 + $0x3f4] ss:$8 sps:$4 sm:$0xff]   ;;  %v2155_v23 = vld [vmem:[%s2922_s1 + $0x400] ss:$8 sps:$4 sm:$0xff]  }
  0x4e   :  { %1296 = vmatprep.mubr.bf16.mxu0 %v2117_v31  ;;  %v2166_v30 = vld [vmem:[%s2923_s0 + $0x60] ss:$36 sps:$4 sm:$0xff]  }
  0x4f   :  { %1180 = vmatpush1.bf16.msra.mxu1 %v2055_v21  ;;  %v2149_v21 = vld [vmem:[%s2923_s0 + $0x8] ss:$36 sps:$4 sm:$0xff]  }
  0x50   :  { %1322 = vmatpush1.bf16.msra.mxu0 %v2058_v22  ;;  %1181 = vmatprep.subr.bf16.mxu1 %v2063_v24  ;;  %v2152_v22 = vld [vmem:[%s2923_s0 + $0x18] ss:$36 sps:$4 sm:$0xff]   ;;  %v2167_v31 = vld [vmem:[%s2922_s1 + $0x420] ss:$8 sps:$4 sm:$0xff]  }
  0x51   :  { %1323 = vmatprep.subr.bf16.mxu0 %v2066_v25  ;;  %v2160_v24 = vld [vmem:[%s2922_s1 + $0x414] ss:$8 sps:$4 sm:$0xff]  }
  0x52   :  { %1155 = vmatmul.mubr.bf16.gmra.mrb[8].mxu1 %v2119_v32  ;;  %v2161_v25 = vld [vmem:[%s2923_s0 + $0x54] ss:$36 sps:$4 sm:$0xff]  }
  0x53   :  { %1182 = vmatpush1.bf16.msra.mxu1 %v2061_v26  ;;  %1297 = vmatmul.mubr.bf16.gmra.mrb[8].mxu0 %v2123_v35  ;;  %v2163_v26 = vld [vmem:[%s2923_s0 + $0x64] ss:$36 sps:$4 sm:$0xff]   ;;  %v2172_v32 = vld [vmem:[%s2922_s1 + $0x434] ss:$8 sps:$4 sm:$0xff]   ;;  %v2170_v35 = vld [vmem:[%s2922_s1 + $0x430] ss:$8 sps:$4 sm:$0xff]  }
  0x54   :  { %1324 = vmatpush1.bf16.msra.mxu0 %v2064_v27  ;;  %1183 = vmatprep.subr.bf16.mxu1 %v2069_v28  ;;  %v2158_v27 = vld [vmem:[%s2922_s1 + $0x410] ss:$8 sps:$4 sm:$0xff]   ;;  %v2169_v28 = vld [vmem:[%s2922_s1 + $0x424] ss:$8 sps:$4 sm:$0xff]  }
  0x55   :  { %1325 = vmatprep.subr.bf16.mxu0 %v2072_v29  ;;  %1164 = vmatprep.mubr.bf16.mxu1 %v1691_v44  ;;  %v2165_v29 = vld [vmem:[%s2923_s0 + $0x50] ss:$36 sps:$4 sm:$0xff]   ;;  %v1697_v44 = vcombine.high %v54_v40, %v54_v40 }
  0x56   :  { %1306 = vmatprep.mubr.bf16.mxu0 %v1695_v45  ;;  %v2182_v45 = vld [vmem:[%s2922_s1 + $0x450] ss:$8 sps:$4 sm:$0xff]  }
  0x57   :  { %1184 = vmatpush1.bf16.msra.mxu1 %v2067_v33  ;;  %v2173_v33 = vld [vmem:[%s2923_s0 + $0x9c] ss:$36 sps:$4 sm:$0xff]  }
  0x58   :  { %1326 = vmatpush1.bf16.msra.mxu0 %v2070_v34  ;;  %1185 = vmatprep.subr.bf16.mxu1 %v2075_v36  ;;  %v2175_v34 = vld [vmem:[%s2923_s0 + $0xac] ss:$36 sps:$4 sm:$0xff]  }
  0x59   :  { %1327 = vmatprep.subr.bf16.mxu0 %v2078_v37  ;;  %v2181_v36 = vld [vmem:[%s2922_s1 + $0x444] ss:$8 sps:$4 sm:$0xff]   ;;  %v2177_v37 = vld [vmem:[%s2923_s0 + $0x98] ss:$36 sps:$4 sm:$0xff]  }
  0x5a   :  { %1165 = vmatmul.mubr.bf16.gmra.mrb[12].mxu1 %v1690_v46  ;;  %v2191_v46 = vld [vmem:[%s2922_s1 + $0x464] ss:$8 sps:$4 sm:$0xff]  }
  0x5b   :  { %1186 = vmatpush1.bf16.msra.mxu1 %v2073_v38  ;;  %1307 = vmatmul.mubr.bf16.gmra.mrb[12].mxu0 %v1694_v47  ;;  %v2178_v38 = vld [vmem:[%s2923_s0 + $0xa8] ss:$36 sps:$4 sm:$0xff]  }
  0x5c   :  { %1328 = vmatpush1.bf16.msra.mxu0 %v2076_v39  ;;  %1187 = vmatprep.subr.bf16.mxu1 %v2081_v42  ;;  %v52_v39 = vld [vmem:[%s2923_s0 + $0xe0] sm:$0x11]  ;;  %v2184_v42 = vld [vmem:[%s2922_s1 + $0x454] ss:$8 sps:$4 sm:$0xff]  }
  0x5d   :  { %1329 = vmatprep.subr.bf16.mxu0 %v2084_v43  ;;  %1205 = vmatprep.mubr.bf16.mxu1 %v2151_v53  ;;  %v1693_v43 = vcombine.high %v52_v39, %v52_v39  ;;  %v1692_v47 = vcombine.low %v52_v39, %v52_v39  ;;  %v2195_v53 = vld [vmem:[%s2923_s0 + $0x20] ss:$36 sps:$4 sm:$0xff]  }
  0x5e   :  { %1347 = vmatprep.mubr.bf16.mxu0 %v2154_v55  ;;  %v2197_v55 = vld [vmem:[%s2923_s0 + $0x68] ss:$36 sps:$4 sm:$0xff]  }
  0x5f   :  { %1188 = vmatpush1.bf16.msra.mxu1 %v2079_v48  ;;  %v1696_v48 = vcombine.low %v54_v40, %v54_v40 }
  0x60   :  { %1330 = vmatpush1.bf16.msra.mxu0 %v2082_v49  ;;  %1189 = vmatprep.subr.bf16.mxu1 %v2087_v50  ;;  %v2189_v49 = vld [vmem:[%s2922_s1 + $0x460] ss:$8 sps:$4 sm:$0xff]   ;;  %v2194_v50 = vld [vmem:[%s2922_s1 + $0x474] ss:$8 sps:$4 sm:$0xff]  }
  0x61   :  { %1331 = vmatprep.subr.bf16.mxu0 %v2090_v51  ;;  %v2192_v51 = vld [vmem:[%s2922_s1 + $0x470] ss:$8 sps:$4 sm:$0xff]  }
  0x63   :  { %1190 = vmatpush1.bf16.msra.mxu1 %v2085_v52  ;;  %v2203_v52 = vmov 0  }
  0x64   :  { %1332 = vmatpush1.bf16.msra.mxu0 %v2088_v54  ;;  %1191 = vmatprep.subr.bf16.mxu1 %v2093_v56  ;;  %v2196_v54 = vld [vmem:[%s2923_s0 + $0xb0] ss:$36 sps:$4 sm:$0xff]   ;;  %v2198_v56 = vld [vmem:[%s2923_s0 + $0xf8] ss:$0 sps:$4 sm:$0x11]  }
  0x65   :  { %1333 = vmatprep.subr.bf16.mxu0 %v2096_v57 }
  0x67   :  { %1192 = vmatpush1.bf16.msra.mxu1 %v2091_v58 }
  0x68   :  { %1334 = vmatpush1.bf16.msra.mxu0 %v2094_v59  ;;  %1193 = vmatprep.subr.bf16.mxu1 %v2104_v60  ;;  %v202_v60 = vlaneseq }
  0x69   :  { %1335 = vmatprep.subr.bf16.mxu0 %v2108_v61 }
  0x6b   :  { %1194 = vmatpush1.bf16.msra.mxu1 %v2102_v62  ;;  %v2763_v62 = vshrl.u32 %v202_v60, 7 }
  0x6c   :  { %1336 = vmatpush1.bf16.msra.mxu0 %v2106_v63  ;;  %1195 = vmatprep.subr.bf16.mxu1 %v2111_v0 }
  0x6d   :  { %1337 = vmatprep.subr.bf16.mxu0 %v2114_v1 }
  0x6f   :  { %1196 = vmatpush1.bf16.msra.mxu1 %v2109_v2  ;;  %v2766_v2 = vsub.s32 0, %v2763_v62 }
  0x70   :  { %1338 = vmatpush1.bf16.msra.mxu0 %v2112_v3  ;;  %1197 = vmatprep.subr.bf16.mxu1 %v2122_v4  ;;  %v200_v4 = vld [vmem:[%s2924_s2] sm:$0x3] }
  0x71   :  { %1339 = vmatprep.subr.bf16.mxu0 %v2126_v5  ;;  %v2774_v5 = vsub.s32 1, %v2763_v62 }
  0x73   :  { %1198 = vmatpush1.bf16.msra.mxu1 %v2120_v6  ;;  %v205_v6 = vrot.slane %v200_v4, %v2766_v2 }
  0x74   :  { %1340 = vmatpush1.bf16.msra.mxu0 %v2124_v7  ;;  %1199 = vmatprep.subr.bf16.mxu1 %v2129_v8  ;;  %v209_v7 = vrot.slane %v200_v4, %v2774_v5 }
  0x75   :  { %1341 = vmatprep.subr.bf16.mxu0 %v2132_v9 }
  0x77   :  { %1200 = vmatpush1.bf16.msra.mxu1 %v2127_v10 }
  0x78   :  { %1342 = vmatpush1.bf16.msra.mxu0 %v2130_v11  ;;  %1201 = vmatprep.subr.bf16.mxu1 %v2138_v12 }
  0x79   :  { %1343 = vmatprep.subr.bf16.mxu0 %v2142_v13 }
  0x7b   :  { %1202 = vmatpush1.bf16.msra.mxu1 %v2136_v14 }
  0x7c   :  { %1344 = vmatpush1.bf16.msra.mxu0 %v2140_v15  ;;  %1203 = vmatprep.subr.bf16.mxu1 %v2145_v16 }
  0x7d   :  { %1345 = vmatprep.subr.bf16.mxu0 %v2148_v17 }
  0x7f   :  { %1204 = vmatpush1.bf16.msra.mxu1 %v2143_v18 }
  0x80   :  { %1346 = vmatpush1.bf16.msra.mxu0 %v2146_v19  ;;  %1843 = vmatprep.subr.bf16.mxu1 %v2157_v20 }
  0x81   :  { %1386 = vmatprep.subr.bf16.mxu0 %v2157_v20 }
  0x82   :  { %1206 = vmatmul.mubr.bf16.vlgmr.msra.gmra.mrb[0].mxu1 %v2149_v21 }
  0x83   :  { %1348 = vmatmul.mubr.bf16.vlgmr.msra.gmra.mrb[0].mxu0 %v2152_v22  ;;  %1851 = vmatpush1.bf16.msra.mxu1 %v2155_v23 }
  0x84   :  { %1387 = vmatpush1.bf16.msra.mxu0 %v2155_v23  ;;  %1844 = vmatprep.subr.bf16.mxu1 %v2160_v24 }
  0x85   :  { %1388 = vmatprep.subr.bf16.mxu0 %v2160_v24  ;;  %1215 = vmatprep.mubr.bf16.mxu1 %v2161_v25 }
  0x86   :  { %1357 = vmatprep.mubr.bf16.mxu0 %v2163_v26 }
  0x87   :  { %1852 = vmatpush1.bf16.msra.mxu1 %v2158_v27 }
  0x88   :  { %1389 = vmatpush1.bf16.msra.mxu0 %v2158_v27  ;;  %1845 = vmatprep.subr.bf16.mxu1 %v2169_v28 }
  0x89   :  { %1390 = vmatprep.subr.bf16.mxu0 %v2169_v28 }
  0x8a   :  { %1216 = vmatmul.mubr.bf16.gmra.mrb[4].mxu1 %v2165_v29 }
  0x8b   :  { %1358 = vmatmul.mubr.bf16.gmra.mrb[4].mxu0 %v2166_v30  ;;  %1853 = vmatpush1.bf16.msra.mxu1 %v2167_v31 }
  0x8c   :  { %1391 = vmatpush1.bf16.msra.mxu0 %v2167_v31  ;;  %1846 = vmatprep.subr.bf16.mxu1 %v2172_v32 }
  0x8d   :  { %1392 = vmatprep.subr.bf16.mxu0 %v2172_v32  ;;  %1225 = vmatprep.mubr.bf16.mxu1 %v2173_v33 }
  0x8e   :  { %1367 = vmatprep.mubr.bf16.mxu0 %v2175_v34 }
  0x8f   :  { %1854 = vmatpush1.bf16.msra.mxu1 %v2170_v35 }
  0x90   :  { %1393 = vmatpush1.bf16.msra.mxu0 %v2170_v35  ;;  %1847 = vmatprep.subr.bf16.mxu1 %v2181_v36 }
  0x91   :  { %1394 = vmatprep.subr.bf16.mxu0 %v2181_v36 }
  0x92   :  { %1226 = vmatmul.mubr.bf16.gmra.mrb[8].mxu1 %v2177_v37 }
  0x93   :  { %1368 = vmatmul.mubr.bf16.gmra.mrb[8].mxu0 %v2178_v38  ;;  %1855 = vmatpush1.bf16.msra.mxu1 %v2179_v41 }
  0x94   :  { %1395 = vmatpush1.bf16.msra.mxu0 %v2179_v41  ;;  %1848 = vmatprep.subr.bf16.mxu1 %v2184_v42 }
  0x95   :  { %1396 = vmatprep.subr.bf16.mxu0 %v2184_v42  ;;  %1235 = vmatprep.mubr.bf16.mxu1 %v1693_v43 }
  0x96   :  { %1377 = vmatprep.mubr.bf16.mxu0 %v1697_v44 }
  0x97   :  { %1856 = vmatpush1.bf16.msra.mxu1 %v2182_v45 }
  0x98   :  { %1397 = vmatpush1.bf16.msra.mxu0 %v2182_v45  ;;  %1849 = vmatprep.subr.bf16.mxu1 %v2191_v46 }
  0x99   :  { %1398 = vmatprep.subr.bf16.mxu0 %v2191_v46 }
  0x9a   :  { %1236 = vmatmul.mubr.bf16.gmra.mrb[12].mxu1 %v1692_v47 }
  0x9b   :  { %1378 = vmatmul.mubr.bf16.gmra.mrb[12].mxu0 %v1696_v48  ;;  %1857 = vmatpush1.bf16.msra.mxu1 %v2189_v49 }
  0x9c   :  { %1399 = vmatpush1.bf16.msra.mxu0 %v2189_v49  ;;  %1850 = vmatprep.subr.bf16.mxu1 %v2194_v50 }
  0x9d   :  { %1400 = vmatprep.subr.bf16.mxu0 %v2194_v50  ;;  %1418 = vmatprep.mubr.bf16.mxu0 %v2203_v52 }
  0x9e   :  { %1438 = vmatprep.mubr.bf16.mxu1 %v2203_v52 }
  0x9f   :  { %1858 = vmatpush1.bf16.msra.mxu1 %v2192_v51 }
  0xa0   :  { %1401 = vmatpush1.bf16.msra.mxu0 %v2192_v51 }
  0xa2   :  { %1439 = vmatmul.mubr.bf16.vlgmr.msra.gmra.mrb[16].mxu1 %v2196_v54 }
  0xa3   :  { %1419 = vmatmul.mubr.bf16.vlgmr.msra.gmra.mrb[0].mxu0 %v2195_v53  ;;  %1448 = vmatprep.mubr.bf16.mxu1 %v2203_v52 }
  0xa4   :  { %1428 = vmatprep.mubr.bf16.mxu0 %v2203_v52 }
  0xaa   :  { %1449 = vmatmul.mubr.bf16.gmra.mrb[20].mxu1 %v2198_v56 }
  0xab   :  { %1429 = vmatmul.mubr.bf16.gmra.mrb[4].mxu0 %v2197_v55 }
 0x155   :  { %v1207_v57 = vpop.f32.mrb[0].mxu1 }
 0x156   :  { %v1209_v58 = vpop.f32.mrb[1].mxu1  ;;  %v1859_v36 = vadd.f32 %v1207_v57, %v205_v6 }
 0x157   :  { %v1211_v59 = vpop.f32.mrb[2].mxu1  ;;  %v1861_v37 = vadd.f32 %v1209_v58, %v209_v7 }
 0x158   :  { %v1213_v61 = vpop.f32.mrb[3].mxu1  ;;  %v1863_v40 = vadd.f32 %v1211_v59, %v205_v6 }
 0x159   :  { %v1865_v45 = vadd.f32 %v1213_v61, %v209_v7 }
 0x15d   :  { %v1217_v63 = vpop.f32.mrb[4].mxu1 }
 0x15e   :  { %v1219_v0 = vpop.f32.mrb[5].mxu1  ;;  %v1867_v58 = vadd.f32 %v1217_v63, %v205_v6 }
 0x15f   :  { %v1221_v1 = vpop.f32.mrb[6].mxu1  ;;  %v1869_v59 = vadd.f32 %v1219_v0, %v209_v7 }
 0x160   :  { %v2768_v3 = vpop.f32.mrb[7].mxu1  ;;  %v1871_v4 = vadd.f32 %v1221_v1, %v205_v6 }
 0x165   :  { %v1227_v8 = vpop.f32.mrb[8].mxu1 }
 0x166   :  { %v1369_v9 = vpop.f32.mrb[8].mxu0  ;;  %v1875_v10 = vadd.f32 %v1227_v8, %v205_v6  ;;  %v1229_v11 = vpop.f32.mrb[9].mxu1 }
 0x167   :  { %v1371_v12 = vpop.f32.mrb[9].mxu0  ;;  %v1878_v13 = vadd.f32 %v1229_v11, %v209_v7  ;;  %v1231_v14 = vpop.f32.mrb[10].mxu1 }
 0x168   :  { %v1373_v15 = vpop.f32.mrb[10].mxu0  ;;  %v1876_v16 = vadd.f32 %v1875_v10, %v1369_v9  ;;  %v1881_v17 = vadd.f32 %v1231_v14, %v205_v6  ;;  %v1233_v18 = vpop.f32.mrb[11].mxu1 }
 0x169   :  { %v1375_v19 = vpop.f32.mrb[11].mxu0  ;;  %v1879_v20 = vadd.f32 %v1878_v13, %v1371_v12  ;;  %v1884_v21 = vadd.f32 %v1233_v18, %v209_v7  ;;  %v1873_v12 = vadd.f32 %v2768_v3, %v209_v7 }
 0x16a   :  { %v1882_v22 = vadd.f32 %v1881_v17, %v1373_v15 }
 0x16b   :  { %v1885_v23 = vadd.f32 %v1884_v21, %v1375_v19 }
 0x16d   :  { %v1237_v24 = vpop.f32.mrb[12].mxu1 }
 0x16e   :  { %v1379_v25 = vpop.f32.mrb[12].mxu0  ;;  %v1887_v26 = vadd.f32 %v1237_v24, %v205_v6  ;;  %v1239_v27 = vpop.f32.mrb[13].mxu1 }
 0x16f   :  { %v1381_v28 = vpop.f32.mrb[13].mxu0  ;;  %v1890_v29 = vadd.f32 %v1239_v27, %v209_v7  ;;  %v1241_v30 = vpop.f32.mrb[14].mxu1 }
 0x170   :  { %v1383_v31 = vpop.f32.mrb[14].mxu0  ;;  %v1888_v32 = vadd.f32 %v1887_v26, %v1379_v25  ;;  %v1242_v33 = vpop.f32.mrb[15].mxu1 }
 0x171   :  { %v1384_v34 = vpop.f32.mrb[15].mxu0  ;;  %v1891_v35 = vadd.f32 %v1890_v29, %v1381_v28 }
 0x175   :  { %v1440_v39 = vpop.f32.mrb[16].mxu1 }
 0x176   :  { %v1420_v38 = vpop.f32.mrb[0].mxu0  ;;  %v2778_v42 = vadd.f32 %v1876_v16, %v1440_v39  ;;  %v1442_v44 = vpop.f32.mrb[17].mxu1 }
 0x177   :  { %v1860_v41 = vadd.f32 %v1859_v36, %v1420_v38  ;;  %v1422_v43 = vpop.f32.mrb[1].mxu0  ;;  %v2782_v47 = vadd.f32 %v1879_v20, %v1442_v44  ;;  %v1444_v49 = vpop.f32.mrb[18].mxu1 }
 0x178   :  { %v2780_v46 = vadd.f32 %v1861_v37, %v1422_v43  ;;  %v1424_v48 = vpop.f32.mrb[2].mxu0  ;;  %v1883_v51 = vadd.f32 %v1882_v22, %v1444_v49  ;;  %v1446_v53 = vpop.f32.mrb[19].mxu1 }
 0x179   :  { %v1864_v50 = vadd.f32 %v1863_v40, %v1424_v48  ;;  %v1426_v52 = vpop.f32.mrb[3].mxu0  ;;  %v2784_v55 = vadd.f32 %v1885_v23, %v1446_v53 }
 0x17a   :  { %v1866_v54 = vadd.f32 %v1865_v45, %v1426_v52 }
 0x17b   :  { %v1457_v56 = vadd.f32 %v1864_v50, %v1860_v41 }
 0x17c   :  { %v1471_v57 = vadd.f32 %v1866_v54, %v2780_v46 }
 0x17d   :  { %v1450_v61 = vpop.f32.mrb[20].mxu1 }
 0x17e   :  { %v1430_v60 = vpop.f32.mrb[4].mxu0  ;;  %v1889_v9 = vadd.f32 %v1888_v32, %v1450_v61  ;;  %v1452_v11 = vpop.f32.mrb[21].mxu1 }
 0x17f   :  { %v1868_v8 = vadd.f32 %v1867_v58, %v1430_v60  ;;  %v1432_v10 = vpop.f32.mrb[5].mxu0  ;;  %v1892_v14 = vadd.f32 %v1891_v35, %v1452_v11  ;;  %v1454_v16 = vpop.f32.mrb[22].mxu1 }
 0x180   :  { %v1870_v13 = vadd.f32 %v1869_v59, %v1432_v10  ;;  %v1434_v15 = vpop.f32.mrb[6].mxu0  ;;  %v1455_v20 = vpop.f32.mrb[23].mxu1  ;;  %v1463_v3 = vsel %vm1462_vm0, %v1889_v9, 0.0 }
 0x181   :  { %v1458_v17 = vadd.f32 %v1868_v8, %v1457_v56  ;;  %v1872_v18 = vadd.f32 %v1871_v4, %v1434_v15  ;;  %v1436_v19 = vpop.f32.mrb[7].mxu0  ;;  %v1476_v24 = vsel %vm1462_vm0, %v1892_v14, 0.0 }
 0x182   :  { %v1472_v21 = vadd.f32 %v1870_v13, %v1471_v57  ;;  %v1874_v63 = vadd.f32 %v1873_v12, %v1436_v19 }
 0x183   :  { %v1459_v0 = vadd.f32 %v1872_v18, %v1458_v17 }
 0x184   :  { %v1473_v22 = vadd.f32 %v1874_v63, %v1472_v21 }
 0x185   :  { %v1460_v1 = vadd.f32 %v2778_v42, %v1459_v0 }
 0x186   :  { %v1474_v6 = vadd.f32 %v2782_v47, %v1473_v22 }
 0x187   :  { %v1461_v23 = vadd.f32 %v1883_v51, %v1460_v1 }
 0x188   :  { %v1475_v7 = vadd.f32 %v2784_v55, %v1474_v6 }
 0x189   :  { %v1464_v25 = vadd.f32 %v1463_v3, %v1461_v23 }
 0x18a   :  { %v1477_v26 = vadd.f32 %v1476_v24, %v1475_v7 }
 0x18b   :  { %v1465_v27 = vrot.slane %v1464_v25, 4 }
 0x18c   :  { %v1478_v28 = vrot.slane %v1477_v26, 4 }
 0x18d   :  { %v1466_v29 = vadd.f32 %v1465_v27, %v1464_v25 }
 0x18e   :  { %v1479_v30 = vadd.f32 %v1478_v28, %v1477_v26 }
 0x18f   :  { %v1467_v31 = vrot.slane %v1466_v29, 2 }
 0x190   :  { %v1480_v32 = vrot.slane %v1479_v30, 2 }
 0x191   :  { %v1468_v33 = vadd.f32 %v1467_v31, %v1466_v29 }
 0x192   :  { %v1481_v34 = vadd.f32 %v1480_v32, %v1479_v30 }
 0x193   :  { %v1469_v35 = vrot.slane %v1468_v33, 1 }
 0x194   :  { %v1482_v36 = vrot.slane %v1481_v34, 1 }
 0x195   :  { %v1470_v37 = vadd.f32 %v1469_v35, %v1468_v33 }
 0x196   :  { %v1483_v38 = vadd.f32 %v1482_v36, %v1481_v34 }
 0x197   :  { %v1484_v39 = vmul.f32 0.02, %v1470_v37 }
 0x198   :  { %v1485_v40 = vmul.f32 0.02, %v1483_v38  ;;  %v2204_v38 = vmov 1966171168  }
 0x199   :  { %v2793_v43 = vsub.f32 %v1860_v41, %v1484_v39  ;;  %v2795_v44 = vsub.f32 %v1864_v50, %v1484_v39  ;;  %v2797_v45 = vsub.f32 %v1868_v8, %v1484_v39  ;;  %v2799_v48 = vsub.f32 %v1872_v18, %v1484_v39 }
 0x19a   :  { %v2802_v49 = vsub.f32 %v2778_v42, %v1484_v39  ;;  %v2804_v52 = vsub.f32 %v1883_v51, %v1484_v39  ;;  %v2806_v53 = vsub.f32 %v1889_v9, %v1484_v39  ;;  %v2809_v56 = vsub.f32 %v2780_v46, %v1485_v40 }
 0x19b   :  { %v1500_v41 = vmul.f32 %v2793_v43, %v2793_v43  ;;  %v1502_v50 = vmul.f32 %v2795_v44, %v2795_v44  ;;  %v1504_v57 = vmul.f32 %v2797_v45, %v2797_v45  ;;  %v2817_v58 = vsub.f32 %v1866_v54, %v1485_v40 }
 0x19c   :  { %v2819_v59 = vsub.f32 %v1870_v13, %v1485_v40  ;;  %v2821_v51 = vsub.f32 %v1874_v63, %v1485_v40  ;;  %v2824_v60 = vsub.f32 %v2782_v47, %v1485_v40  ;;  %v2827_v46 = vsub.f32 %v2784_v55, %v1485_v40 }
 0x19d   :  { %v1514_v42 = vadd.f32 %v1502_v50, %v1500_v41  ;;  %v2829_v61 = vsub.f32 %v1892_v14, %v1485_v40  ;;  %v1501_v4 = vmul.f32 %v2809_v56, %v2809_v56  ;;  %v1506_v54 = vmul.f32 %v2799_v48, %v2799_v48 }
 0x19e   :  { %v1503_v9 = vmul.f32 %v2817_v58, %v2817_v58  ;;  %v1508_v10 = vmul.f32 %v2802_v49, %v2802_v49  ;;  %v1505_v55 = vmul.f32 %v2819_v59, %v2819_v59  ;;  %v1512_v12 = vmul.f32 %v2806_v53, %v2806_v53 }
 0x19f   :  { %v1515_v8 = vadd.f32 %v1514_v42, %v1504_v57  ;;  %v1510_v13 = vmul.f32 %v2804_v52, %v2804_v52  ;;  %v1507_v15 = vmul.f32 %v2821_v51, %v2821_v51  ;;  %v1509_v18 = vmul.f32 %v2824_v60, %v2824_v60 }
 0x1a0   :  { %v1527_v11 = vadd.f32 %v1503_v9, %v1501_v4  ;;  %v1519_v20 = vsel %vm1462_vm0, %v1512_v12, 0.0  ;;  %v1513_v21 = vmul.f32 %v2829_v61, %v2829_v61  ;;  %v1511_v0 = vmul.f32 %v2827_v46, %v2827_v46 }
 0x1a1   :  { %v1516_v47 = vadd.f32 %v1515_v8, %v1506_v54  ;;  %v1551_v39 = vunpack.c.l.s4 %v2204_v38  ;;  %v1542_v54 = vld [vmem:[%s2925_s3] sm:$0x3] }
 0x1a2   :  { %v1528_v16 = vadd.f32 %v1527_v11, %v1505_v55  ;;  %v1532_v23 = vsel %vm1462_vm0, %v1513_v21, 0.0 }
 0x1a3   :  { %v1517_v14 = vadd.f32 %v1516_v47, %v1508_v10  ;;  %v1552_v40 = vunpack.c.0.s8 %v1551_v39  ;;  %v1591_v10 = vld [vmem:[%s2926_s4] sm:$0x3] }
 0x1a4   :  { %v1529_v19 = vadd.f32 %v1528_v16, %v1507_v15  ;;  %v1596_v11 = vrot.slane %v1591_v10, %v2766_v2 }
 0x1a5   :  { %v1518_v17 = vadd.f32 %v1517_v14, %v1510_v13  ;;  %v1555_v50 = vsub.s32 %v1552_v40, %v2763_v62  ;;  %v1600_v62 = vrot.slane %v1591_v10, %v2774_v5 }
 0x1a6   :  { %v1530_v22 = vadd.f32 %v1529_v19, %v1509_v18 }
 0x1a7   :  { %v1520_v63 = vadd.f32 %v1519_v20, %v1518_v17 }
 0x1a8   :  { %v1531_v6 = vadd.f32 %v1530_v22, %v1511_v0 }
 0x1a9   :  { %v1521_v1 = vrot.slane %v1520_v63, 4 }
 0x1aa   :  { %v1533_v7 = vadd.f32 %v1532_v23, %v1531_v6 }
 0x1ab   :  { %v1522_v3 = vadd.f32 %v1521_v1, %v1520_v63 }
 0x1ac   :  { %v1534_v25 = vrot.slane %v1533_v7, 4 }
 0x1ad   :  { %v1523_v24 = vrot.slane %v1522_v3, 2 }
 0x1ae   :  { %v1535_v27 = vadd.f32 %v1534_v25, %v1533_v7 }
 0x1af   :  { %v1524_v26 = vadd.f32 %v1523_v24, %v1522_v3 }
 0x1b0   :  { %v1536_v29 = vrot.slane %v1535_v27, 2 }
 0x1b1   :  { %v1525_v28 = vrot.slane %v1524_v26, 1 }
 0x1b2   :  { %v1537_v31 = vadd.f32 %v1536_v29, %v1535_v27 }
 0x1b3   :  { %v1526_v30 = vadd.f32 %v1525_v28, %v1524_v26 }
 0x1b4   :  { %v1538_v33 = vrot.slane %v1537_v31, 1 }
 0x1b5   :  { %v1540_v32 = vmul.f32 0.02, %v1526_v30 }
 0x1b6   :  { %v1539_v35 = vadd.f32 %v1538_v33, %v1537_v31 }
 0x1b7   :  { %v1543_v34 = vadd.f32 1e-05, %v1540_v32 }
 0x1b8   :  { %v1541_v36 = vmul.f32 0.02, %v1539_v35 }
 0x1b9   :  { %2199 = vrsqrt.f32 %v1543_v34 }
 0x1ba   :  { %v1544_v37 = vadd.f32 1e-05, %v1541_v36 }
 0x1bc   :  { %2201 = vrsqrt.f32 %v1544_v37 }
 0x1c3   :  { %v2200_v41 = vpop.eup %2199 }
 0x1c6   :  { %v2202_v57 = vpop.eup %2201 }
 0x1c7   :  { %v1549_v42 = vcombine.low %v2200_v41, %v2202_v57 }
 0x1c9   :  { %v1556_v4 = vrot.slane %v1549_v42, %v1555_v50 }
 0x1cb   :  { %v1563_v8 = vrot.slane %v1556_v4, %v1555_v50 }
 0x1cd   :  { %v1565_v9 = vmul.f32 %v1563_v8, %v1542_v54 }
 0x1cf   :  { %v1570_v47 = vrot.slane %v1565_v9, %v2766_v2  ;;  %v1574_v55 = vrot.slane %v1565_v9, %v2774_v5 }
 0x1d1   :  { %v1577_v12 = vmul.f32 %v1570_v47, %v2793_v43  ;;  %v1578_v13 = vmul.f32 %v1574_v55, %v2809_v56  ;;  %v1579_v14 = vmul.f32 %v1570_v47, %v2795_v44  ;;  %v1580_v15 = vmul.f32 %v1574_v55, %v2817_v58 }
 0x1d2   :  { %v1581_v16 = vmul.f32 %v1570_v47, %v2797_v45  ;;  %v1582_v17 = vmul.f32 %v1574_v55, %v2819_v59  ;;  %v1583_v18 = vmul.f32 %v1570_v47, %v2799_v48  ;;  %v1584_v19 = vmul.f32 %v1574_v55, %v2821_v51 }
 0x1d3   :  { %v1585_v2 = vmul.f32 %v1570_v47, %v2802_v49  ;;  %v1586_v5 = vmul.f32 %v1574_v55, %v2824_v60  ;;  %v1587_v43 = vmul.f32 %v1570_v47, %v2804_v52  ;;  %v1588_v56 = vmul.f32 %v1574_v55, %v2827_v46 }
 0x1d4   :  { %v1589_v44 = vmul.f32 %v1570_v47, %v2806_v53  ;;  %v1590_v58 = vmul.f32 %v1574_v55, %v2829_v61  ;;  %v1603_v20 = vadd.f32 %v1596_v11, %v1577_v12  ;;  %v1604_v45 = vadd.f32 %v1600_v62, %v1578_v13 }
 0x1d5   :  { %v1605_v21 = vadd.f32 %v1596_v11, %v1579_v14  ;;  %v1606_v59 = vadd.f32 %v1600_v62, %v1580_v15  ;;  %v1607_v63 = vadd.f32 %v1596_v11, %v1581_v16  ;;  %v1608_v48 = vadd.f32 %v1600_v62, %v1582_v17 }
 0x1d6   :  { %v1609_v0 = vadd.f32 %v1596_v11, %v1583_v18  ;;  %v1610_v51 = vadd.f32 %v1600_v62, %v1584_v19  ;;  %v1611_v22 = vadd.f32 %v1596_v11, %v1585_v2  ;;  %v1612_v49 = vadd.f32 %v1600_v62, %v1586_v5 }
 0x1d7   :  { %v1613_v1 = vadd.f32 %v1596_v11, %v1587_v43  ;;  %v1614_v60 = vadd.f32 %v1600_v62, %v1588_v56  ;;  %v1615_v6 = vadd.f32 %v1596_v11, %v1589_v44  ;;  %v1616_v52 = vadd.f32 %v1600_v62, %v1590_v58 }
 0x1d8   :  { %v1617_v23 = vmul.f32 0.1, %v1603_v20  ;;  %v1618_v46 = vmul.f32 0.1, %v1604_v45  ;;  %v1619_v3 = vmul.f32 0.1, %v1605_v21 }
 0x1d9   :  { %v1620_v53 = vmul.f32 0.1, %v1606_v59  ;;  %v1621_v7 = vmul.f32 0.1, %v1607_v63  ;;  %v1622_v61 = vmul.f32 0.1, %v1608_v48 }
 0x1da   :  { %v1623_v24 = vmul.f32 0.1, %v1609_v0  ;;  %v1624_v25 = vmul.f32 0.1, %v1610_v51  ;;  %v1625_v26 = vmul.f32 0.1, %v1611_v22  ;;  %v1631_v27 = vmax.f32 %v1603_v20, %v1617_v23 }
 0x1db   :  { %v1626_v28 = vmul.f32 0.1, %v1612_v49  ;;  %v1627_v29 = vmul.f32 0.1, %v1613_v1  ;;  %v1628_v30 = vmul.f32 0.1, %v1614_v60  ;;  %v1632_v31 = vmax.f32 %v1604_v45, %v1618_v46 }
 0x1dc   :  { %v1629_v32 = vmul.f32 0.1, %v1615_v6  ;;  %v1630_v33 = vmul.f32 0.1, %v1616_v52  ;;  %v1633_v34 = vmax.f32 %v1605_v21, %v1619_v3  ;;  %v1634_v35 = vmax.f32 %v1606_v59, %v1620_v53  ;;  %1645 = vst [vmem:[%s2927_s5] sm:$0xff] %v1631_v27 }
 0x1dd   :  { %v1635_v36 = vmax.f32 %v1607_v63, %v1621_v7  ;;  %v1636_v37 = vmax.f32 %v1608_v48, %v1622_v61  ;;  %v1637_v38 = vmax.f32 %v1609_v0, %v1623_v24  ;;  %v1638_v39 = vmax.f32 %v1610_v51, %v1624_v25  ;;  %1646 = vst [vmem:[%s2927_s5 + $0x8] sm:$0xff] %v1632_v31 }
 0x1de   :  { %v1639_v40 = vmax.f32 %v1611_v22, %v1625_v26  ;;  %v1640_v41 = vmax.f32 %v1612_v49, %v1626_v28  ;;  %v1641_v50 = vmax.f32 %v1613_v1, %v1627_v29  ;;  %v1642_v57 = vmax.f32 %v1614_v60, %v1628_v30  ;;  %1647 = vst [vmem:[%s2927_s5 + $0x10] sm:$0xff] %v1633_v34 }
 0x1df   :  { %1648 = vst [vmem:[%s2927_s5 + $0x18] sm:$0xff] %v1634_v35  ;;  %v1643_v42 = vmax.f32 %v1615_v6, %v1629_v32  ;;  %v1644_v4 = vmax.f32 %v1616_v52, %v1630_v33  ;;  %1649 = vst [vmem:[%s2927_s5 + $0x20] sm:$0xff] %v1635_v36 }
 0x1e0   :  { %1650 = vst [vmem:[%s2927_s5 + $0x28] sm:$0xff] %v1636_v37  ;;  %1651 = vst [vmem:[%s2927_s5 + $0x30] sm:$0xff] %v1637_v38 }
 0x1e1   :  { %1652 = vst [vmem:[%s2927_s5 + $0x38] sm:$0xff] %v1638_v39  ;;  %1653 = vst [vmem:[%s2927_s5 + $0x40] sm:$0xff] %v1639_v40 }
 0x1e2   :  { %1654 = vst [vmem:[%s2927_s5 + $0x48] sm:$0xff] %v1640_v41  ;;  %1655 = vst [vmem:[%s2927_s5 + $0x50] sm:$0xff] %v1641_v50 }
 0x1e3   :  { %1656 = vst [vmem:[%s2927_s5 + $0x58] sm:$0xff] %v1642_v57  ;;  %1657 = vst [vmem:[%s2927_s5 + $0x60] sm:$0x3] %v1643_v42 }
 0x1e4   :  { %1658 = vst [vmem:[%s2927_s5 + $0x68] sm:$0x3] %v1644_v4 }

// kernel: encoder_28_forward.7
= control target key start
LH: loop header
LB: loop body
LE: loop exit
PB: predicated region body
PF: predicated region fallthrough
CT: control target
= control target key end

     0   :  { %v847_v27 = vlaneseq  ;;  %v6043_v35 = vmov 1966171168   ;;  %s7402_s0 = inlined_call_operand.vmem [shape: bf16[2,6400], index: 0, kind: input, shape index: {}]   ;;  %s7403_s1 = inlined_call_operand.vmem [shape: bf16[6400,32], index: 1, kind: input, shape index: {}]   ;;  %s7404_s2 = inlined_call_operand.vmem [shape: f32[1,32], index: 2, kind: input, shape index: {}]   ;;  %s7405_s3 = inlined_call_operand.vmem [shape: f32[1,32], index: 3, kind: input, shape index: {}]   ;;  %s7406_s4 = inlined_call_operand.vmem [shape: f32[1,32], index: 4, kind: input, shape index: {}]   ;;  %s7407_s5 = inlined_call_operand.hbm [shape: f32[2,32], index: 5, kind: output, shape index: {}]  }
   0x1   :  { %v5611_v0 = vld [vmem:[%s7403_s1 + $0x40] sm:$0xff]   ;;  %v5615_v4 = vld [vmem:[%s7403_s1 + $0x48] sm:$0xff]   ;;  %v5619_v8 = vld [vmem:[%s7403_s1 + $0x50] sm:$0xff]   ;;  %v845_v36 = vunpack.c.l.s4 %v6043_v35 }
   0x2   :  { %v5612_v1 = vld [vmem:[%s7403_s1] sm:$0xff]   ;;  %5059 = vmatprep.subr.bf16.mxu0 %v5611_v0  ;;  %v5616_v5 = vld [vmem:[%s7403_s1 + $0x8] sm:$0xff]   ;;  %v5620_v9 = vld [vmem:[%s7403_s1 + $0x10] sm:$0xff]   ;;  %v848_v32 = vshrl.u32 %v847_v27, 7 }
   0x3   :  { %v5613_v2 = vld [vmem:[%s7403_s1 + $0xc0] sm:$0xff]   ;;  %5060 = vmatpush3.bf16.msra.mxu0 %v5612_v1  ;;  %v5617_v6 = vld [vmem:[%s7403_s1 + $0xc8] sm:$0xff]   ;;  %v5621_v10 = vld [vmem:[%s7403_s1 + $0xd0] sm:$0xff]   ;;  %v846_v39 = vunpack.c.0.s8 %v845_v36 }
   0x4   :  { %v5614_v3 = vld [vmem:[%s7403_s1 + $0x80] sm:$0xff]   ;;  %5081 = vmatprep.subr.bf16.mxu1 %v5613_v2  ;;  %5061 = vmatprep.subr.bf16.mxu0 %v5615_v4  ;;  %v5618_v7 = vld [vmem:[%s7403_s1 + $0x88] sm:$0xff]   ;;  %v5622_v11 = vld [vmem:[%s7403_s1 + $0x90] sm:$0xff]  }
   0x5   :  { %5082 = vmatpush3.bf16.msra.mxu1 %v5614_v3  ;;  %v5623_v12 = vld [vmem:[%s7403_s1 + $0x58] sm:$0xff]   ;;  %v5627_v16 = vld [vmem:[%s7403_s1 + $0x60] sm:$0xff]   ;;  %v5631_v20 = vld [vmem:[%s7403_s1 + $0x68] sm:$0xff]   ;;  %v6180_v41 = vsub.s32 %v846_v39, %v848_v32 }
   0x6   :  { %5083 = vmatprep.subr.bf16.mxu1 %v5617_v6  ;;  %v5624_v13 = vld [vmem:[%s7403_s1 + $0x18] sm:$0xff]   ;;  %v5628_v17 = vld [vmem:[%s7403_s1 + $0x20] sm:$0xff]   ;;  %v5632_v21 = vld [vmem:[%s7403_s1 + $0x28] sm:$0xff]  }
   0x7   :  { %5062 = vmatpush3.bf16.msra.mxu0 %v5616_v5  ;;  %v5625_v14 = vld [vmem:[%s7403_s1 + $0xd8] sm:$0xff]   ;;  %v5629_v18 = vld [vmem:[%s7403_s1 + $0xe0] sm:$0xff]   ;;  %v5633_v22 = vld [vmem:[%s7403_s1 + $0xe8] sm:$0xff]  }
   0x8   :  { %5063 = vmatprep.subr.bf16.mxu0 %v5619_v8  ;;  %v5626_v15 = vld [vmem:[%s7403_s1 + $0x98] sm:$0xff]   ;;  %v5630_v19 = vld [vmem:[%s7403_s1 + $0xa0] sm:$0xff]   ;;  %v5634_v23 = vld [vmem:[%s7403_s1 + $0xa8] sm:$0xff]  }
   0x9   :  { %5084 = vmatpush3.bf16.msra.mxu1 %v5618_v7  ;;  %v5635_v24 = vld [vmem:[%s7403_s1 + $0x70] sm:$0xff]   ;;  %v5639_v29 = vld [vmem:[%s7403_s1 + $0x78] sm:$0xff]   ;;  %v22_v33 = vld [vmem:[%s7402_s0] sm:$0xff] }
   0xa   :  { %5085 = vmatprep.subr.bf16.mxu1 %v5621_v10  ;;  %v5636_v25 = vld [vmem:[%s7403_s1 + $0x30] sm:$0xff]   ;;  %v5640_v30 = vld [vmem:[%s7403_s1 + $0x38] sm:$0xff]   ;;  %v5644_v37 = vld [vmem:[%s7403_s1 + $0x140] sm:$0xff]   ;;  %v843_v38 = vcombine.high %v22_v33, %v22_v33  ;;  %v850_v42 = vrot.slane %v22_v33, %v6180_v41 }
   0xb   :  { %5064 = vmatpush3.bf16.msra.mxu0 %v5620_v9  ;;  %v5637_v26 = vld [vmem:[%s7403_s1 + $0xf0] sm:$0xff]   ;;  %v5641_v31 = vld [vmem:[%s7403_s1 + $0xf8] sm:$0xff]   ;;  %v5646_v40 = vld [vmem:[%s7403_s1 + $0x1c0] sm:$0xff]  }
   0xc   :  { %5065 = vmatprep.subr.bf16.mxu0 %v5623_v12  ;;  %v5638_v28 = vld [vmem:[%s7403_s1 + $0xb0] sm:$0xff]   ;;  %v5643_v34 = vld [vmem:[%s7403_s1 + $0xb8] sm:$0xff]   ;;  %v6184_v43 = vrot.slane %v843_v38, %v6180_v41  ;;  %v858_v44 = vcombine.high %v850_v42, %v850_v42  ;;  %v866_v45 = vrot.slane %v850_v42, %v6180_v41  ;;  %v5645_v47 = vld [vmem:[%s7403_s1 + $0x100] sm:$0xff]  }
   0xd   :  { %5086 = vmatpush3.bf16.msra.mxu1 %v5622_v11  ;;  %v5647_v49 = vld [vmem:[%s7403_s1 + $0x180] sm:$0xff]   ;;  %v5648_v52 = vld [vmem:[%s7403_s1 + $0x148] sm:$0xff]   ;;  %v5652_v58 = vld [vmem:[%s7403_s1 + $0x150] sm:$0xff]  }
   0xe   :  { %5087 = vmatprep.subr.bf16.mxu1 %v5625_v14  ;;  %v859_v46 = vcombine.high %v6184_v43, %v6184_v43  ;;  %v880_v48 = vrot.slane %v858_v44, %v6180_v41  ;;  %v888_v51 = vcombine.high %v866_v45, %v866_v45  ;;  %v5649_v54 = vld [vmem:[%s7403_s1 + $0x108] sm:$0xff]   ;;  %v5653_v59 = vld [vmem:[%s7403_s1 + $0x110] sm:$0xff]   ;;  %v5656_v62 = vld [vmem:[%s7403_s1 + $0x158] sm:$0xff]  }
   0xf   :  { %5066 = vmatpush3.bf16.msra.mxu0 %v5624_v13  ;;  %v5650_v55 = vld [vmem:[%s7403_s1 + $0x1c8] sm:$0xff]   ;;  %v5654_v60 = vld [vmem:[%s7403_s1 + $0x1d0] sm:$0xff]   ;;  %v5657_v63 = vld [vmem:[%s7403_s1 + $0x118] sm:$0xff]  }
  0x10   :  { %5067 = vmatprep.subr.bf16.mxu0 %v5627_v16  ;;  %v887_v50 = vrot.slane %v859_v46, %v6180_v41  ;;  %3641 = vmatprep.mubr.bf16.mxu0 %v880_v48  ;;  %v890_v53 = vcombine.high %v880_v48, %v880_v48  ;;  %v5651_v57 = vld [vmem:[%s7403_s1 + $0x188] sm:$0xff]   ;;  %v5655_v61 = vld [vmem:[%s7403_s1 + $0x190] sm:$0xff]   ;;  %v5658_v0 = vld [vmem:[%s7403_s1 + $0x1d8] sm:$0xff]  }
  0x11   :  { %5088 = vmatpush3.bf16.msra.mxu1 %v5626_v15  ;;  %v5659_v1 = vld [vmem:[%s7403_s1 + $0x198] sm:$0xff]   ;;  %v5660_v2 = vld [vmem:[%s7403_s1 + $0x160] sm:$0xff]   ;;  %v5664_v6 = vld [vmem:[%s7403_s1 + $0x168] sm:$0xff]  }
  0x12   :  { %5089 = vmatprep.subr.bf16.mxu1 %v5629_v18  ;;  %v891_v56 = vcombine.high %v887_v50, %v887_v50  ;;  %3681 = vmatprep.mubr.bf16.mxu1 %v890_v53  ;;  %v5661_v3 = vld [vmem:[%s7403_s1 + $0x120] sm:$0xff]   ;;  %v5665_v7 = vld [vmem:[%s7403_s1 + $0x128] sm:$0xff]   ;;  %v5668_v10 = vld [vmem:[%s7403_s1 + $0x170] sm:$0xff]   ;;  %v873_v18 = vrot.slane %v6184_v43, %v6180_v41 }
  0x13   :  { %5068 = vmatpush3.bf16.msra.mxu0 %v5628_v17  ;;  %v5662_v4 = vld [vmem:[%s7403_s1 + $0x1e0] sm:$0xff]   ;;  %v5666_v8 = vld [vmem:[%s7403_s1 + $0x1e8] sm:$0xff]   ;;  %v5669_v11 = vld [vmem:[%s7403_s1 + $0x130] sm:$0xff]  }
  0x14   :  { %5069 = vmatprep.subr.bf16.mxu0 %v5631_v20  ;;  %v5663_v5 = vld [vmem:[%s7403_s1 + $0x1a0] sm:$0xff]   ;;  %v5667_v9 = vld [vmem:[%s7403_s1 + $0x1a8] sm:$0xff]   ;;  %v5670_v12 = vld [vmem:[%s7403_s1 + $0x1f0] sm:$0xff]  }
  0x15   :  { %5090 = vmatpush3.bf16.msra.mxu1 %v5630_v19  ;;  %v5671_v13 = vld [vmem:[%s7403_s1 + $0x1b0] sm:$0xff]   ;;  %v5672_v14 = vld [vmem:[%s7403_s1 + $0x178] sm:$0xff]   ;;  %v5676_v19 = vld [vmem:[%s7403_s1 + $0x240] sm:$0xff]  }
  0x16   :  { %5091 = vmatprep.subr.bf16.mxu1 %v5633_v22  ;;  %v5673_v15 = vld [vmem:[%s7403_s1 + $0x138] sm:$0xff]   ;;  %v5677_v20 = vld [vmem:[%s7403_s1 + $0x200] sm:$0xff]   ;;  %v5683_v27 = vld [vmem:[%s7403_s1 + $0x288] sm:$0xff]  }
  0x17   :  { %5070 = vmatpush3.bf16.msra.mxu0 %v5632_v21  ;;  %v5674_v16 = vld [vmem:[%s7403_s1 + $0x1f8] sm:$0xff]   ;;  %v5678_v21 = vld [vmem:[%s7403_s1 + $0x2c0] sm:$0xff]   ;;  %v5697_v42 = vld [vmem:[%s7403_s1 + $0x228] sm:$0xff]  }
  0x18   :  { %5071 = vmatprep.subr.bf16.mxu0 %v5635_v24  ;;  %v5675_v17 = vld [vmem:[%s7403_s1 + $0x1b8] sm:$0xff]   ;;  %v5679_v22 = vld [vmem:[%s7403_s1 + $0x280] sm:$0xff]   ;;  %v5680_v24 = vld [vmem:[%s7403_s1 + $0x248] sm:$0xff]  }
  0x19   :  { %5092 = vmatpush3.bf16.msra.mxu1 %v5634_v23  ;;  %v889_v23 = vcombine.high %v873_v18, %v873_v18  ;;  %v5688_v32 = vld [vmem:[%s7403_s1 + $0x258] sm:$0xff]   ;;  %v5692_v36 = vld [vmem:[%s7403_s1 + $0x260] sm:$0xff]   ;;  %v5698_v43 = vld [vmem:[%s7403_s1 + $0x2e8] sm:$0xff]  }
  0x1a   :  { %5093 = vmatprep.subr.bf16.mxu1 %v5637_v26  ;;  %v5682_v26 = vld [vmem:[%s7403_s1 + $0x2c8] sm:$0xff]   ;;  %v5689_v33 = vld [vmem:[%s7403_s1 + $0x218] sm:$0xff]   ;;  %v5694_v38 = vld [vmem:[%s7403_s1 + $0x2e0] sm:$0xff]  }
  0x1b   :  { %5072 = vmatpush3.bf16.msra.mxu0 %v5636_v25  ;;  %v5681_v25 = vld [vmem:[%s7403_s1 + $0x208] sm:$0xff]   ;;  %v5691_v35 = vld [vmem:[%s7403_s1 + $0x298] sm:$0xff]   ;;  %v5695_v39 = vld [vmem:[%s7403_s1 + $0x2a0] sm:$0xff]  }
  0x1c   :  { %5073 = vmatprep.subr.bf16.mxu0 %v5639_v29  ;;  %v5685_v29 = vld [vmem:[%s7403_s1 + $0x210] sm:$0xff]   ;;  %v5699_v44 = vld [vmem:[%s7403_s1 + $0x2a8] sm:$0xff]  }
  0x1d   :  { %5094 = vmatpush3.bf16.msra.mxu1 %v5638_v28  ;;  %v5684_v28 = vld [vmem:[%s7403_s1 + $0x250] sm:$0xff]   ;;  %v23_v46 = vld [vmem:[%s7402_s0 + $0x8] sm:$0xff] }
  0x1e   :  { %5095 = vmatprep.subr.bf16.mxu1 %v5641_v31  ;;  %v5687_v31 = vld [vmem:[%s7403_s1 + $0x290] sm:$0xff]   ;;  %v899_v48 = vrot.slane %v23_v46, %v6180_v41 }
  0x1f   :  { %5074 = vmatpush3.bf16.msra.mxu0 %v5640_v30  ;;  %v5686_v30 = vld [vmem:[%s7403_s1 + $0x2d0] sm:$0xff]  }
  0x20   :  { %5103 = vmatprep.subr.bf16.mxu0 %v5644_v37  ;;  %v5693_v37 = vld [vmem:[%s7403_s1 + $0x220] sm:$0xff]  }
  0x21   :  { %5096 = vmatpush3.bf16.msra.mxu1 %v5643_v34  ;;  %v5690_v34 = vld [vmem:[%s7403_s1 + $0x2d8] sm:$0xff]  }
  0x22   :  { %5125 = vmatprep.subr.bf16.mxu1 %v5646_v40  ;;  %3642 = vmatmul.mubr.bf16.vlgmr.msra.gmra.mrb[0].mxu0 %v866_v45  ;;  %v5696_v40 = vld [vmem:[%s7403_s1 + $0x268] sm:$0xff]   ;;  %v5700_v45 = vld [vmem:[%s7403_s1 + $0x270] sm:$0xff]  }
  0x23   :  { %5104 = vmatpush3.bf16.msra.mxu0 %v5645_v47  ;;  %3721 = vmatprep.mubr.bf16.mxu0 %v887_v50  ;;  %v5701_v47 = vld [vmem:[%s7403_s1 + $0x230] sm:$0xff]  }
  0x24   :  { %3682 = vmatmul.mubr.bf16.vlgmr.msra.gmra.mrb[0].mxu1 %v888_v51  ;;  %5105 = vmatprep.subr.bf16.mxu0 %v5648_v52  ;;  %v5702_v50 = vld [vmem:[%s7403_s1 + $0x2f0] sm:$0xff]   ;;  %v907_v52 = vcombine.high %v899_v48, %v899_v48 }
  0x25   :  { %5126 = vmatpush3.bf16.msra.mxu1 %v5647_v49  ;;  %3761 = vmatprep.mubr.bf16.mxu1 %v891_v56  ;;  %v892_v49 = vcombine.high %v23_v46, %v23_v46  ;;  %v5703_v51 = vld [vmem:[%s7403_s1 + $0x2b0] sm:$0xff]  }
  0x26   :  { %5127 = vmatprep.subr.bf16.mxu1 %v5650_v55  ;;  %v5705_v55 = vld [vmem:[%s7403_s1 + $0x238] sm:$0xff]   ;;  %v929_v56 = vrot.slane %v907_v52, %v6180_v41  ;;  %v5751_v46 = vld [vmem:[%s7403_s1 + $0x4d0] sm:$0xff]   ;;  %v5757_v52 = vld [vmem:[%s7403_s1 + $0x460] sm:$0xff]  }
  0x27   :  { %5106 = vmatpush3.bf16.msra.mxu0 %v5649_v54  ;;  %v6372_v53 = vrot.slane %v892_v49, %v6180_v41  ;;  %v5704_v54 = vld [vmem:[%s7403_s1 + $0x278] sm:$0xff]  }
  0x28   :  { %5107 = vmatprep.subr.bf16.mxu0 %v5652_v58  ;;  %v5706_v58 = vld [vmem:[%s7403_s1 + $0x2f8] sm:$0xff]  }
  0x29   :  { %5128 = vmatpush3.bf16.msra.mxu1 %v5651_v57  ;;  %v908_v57 = vcombine.high %v6372_v53, %v6372_v53  ;;  %v5754_v49 = vld [vmem:[%s7403_s1 + $0x418] sm:$0xff]  }
  0x2a   :  { %5129 = vmatprep.subr.bf16.mxu1 %v5654_v60  ;;  %v939_v60 = vcombine.high %v929_v56, %v929_v56 }
  0x2b   :  { %5108 = vmatpush3.bf16.msra.mxu0 %v5653_v59  ;;  %v5707_v59 = vld [vmem:[%s7403_s1 + $0x2b8] sm:$0xff]  }
  0x2c   :  { %5109 = vmatprep.subr.bf16.mxu0 %v5656_v62  ;;  %v5708_v62 = vld [vmem:[%s7403_s1 + $0x340] sm:$0xff]  }
  0x2d   :  { %5130 = vmatpush3.bf16.msra.mxu1 %v5655_v61  ;;  %v915_v61 = vrot.slane %v899_v48, %v6180_v41  ;;  %v5753_v48 = vld [vmem:[%s7403_s1 + $0x458] sm:$0xff]  }
  0x2e   :  { %5131 = vmatprep.subr.bf16.mxu1 %v5658_v0  ;;  %v936_v0 = vrot.slane %v908_v57, %v6180_v41  ;;  %v5762_v57 = vld [vmem:[%s7403_s1 + $0x428] sm:$0xff]  }
  0x2f   :  { %5110 = vmatpush3.bf16.msra.mxu0 %v5657_v63  ;;  %v5709_v63 = vld [vmem:[%s7403_s1 + $0x300] sm:$0xff]  }
  0x30   :  { %5111 = vmatprep.subr.bf16.mxu0 %v5660_v2  ;;  %v5711_v2 = vld [vmem:[%s7403_s1 + $0x380] sm:$0xff]  }
  0x31   :  { %5132 = vmatpush3.bf16.msra.mxu1 %v5659_v1  ;;  %v5710_v1 = vld [vmem:[%s7403_s1 + $0x3c0] sm:$0xff]  }
  0x32   :  { %5133 = vmatprep.subr.bf16.mxu1 %v5662_v4  ;;  %v5712_v4 = vld [vmem:[%s7403_s1 + $0x348] sm:$0xff]  }
  0x33   :  { %5112 = vmatpush3.bf16.msra.mxu0 %v5661_v3  ;;  %v937_v3 = vcombine.high %v915_v61, %v915_v61 }
  0x34   :  { %5113 = vmatprep.subr.bf16.mxu0 %v5664_v6  ;;  %v940_v6 = vcombine.high %v936_v0, %v936_v0 }
  0x35   :  { %5134 = vmatpush3.bf16.msra.mxu1 %v5663_v5  ;;  %v5713_v5 = vld [vmem:[%s7403_s1 + $0x308] sm:$0xff]  }
  0x36   :  { %5135 = vmatprep.subr.bf16.mxu1 %v5666_v8  ;;  %v5715_v8 = vld [vmem:[%s7403_s1 + $0x388] sm:$0xff]  }
  0x37   :  { %5114 = vmatpush3.bf16.msra.mxu0 %v5665_v7  ;;  %v5714_v7 = vld [vmem:[%s7403_s1 + $0x3c8] sm:$0xff]  }
  0x38   :  { %5115 = vmatprep.subr.bf16.mxu0 %v5668_v10  ;;  %v5717_v10 = vld [vmem:[%s7403_s1 + $0x310] sm:$0xff]  }
  0x39   :  { %5136 = vmatpush3.bf16.msra.mxu1 %v5667_v9  ;;  %v5716_v9 = vld [vmem:[%s7403_s1 + $0x350] sm:$0xff]  }
  0x3a   :  { %5137 = vmatprep.subr.bf16.mxu1 %v5670_v12  ;;  %v5719_v12 = vld [vmem:[%s7403_s1 + $0x390] sm:$0xff]  }
  0x3b   :  { %5116 = vmatpush3.bf16.msra.mxu0 %v5669_v11  ;;  %v5718_v11 = vld [vmem:[%s7403_s1 + $0x3d0] sm:$0xff]  }
  0x3c   :  { %5117 = vmatprep.subr.bf16.mxu0 %v5672_v14  ;;  %v5721_v14 = vld [vmem:[%s7403_s1 + $0x318] sm:$0xff]  }
  0x3d   :  { %5138 = vmatpush3.bf16.msra.mxu1 %v5671_v13  ;;  %v5720_v13 = vld [vmem:[%s7403_s1 + $0x358] sm:$0xff]  }
  0x3e   :  { %5139 = vmatprep.subr.bf16.mxu1 %v5674_v16  ;;  %v5723_v16 = vld [vmem:[%s7403_s1 + $0x398] sm:$0xff]  }
  0x3f   :  { %5118 = vmatpush3.bf16.msra.mxu0 %v5673_v15  ;;  %v5722_v15 = vld [vmem:[%s7403_s1 + $0x3d8] sm:$0xff]  }
  0x40   :  { %5147 = vmatprep.subr.bf16.mxu0 %v5676_v19  ;;  %v5726_v19 = vld [vmem:[%s7403_s1 + $0x3e0] sm:$0xff]  }
  0x41   :  { %5140 = vmatpush3.bf16.msra.mxu1 %v5675_v17  ;;  %v5724_v17 = vld [vmem:[%s7403_s1 + $0x360] sm:$0xff]  }
  0x42   :  { %3722 = vmatmul.mubr.bf16.vlgmr.msra.gmra.mrb[4].mxu0 %v873_v18  ;;  %5169 = vmatprep.subr.bf16.mxu1 %v5678_v21  ;;  %v5725_v18 = vld [vmem:[%s7403_s1 + $0x320] sm:$0xff]   ;;  %v5728_v21 = vld [vmem:[%s7403_s1 + $0x368] sm:$0xff]  }
  0x43   :  { %5148 = vmatpush3.bf16.msra.mxu0 %v5677_v20  ;;  %3801 = vmatprep.mubr.bf16.mxu0 %v929_v56  ;;  %v5727_v20 = vld [vmem:[%s7403_s1 + $0x3a0] sm:$0xff]   ;;  %v5761_v56 = vld [vmem:[%s7403_s1 + $0x468] sm:$0xff]  }
  0x44   :  { %3762 = vmatmul.mubr.bf16.vlgmr.msra.gmra.mrb[4].mxu1 %v889_v23  ;;  %5149 = vmatprep.subr.bf16.mxu0 %v5680_v24  ;;  %v5730_v23 = vld [vmem:[%s7403_s1 + $0x3e8] sm:$0xff]  }
  0x45   :  { %5170 = vmatpush3.bf16.msra.mxu1 %v5679_v22  ;;  %3841 = vmatprep.mubr.bf16.mxu1 %v939_v60  ;;  %v5729_v22 = vld [vmem:[%s7403_s1 + $0x328] sm:$0xff]   ;;  %v5765_v60 = vld [vmem:[%s7403_s1 + $0x470] sm:$0xff]  }
  0x46   :  { %5171 = vmatprep.subr.bf16.mxu1 %v5682_v26  ;;  %v5731_v24 = vld [vmem:[%s7403_s1 + $0x3a8] sm:$0xff]   ;;  %v5733_v26 = vld [vmem:[%s7403_s1 + $0x330] sm:$0xff]  }
  0x47   :  { %5150 = vmatpush3.bf16.msra.mxu0 %v5681_v25  ;;  %v5732_v25 = vld [vmem:[%s7403_s1 + $0x370] sm:$0xff]  }
  0x48   :  { %5151 = vmatprep.subr.bf16.mxu0 %v5684_v28  ;;  %v5735_v28 = vld [vmem:[%s7403_s1 + $0x3b0] sm:$0xff]  }
  0x49   :  { %5172 = vmatpush3.bf16.msra.mxu1 %v5683_v27  ;;  %v5734_v27 = vld [vmem:[%s7403_s1 + $0x3f0] sm:$0xff]  }
  0x4a   :  { %5173 = vmatprep.subr.bf16.mxu1 %v5686_v30  ;;  %v5737_v30 = vld [vmem:[%s7403_s1 + $0x338] sm:$0xff]  }
  0x4b   :  { %5152 = vmatpush3.bf16.msra.mxu0 %v5685_v29  ;;  %v5736_v29 = vld [vmem:[%s7403_s1 + $0x378] sm:$0xff]  }
  0x4c   :  { %5153 = vmatprep.subr.bf16.mxu0 %v5688_v32  ;;  %v5740_v32 = vld [vmem:[%s7403_s1 + $0x3b8] sm:$0xff]  }
  0x4d   :  { %5174 = vmatpush3.bf16.msra.mxu1 %v5687_v31  ;;  %v5738_v31 = vld [vmem:[%s7403_s1 + $0x3f8] sm:$0xff]  }
  0x4e   :  { %5175 = vmatprep.subr.bf16.mxu1 %v5690_v34  ;;  %v5741_v34 = vld [vmem:[%s7403_s1 + $0x440] sm:$0xff]  }
  0x4f   :  { %5154 = vmatpush3.bf16.msra.mxu0 %v5689_v33  ;;  %v922_v33 = vrot.slane %v6372_v53, %v6180_v41  ;;  %v5758_v53 = vld [vmem:[%s7403_s1 + $0x420] sm:$0xff]  }
  0x50   :  { %5155 = vmatprep.subr.bf16.mxu0 %v5692_v36  ;;  %v5743_v36 = vld [vmem:[%s7403_s1 + $0x4c0] sm:$0xff]  }
  0x51   :  { %5176 = vmatpush3.bf16.msra.mxu1 %v5691_v35  ;;  %v5742_v35 = vld [vmem:[%s7403_s1 + $0x400] sm:$0xff]  }
  0x52   :  { %5177 = vmatprep.subr.bf16.mxu1 %v5694_v38  ;;  %v938_v38 = vcombine.high %v922_v33, %v922_v33 }
  0x53   :  { %5156 = vmatpush3.bf16.msra.mxu0 %v5693_v37  ;;  %v5744_v37 = vld [vmem:[%s7403_s1 + $0x480] sm:$0xff]  }
  0x54   :  { %5157 = vmatprep.subr.bf16.mxu0 %v5696_v40  ;;  %v5746_v40 = vld [vmem:[%s7403_s1 + $0x408] sm:$0xff]  }
  0x55   :  { %5178 = vmatpush3.bf16.msra.mxu1 %v5695_v39  ;;  %v5745_v39 = vld [vmem:[%s7403_s1 + $0x448] sm:$0xff]  }
  0x56   :  { %5179 = vmatprep.subr.bf16.mxu1 %v5698_v43  ;;  %v5748_v43 = vld [vmem:[%s7403_s1 + $0x488] sm:$0xff]  }
  0x57   :  { %5158 = vmatpush3.bf16.msra.mxu0 %v5697_v42  ;;  %v5747_v42 = vld [vmem:[%s7403_s1 + $0x4c8] sm:$0xff]  }
  0x58   :  { %5159 = vmatprep.subr.bf16.mxu0 %v5700_v45  ;;  %v5750_v45 = vld [vmem:[%s7403_s1 + $0x410] sm:$0xff]  }
  0x59   :  { %5180 = vmatpush3.bf16.msra.mxu1 %v5699_v44  ;;  %v5749_v44 = vld [vmem:[%s7403_s1 + $0x450] sm:$0xff]  }
  0x5a   :  { %5181 = vmatprep.subr.bf16.mxu1 %v5702_v50  ;;  %v5755_v50 = vld [vmem:[%s7403_s1 + $0x4d8] sm:$0xff]  }
  0x5b   :  { %5160 = vmatpush3.bf16.msra.mxu0 %v5701_v47  ;;  %v5752_v47 = vld [vmem:[%s7403_s1 + $0x490] sm:$0xff]  }
  0x5c   :  { %5161 = vmatprep.subr.bf16.mxu0 %v5704_v54  ;;  %v5759_v54 = vld [vmem:[%s7403_s1 + $0x4e0] sm:$0xff]  }
  0x5d   :  { %5182 = vmatpush3.bf16.msra.mxu1 %v5703_v51  ;;  %v5756_v51 = vld [vmem:[%s7403_s1 + $0x498] sm:$0xff]  }
  0x5e   :  { %5183 = vmatprep.subr.bf16.mxu1 %v5706_v58  ;;  %v5763_v58 = vld [vmem:[%s7403_s1 + $0x4e8] sm:$0xff]  }
  0x5f   :  { %5162 = vmatpush3.bf16.msra.mxu0 %v5705_v55  ;;  %v5760_v55 = vld [vmem:[%s7403_s1 + $0x4a0] sm:$0xff]  }
  0x60   :  { %5191 = vmatprep.subr.bf16.mxu0 %v5708_v62  ;;  %v5766_v62 = vld [vmem:[%s7403_s1 + $0x430] sm:$0xff]  }
  0x61   :  { %5184 = vmatpush3.bf16.msra.mxu1 %v5707_v59  ;;  %v5764_v59 = vld [vmem:[%s7403_s1 + $0x4a8] sm:$0xff]  }
  0x62   :  { %3802 = vmatmul.mubr.bf16.vlgmr.msra.gmra.mrb[8].mxu0 %v915_v61  ;;  %5213 = vmatprep.subr.bf16.mxu1 %v5710_v1  ;;  %v24_v61 = vld [vmem:[%s7402_s0 + $0x10] sm:$0xff] }
  0x63   :  { %5192 = vmatpush3.bf16.msra.mxu0 %v5709_v63  ;;  %3881 = vmatprep.mubr.bf16.mxu0 %v936_v0  ;;  %v948_v63 = vrot.slane %v24_v61, %v6180_v41  ;;  %v941_v0 = vcombine.high %v24_v61, %v24_v61  ;;  %v5767_v1 = vld [vmem:[%s7403_s1 + $0x4f0] sm:$0xff]  }
  0x64   :  { %3842 = vmatmul.mubr.bf16.vlgmr.msra.gmra.mrb[8].mxu1 %v937_v3  ;;  %5193 = vmatprep.subr.bf16.mxu0 %v5712_v4  ;;  %v5816_v61 = vld [vmem:[%s7403_s1 + $0x6d0] sm:$0xff]  }
  0x65   :  { %5214 = vmatpush3.bf16.msra.mxu1 %v5711_v2  ;;  %3921 = vmatprep.mubr.bf16.mxu1 %v940_v6  ;;  %v5768_v2 = vld [vmem:[%s7403_s1 + $0x4b0] sm:$0xff]   ;;  %v956_v3 = vcombine.high %v948_v63, %v948_v63  ;;  %v6578_v4 = vrot.slane %v941_v0, %v6180_v41  ;;  %v5770_v6 = vld [vmem:[%s7403_s1 + $0x438] sm:$0xff]  }
  0x66   :  { %5215 = vmatprep.subr.bf16.mxu1 %v5714_v7  ;;  %v5819_v0 = vld [vmem:[%s7403_s1 + $0x618] sm:$0xff]  }
  0x67   :  { %5194 = vmatpush3.bf16.msra.mxu0 %v5713_v5  ;;  %v5769_v5 = vld [vmem:[%s7403_s1 + $0x478] sm:$0xff]   ;;  %v978_v7 = vrot.slane %v956_v3, %v6180_v41  ;;  %v5822_v3 = vld [vmem:[%s7403_s1 + $0x660] sm:$0xff]  }
  0x68   :  { %5195 = vmatprep.subr.bf16.mxu0 %v5716_v9  ;;  %v5771_v9 = vld [vmem:[%s7403_s1 + $0x4f8] sm:$0xff]  }
  0x69   :  { %5216 = vmatpush3.bf16.msra.mxu1 %v5715_v8  ;;  %v957_v8 = vcombine.high %v6578_v4, %v6578_v4 }
  0x6a   :  { %5217 = vmatprep.subr.bf16.mxu1 %v5718_v11  ;;  %v988_v11 = vcombine.high %v978_v7, %v978_v7 }
  0x6b   :  { %5196 = vmatpush3.bf16.msra.mxu0 %v5717_v10  ;;  %v5772_v10 = vld [vmem:[%s7403_s1 + $0x4b8] sm:$0xff]  }
  0x6c   :  { %5197 = vmatprep.subr.bf16.mxu0 %v5720_v13  ;;  %v5773_v13 = vld [vmem:[%s7403_s1 + $0x540] sm:$0xff]  }
  0x6d   :  { %5218 = vmatpush3.bf16.msra.mxu1 %v5719_v12  ;;  %v964_v12 = vrot.slane %v948_v63, %v6180_v41  ;;  %v5818_v63 = vld [vmem:[%s7403_s1 + $0x658] sm:$0xff]  }
  0x6e   :  { %5219 = vmatprep.subr.bf16.mxu1 %v5722_v15  ;;  %v985_v15 = vrot.slane %v957_v8, %v6180_v41  ;;  %v5827_v8 = vld [vmem:[%s7403_s1 + $0x628] sm:$0xff]  }
  0x6f   :  { %5198 = vmatpush3.bf16.msra.mxu0 %v5721_v14  ;;  %v5774_v14 = vld [vmem:[%s7403_s1 + $0x500] sm:$0xff]  }
  0x70   :  { %5199 = vmatprep.subr.bf16.mxu0 %v5724_v17  ;;  %v5776_v17 = vld [vmem:[%s7403_s1 + $0x580] sm:$0xff]  }
  0x71   :  { %5220 = vmatpush3.bf16.msra.mxu1 %v5723_v16  ;;  %v5775_v16 = vld [vmem:[%s7403_s1 + $0x5c0] sm:$0xff]  }
  0x72   :  { %5221 = vmatprep.subr.bf16.mxu1 %v5726_v19  ;;  %v5777_v19 = vld [vmem:[%s7403_s1 + $0x548] sm:$0xff]  }
  0x73   :  { %5200 = vmatpush3.bf16.msra.mxu0 %v5725_v18  ;;  %v986_v18 = vcombine.high %v964_v12, %v964_v12 }
  0x74   :  { %5201 = vmatprep.subr.bf16.mxu0 %v5728_v21  ;;  %v989_v21 = vcombine.high %v985_v15, %v985_v15 }
  0x75   :  { %5222 = vmatpush3.bf16.msra.mxu1 %v5727_v20  ;;  %v5778_v20 = vld [vmem:[%s7403_s1 + $0x508] sm:$0xff]  }
  0x76   :  { %5223 = vmatprep.subr.bf16.mxu1 %v5730_v23  ;;  %v5780_v23 = vld [vmem:[%s7403_s1 + $0x588] sm:$0xff]  }
  0x77   :  { %5202 = vmatpush3.bf16.msra.mxu0 %v5729_v22  ;;  %v5779_v22 = vld [vmem:[%s7403_s1 + $0x5c8] sm:$0xff]  }
  0x78   :  { %5203 = vmatprep.subr.bf16.mxu0 %v5732_v25  ;;  %v5782_v25 = vld [vmem:[%s7403_s1 + $0x510] sm:$0xff]  }
  0x79   :  { %5224 = vmatpush3.bf16.msra.mxu1 %v5731_v24  ;;  %v5781_v24 = vld [vmem:[%s7403_s1 + $0x550] sm:$0xff]  }
  0x7a   :  { %5225 = vmatprep.subr.bf16.mxu1 %v5734_v27  ;;  %v5784_v27 = vld [vmem:[%s7403_s1 + $0x590] sm:$0xff]  }
  0x7b   :  { %5204 = vmatpush3.bf16.msra.mxu0 %v5733_v26  ;;  %v5783_v26 = vld [vmem:[%s7403_s1 + $0x5d0] sm:$0xff]  }
  0x7c   :  { %5205 = vmatprep.subr.bf16.mxu0 %v5736_v29  ;;  %v5786_v29 = vld [vmem:[%s7403_s1 + $0x518] sm:$0xff]  }
  0x7d   :  { %5226 = vmatpush3.bf16.msra.mxu1 %v5735_v28  ;;  %v5785_v28 = vld [vmem:[%s7403_s1 + $0x558] sm:$0xff]  }
  0x7e   :  { %5227 = vmatprep.subr.bf16.mxu1 %v5738_v31  ;;  %v5788_v31 = vld [vmem:[%s7403_s1 + $0x598] sm:$0xff]  }
  0x7f   :  { %5206 = vmatpush3.bf16.msra.mxu0 %v5737_v30  ;;  %v5787_v30 = vld [vmem:[%s7403_s1 + $0x5d8] sm:$0xff]  }
  0x80   :  { %5235 = vmatprep.subr.bf16.mxu0 %v5741_v34  ;;  %v5791_v34 = vld [vmem:[%s7403_s1 + $0x5e0] sm:$0xff]  }
  0x81   :  { %5228 = vmatpush3.bf16.msra.mxu1 %v5740_v32  ;;  %v5789_v32 = vld [vmem:[%s7403_s1 + $0x560] sm:$0xff]  }
  0x82   :  { %3882 = vmatmul.mubr.bf16.vlgmr.msra.gmra.mrb[12].mxu0 %v922_v33  ;;  %5257 = vmatprep.subr.bf16.mxu1 %v5743_v36  ;;  %v5790_v33 = vld [vmem:[%s7403_s1 + $0x520] sm:$0xff]   ;;  %v5793_v36 = vld [vmem:[%s7403_s1 + $0x568] sm:$0xff]  }
  0x83   :  { %5236 = vmatpush3.bf16.msra.mxu0 %v5742_v35  ;;  %3961 = vmatprep.mubr.bf16.mxu0 %v978_v7  ;;  %v5792_v35 = vld [vmem:[%s7403_s1 + $0x5a0] sm:$0xff]   ;;  %v5826_v7 = vld [vmem:[%s7403_s1 + $0x668] sm:$0xff]  }
  0x84   :  { %3922 = vmatmul.mubr.bf16.vlgmr.msra.gmra.mrb[12].mxu1 %v938_v38  ;;  %5237 = vmatprep.subr.bf16.mxu0 %v5745_v39  ;;  %v5795_v38 = vld [vmem:[%s7403_s1 + $0x5e8] sm:$0xff]  }
  0x85   :  { %5258 = vmatpush3.bf16.msra.mxu1 %v5744_v37  ;;  %4001 = vmatprep.mubr.bf16.mxu1 %v988_v11  ;;  %v5794_v37 = vld [vmem:[%s7403_s1 + $0x528] sm:$0xff]   ;;  %v5830_v11 = vld [vmem:[%s7403_s1 + $0x670] sm:$0xff]  }
  0x86   :  { %5259 = vmatprep.subr.bf16.mxu1 %v5747_v42  ;;  %v5796_v39 = vld [vmem:[%s7403_s1 + $0x5a8] sm:$0xff]   ;;  %v5798_v42 = vld [vmem:[%s7403_s1 + $0x530] sm:$0xff]  }
  0x87   :  { %5238 = vmatpush3.bf16.msra.mxu0 %v5746_v40  ;;  %v5797_v40 = vld [vmem:[%s7403_s1 + $0x570] sm:$0xff]  }
  0x88   :  { %5239 = vmatprep.subr.bf16.mxu0 %v5749_v44  ;;  %v5800_v44 = vld [vmem:[%s7403_s1 + $0x5b0] sm:$0xff]  }
  0x89   :  { %5260 = vmatpush3.bf16.msra.mxu1 %v5748_v43  ;;  %v5799_v43 = vld [vmem:[%s7403_s1 + $0x5f0] sm:$0xff]  }
  0x8a   :  { %5261 = vmatprep.subr.bf16.mxu1 %v5751_v46  ;;  %v5802_v46 = vld [vmem:[%s7403_s1 + $0x538] sm:$0xff]  }
  0x8b   :  { %5240 = vmatpush3.bf16.msra.mxu0 %v5750_v45  ;;  %v5801_v45 = vld [vmem:[%s7403_s1 + $0x578] sm:$0xff]  }
  0x8c   :  { %5241 = vmatprep.subr.bf16.mxu0 %v5753_v48  ;;  %v5805_v48 = vld [vmem:[%s7403_s1 + $0x5b8] sm:$0xff]  }
  0x8d   :  { %5262 = vmatpush3.bf16.msra.mxu1 %v5752_v47  ;;  %v5803_v47 = vld [vmem:[%s7403_s1 + $0x5f8] sm:$0xff]  }
  0x8e   :  { %5263 = vmatprep.subr.bf16.mxu1 %v5755_v50  ;;  %v5806_v50 = vld [vmem:[%s7403_s1 + $0x640] sm:$0xff]  }
  0x8f   :  { %5242 = vmatpush3.bf16.msra.mxu0 %v5754_v49  ;;  %v971_v49 = vrot.slane %v6578_v4, %v6180_v41  ;;  %v5823_v4 = vld [vmem:[%s7403_s1 + $0x620] sm:$0xff]  }
  0x90   :  { %5243 = vmatprep.subr.bf16.mxu0 %v5757_v52  ;;  %v5808_v52 = vld [vmem:[%s7403_s1 + $0x6c0] sm:$0xff]  }
  0x91   :  { %5264 = vmatpush3.bf16.msra.mxu1 %v5756_v51  ;;  %v5807_v51 = vld [vmem:[%s7403_s1 + $0x600] sm:$0xff]  }
  0x92   :  { %5265 = vmatprep.subr.bf16.mxu1 %v5759_v54  ;;  %v987_v54 = vcombine.high %v971_v49, %v971_v49 }
  0x93   :  { %5244 = vmatpush3.bf16.msra.mxu0 %v5758_v53  ;;  %v5809_v53 = vld [vmem:[%s7403_s1 + $0x680] sm:$0xff]  }
  0x94   :  { %5245 = vmatprep.subr.bf16.mxu0 %v5761_v56  ;;  %v5811_v56 = vld [vmem:[%s7403_s1 + $0x608] sm:$0xff]  }
  0x95   :  { %5266 = vmatpush3.bf16.msra.mxu1 %v5760_v55  ;;  %v5810_v55 = vld [vmem:[%s7403_s1 + $0x648] sm:$0xff]  }
  0x96   :  { %5267 = vmatprep.subr.bf16.mxu1 %v5763_v58  ;;  %v5813_v58 = vld [vmem:[%s7403_s1 + $0x688] sm:$0xff]  }
  0x97   :  { %5246 = vmatpush3.bf16.msra.mxu0 %v5762_v57  ;;  %v5812_v57 = vld [vmem:[%s7403_s1 + $0x6c8] sm:$0xff]  }
  0x98   :  { %5247 = vmatprep.subr.bf16.mxu0 %v5765_v60  ;;  %v5815_v60 = vld [vmem:[%s7403_s1 + $0x610] sm:$0xff]  }
  0x99   :  { %5268 = vmatpush3.bf16.msra.mxu1 %v5764_v59  ;;  %v5814_v59 = vld [vmem:[%s7403_s1 + $0x650] sm:$0xff]  }
  0x9a   :  { %5269 = vmatprep.subr.bf16.mxu1 %v5767_v1  ;;  %v5820_v1 = vld [vmem:[%s7403_s1 + $0x6d8] sm:$0xff]  }
  0x9b   :  { %5248 = vmatpush3.bf16.msra.mxu0 %v5766_v62  ;;  %v5817_v62 = vld [vmem:[%s7403_s1 + $0x690] sm:$0xff]  }
  0x9c   :  { %5249 = vmatprep.subr.bf16.mxu0 %v5769_v5  ;;  %v5824_v5 = vld [vmem:[%s7403_s1 + $0x6e0] sm:$0xff]  }
  0x9d   :  { %5270 = vmatpush3.bf16.msra.mxu1 %v5768_v2  ;;  %v5821_v2 = vld [vmem:[%s7403_s1 + $0x698] sm:$0xff]  }
  0x9e   :  { %5271 = vmatprep.subr.bf16.mxu1 %v5771_v9  ;;  %v5828_v9 = vld [vmem:[%s7403_s1 + $0x6e8] sm:$0xff]  }
  0x9f   :  { %5250 = vmatpush3.bf16.msra.mxu0 %v5770_v6  ;;  %v5825_v6 = vld [vmem:[%s7403_s1 + $0x6a0] sm:$0xff]  }
  0xa0   :  { %5279 = vmatprep.subr.bf16.mxu0 %v5773_v13  ;;  %v5832_v13 = vld [vmem:[%s7403_s1 + $0x6f0] sm:$0xff]  }
  0xa1   :  { %5272 = vmatpush3.bf16.msra.mxu1 %v5772_v10  ;;  %v5829_v10 = vld [vmem:[%s7403_s1 + $0x6a8] sm:$0xff]  }
  0xa2   :  { %3962 = vmatmul.mubr.bf16.vlgmr.msra.gmra.mrb[16].mxu0 %v964_v12  ;;  %5301 = vmatprep.subr.bf16.mxu1 %v5775_v16  ;;  %v25_v12 = vld [vmem:[%s7402_s0 + $0x18] sm:$0xff]  ;;  %v5831_v16 = vld [vmem:[%s7403_s1 + $0x630] sm:$0xff]  }
  0xa3   :  { %5280 = vmatpush3.bf16.msra.mxu0 %v5774_v14  ;;  %4041 = vmatprep.mubr.bf16.mxu0 %v985_v15  ;;  %v997_v14 = vrot.slane %v25_v12, %v6180_v41  ;;  %v990_v15 = vcombine.high %v25_v12, %v25_v12  ;;  %v5870_v12 = vld [vmem:[%s7403_s1 + $0x7b8] sm:$0xff]  }
  0xa4   :  { %4002 = vmatmul.mubr.bf16.vlgmr.msra.gmra.mrb[16].mxu1 %v986_v18  ;;  %5281 = vmatprep.subr.bf16.mxu0 %v5777_v19 }
  0xa5   :  { %5302 = vmatpush3.bf16.msra.mxu1 %v5776_v17  ;;  %4081 = vmatprep.mubr.bf16.mxu1 %v989_v21  ;;  %v5834_v17 = vld [vmem:[%s7403_s1 + $0x678] sm:$0xff]   ;;  %v1005_v18 = vcombine.high %v997_v14, %v997_v14  ;;  %v6784_v19 = vrot.slane %v990_v15, %v6180_v41  ;;  %v5872_v15 = vld [vmem:[%s7403_s1 + $0x800] sm:$0xff]  }
  0xa6   :  { %5303 = vmatprep.subr.bf16.mxu1 %v5779_v22  ;;  %v5836_v21 = vld [vmem:[%s7403_s1 + $0x6f8] sm:$0xff]  }
  0xa7   :  { %5282 = vmatpush3.bf16.msra.mxu0 %v5778_v20  ;;  %v5833_v20 = vld [vmem:[%s7403_s1 + $0x6b0] sm:$0xff]   ;;  %v1027_v22 = vrot.slane %v1005_v18, %v6180_v41 }
  0xa8   :  { %5283 = vmatprep.subr.bf16.mxu0 %v5781_v24  ;;  %v5835_v24 = vld [vmem:[%s7403_s1 + $0x638] sm:$0xff]  }
  0xa9   :  { %5304 = vmatpush3.bf16.msra.mxu1 %v5780_v23  ;;  %v1006_v23 = vcombine.high %v6784_v19, %v6784_v19 }
  0xaa   :  { %5305 = vmatprep.subr.bf16.mxu1 %v5783_v26  ;;  %v5838_v26 = vld [vmem:[%s7403_s1 + $0x740] sm:$0xff]  }
  0xab   :  { %5284 = vmatpush3.bf16.msra.mxu0 %v5782_v25  ;;  %v1013_v25 = vrot.slane %v997_v14, %v6180_v41  ;;  %v5871_v14 = vld [vmem:[%s7403_s1 + $0x840] sm:$0xff]  }
  0xac   :  { %5285 = vmatprep.subr.bf16.mxu0 %v5785_v28  ;;  %v5837_v28 = vld [vmem:[%s7403_s1 + $0x6b8] sm:$0xff]  }
  0xad   :  { %5306 = vmatpush3.bf16.msra.mxu1 %v5784_v27  ;;  %v1037_v27 = vcombine.high %v1027_v22, %v1027_v22 }
  0xae   :  { %5307 = vmatprep.subr.bf16.mxu1 %v5787_v30  ;;  %v5840_v30 = vld [vmem:[%s7403_s1 + $0x7c0] sm:$0xff]  }
  0xaf   :  { %5286 = vmatpush3.bf16.msra.mxu0 %v5786_v29  ;;  %v1034_v29 = vrot.slane %v1006_v23, %v6180_v41  ;;  %v5879_v23 = vld [vmem:[%s7403_s1 + $0x850] sm:$0xff]  }
  0xb0   :  { %5287 = vmatprep.subr.bf16.mxu0 %v5789_v32  ;;  %v1035_v32 = vcombine.high %v1013_v25, %v1013_v25 }
  0xb1   :  { %5308 = vmatpush3.bf16.msra.mxu1 %v5788_v31  ;;  %v5839_v31 = vld [vmem:[%s7403_s1 + $0x700] sm:$0xff]  }
  0xb2   :  { %5309 = vmatprep.subr.bf16.mxu1 %v5791_v34  ;;  %v5841_v34 = vld [vmem:[%s7403_s1 + $0x780] sm:$0xff]  }
  0xb3   :  { %5288 = vmatpush3.bf16.msra.mxu0 %v5790_v33  ;;  %v5842_v33 = vld [vmem:[%s7403_s1 + $0x748] sm:$0xff]  }
  0xb4   :  { %5289 = vmatprep.subr.bf16.mxu0 %v5793_v36  ;;  %v5844_v36 = vld [vmem:[%s7403_s1 + $0x7c8] sm:$0xff]  }
  0xb5   :  { %5310 = vmatpush3.bf16.msra.mxu1 %v5792_v35  ;;  %v1038_v35 = vcombine.high %v1034_v29, %v1034_v29 }
  0xb6   :  { %5311 = vmatprep.subr.bf16.mxu1 %v5795_v38  ;;  %v5846_v38 = vld [vmem:[%s7403_s1 + $0x750] sm:$0xff]  }
  0xb7   :  { %5290 = vmatpush3.bf16.msra.mxu0 %v5794_v37  ;;  %v5843_v37 = vld [vmem:[%s7403_s1 + $0x708] sm:$0xff]  }
  0xb8   :  { %5291 = vmatprep.subr.bf16.mxu0 %v5797_v40  ;;  %v5848_v40 = vld [vmem:[%s7403_s1 + $0x7d0] sm:$0xff]  }
  0xb9   :  { %5312 = vmatpush3.bf16.msra.mxu1 %v5796_v39  ;;  %v5845_v39 = vld [vmem:[%s7403_s1 + $0x788] sm:$0xff]  }
  0xba   :  { %5313 = vmatprep.subr.bf16.mxu1 %v5799_v43  ;;  %v5850_v43 = vld [vmem:[%s7403_s1 + $0x758] sm:$0xff]  }
  0xbb   :  { %5292 = vmatpush3.bf16.msra.mxu0 %v5798_v42  ;;  %v5847_v42 = vld [vmem:[%s7403_s1 + $0x710] sm:$0xff]  }
  0xbc   :  { %5293 = vmatprep.subr.bf16.mxu0 %v5801_v45  ;;  %v5851_v45 = vld [vmem:[%s7403_s1 + $0x718] sm:$0xff]  }
  0xbd   :  { %5314 = vmatpush3.bf16.msra.mxu1 %v5800_v44  ;;  %v5849_v44 = vld [vmem:[%s7403_s1 + $0x790] sm:$0xff]  }
  0xbe   :  { %5315 = vmatprep.subr.bf16.mxu1 %v5803_v47  ;;  %v5853_v47 = vld [vmem:[%s7403_s1 + $0x798] sm:$0xff]  }
  0xbf   :  { %5294 = vmatpush3.bf16.msra.mxu0 %v5802_v46  ;;  %v5852_v46 = vld [vmem:[%s7403_s1 + $0x7d8] sm:$0xff]  }
  0xc0   :  { %5323 = vmatprep.subr.bf16.mxu0 %v5806_v50  ;;  %v5856_v50 = vld [vmem:[%s7403_s1 + $0x7e0] sm:$0xff]  }
  0xc1   :  { %5316 = vmatpush3.bf16.msra.mxu1 %v5805_v48  ;;  %v5854_v48 = vld [vmem:[%s7403_s1 + $0x760] sm:$0xff]  }
  0xc2   :  { %4042 = vmatmul.mubr.bf16.vlgmr.msra.gmra.mrb[20].mxu0 %v971_v49  ;;  %5345 = vmatprep.subr.bf16.mxu1 %v5808_v52  ;;  %v5855_v49 = vld [vmem:[%s7403_s1 + $0x720] sm:$0xff]   ;;  %v5858_v52 = vld [vmem:[%s7403_s1 + $0x768] sm:$0xff]  }
  0xc3   :  { %5324 = vmatpush3.bf16.msra.mxu0 %v5807_v51  ;;  %4121 = vmatprep.mubr.bf16.mxu0 %v1027_v22  ;;  %v5857_v51 = vld [vmem:[%s7403_s1 + $0x7a0] sm:$0xff]   ;;  %v5878_v22 = vld [vmem:[%s7403_s1 + $0x888] sm:$0xff]  }
  0xc4   :  { %4082 = vmatmul.mubr.bf16.vlgmr.msra.gmra.mrb[20].mxu1 %v987_v54  ;;  %5325 = vmatprep.subr.bf16.mxu0 %v5810_v55  ;;  %v5860_v54 = vld [vmem:[%s7403_s1 + $0x7e8] sm:$0xff]  }
  0xc5   :  { %5346 = vmatpush3.bf16.msra.mxu1 %v5809_v53  ;;  %4161 = vmatprep.mubr.bf16.mxu1 %v1037_v27  ;;  %v5859_v53 = vld [vmem:[%s7403_s1 + $0x728] sm:$0xff]   ;;  %v5883_v27 = vld [vmem:[%s7403_s1 + $0x858] sm:$0xff]  }
  0xc6   :  { %5347 = vmatprep.subr.bf16.mxu1 %v5812_v57  ;;  %v5861_v55 = vld [vmem:[%s7403_s1 + $0x7a8] sm:$0xff]   ;;  %v5862_v57 = vld [vmem:[%s7403_s1 + $0x770] sm:$0xff]  }
  0xc7   :  { %5326 = vmatpush3.bf16.msra.mxu0 %v5811_v56  ;;  %v4655_v56 = vld [vmem:[%s7404_s2] ss:$0 sm:$0xff] }
  0xc8   :  { %5327 = vmatprep.subr.bf16.mxu0 %v5814_v59  ;;  %v5863_v59 = vld [vmem:[%s7403_s1 + $0x730] sm:$0xff]  }
  0xc9   :  { %5348 = vmatpush3.bf16.msra.mxu1 %v5813_v58 }
  0xca   :  { %5349 = vmatprep.subr.bf16.mxu1 %v5816_v61  ;;  %v5864_v61 = vld [vmem:[%s7403_s1 + $0x7f0] sm:$0xff]  }
  0xcb   :  { %5328 = vmatpush3.bf16.msra.mxu0 %v5815_v60 }
  0xcc   :  { %5329 = vmatprep.subr.bf16.mxu0 %v5818_v63 }
  0xcd   :  { %5350 = vmatpush3.bf16.msra.mxu1 %v5817_v62 }
  0xce   :  { %5351 = vmatprep.subr.bf16.mxu1 %v5820_v1  ;;  %v5865_v1 = vld [vmem:[%s7403_s1 + $0x7b0] sm:$0xff]  }
  0xcf   :  { %5330 = vmatpush3.bf16.msra.mxu0 %v5819_v0 }
  0xd0   :  { %5331 = vmatprep.subr.bf16.mxu0 %v5822_v3 }
  0xd1   :  { %5352 = vmatpush3.bf16.msra.mxu1 %v5821_v2  ;;  %v5866_v2 = vld [vmem:[%s7403_s1 + $0x778] sm:$0xff]  }
  0xd2   :  { %5353 = vmatprep.subr.bf16.mxu1 %v5824_v5 }
  0xd3   :  { %5332 = vmatpush3.bf16.msra.mxu0 %v5823_v4 }
  0xd4   :  { %5333 = vmatprep.subr.bf16.mxu0 %v5826_v7  ;;  %v5867_v7 = vld [vmem:[%s7403_s1 + $0x738] sm:$0xff]  }
  0xd5   :  { %5354 = vmatpush3.bf16.msra.mxu1 %v5825_v6 }
  0xd6   :  { %5355 = vmatprep.subr.bf16.mxu1 %v5828_v9  ;;  %v5868_v9 = vld [vmem:[%s7403_s1 + $0x7f8] sm:$0xff]  }
  0xd7   :  { %5334 = vmatpush3.bf16.msra.mxu0 %v5827_v8 }
  0xd8   :  { %5335 = vmatprep.subr.bf16.mxu0 %v5830_v11 }
  0xd9   :  { %5356 = vmatpush3.bf16.msra.mxu1 %v5829_v10 }
  0xda   :  { %5357 = vmatprep.subr.bf16.mxu1 %v5832_v13  ;;  %v1020_v13 = vrot.slane %v6784_v19, %v6180_v41  ;;  %v5875_v19 = vld [vmem:[%s7403_s1 + $0x848] sm:$0xff]  }
  0xdb   :  { %5336 = vmatpush3.bf16.msra.mxu0 %v5831_v16  ;;  %v5873_v16 = vld [vmem:[%s7403_s1 + $0x8c0] sm:$0xff]  }
  0xdc   :  { %5337 = vmatprep.subr.bf16.mxu0 %v5834_v17  ;;  %v5874_v17 = vld [vmem:[%s7403_s1 + $0x880] sm:$0xff]   ;;  %v1036_v18 = vcombine.high %v1020_v13, %v1020_v13 }
  0xdd   :  { %5358 = vmatpush3.bf16.msra.mxu1 %v5833_v20  ;;  %v5876_v20 = vld [vmem:[%s7403_s1 + $0x808] sm:$0xff]  }
  0xde   :  { %5359 = vmatprep.subr.bf16.mxu1 %v5836_v21  ;;  %v5877_v21 = vld [vmem:[%s7403_s1 + $0x8c8] sm:$0xff]  }
  0xdf   :  { %5338 = vmatpush3.bf16.msra.mxu0 %v5835_v24  ;;  %v5880_v24 = vld [vmem:[%s7403_s1 + $0x810] sm:$0xff]  }
  0xe0   :  { %5367 = vmatprep.subr.bf16.mxu0 %v5838_v26  ;;  %v5882_v26 = vld [vmem:[%s7403_s1 + $0x890] sm:$0xff]  }
  0xe1   :  { %5360 = vmatpush3.bf16.msra.mxu1 %v5837_v28  ;;  %v5884_v28 = vld [vmem:[%s7403_s1 + $0x818] sm:$0xff]  }
  0xe2   :  { %4122 = vmatmul.mubr.bf16.vlgmr.msra.gmra.mrb[24].mxu0 %v1013_v25  ;;  %5389 = vmatprep.subr.bf16.mxu1 %v5840_v30  ;;  %v5881_v25 = vld [vmem:[%s7403_s1 + $0x8d0] sm:$0xff]   ;;  %v5886_v30 = vld [vmem:[%s7403_s1 + $0x898] sm:$0xff]  }
  0xe3   :  { %5368 = vmatpush3.bf16.msra.mxu0 %v5839_v31  ;;  %4201 = vmatprep.mubr.bf16.mxu0 %v1034_v29  ;;  %v5885_v29 = vld [vmem:[%s7403_s1 + $0x8d8] sm:$0xff]   ;;  %v5887_v31 = vld [vmem:[%s7403_s1 + $0x860] sm:$0xff]  }
  0xe4   :  { %4162 = vmatmul.mubr.bf16.vlgmr.msra.gmra.mrb[24].mxu1 %v1035_v32  ;;  %5369 = vmatprep.subr.bf16.mxu0 %v5842_v33  ;;  %v5888_v32 = vld [vmem:[%s7403_s1 + $0x820] sm:$0xff]  }
  0xe5   :  { %5390 = vmatpush3.bf16.msra.mxu1 %v5841_v34  ;;  %4241 = vmatprep.mubr.bf16.mxu1 %v1038_v35  ;;  %v5889_v33 = vld [vmem:[%s7403_s1 + $0x8e0] sm:$0xff]   ;;  %v5891_v35 = vld [vmem:[%s7403_s1 + $0x868] sm:$0xff]  }
  0xe6   :  { %5391 = vmatprep.subr.bf16.mxu1 %v5844_v36  ;;  %v5890_v34 = vld [vmem:[%s7403_s1 + $0x8a0] sm:$0xff]   ;;  %v5892_v36 = vld [vmem:[%s7403_s1 + $0x828] sm:$0xff]  }
  0xe7   :  { %5370 = vmatpush3.bf16.msra.mxu0 %v5843_v37  ;;  %v5893_v37 = vld [vmem:[%s7403_s1 + $0x8e8] sm:$0xff]  }
  0xe8   :  { %5371 = vmatprep.subr.bf16.mxu0 %v5846_v38  ;;  %v5894_v38 = vld [vmem:[%s7403_s1 + $0x8a8] sm:$0xff]  }
  0xe9   :  { %5392 = vmatpush3.bf16.msra.mxu1 %v5845_v39  ;;  %v5895_v39 = vld [vmem:[%s7403_s1 + $0x870] sm:$0xff]  }
  0xea   :  { %5393 = vmatprep.subr.bf16.mxu1 %v5848_v40 }
  0xeb   :  { %5372 = vmatpush3.bf16.msra.mxu0 %v5847_v42  ;;  %v5896_v42 = vld [vmem:[%s7403_s1 + $0x830] sm:$0xff]  }
  0xec   :  { %5373 = vmatprep.subr.bf16.mxu0 %v5850_v43  ;;  %v5897_v43 = vld [vmem:[%s7403_s1 + $0x8f0] sm:$0xff]  }
  0xed   :  { %5394 = vmatpush3.bf16.msra.mxu1 %v5849_v44 }
  0xee   :  { %5395 = vmatprep.subr.bf16.mxu1 %v5852_v46 }
  0xef   :  { %5374 = vmatpush3.bf16.msra.mxu0 %v5851_v45  ;;  %v26_v45 = vld [vmem:[%s7402_s0 + $0x20] sm:$0xff] }
  0xf0   :  { %5375 = vmatprep.subr.bf16.mxu0 %v5854_v48 }
  0xf1   :  { %5396 = vmatpush3.bf16.msra.mxu1 %v5853_v47 }
  0xf2   :  { %5397 = vmatprep.subr.bf16.mxu1 %v5856_v50  ;;  %v5899_v50 = vld [vmem:[%s7403_s1 + $0x878] sm:$0xff]  }
  0xf3   :  { %5376 = vmatpush3.bf16.msra.mxu0 %v5855_v49  ;;  %v5898_v49 = vld [vmem:[%s7403_s1 + $0x8b0] sm:$0xff]  }
  0xf4   :  { %5377 = vmatprep.subr.bf16.mxu0 %v5858_v52  ;;  %v1039_v52 = vcombine.high %v26_v45, %v26_v45 }
  0xf5   :  { %v5075_v58 = vpop.f32.mrb[0].mxu0  ;;  %5398 = vmatpush3.bf16.msra.mxu1 %v5857_v51  ;;  %v1046_v51 = vrot.slane %v26_v45, %v6180_v41 }
  0xf6   :  { %v5076_v60 = vpop.f32.mrb[1].mxu0  ;;  %5399 = vmatprep.subr.bf16.mxu1 %v5860_v54 }
  0xf7   :  { %v5077_v62 = vadd.f32 %v5076_v60, %v5075_v58  ;;  %v5078_v63 = vpop.f32.mrb[2].mxu0  ;;  %v5097_v0 = vpop.f32.mrb[0].mxu1  ;;  %5378 = vmatpush3.bf16.msra.mxu0 %v5859_v53  ;;  %v1054_v58 = vcombine.high %v1046_v51, %v1046_v51  ;;  %v5901_v60 = vld [vmem:[%s7403_s1 + $0x8f8] sm:$0xff]  }
  0xf8   :  { %v5079_v3 = vpop.f32.mrb[3].mxu0  ;;  %v5098_v4 = vpop.f32.mrb[1].mxu1  ;;  %5379 = vmatprep.subr.bf16.mxu0 %v5862_v57  ;;  %v5900_v57 = vld [vmem:[%s7403_s1 + $0x838] sm:$0xff]  }
  0xf9   :  { %v3644_v5 = vadd.f32 %v5077_v62, %v4655_v56  ;;  %v5099_v6 = vadd.f32 %v5098_v4, %v5097_v0  ;;  %5400 = vmatpush3.bf16.msra.mxu1 %v5861_v55  ;;  %v5100_v8 = vpop.f32.mrb[2].mxu1  ;;  %v7005_v62 = vrot.slane %v1039_v52, %v6180_v41  ;;  %v1076_v0 = vrot.slane %v1054_v58, %v6180_v41  ;;  %v5903_v3 = vld [vmem:[%s7403_s1 + $0x940] sm:$0xff]   ;;  %v5935_v52 = vld [vmem:[%s7403_s1 + $0x9b8] sm:$0xff]  }
  0xfa   :  { %5401 = vmatprep.subr.bf16.mxu1 %v5864_v61  ;;  %v5101_v10 = vpop.f32.mrb[3].mxu1 }
  0xfb   :  { %v6899_v11 = vadd.f32 %v5099_v6, %v3644_v5  ;;  %5380 = vmatpush3.bf16.msra.mxu0 %v5863_v59  ;;  %v1055_v4 = vcombine.high %v7005_v62, %v7005_v62  ;;  %v1086_v5 = vcombine.high %v1076_v0, %v1076_v0  ;;  %v5904_v6 = vld [vmem:[%s7403_s1 + $0x900] sm:$0xff]  }
  0xfc   :  { %5381 = vmatprep.subr.bf16.mxu0 %v5866_v2  ;;  %v1062_v2 = vrot.slane %v1046_v51, %v6180_v41 }
  0xfd   :  { %5402 = vmatpush3.bf16.msra.mxu1 %v5865_v1  ;;  %v5902_v1 = vld [vmem:[%s7403_s1 + $0x8b8] sm:$0xff]   ;;  %v1083_v8 = vrot.slane %v1055_v4, %v6180_v41 }
  0xfe   :  { %5403 = vmatprep.subr.bf16.mxu1 %v5868_v9  ;;  %v5906_v9 = vld [vmem:[%s7403_s1 + $0x980] sm:$0xff]   ;;  %v1084_v10 = vcombine.high %v1062_v2, %v1062_v2  ;;  %v5949_v4 = vld [vmem:[%s7403_s1 + $0xa18] sm:$0xff]  }
  0xff   :  { %5382 = vmatpush3.bf16.msra.mxu0 %v5867_v7  ;;  %v5905_v7 = vld [vmem:[%s7403_s1 + $0x9c0] sm:$0xff]  }
 0x100   :  { %5411 = vmatprep.subr.bf16.mxu0 %v5871_v14  ;;  %v5909_v14 = vld [vmem:[%s7403_s1 + $0x9c8] sm:$0xff]  }
 0x101   :  { %5404 = vmatpush3.bf16.msra.mxu1 %v5870_v12  ;;  %v5908_v12 = vld [vmem:[%s7403_s1 + $0x908] sm:$0xff]  }
 0x102   :  { %4202 = vmatmul.mubr.bf16.vlgmr.msra.gmra.mrb[28].mxu0 %v1020_v13  ;;  %5433 = vmatprep.subr.bf16.mxu1 %v5873_v16  ;;  %v1087_v13 = vcombine.high %v1083_v8, %v1083_v8  ;;  %v5911_v16 = vld [vmem:[%s7403_s1 + $0x950] sm:$0xff]  }
 0x103   :  { %5412 = vmatpush3.bf16.msra.mxu0 %v5872_v15  ;;  %4281 = vmatprep.mubr.bf16.mxu0 %v1076_v0  ;;  %v5910_v15 = vld [vmem:[%s7403_s1 + $0x988] sm:$0xff]   ;;  %v5945_v0 = vld [vmem:[%s7403_s1 + $0xa10] sm:$0xff]  }
 0x104   :  { %4242 = vmatmul.mubr.bf16.vlgmr.msra.gmra.mrb[28].mxu1 %v1036_v18  ;;  %5413 = vmatprep.subr.bf16.mxu0 %v5875_v19  ;;  %v5913_v18 = vld [vmem:[%s7403_s1 + $0x9d0] sm:$0xff]  }
 0x105   :  { %5434 = vmatpush3.bf16.msra.mxu1 %v5874_v17  ;;  %4321 = vmatprep.mubr.bf16.mxu1 %v1086_v5  ;;  %v5912_v17 = vld [vmem:[%s7403_s1 + $0x910] sm:$0xff]   ;;  %v5950_v5 = vld [vmem:[%s7403_s1 + $0xad8] sm:$0xff]  }
 0x106   :  { %5435 = vmatprep.subr.bf16.mxu1 %v5877_v21  ;;  %v5914_v19 = vld [vmem:[%s7403_s1 + $0x990] sm:$0xff]   ;;  %v5916_v21 = vld [vmem:[%s7403_s1 + $0x918] sm:$0xff]  }
 0x107   :  { %5414 = vmatpush3.bf16.msra.mxu0 %v5876_v20  ;;  %v5915_v20 = vld [vmem:[%s7403_s1 + $0x958] sm:$0xff]  }
 0x108   :  { %5415 = vmatprep.subr.bf16.mxu0 %v5879_v23  ;;  %v5918_v23 = vld [vmem:[%s7403_s1 + $0x998] sm:$0xff]  }
 0x109   :  { %5436 = vmatpush3.bf16.msra.mxu1 %v5878_v22  ;;  %v5917_v22 = vld [vmem:[%s7403_s1 + $0x9d8] sm:$0xff]  }
 0x10a   :  { %5437 = vmatprep.subr.bf16.mxu1 %v5881_v25  ;;  %v5920_v25 = vld [vmem:[%s7403_s1 + $0x920] sm:$0xff]  }
 0x10b   :  { %5416 = vmatpush3.bf16.msra.mxu0 %v5880_v24  ;;  %v5919_v24 = vld [vmem:[%s7403_s1 + $0x960] sm:$0xff]  }
 0x10c   :  { %5417 = vmatprep.subr.bf16.mxu0 %v5883_v27  ;;  %v5922_v27 = vld [vmem:[%s7403_s1 + $0x9a0] sm:$0xff]  }
 0x10d   :  { %5438 = vmatpush3.bf16.msra.mxu1 %v5882_v26  ;;  %v5921_v26 = vld [vmem:[%s7403_s1 + $0x9e0] sm:$0xff]  }
 0x10e   :  { %5439 = vmatprep.subr.bf16.mxu1 %v5885_v29  ;;  %v5924_v29 = vld [vmem:[%s7403_s1 + $0x928] sm:$0xff]  }
 0x10f   :  { %5418 = vmatpush3.bf16.msra.mxu0 %v5884_v28  ;;  %v5923_v28 = vld [vmem:[%s7403_s1 + $0x968] sm:$0xff]  }
 0x110   :  { %5419 = vmatprep.subr.bf16.mxu0 %v5887_v31  ;;  %v5926_v31 = vld [vmem:[%s7403_s1 + $0x9a8] sm:$0xff]  }
 0x111   :  { %5440 = vmatpush3.bf16.msra.mxu1 %v5886_v30  ;;  %v5925_v30 = vld [vmem:[%s7403_s1 + $0x9e8] sm:$0xff]  }
 0x112   :  { %5441 = vmatprep.subr.bf16.mxu1 %v5889_v33 }
 0x113   :  { %5420 = vmatpush3.bf16.msra.mxu0 %v5888_v32  ;;  %v5927_v32 = vld [vmem:[%s7403_s1 + $0x970] sm:$0xff]  }
 0x114   :  { %5421 = vmatprep.subr.bf16.mxu0 %v5891_v35 }
 0x115   :  { %v5119_v40 = vpop.f32.mrb[4].mxu0  ;;  %5442 = vmatpush3.bf16.msra.mxu1 %v5890_v34  ;;  %v5928_v34 = vld [vmem:[%s7403_s1 + $0x930] sm:$0xff]  }
 0x116   :  { %v5120_v44 = vpop.f32.mrb[5].mxu0  ;;  %5443 = vmatprep.subr.bf16.mxu1 %v5893_v37 }
 0x117   :  { %v5121_v46 = vadd.f32 %v5120_v44, %v5119_v40  ;;  %v5122_v47 = vpop.f32.mrb[6].mxu0  ;;  %v5141_v48 = vpop.f32.mrb[4].mxu1  ;;  %5422 = vmatpush3.bf16.msra.mxu0 %v5892_v36  ;;  %v5929_v36 = vld [vmem:[%s7403_s1 + $0x9f0] sm:$0xff]  }
 0x118   :  { %v5123_v53 = vpop.f32.mrb[7].mxu0  ;;  %v5142_v54 = vpop.f32.mrb[5].mxu1  ;;  %5423 = vmatprep.subr.bf16.mxu0 %v5895_v39  ;;  %v5930_v40 = vld [vmem:[%s7403_s1 + $0x9b0] sm:$0xff]   ;;  %v5932_v47 = vld [vmem:[%s7403_s1 + $0x938] sm:$0xff]  }
 0x119   :  { %v3724_v55 = vadd.f32 %v5121_v46, %v6899_v11  ;;  %v5143_v56 = vadd.f32 %v5142_v54, %v5141_v48  ;;  %5444 = vmatpush3.bf16.msra.mxu1 %v5894_v38  ;;  %v5144_v59 = vpop.f32.mrb[6].mxu1  ;;  %v5907_v11 = vld [vmem:[%s7403_s1 + $0x948] sm:$0xff]   ;;  %v1069_v53 = vrot.slane %v7005_v62, %v6180_v41  ;;  %v5936_v54 = vld [vmem:[%s7403_s1 + $0xa40] sm:$0xff]  }
 0x11a   :  { %5445 = vmatprep.subr.bf16.mxu1 %v5897_v43  ;;  %v5145_v61 = vpop.f32.mrb[7].mxu1  ;;  %v5940_v59 = vld [vmem:[%s7403_s1 + $0xa48] sm:$0xff]  }
 0x11b   :  { %v7007_v63 = vadd.f32 %v5143_v56, %v3724_v55  ;;  %5424 = vmatpush3.bf16.msra.mxu0 %v5896_v42  ;;  %v5931_v42 = vld [vmem:[%s7403_s1 + $0x978] sm:$0xff]   ;;  %v5937_v55 = vld [vmem:[%s7403_s1 + $0xa00] sm:$0xff]   ;;  %v1085_v58 = vcombine.high %v1069_v53, %v1069_v53  ;;  %v5942_v61 = vld [vmem:[%s7403_s1 + $0xac8] sm:$0xff]  }
 0x11c   :  { %5425 = vmatprep.subr.bf16.mxu0 %v5899_v50  ;;  %v5938_v56 = vld [vmem:[%s7403_s1 + $0xac0] sm:$0xff]   ;;  %v5943_v62 = vld [vmem:[%s7403_s1 + $0xa88] sm:$0xff]  }
 0x11d   :  { %5446 = vmatpush3.bf16.msra.mxu1 %v5898_v49  ;;  %v5933_v49 = vld [vmem:[%s7403_s1 + $0x9f8] sm:$0xff]  }
 0x11e   :  { %5447 = vmatprep.subr.bf16.mxu1 %v5901_v60  ;;  %v5941_v60 = vld [vmem:[%s7403_s1 + $0xa08] sm:$0xff]  }
 0x11f   :  { %5426 = vmatpush3.bf16.msra.mxu0 %v5900_v57  ;;  %v5939_v57 = vld [vmem:[%s7403_s1 + $0xa80] sm:$0xff]  }
 0x120   :  { %5455 = vmatprep.subr.bf16.mxu0 %v5903_v3  ;;  %v5948_v3 = vld [vmem:[%s7403_s1 + $0xa58] sm:$0xff]  }
 0x121   :  { %5448 = vmatpush3.bf16.msra.mxu1 %v5902_v1  ;;  %v5946_v1 = vld [vmem:[%s7403_s1 + $0xad0] sm:$0xff]  }
 0x122   :  { %4282 = vmatmul.mubr.bf16.vlgmr.msra.gmra.mrb[32].mxu0 %v1062_v2  ;;  %5477 = vmatprep.subr.bf16.mxu1 %v5905_v7  ;;  %v5947_v2 = vld [vmem:[%s7403_s1 + $0xa90] sm:$0xff]   ;;  %v5952_v7 = vld [vmem:[%s7403_s1 + $0xa60] sm:$0xff]  }
 0x123   :  { %5456 = vmatpush3.bf16.msra.mxu0 %v5904_v6  ;;  %4361 = vmatprep.mubr.bf16.mxu0 %v1083_v8  ;;  %v5951_v6 = vld [vmem:[%s7403_s1 + $0xa98] sm:$0xff]   ;;  %v5953_v8 = vld [vmem:[%s7403_s1 + $0xa20] sm:$0xff]  }
 0x124   :  { %4322 = vmatmul.mubr.bf16.vlgmr.msra.gmra.mrb[32].mxu1 %v1084_v10  ;;  %5457 = vmatprep.subr.bf16.mxu0 %v5907_v11  ;;  %v5955_v10 = vld [vmem:[%s7403_s1 + $0xaa0] sm:$0xff]   ;;  %v5956_v11 = vld [vmem:[%s7403_s1 + $0xa68] sm:$0xff]  }
 0x125   :  { %5478 = vmatpush3.bf16.msra.mxu1 %v5906_v9  ;;  %4401 = vmatprep.mubr.bf16.mxu1 %v1087_v13  ;;  %v5954_v9 = vld [vmem:[%s7403_s1 + $0xae0] sm:$0xff]   ;;  %v5958_v13 = vld [vmem:[%s7403_s1 + $0xae8] sm:$0xff]  }
 0x126   :  { %5479 = vmatprep.subr.bf16.mxu1 %v5909_v14  ;;  %v5959_v14 = vld [vmem:[%s7403_s1 + $0xaa8] sm:$0xff]  }
 0x127   :  { %5458 = vmatpush3.bf16.msra.mxu0 %v5908_v12  ;;  %v5957_v12 = vld [vmem:[%s7403_s1 + $0xa28] sm:$0xff]  }
 0x128   :  { %5459 = vmatprep.subr.bf16.mxu0 %v5911_v16 }
 0x129   :  { %5480 = vmatpush3.bf16.msra.mxu1 %v5910_v15  ;;  %v5960_v15 = vld [vmem:[%s7403_s1 + $0xa70] sm:$0xff]  }
 0x12a   :  { %5481 = vmatprep.subr.bf16.mxu1 %v5913_v18 }
 0x12b   :  { %5460 = vmatpush3.bf16.msra.mxu0 %v5912_v17  ;;  %v5961_v17 = vld [vmem:[%s7403_s1 + $0xa30] sm:$0xff]  }
 0x12c   :  { %5461 = vmatprep.subr.bf16.mxu0 %v5915_v20 }
 0x12d   :  { %5482 = vmatpush3.bf16.msra.mxu1 %v5914_v19  ;;  %v5962_v19 = vld [vmem:[%s7403_s1 + $0xaf0] sm:$0xff]  }
 0x12e   :  { %5483 = vmatprep.subr.bf16.mxu1 %v5917_v22 }
 0x12f   :  { %5462 = vmatpush3.bf16.msra.mxu0 %v5916_v21 }
 0x130   :  { %5463 = vmatprep.subr.bf16.mxu0 %v5919_v24  ;;  %v27_v24 = vld [vmem:[%s7402_s0 + $0x28] sm:$0xff] }
 0x131   :  { %5484 = vmatpush3.bf16.msra.mxu1 %v5918_v23  ;;  %v5964_v23 = vld [vmem:[%s7403_s1 + $0xa78] sm:$0xff]  }
 0x132   :  { %5485 = vmatprep.subr.bf16.mxu1 %v5921_v26 }
 0x133   :  { %5464 = vmatpush3.bf16.msra.mxu0 %v5920_v25 }
 0x134   :  { %5465 = vmatprep.subr.bf16.mxu0 %v5923_v28  ;;  %v1088_v28 = vcombine.high %v27_v24, %v27_v24 }
 0x135   :  { %v5163_v33 = vpop.f32.mrb[8].mxu0  ;;  %5486 = vmatpush3.bf16.msra.mxu1 %v5922_v27  ;;  %v1095_v27 = vrot.slane %v27_v24, %v6180_v41 }
 0x136   :  { %v5164_v35 = vpop.f32.mrb[9].mxu0  ;;  %5487 = vmatprep.subr.bf16.mxu1 %v5925_v30 }
 0x137   :  { %v5165_v37 = vadd.f32 %v5164_v35, %v5163_v33  ;;  %v5166_v38 = vpop.f32.mrb[10].mxu0  ;;  %v5185_v39 = vpop.f32.mrb[8].mxu1  ;;  %5466 = vmatpush3.bf16.msra.mxu0 %v5924_v29  ;;  %v5966_v33 = vld [vmem:[%s7403_s1 + $0xaf8] sm:$0xff]  }
 0x138   :  { %v5167_v43 = vpop.f32.mrb[11].mxu0  ;;  %v5186_v44 = vpop.f32.mrb[9].mxu1  ;;  %5467 = vmatprep.subr.bf16.mxu0 %v5927_v32  ;;  %v5965_v38 = vld [vmem:[%s7403_s1 + $0xa38] sm:$0xff]  }
 0x139   :  { %v3804_v45 = vadd.f32 %v5165_v37, %v7007_v63  ;;  %v5187_v46 = vadd.f32 %v5186_v44, %v5185_v39  ;;  %5488 = vmatpush3.bf16.msra.mxu1 %v5926_v31  ;;  %v5188_v48 = vpop.f32.mrb[10].mxu1  ;;  %v5944_v63 = vld [vmem:[%s7403_s1 + $0xa50] sm:$0xff]   ;;  %v5967_v44 = vld [vmem:[%s7403_s1 + $0xab8] sm:$0xff]  }
 0x13a   :  { %5489 = vmatprep.subr.bf16.mxu1 %v5929_v36  ;;  %v5189_v50 = vpop.f32.mrb[11].mxu1  ;;  %v5963_v31 = vld [vmem:[%s7403_s1 + $0xab0] sm:$0xff]   ;;  %v7214_v36 = vrot.slane %v1088_v28, %v6180_v41  ;;  %v5969_v48 = vld [vmem:[%s7403_s1 + $0xb00] sm:$0xff]  }
 0x13b   :  { %v7111_v51 = vadd.f32 %v5187_v46, %v3804_v45  ;;  %5468 = vmatpush3.bf16.msra.mxu0 %v5928_v34  ;;  %v1103_v34 = vcombine.high %v1095_v27, %v1095_v27  ;;  %v5970_v46 = vld [vmem:[%s7403_s1 + $0xbc0] sm:$0xff]   ;;  %v5972_v50 = vld [vmem:[%s7403_s1 + $0xb48] sm:$0xff]  }
 0x13c   :  { %5469 = vmatprep.subr.bf16.mxu0 %v5931_v42  ;;  %v5968_v42 = vld [vmem:[%s7403_s1 + $0xb40] sm:$0xff]   ;;  %v1104_v43 = vcombine.high %v7214_v36, %v7214_v36 }
 0x13d   :  { %5490 = vmatpush3.bf16.msra.mxu1 %v5930_v40  ;;  %v1125_v39 = vrot.slane %v1103_v34, %v6180_v41  ;;  %v1111_v40 = vrot.slane %v1095_v27, %v6180_v41  ;;  %v1118_v27 = vrot.slane %v7214_v36, %v6180_v41  ;;  %v6001_v28 = vld [vmem:[%s7403_s1 + $0xc40] sm:$0xff]   ;;  %v6005_v34 = vld [vmem:[%s7403_s1 + $0xc50] sm:$0xff]   ;;  %v6007_v36 = vld [vmem:[%s7403_s1 + $0xc58] sm:$0xff]  }
 0x13e   :  { %5491 = vmatprep.subr.bf16.mxu1 %v5933_v49 }
 0x13f   :  { %5470 = vmatpush3.bf16.msra.mxu0 %v5932_v47  ;;  %v1135_v45 = vcombine.high %v1125_v39, %v1125_v39  ;;  %v1132_v47 = vrot.slane %v1104_v43, %v6180_v41  ;;  %v1133_v49 = vcombine.high %v1111_v40, %v1111_v40 }
 0x140   :  { %5499 = vmatprep.subr.bf16.mxu0 %v5936_v54  ;;  %v5973_v54 = vld [vmem:[%s7403_s1 + $0xb08] sm:$0xff]  }
 0x141   :  { %5492 = vmatpush3.bf16.msra.mxu1 %v5935_v52  ;;  %v1136_v52 = vcombine.high %v1132_v47, %v1132_v47 }
 0x142   :  { %4362 = vmatmul.mubr.bf16.vlgmr.msra.gmra.mrb[36].mxu0 %v1069_v53  ;;  %5521 = vmatprep.subr.bf16.mxu1 %v5938_v56  ;;  %v5974_v53 = vld [vmem:[%s7403_s1 + $0xbc8] sm:$0xff]  }
 0x143   :  { %5500 = vmatpush3.bf16.msra.mxu0 %v5937_v55  ;;  %4441 = vmatprep.mubr.bf16.mxu0 %v1125_v39  ;;  %v5976_v55 = vld [vmem:[%s7403_s1 + $0xb50] sm:$0xff]   ;;  %v5975_v56 = vld [vmem:[%s7403_s1 + $0xb88] sm:$0xff]  }
 0x144   :  { %4402 = vmatmul.mubr.bf16.vlgmr.msra.gmra.mrb[36].mxu1 %v1085_v58  ;;  %5501 = vmatprep.subr.bf16.mxu0 %v5940_v59  ;;  %v5977_v58 = vld [vmem:[%s7403_s1 + $0xb10] sm:$0xff]   ;;  %v5980_v59 = vld [vmem:[%s7403_s1 + $0xb58] sm:$0xff]  }
 0x145   :  { %5522 = vmatpush3.bf16.msra.mxu1 %v5939_v57  ;;  %4481 = vmatprep.mubr.bf16.mxu1 %v1135_v45  ;;  %v5978_v57 = vld [vmem:[%s7403_s1 + $0xbd0] sm:$0xff]  }
 0x146   :  { %5523 = vmatprep.subr.bf16.mxu1 %v5942_v61  ;;  %v5982_v61 = vld [vmem:[%s7403_s1 + $0xbd8] sm:$0xff]  }
 0x147   :  { %5502 = vmatpush3.bf16.msra.mxu0 %v5941_v60  ;;  %v5979_v60 = vld [vmem:[%s7403_s1 + $0xb90] sm:$0xff]  }
 0x148   :  { %5503 = vmatprep.subr.bf16.mxu0 %v5944_v63  ;;  %v5984_v63 = vld [vmem:[%s7403_s1 + $0xb60] sm:$0xff]  }
 0x149   :  { %5524 = vmatpush3.bf16.msra.mxu1 %v5943_v62  ;;  %v5981_v62 = vld [vmem:[%s7403_s1 + $0xb18] sm:$0xff]  }
 0x14a   :  { %5525 = vmatprep.subr.bf16.mxu1 %v5946_v1  ;;  %v5986_v1 = vld [vmem:[%s7403_s1 + $0xbe0] sm:$0xff]  }
 0x14b   :  { %5504 = vmatpush3.bf16.msra.mxu0 %v5945_v0  ;;  %v5983_v0 = vld [vmem:[%s7403_s1 + $0xb98] sm:$0xff]  }
 0x14c   :  { %5505 = vmatprep.subr.bf16.mxu0 %v5948_v3  ;;  %v5988_v3 = vld [vmem:[%s7403_s1 + $0xb68] sm:$0xff]  }
 0x14d   :  { %5526 = vmatpush3.bf16.msra.mxu1 %v5947_v2  ;;  %v5985_v2 = vld [vmem:[%s7403_s1 + $0xb20] sm:$0xff]  }
 0x14e   :  { %5527 = vmatprep.subr.bf16.mxu1 %v5950_v5  ;;  %v5990_v5 = vld [vmem:[%s7403_s1 + $0xbe8] sm:$0xff]  }
 0x14f   :  { %5506 = vmatpush3.bf16.msra.mxu0 %v5949_v4  ;;  %v5987_v4 = vld [vmem:[%s7403_s1 + $0xba0] sm:$0xff]  }
 0x150   :  { %5507 = vmatprep.subr.bf16.mxu0 %v5952_v7  ;;  %v5992_v7 = vld [vmem:[%s7403_s1 + $0xb70] sm:$0xff]  }
 0x151   :  { %5528 = vmatpush3.bf16.msra.mxu1 %v5951_v6  ;;  %v5989_v6 = vld [vmem:[%s7403_s1 + $0xb28] sm:$0xff]  }
 0x152   :  { %5529 = vmatprep.subr.bf16.mxu1 %v5954_v9  ;;  %v5991_v9 = vld [vmem:[%s7403_s1 + $0xba8] sm:$0xff]  }
 0x153   :  { %5508 = vmatpush3.bf16.msra.mxu0 %v5953_v8 }
 0x154   :  { %5509 = vmatprep.subr.bf16.mxu0 %v5956_v11  ;;  %v5994_v11 = vld [vmem:[%s7403_s1 + $0xbf0] sm:$0xff]  }
 0x155   :  { %v5207_v16 = vpop.f32.mrb[12].mxu0  ;;  %5530 = vmatpush3.bf16.msra.mxu1 %v5955_v10 }
 0x156   :  { %v5208_v18 = vpop.f32.mrb[13].mxu0  ;;  %5531 = vmatprep.subr.bf16.mxu1 %v5958_v13 }
 0x157   :  { %v5209_v20 = vadd.f32 %v5208_v18, %v5207_v16  ;;  %v5210_v21 = vpop.f32.mrb[14].mxu0  ;;  %v5229_v22 = vpop.f32.mrb[12].mxu1  ;;  %5510 = vmatpush3.bf16.msra.mxu0 %v5957_v12  ;;  %v5996_v16 = vld [vmem:[%s7403_s1 + $0xb78] sm:$0xff]  }
 0x158   :  { %v5211_v25 = vpop.f32.mrb[15].mxu0  ;;  %v5230_v26 = vpop.f32.mrb[13].mxu1  ;;  %5511 = vmatprep.subr.bf16.mxu0 %v5960_v15  ;;  %v5993_v15 = vld [vmem:[%s7403_s1 + $0xb30] sm:$0xff]  }
 0x159   :  { %v3884_v29 = vadd.f32 %v5209_v20, %v7111_v51  ;;  %v5231_v30 = vadd.f32 %v5230_v26, %v5229_v22  ;;  %5532 = vmatpush3.bf16.msra.mxu1 %v5959_v14  ;;  %v5232_v32 = vpop.f32.mrb[14].mxu1  ;;  %v5971_v51 = vld [vmem:[%s7403_s1 + $0xb80] sm:$0xff]   ;;  %v5995_v21 = vld [vmem:[%s7403_s1 + $0xbb0] sm:$0xff]   ;;  %v5997_v26 = vld [vmem:[%s7403_s1 + $0xb38] sm:$0xff]  }
 0x15a   :  { %5533 = vmatprep.subr.bf16.mxu1 %v5962_v19  ;;  %v5233_v35 = vpop.f32.mrb[15].mxu1  ;;  %v6003_v32 = vld [vmem:[%s7403_s1 + $0xc48] sm:$0xff]  }
 0x15b   :  { %v7216_v37 = vadd.f32 %v5231_v30, %v3884_v29  ;;  %5512 = vmatpush3.bf16.msra.mxu0 %v5961_v17  ;;  %v6000_v29 = vld [vmem:[%s7403_s1 + $0xbb8] sm:$0xff]   ;;  %v6002_v30 = vld [vmem:[%s7403_s1 + $0xc00] sm:$0xff]   ;;  %v6006_v35 = vld [vmem:[%s7403_s1 + $0xc10] sm:$0xff]  }
 0x15c   :  { %5513 = vmatprep.subr.bf16.mxu0 %v5964_v23  ;;  %v5998_v23 = vld [vmem:[%s7403_s1 + $0xbf8] sm:$0xff]  }
 0x15d   :  { %5534 = vmatpush3.bf16.msra.mxu1 %v5963_v31  ;;  %v1134_v31 = vcombine.high %v1118_v27, %v1118_v27 }
 0x15e   :  { %5535 = vmatprep.subr.bf16.mxu1 %v5966_v33  ;;  %v6004_v33 = vld [vmem:[%s7403_s1 + $0xc08] sm:$0xff]  }
 0x15f   :  { %5514 = vmatpush3.bf16.msra.mxu0 %v5965_v38 }
 0x160   :  { %5543 = vmatprep.subr.bf16.mxu0 %v5968_v42 }
 0x161   :  { %5536 = vmatpush3.bf16.msra.mxu1 %v5967_v44 }
 0x162   :  { %4442 = vmatmul.mubr.bf16.vlgmr.msra.gmra.mrb[40].mxu0 %v1111_v40  ;;  %5565 = vmatprep.subr.bf16.mxu1 %v5970_v46 }
 0x163   :  { %5544 = vmatpush3.bf16.msra.mxu0 %v5969_v48  ;;  %4521 = vmatprep.mubr.bf16.mxu0 %v1132_v47 }
 0x164   :  { %4482 = vmatmul.mubr.bf16.vlgmr.msra.gmra.mrb[40].mxu1 %v1133_v49  ;;  %5545 = vmatprep.subr.bf16.mxu0 %v5972_v50 }
 0x165   :  { %5566 = vmatpush3.bf16.msra.mxu1 %v5971_v51  ;;  %4561 = vmatprep.mubr.bf16.mxu1 %v1136_v52 }
 0x166   :  { %5567 = vmatprep.subr.bf16.mxu1 %v5974_v53 }
 0x167   :  { %5546 = vmatpush3.bf16.msra.mxu0 %v5973_v54 }
 0x168   :  { %5547 = vmatprep.subr.bf16.mxu0 %v5976_v55 }
 0x169   :  { %5568 = vmatpush3.bf16.msra.mxu1 %v5975_v56 }
 0x16a   :  { %5569 = vmatprep.subr.bf16.mxu1 %v5978_v57 }
 0x16b   :  { %5548 = vmatpush3.bf16.msra.mxu0 %v5977_v58 }
 0x16c   :  { %5549 = vmatprep.subr.bf16.mxu0 %v5980_v59 }
 0x16d   :  { %5570 = vmatpush3.bf16.msra.mxu1 %v5979_v60 }
 0x16e   :  { %5571 = vmatprep.subr.bf16.mxu1 %v5982_v61 }
 0x16f   :  { %5550 = vmatpush3.bf16.msra.mxu0 %v5981_v62 }
 0x170   :  { %5551 = vmatprep.subr.bf16.mxu0 %v5984_v63 }
 0x171   :  { %5572 = vmatpush3.bf16.msra.mxu1 %v5983_v0 }
 0x172   :  { %5573 = vmatprep.subr.bf16.mxu1 %v5986_v1 }
 0x173   :  { %5552 = vmatpush3.bf16.msra.mxu0 %v5985_v2 }
 0x174   :  { %5553 = vmatprep.subr.bf16.mxu0 %v5988_v3 }
 0x175   :  { %v5251_v8 = vpop.f32.mrb[16].mxu0  ;;  %5574 = vmatpush3.bf16.msra.mxu1 %v5987_v4 }
 0x176   :  { %v5252_v10 = vpop.f32.mrb[17].mxu0  ;;  %5575 = vmatprep.subr.bf16.mxu1 %v5990_v5 }
 0x177   :  { %v5253_v12 = vadd.f32 %v5252_v10, %v5251_v8  ;;  %v5254_v13 = vpop.f32.mrb[18].mxu0  ;;  %v5273_v14 = vpop.f32.mrb[16].mxu1  ;;  %5554 = vmatpush3.bf16.msra.mxu0 %v5989_v6 }
 0x178   :  { %v5255_v17 = vpop.f32.mrb[19].mxu0  ;;  %v5274_v18 = vpop.f32.mrb[17].mxu1  ;;  %5555 = vmatprep.subr.bf16.mxu0 %v5992_v7 }
 0x179   :  { %v3964_v19 = vadd.f32 %v5253_v12, %v7216_v37  ;;  %v5275_v20 = vadd.f32 %v5274_v18, %v5273_v14  ;;  %5576 = vmatpush3.bf16.msra.mxu1 %v5991_v9  ;;  %v5276_v22 = vpop.f32.mrb[18].mxu1  ;;  %v4656_v37 = vld.sshfl [vmem:[%s7402_s0 + $0x30] sm:$0x11 pattern:$0x75316420] }
 0x17a   :  { %5577 = vmatprep.subr.bf16.mxu1 %v5994_v11  ;;  %v5277_v24 = vpop.f32.mrb[19].mxu1 }
 0x17b   :  { %v4004_v25 = vadd.f32 %v5275_v20, %v3964_v19  ;;  %5556 = vmatpush3.bf16.msra.mxu0 %v5993_v15 }
 0x17c   :  { %5557 = vmatprep.subr.bf16.mxu0 %v5996_v16 }
 0x17d   :  { %5578 = vmatpush3.bf16.msra.mxu1 %v5995_v21 }
 0x17e   :  { %5579 = vmatprep.subr.bf16.mxu1 %v5998_v23 }
 0x17f   :  { %5558 = vmatpush3.bf16.msra.mxu0 %v5997_v26 }
 0x180   :  { %5587 = vmatprep.subr.bf16.mxu0 %v6001_v28 }
 0x181   :  { %5580 = vmatpush3.bf16.msra.mxu1 %v6000_v29 }
 0x182   :  { %4522 = vmatmul.mubr.bf16.vlgmr.msra.gmra.mrb[44].mxu0 %v1118_v27 }
 0x183   :  { %5588 = vmatpush3.bf16.msra.mxu0 %v6002_v30 }
 0x184   :  { %4562 = vmatmul.mubr.bf16.vlgmr.msra.gmra.mrb[44].mxu1 %v1134_v31  ;;  %5589 = vmatprep.subr.bf16.mxu0 %v6003_v32 }
 0x187   :  { %5590 = vmatpush3.bf16.msra.mxu0 %v6004_v33 }
 0x188   :  { %5591 = vmatprep.subr.bf16.mxu0 %v6005_v34 }
 0x189   :  { %10 = vsyncpa [#allocation3], 0  ;;  %v1144_v38 = vcombine.high %v4656_v37, %v4656_v37  ;;  %v6008_v39 = vld [vmem:[%s7403_s1 + $0xc18] sm:$0xff]   ;;  %v6009_v40 = vld [vmem:[%s7403_s1 + $0xc60] sm:$0xff]   ;;  %v1151_v62 = vrot.slane %v4656_v37, %v6180_v41  ;;  %vm4609_vm0 = vcmask 254976   ;;  %s6044_s24 = smov [#allocation2]  }
 0x18a   :  { %v6010_v43 = vld [vmem:[%s7403_s1 + $0xc20] sm:$0xff]   ;;  %v6011_v44 = vld [vmem:[%s7403_s1 + $0xc68] sm:$0xff]   ;;  %v6013_v46 = vld [vmem:[%s7403_s1 + $0xc70] sm:$0xff]   ;;  %s4647_s25 = sshll.u32 %s6044_s24, 4  ;;  %s4648_s25 = int_to_ptr.vmem [resolvable:$true] %s4647_s25 }
 0x18b   :  { %5592 = vmatpush3.bf16.msra.mxu0 %v6006_v35  ;;  %v1158_v42 = vrot.slane %v1144_v38, %v6180_v41  ;;  %v6012_v45 = vld [vmem:[%s7403_s1 + $0xc28] sm:$0xff]   ;;  %v6014_v52 = vld [vmem:[%s7403_s1 + $0xc30] sm:$0xff]   ;;  %v6015_v55 = vld [vmem:[%s7403_s1 + $0xc78] sm:$0xff]   ;;  %s6019_s26 = scalar_lea.vmem %s4648_s25, 32  ;;  %p6024_p1 = scmp.lt.s32.totalorder %s4648_s25, %s4648_s25 }
 0x18c   :  { %5593 = vmatprep.subr.bf16.mxu0 %v6007_v36  ;;  %v6016_v61 = vld [vmem:[%s7403_s1 + $0xc38] sm:$0xff]   ;;  %p6020_p0 = scmp.ne.s32.totalorder %s4648_s25, %s6019_s26  ;;  %p6025_p2 = scmp.lt.s32.totalorder %s6019_s26, %s6019_s26 }
 0x18d   :  { %4601 = vmatprep.mubr.bf16.mxu0 %v1158_v42 }
 0x18e   :  { %p6026_p3 = por %p6025_p2, %p6024_p1 }
 0x18f   :  { %5594 = vmatpush3.bf16.msra.mxu0 %v6008_v39 }
 0x190   :  { %5595 = vmatprep.subr.bf16.mxu0 %v6009_v40  ;;  %p6027_p4 = pnand %p6026_p3, %p6020_p0 }
 0x193   :  { %5596 = vmatpush3.bf16.msra.mxu0 %v6010_v43 }
 0x194   :  { %5597 = vmatprep.subr.bf16.mxu0 %v6011_v44 }
 0x195   :  { %v5295_v47 = vpop.f32.mrb[20].mxu0 }
 0x196   :  { %v5296_v48 = vpop.f32.mrb[21].mxu0 }
 0x197   :  { %v5297_v49 = vadd.f32 %v5296_v48, %v5295_v47  ;;  %v5298_v50 = vpop.f32.mrb[22].mxu0  ;;  %v5317_v51 = vpop.f32.mrb[20].mxu1  ;;  %5598 = vmatpush3.bf16.msra.mxu0 %v6012_v45 }
 0x198   :  { %v5299_v53 = vpop.f32.mrb[23].mxu0  ;;  %v5318_v54 = vpop.f32.mrb[21].mxu1  ;;  %5599 = vmatprep.subr.bf16.mxu0 %v6013_v46 }
 0x199   :  { %v4044_v56 = vadd.f32 %v5297_v49, %v4004_v25  ;;  %v5319_v57 = vadd.f32 %v5318_v54, %v5317_v51  ;;  %v5320_v58 = vpop.f32.mrb[22].mxu1 }
 0x19a   :  { %v5321_v59 = vpop.f32.mrb[23].mxu1 }
 0x19b   :  { %v4084_v60 = vadd.f32 %v5319_v57, %v4044_v56  ;;  %5600 = vmatpush3.bf16.msra.mxu0 %v6014_v52 }
 0x19c   :  { %5601 = vmatprep.subr.bf16.mxu0 %v6015_v55 }
 0x19f   :  { %5602 = vmatpush3.bf16.msra.mxu0 %v6016_v61 }
 0x1a2   :  { %4602 = vmatmul.mubr.bf16.vlgmr.msra.gmra.mrb[48].mxu0 %v1151_v62 }
 0x1b5   :  { %v5339_v63 = vpop.f32.mrb[24].mxu0 }
 0x1b6   :  { %v5340_v0 = vpop.f32.mrb[25].mxu0 }
 0x1b7   :  { %v5341_v1 = vadd.f32 %v5340_v0, %v5339_v63  ;;  %v5342_v2 = vpop.f32.mrb[26].mxu0  ;;  %v5361_v3 = vpop.f32.mrb[24].mxu1 }
 0x1b8   :  { %v5343_v4 = vpop.f32.mrb[27].mxu0  ;;  %v5362_v5 = vpop.f32.mrb[25].mxu1 }
 0x1b9   :  { %v4124_v6 = vadd.f32 %v5341_v1, %v4084_v60  ;;  %v5363_v7 = vadd.f32 %v5362_v5, %v5361_v3  ;;  %v5364_v8 = vpop.f32.mrb[26].mxu1 }
 0x1ba   :  { %v5365_v9 = vpop.f32.mrb[27].mxu1 }
 0x1bb   :  { %v4164_v10 = vadd.f32 %v5363_v7, %v4124_v6 }
 0x1d5   :  { %v5383_v11 = vpop.f32.mrb[28].mxu0 }
 0x1d6   :  { %v5384_v12 = vpop.f32.mrb[29].mxu0 }
 0x1d7   :  { %v5385_v13 = vadd.f32 %v5384_v12, %v5383_v11  ;;  %v5386_v14 = vpop.f32.mrb[30].mxu0  ;;  %v5405_v15 = vpop.f32.mrb[28].mxu1 }
 0x1d8   :  { %v5387_v41 = vpop.f32.mrb[31].mxu0  ;;  %v5406_v16 = vpop.f32.mrb[29].mxu1 }
 0x1d9   :  { %v4204_v17 = vadd.f32 %v5385_v13, %v4164_v10  ;;  %v5407_v18 = vadd.f32 %v5406_v16, %v5405_v15  ;;  %v5408_v19 = vpop.f32.mrb[30].mxu1 }
 0x1da   :  { %v5409_v20 = vpop.f32.mrb[31].mxu1 }
 0x1db   :  { %v4244_v21 = vadd.f32 %v5407_v18, %v4204_v17 }
 0x1f5   :  { %v5427_v22 = vpop.f32.mrb[32].mxu0 }
 0x1f6   :  { %v5428_v23 = vpop.f32.mrb[33].mxu0 }
 0x1f7   :  { %v5429_v24 = vadd.f32 %v5428_v23, %v5427_v22  ;;  %v5430_v25 = vpop.f32.mrb[34].mxu0  ;;  %v5449_v26 = vpop.f32.mrb[32].mxu1  ;;  %v5057_v22 = vld [vmem:[%s7405_s3] ss:$0 sm:$0xff] }
 0x1f8   :  { %v5431_v27 = vpop.f32.mrb[35].mxu0  ;;  %v5450_v28 = vpop.f32.mrb[33].mxu1 }
 0x1f9   :  { %v4284_v29 = vadd.f32 %v5429_v24, %v4244_v21  ;;  %v5451_v30 = vadd.f32 %v5450_v28, %v5449_v26  ;;  %v5452_v31 = vpop.f32.mrb[34].mxu1  ;;  %v5058_v24 = vld [vmem:[%s7406_s4] ss:$0 sm:$0xff] }
 0x1fa   :  { %v5453_v32 = vpop.f32.mrb[35].mxu1 }
 0x1fb   :  { %v4324_v33 = vadd.f32 %v5451_v30, %v4284_v29 }
 0x215   :  { %v5471_v34 = vpop.f32.mrb[36].mxu0 }
 0x216   :  { %v5472_v35 = vpop.f32.mrb[37].mxu0 }
 0x217   :  { %v5473_v36 = vadd.f32 %v5472_v35, %v5471_v34  ;;  %v5474_v37 = vpop.f32.mrb[38].mxu0  ;;  %v5493_v38 = vpop.f32.mrb[36].mxu1 }
 0x218   :  { %v5475_v39 = vpop.f32.mrb[39].mxu0  ;;  %v5494_v40 = vpop.f32.mrb[37].mxu1 }
 0x219   :  { %v4364_v42 = vadd.f32 %v5473_v36, %v4324_v33  ;;  %v5495_v43 = vadd.f32 %v5494_v40, %v5493_v38  ;;  %v5496_v44 = vpop.f32.mrb[38].mxu1 }
 0x21a   :  { %v5497_v45 = vpop.f32.mrb[39].mxu1 }
 0x21b   :  { %v4404_v46 = vadd.f32 %v5495_v43, %v4364_v42 }
 0x235   :  { %v5515_v47 = vpop.f32.mrb[40].mxu0 }
 0x236   :  { %v5516_v48 = vpop.f32.mrb[41].mxu0 }
 0x237   :  { %v5517_v49 = vadd.f32 %v5516_v48, %v5515_v47  ;;  %v5518_v50 = vpop.f32.mrb[42].mxu0  ;;  %v5537_v51 = vpop.f32.mrb[40].mxu1 }
 0x238   :  { %v5519_v52 = vpop.f32.mrb[43].mxu0  ;;  %v5538_v53 = vpop.f32.mrb[41].mxu1 }
 0x239   :  { %v4444_v54 = vadd.f32 %v5517_v49, %v4404_v46  ;;  %v5539_v55 = vadd.f32 %v5538_v53, %v5537_v51  ;;  %v5540_v56 = vpop.f32.mrb[42].mxu1 }
 0x23a   :  { %v5541_v57 = vpop.f32.mrb[43].mxu1 }
 0x23b   :  { %v4484_v58 = vadd.f32 %v5539_v55, %v4444_v54 }
 0x255   :  { %v5559_v59 = vpop.f32.mrb[44].mxu0 }
 0x256   :  { %v5560_v60 = vpop.f32.mrb[45].mxu0 }
 0x257   :  { %v5561_v61 = vadd.f32 %v5560_v60, %v5559_v59  ;;  %v5562_v62 = vpop.f32.mrb[46].mxu0  ;;  %v5581_v63 = vpop.f32.mrb[44].mxu1 }
 0x258   :  { %v5563_v0 = vpop.f32.mrb[47].mxu0  ;;  %v5582_v1 = vpop.f32.mrb[45].mxu1 }
 0x259   :  { %v4524_v2 = vadd.f32 %v5561_v61, %v4484_v58  ;;  %v5583_v3 = vadd.f32 %v5582_v1, %v5581_v63  ;;  %v5584_v4 = vpop.f32.mrb[46].mxu1 }
 0x25a   :  { %v5585_v5 = vpop.f32.mrb[47].mxu1 }
 0x25b   :  { %v4564_v6 = vadd.f32 %v5583_v3, %v4524_v2 }
 0x275   :  { %v5603_v7 = vpop.f32.mrb[48].mxu0 }
 0x276   :  { %v5604_v8 = vpop.f32.mrb[49].mxu0 }
 0x277   :  { %v5605_v9 = vadd.f32 %v5604_v8, %v5603_v7  ;;  %v5606_v10 = vpop.f32.mrb[50].mxu0 }
 0x278   :  { %v5607_v11 = vpop.f32.mrb[51].mxu0 }
 0x279   :  { %v4604_v12 = vadd.f32 %v5605_v9, %v4564_v6 }
 0x27b   :  { %v4610_v13 = vsel %vm4609_vm0, %v4604_v12, 0.0 }
 0x27c   :  { %4611 = vadd.xlane.f32.xlu0 %v4610_v13 }
 0x309   :  { %v4612_v14 = vpop.xlane.xlu0 %4611 }
 0x30a   :  { %v4614_v15 = vmul.f32 0.03125, %v4612_v14 }
 0x30c   :  { %v4615_v41 = vsub.f32 %v4604_v12, %v4614_v15 }
 0x30e   :  { %v4616_v16 = vmul.f32 %v4615_v41, %v4615_v41 }
 0x310   :  { %v4617_v17 = vsel %vm4609_vm0, %v4616_v16, 0.0 }
 0x311   :  { %4618 = vadd.xlane.f32.xlu0 %v4617_v17 }
 0x39e   :  { %v4619_v18 = vpop.xlane.xlu0 %4618 }
 0x39f   :  { %v4620_v19 = vmul.f32 0.03125, %v4619_v18 }
 0x3a1   :  { %v4621_v20 = vadd.f32 1e-05, %v4620_v19 }
 0x3a3   :  { %6017 = vrsqrt.f32 %v4621_v20 }
 0x3ad   :  { %v6018_v21 = vpop.eup %6017 }
 0x3ae   :  { %v4623_v23 = vmul.f32 %v6018_v21, %v4615_v41 }
 0x3b0   :  { %v4631_v25 = vmul.f32 %v5057_v22, %v4623_v23 }
 0x3b2   :  { %v4639_v26 = vadd.f32 %v5058_v24, %v4631_v25 }
 0x3b4   :  { %4640 = vst.msk [vmem:[#allocation2] sm:$0x3] %vm4609_vm0, %v4639_v26 }
 0x3b5   :  { %6030 = shalt.err (!%p6027_p4)
}
 0x3b6   :  { %s6031_s28 = scalar_lea.hbm %s7407_s5, 32 }
 0x3b7   :  { %p6032_p5 = scmp.ne.s32.totalorder %s7407_s5, %s6031_s28  ;;  %p6035_p6 = scmp.lt.u32.totalorder %s6031_s28, %s7407_s5 }
 0x3b9   :  { %p6037_p7 = pnand %p6035_p6, %p6032_p5 }
 0x3bb   :  { %6040 = shalt.err (!%p6037_p7)
}
 0x3bc   :  { %4650 = dma.vmem_to_hbm [thread:$0]  %s4648_s25, 32, %s7407_s5, [#allocation3]  }
 0x3bd   :  { %6041 = dma.done.wait [#allocation3], 32  }
 0x3be   :  { %6042 = vsyncadd [#allocation3], 4294967264 }
 0x3bf   :  { %4654 = vsyncpa [#allocation3], 1 }

</bundles_post_ra>
